<compile_context>
chip_gen: v5e
topology: v5e:2x2
jax: 0.10.0
libtpu: 0.0.40
codegen_flags: <defaults>
</compile_context>

<pallas_src>
import math

import jax
import jax.numpy as jnp
import numpy as np
from jax.experimental import pallas as pl
from jax.experimental.pallas import tpu as pltpu

IN_DIM = 512
HID = 1024
OUT_DIM = 512
NUM_INNER = 8                      # interior 1024 -> 1024 layers
LAYERS_PER_STEP = 2                # fuse 2 interior layers per grid step
NUM_STEPS = NUM_INNER // LAYERS_PER_STEP
LR_MUL = 0.01
NEG_SLOPE = 0.2
FLRELU_SCALE = math.sqrt(2.0)
EPS = 1e-8


def _fused_lrelu(out):
    return jnp.where(out >= 0.0, out, NEG_SLOPE * out) * FLRELU_SCALE


def mapper_kernel(x_ref, w_first_ref, b_first_ref, w_inner_ref, b_inner_ref,
                  w_last_ref, b_last_ref, o_ref, h_ref):
    """One grid step = 2 interior EqualLinear layers.

    PixelNorm + first layer (512->1024) are fused into step 0;
    last layer (1024->512) is fused into the final step.
    """
    step = pl.program_id(0)

    # --- step 0: PixelNorm + first EqualLinear (resident 512x1024 weight) ---
    @pl.when(step == 0)
    def _head():
        x = x_ref[...].astype(jnp.float32)                        # (B, 512)
        mean_sq = jnp.mean(x * x, axis=1, keepdims=True)
        xn = x * jax.lax.rsqrt(mean_sq + EPS)
        out = jnp.dot(xn.astype(jnp.bfloat16), w_first_ref[...],
                      preferred_element_type=jnp.float32)
        out = out + b_first_ref[...]
        h_ref[...] = _fused_lrelu(out)                            # (B, 1024)

    # --- hot path: two streamed interior 1024->1024 layers per step ---
    h = h_ref[...]                                                # (B, 1024) f32
    for j in range(LAYERS_PER_STEP):                              # static unroll
        w = w_inner_ref[j]                                        # (1024, 1024) bf16
        b = b_inner_ref[step * LAYERS_PER_STEP + j]               # (1, 1024) f32
        out = jnp.dot(h.astype(jnp.bfloat16), w,
                      preferred_element_type=jnp.float32)
        h = _fused_lrelu(out + b)
    h_ref[...] = h

    # --- final step: last EqualLinear (resident 1024x512 weight) -> output ---
    @pl.when(step == NUM_STEPS - 1)
    def _tail():
        out = jnp.dot(h.astype(jnp.bfloat16), w_last_ref[...],
                      preferred_element_type=jnp.float32)
        out = out + b_last_ref[...]
        o_ref[...] = _fused_lrelu(out).astype(o_ref.dtype)


def mapper_multi_pallas(x, w_first, b_first, w_inner, b_inner, w_last, b_last):
    B = x.shape[0]
    return pl.pallas_call(
        mapper_kernel,
        out_shape=jax.ShapeDtypeStruct((B, OUT_DIM), jnp.float32),
        grid_spec=pltpu.PrefetchScalarGridSpec(
            num_scalar_prefetch=0,
            grid=(NUM_STEPS,),
            in_specs=[
                pl.BlockSpec((B, IN_DIM), lambda i: (0, 0)),           # x, resident
                pl.BlockSpec((IN_DIM, HID), lambda i: (0, 0)),         # w_first, resident
                pl.BlockSpec((1, HID), lambda i: (0, 0)),              # b_first, resident
                pl.BlockSpec((LAYERS_PER_STEP, HID, HID),
                             lambda i: (i, 0, 0)),                     # interior weights, streamed
                pl.BlockSpec((NUM_INNER, 1, HID), lambda i: (0, 0, 0)),  # interior biases, resident
                pl.BlockSpec((HID, OUT_DIM), lambda i: (0, 0)),        # w_last, resident
                pl.BlockSpec((1, OUT_DIM), lambda i: (0, 0)),          # b_last, resident
            ],
            out_specs=pl.BlockSpec((B, OUT_DIM), lambda i: (0, 0)),
            scratch_shapes=[pltpu.VMEM((B, HID), jnp.float32)],        # running activation
        ),
        compiler_params=pltpu.CompilerParams(
            dimension_semantics=("arbitrary",),        # layers are sequential
            vmem_limit_bytes=32 << 20,                 # ~12 MiB actual footprint; leave headroom
        ),
    )(x, w_first, b_first, w_inner, b_inner, w_last, b_last)


def build_params(key):
    """Deterministic params matching EqualLinear parameterization.

    Returns f32 effective (pre-scaled, (in,out)-transposed) weights/biases for
    the pure-JAX reference, plus the kernel operands (bf16 weights, unpadded,
    first/last split out, interior layers stacked)."""
    dims = [(IN_DIM, HID)] + [(HID, HID)] * NUM_INNER + [(HID, OUT_DIM)]
    weights, biases = [], []
    for din, dout in dims:
        key, wk, bk = jax.random.split(key, 3)
        w_raw = jax.random.normal(wk, (dout, din), jnp.float32) / LR_MUL   # randn / lr_mul
        scale = (1.0 / math.sqrt(din)) * LR_MUL
        w_eff = (w_raw * scale).T                                          # (in, out)
        b_param = jax.random.normal(bk, (dout,), jnp.float32)              # stand-in trained bias
        b_eff = b_param * LR_MUL
        weights.append(w_eff)
        biases.append(b_eff)

    w_first = weights[0].astype(jnp.bfloat16)                              # (512, 1024)
    w_inner = jnp.stack(weights[1:1 + NUM_INNER]).astype(jnp.bfloat16)     # (8, 1024, 1024)
    w_last = weights[-1].astype(jnp.bfloat16)                              # (1024, 512)
    b_first = biases[0].reshape(1, HID)                                    # f32, resident (tiny)
    b_inner = jnp.stack(biases[1:1 + NUM_INNER]).reshape(NUM_INNER, 1, HID)
    b_last = biases[-1].reshape(1, OUT_DIM)
    packed = (w_first, b_first, w_inner, b_inner, w_last, b_last)
    return weights, biases, packed


def mapper_multi_ref(x, weights, biases):
    h = x * jax.lax.rsqrt(jnp.mean(x * x, axis=1, keepdims=True) + EPS)
    for w, b in zip(weights, biases):
        out = h @ w + b
        h = jnp.where(out >= 0.0, out, NEG_SLOPE * out) * FLRELU_SCALE
    return h


if __name__ == "__main__":
    key = jax.random.PRNGKey(0)
    key, xk = jax.random.split(key)
    B = 8
    x = jax.random.normal(xk, (B, IN_DIM), jnp.float32)

    weights, biases, packed = build_params(key)

    out = jax.block_until_ready(mapper_multi_pallas(x, *packed))

    ref = jax.block_until_ready(mapper_multi_ref(x, weights, biases))
    assert out.shape == (B, OUT_DIM)
    out_np = np.asarray(out)
    ref_np = np.asarray(ref)
    assert np.all(np.isfinite(out_np))
    # bf16 weights/activations with f32 accumulation vs. full-f32 reference.
    assert np.allclose(out_np, ref_np, rtol=5e-2, atol=5e-2), \
        f"max abs err {np.max(np.abs(out_np - ref_np))}"

    print("KERNEL_OK")
</pallas_src>

<mosaic_0001>
module attributes {stable_mosaic.version = 11 : i64} {
  func.func @mapper_kernel(%arg0: i32, %arg1: memref<8x512xf32, #tpu.memory_space<vmem>>, %arg2: memref<512x1024xbf16, #tpu.memory_space<vmem>>, %arg3: memref<1x1024xf32, #tpu.memory_space<vmem>>, %arg4: memref<2x1024x1024xbf16, #tpu.memory_space<vmem>>, %arg5: memref<8x1x1024xf32, #tpu.memory_space<vmem>>, %arg6: memref<1024x512xbf16, #tpu.memory_space<vmem>>, %arg7: memref<1x512xf32, #tpu.memory_space<vmem>>, %arg8: memref<8x512xf32, #tpu.memory_space<vmem>>, %arg9: memref<8x1024xf32, #tpu.memory_space<vmem>>) attributes {dimension_semantics = [#tpu.dimension_semantics<arbitrary>], iteration_bounds = array<i64: 4>, scalar_prefetch = 0 : i64, scratch_operands = 1 : i64, tpu.core_type = #tpu.core_type<tc>, window_params = [{pipeline_mode = #tpu.pipeline_mode<synchronous>, transform_indices = @transform_0, window_bounds = array<i64: 8, 512>}, {pipeline_mode = #tpu.pipeline_mode<synchronous>, transform_indices = @transform_1, window_bounds = array<i64: 512, 1024>}, {pipeline_mode = #tpu.pipeline_mode<synchronous>, transform_indices = @transform_2, window_bounds = array<i64: 1, 1024>}, {transform_indices = @transform_3, window_bounds = array<i64: 2, 1024, 1024>}, {pipeline_mode = #tpu.pipeline_mode<synchronous>, transform_indices = @transform_4, window_bounds = array<i64: 8, 1, 1024>}, {pipeline_mode = #tpu.pipeline_mode<synchronous>, transform_indices = @transform_5, window_bounds = array<i64: 1024, 512>}, {pipeline_mode = #tpu.pipeline_mode<synchronous>, transform_indices = @transform_6, window_bounds = array<i64: 1, 512>}, {pipeline_mode = #tpu.pipeline_mode<synchronous>, transform_indices = @transform_7, window_bounds = array<i64: 8, 512>}]} {
    %c0_i32 = arith.constant 0 : i32
    %0 = arith.cmpi eq, %arg0, %c0_i32 : i32
    %1 = arith.extui %0 : i1 to i32
    %c0_i32_0 = arith.constant 0 : i32
    %2 = arith.cmpi ne, %1, %c0_i32_0 : i32
    scf.if %2 {
      %c0_23 = arith.constant 0 : index
      %c0_24 = arith.constant 0 : index
      %44 = vector.load %arg1[%c0_23, %c0_24] : memref<8x512xf32, #tpu.memory_space<vmem>>, vector<8x512xf32>
      %45 = arith.mulf %44, %44 : vector<8x512xf32>
      %cst_25 = arith.constant dense<0.000000e+00> : vector<8xf32>
      %46 = vector.multi_reduction <add>, %45, %cst_25 [1] : vector<8x512xf32> to vector<8xf32>
      %47 = vector.shape_cast %46 : vector<8xf32> to vector<8x1xf32>
      %cst_26 = arith.constant 5.120000e+02 : f32
      %48 = vector.broadcast %cst_26 : f32 to vector<8x1xf32>
      %49 = arith.divf %47, %48 : vector<8x1xf32>
      %cst_27 = arith.constant 9.99999993E-9 : f32
      %50 = vector.broadcast %cst_27 : f32 to vector<8x1xf32>
      %51 = arith.addf %49, %50 : vector<8x1xf32>
      %52 = math.rsqrt %51 : vector<8x1xf32>
      %53 = vector.broadcast %52 : vector<8x1xf32> to vector<8x512xf32>
      %54 = arith.mulf %44, %53 : vector<8x512xf32>
      %55 = arith.truncf %54 : vector<8x512xf32> to vector<8x512xbf16>
      %c0_28 = arith.constant 0 : index
      %c0_29 = arith.constant 0 : index
      %56 = vector.load %arg2[%c0_28, %c0_29] : memref<512x1024xbf16, #tpu.memory_space<vmem>>, vector<512x1024xbf16>
      %cst_30 = arith.constant dense<0.000000e+00> : vector<8x1024xf32>
      %57 = tpu.matmul %55, %56, %cst_30 {dimension_numbers = #tpu.dot_dimension_numbers<[1], [0], [0], [1], [0, 0, 1, 1], [], []>} : vector<8x512xbf16>, vector<512x1024xbf16>, vector<8x1024xf32> -> vector<8x1024xf32>
      %c0_31 = arith.constant 0 : index
      %c0_32 = arith.constant 0 : index
      %58 = vector.load %arg3[%c0_31, %c0_32] : memref<1x1024xf32, #tpu.memory_space<vmem>>, vector<1x1024xf32>
      %59 = vector.broadcast %58 : vector<1x1024xf32> to vector<8x1024xf32>
      %60 = arith.addf %57, %59 : vector<8x1024xf32>
      %cst_33 = arith.constant 0.000000e+00 : f32
      %61 = vector.broadcast %cst_33 : f32 to vector<8x1024xf32>
      %62 = arith.cmpf oge, %60, %61 : vector<8x1024xf32>
      %cst_34 = arith.constant 2.000000e-01 : f32
      %63 = vector.broadcast %cst_34 : f32 to vector<8x1024xf32>
      %64 = arith.mulf %63, %60 : vector<8x1024xf32>
      %65 = arith.select %62, %60, %64 : vector<8x1024xi1>, vector<8x1024xf32>
      %cst_35 = arith.constant 1.41421354 : f32
      %66 = vector.broadcast %cst_35 : f32 to vector<8x1024xf32>
      %67 = arith.mulf %65, %66 : vector<8x1024xf32>
      %c0_36 = arith.constant 0 : index
      %c0_37 = arith.constant 0 : index
      %68 = vector.load %arg9[%c0_36, %c0_37] : memref<8x1024xf32, #tpu.memory_space<vmem>>, vector<8x1024xf32>
      tpu.vector_store %arg9[%c0_36, %c0_37], %67 {strides = array<i32>} : memref<8x1024xf32, #tpu.memory_space<vmem>>, vector<8x1024xf32>,
    } else {
    }
    %c0 = arith.constant 0 : index
    %c0_1 = arith.constant 0 : index
    %3 = vector.load %arg9[%c0, %c0_1] : memref<8x1024xf32, #tpu.memory_space<vmem>>, vector<8x1024xf32>
    %c0_2 = arith.constant 0 : index
    %c0_3 = arith.constant 0 : index
    %c0_4 = arith.constant 0 : index
    %4 = vector.load %arg4[%c0_2, %c0_3, %c0_4] : memref<2x1024x1024xbf16, #tpu.memory_space<vmem>>, vector<1x1024x1024xbf16>
    %5 = vector.shape_cast %4 : vector<1x1024x1024xbf16> to vector<1024x1024xbf16>
    %c2_i32 = arith.constant 2 : i32
    %6 = arith.muli %arg0, %c2_i32 : i32
    %c0_i32_5 = arith.constant 0 : i32
    %7 = arith.addi %6, %c0_i32_5 : i32
    %8 = arith.index_cast %7 : i32 to index
    %c0_6 = arith.constant 0 : index
    %c0_7 = arith.constant 0 : index
    %9 = vector.load %arg5[%8, %c0_6, %c0_7] : memref<8x1x1024xf32, #tpu.memory_space<vmem>>, vector<1x1x1024xf32>
    %10 = vector.shape_cast %9 : vector<1x1x1024xf32> to vector<1x1024xf32>
    %11 = arith.truncf %3 : vector<8x1024xf32> to vector<8x1024xbf16>
    %cst = arith.constant dense<0.000000e+00> : vector<8x1024xf32>
    %12 = tpu.matmul %11, %5, %cst {dimension_numbers = #tpu.dot_dimension_numbers<[1], [0], [0], [1], [0, 0, 1, 1], [], []>} : vector<8x1024xbf16>, vector<1024x1024xbf16>, vector<8x1024xf32> -> vector<8x1024xf32>
    %13 = vector.broadcast %10 : vector<1x1024xf32> to vector<8x1024xf32>
    %14 = arith.addf %12, %13 : vector<8x1024xf32>
    %cst_8 = arith.constant 0.000000e+00 : f32
    %15 = vector.broadcast %cst_8 : f32 to vector<8x1024xf32>
    %16 = arith.cmpf oge, %14, %15 : vector<8x1024xf32>
    %cst_9 = arith.constant 2.000000e-01 : f32
    %17 = vector.broadcast %cst_9 : f32 to vector<8x1024xf32>
    %18 = arith.mulf %17, %14 : vector<8x1024xf32>
    %19 = arith.select %16, %14, %18 : vector<8x1024xi1>, vector<8x1024xf32>
    %cst_10 = arith.constant 1.41421354 : f32
    %20 = vector.broadcast %cst_10 : f32 to vector<8x1024xf32>
    %21 = arith.mulf %19, %20 : vector<8x1024xf32>
    %c1 = arith.constant 1 : index
    %c0_11 = arith.constant 0 : index
    %c0_12 = arith.constant 0 : index
    %22 = vector.load %arg4[%c1, %c0_11, %c0_12] : memref<2x1024x1024xbf16, #tpu.memory_space<vmem>>, vector<1x1024x1024xbf16>
    %23 = vector.shape_cast %22 : vector<1x1024x1024xbf16> to vector<1024x1024xbf16>
    %c2_i32_13 = arith.constant 2 : i32
    %24 = arith.muli %arg0, %c2_i32_13 : i32
    %c1_i32 = arith.constant 1 : i32
    %25 = arith.addi %24, %c1_i32 : i32
    %26 = arith.index_cast %25 : i32 to index
    %c0_14 = arith.constant 0 : index
    %c0_15 = arith.constant 0 : index
    %27 = vector.load %arg5[%26, %c0_14, %c0_15] : memref<8x1x1024xf32, #tpu.memory_space<vmem>>, vector<1x1x1024xf32>
    %28 = vector.shape_cast %27 : vector<1x1x1024xf32> to vector<1x1024xf32>
    %29 = arith.truncf %21 : vector<8x1024xf32> to vector<8x1024xbf16>
    %cst_16 = arith.constant dense<0.000000e+00> : vector<8x1024xf32>
    %30 = tpu.matmul %29, %23, %cst_16 {dimension_numbers = #tpu.dot_dimension_numbers<[1], [0], [0], [1], [0, 0, 1, 1], [], []>} : vector<8x1024xbf16>, vector<1024x1024xbf16>, vector<8x1024xf32> -> vector<8x1024xf32>
    %31 = vector.broadcast %28 : vector<1x1024xf32> to vector<8x1024xf32>
    %32 = arith.addf %30, %31 : vector<8x1024xf32>
    %cst_17 = arith.constant 0.000000e+00 : f32
    %33 = vector.broadcast %cst_17 : f32 to vector<8x1024xf32>
    %34 = arith.cmpf oge, %32, %33 : vector<8x1024xf32>
    %cst_18 = arith.constant 2.000000e-01 : f32
    %35 = vector.broadcast %cst_18 : f32 to vector<8x1024xf32>
    %36 = arith.mulf %35, %32 : vector<8x1024xf32>
    %37 = arith.select %34, %32, %36 : vector<8x1024xi1>, vector<8x1024xf32>
    %cst_19 = arith.constant 1.41421354 : f32
    %38 = vector.broadcast %cst_19 : f32 to vector<8x1024xf32>
    %39 = arith.mulf %37, %38 : vector<8x1024xf32>
    %c0_20 = arith.constant 0 : index
    %c0_21 = arith.constant 0 : index
    %40 = vector.load %arg9[%c0_20, %c0_21] : memref<8x1024xf32, #tpu.memory_space<vmem>>, vector<8x1024xf32>
    tpu.vector_store %arg9[%c0_20, %c0_21], %39 {strides = array<i32>} : memref<8x1024xf32, #tpu.memory_space<vmem>>, vector<8x1024xf32>,
    %c3_i32 = arith.constant 3 : i32
    %41 = arith.cmpi eq, %arg0, %c3_i32 : i32
    %42 = arith.extui %41 : i1 to i32
    %c0_i32_22 = arith.constant 0 : i32
    %43 = arith.cmpi ne, %42, %c0_i32_22 : i32
    scf.if %43 {
      %44 = arith.truncf %39 : vector<8x1024xf32> to vector<8x1024xbf16>
      %c0_23 = arith.constant 0 : index
      %c0_24 = arith.constant 0 : index
      %45 = vector.load %arg6[%c0_23, %c0_24] : memref<1024x512xbf16, #tpu.memory_space<vmem>>, vector<1024x512xbf16>
      %cst_25 = arith.constant dense<0.000000e+00> : vector<8x512xf32>
      %46 = tpu.matmul %44, %45, %cst_25 {dimension_numbers = #tpu.dot_dimension_numbers<[1], [0], [0], [1], [0, 0, 1, 1], [], []>} : vector<8x1024xbf16>, vector<1024x512xbf16>, vector<8x512xf32> -> vector<8x512xf32>
      %c0_26 = arith.constant 0 : index
      %c0_27 = arith.constant 0 : index
      %47 = vector.load %arg7[%c0_26, %c0_27] : memref<1x512xf32, #tpu.memory_space<vmem>>, vector<1x512xf32>
      %48 = vector.broadcast %47 : vector<1x512xf32> to vector<8x512xf32>
      %49 = arith.addf %46, %48 : vector<8x512xf32>
      %cst_28 = arith.constant 0.000000e+00 : f32
      %50 = vector.broadcast %cst_28 : f32 to vector<8x512xf32>
      %51 = arith.cmpf oge, %49, %50 : vector<8x512xf32>
      %cst_29 = arith.constant 2.000000e-01 : f32
      %52 = vector.broadcast %cst_29 : f32 to vector<8x512xf32>
      %53 = arith.mulf %52, %49 : vector<8x512xf32>
      %54 = arith.select %51, %49, %53 : vector<8x512xi1>, vector<8x512xf32>
      %cst_30 = arith.constant 1.41421354 : f32
      %55 = vector.broadcast %cst_30 : f32 to vector<8x512xf32>
      %56 = arith.mulf %54, %55 : vector<8x512xf32>
      %c0_31 = arith.constant 0 : index
      %c0_32 = arith.constant 0 : index
      %57 = vector.load %arg8[%c0_31, %c0_32] : memref<8x512xf32, #tpu.memory_space<vmem>>, vector<8x512xf32>
      tpu.vector_store %arg8[%c0_31, %c0_32], %56 {strides = array<i32>} : memref<8x512xf32, #tpu.memory_space<vmem>>, vector<8x512xf32>,
    } else {
    }
    return
  }
  func.func @transform_0(%arg0: i32) -> (i32, i32) {
    %c0_i32 = arith.constant 0 : i32
    %c0_i32_0 = arith.constant 0 : i32
    %c0_i32_1 = arith.constant 0 : i32
    return %c0_i32, %c0_i32_0 : i32, i32
  }
  func.func @transform_1(%arg0: i32) -> (i32, i32) {
    %c0_i32 = arith.constant 0 : i32
    %c0_i32_0 = arith.constant 0 : i32
    %c0_i32_1 = arith.constant 0 : i32
    return %c0_i32, %c0_i32_0 : i32, i32
  }
  func.func @transform_2(%arg0: i32) -> (i32, i32) {
    %c0_i32 = arith.constant 0 : i32
    %c0_i32_0 = arith.constant 0 : i32
    %c0_i32_1 = arith.constant 0 : i32
    return %c0_i32, %c0_i32_0 : i32, i32
  }
  func.func @transform_3(%arg0: i32) -> (i32, i32, i32) {
    %c0_i32 = arith.constant 0 : i32
    %c0_i32_0 = arith.constant 0 : i32
    %c0_i32_1 = arith.constant 0 : i32
    return %arg0, %c0_i32, %c0_i32_0 : i32, i32, i32
  }
  func.func @transform_4(%arg0: i32) -> (i32, i32, i32) {
    %c0_i32 = arith.constant 0 : i32
    %c0_i32_0 = arith.constant 0 : i32
    %c0_i32_1 = arith.constant 0 : i32
    %c0_i32_2 = arith.constant 0 : i32
    return %c0_i32, %c0_i32_0, %c0_i32_1 : i32, i32, i32
  }
  func.func @transform_5(%arg0: i32) -> (i32, i32) {
    %c0_i32 = arith.constant 0 : i32
    %c0_i32_0 = arith.constant 0 : i32
    %c0_i32_1 = arith.constant 0 : i32
    return %c0_i32, %c0_i32_0 : i32, i32
  }
  func.func @transform_6(%arg0: i32) -> (i32, i32) {
    %c0_i32 = arith.constant 0 : i32
    %c0_i32_0 = arith.constant 0 : i32
    %c0_i32_1 = arith.constant 0 : i32
    return %c0_i32, %c0_i32_0 : i32, i32
  }
  func.func @transform_7(%arg0: i32) -> (i32, i32) {
    %c0_i32 = arith.constant 0 : i32
    %c0_i32_0 = arith.constant 0 : i32
    %c0_i32_1 = arith.constant 0 : i32
    return %c0_i32, %c0_i32_0 : i32, i32
  }
}

</mosaic_0001>

<bundles_post_ra>
// kernel: tpu_custom_call.1
= control target key start
LH: loop header
LB: loop body
LE: loop exit
PB: predicated region body
PF: predicated region fallthrough
CT: control target
= control target key end

     0   :  { %12 = vsyncpa [#allocation4], 0  ;;  %s23984_s0 = inlined_call_operand.hbm [shape: f32[8,512], index: 0, kind: input, shape index: {}]   ;;  %s23985_s1 = inlined_call_operand.hbm [shape: bf16[512,1024], index: 1, kind: input, shape index: {}]   ;;  %s23986_s2 = inlined_call_operand.hbm [shape: f32[1,1024], index: 2, kind: input, shape index: {}]   ;;  %s23987_s3 = inlined_call_operand.hbm [shape: bf16[8,1024,1024], index: 3, kind: input, shape index: {}]   ;;  %s23988_s4 = inlined_call_operand.hbm [shape: f32[8,1,1024], index: 4, kind: input, shape index: {}]   ;;  %s23989_s5 = inlined_call_operand.hbm [shape: bf16[1024,512], index: 5, kind: input, shape index: {}]   ;;  %s23990_s6 = inlined_call_operand.hbm [shape: f32[1,512], index: 6, kind: input, shape index: {}]   ;;  %s23991_s7 = inlined_call_operand.hbm [shape: f32[8,512], index: 7, kind: output, shape index: {}]  }
   0x1   :  { %13 = vsyncpa [#allocation7], 0 }
   0x2   :  { %14 = vsyncpa [#allocation10], 0 }
   0x3   :  { %16 = vsyncpa [#allocation10 + $0x1], 0 }
   0x4   :  { %17 = vsyncpa [#allocation13], 0 }
   0x5   :  { %18 = vsyncpa [#allocation5], 0  ;;  %s21201_s24 = smov 0   ;;  %s21203_s25 = smov 0  }
   0x6   :  { %s21205_s26 = smov 0   ;;  %s21207_s27 = smov 0  }
   0x7 LB: > { %s225_s30 = sshll.u32 %s23985_s1, 4  ;;  %s21225_s8 = sadd.s32 4294967295, %s21145_s27   ;;  %s21145_s27 = sphi %s21207_s27, %s23999_s27   ;;  %s21141_s26 = sphi %s21205_s26, %s23998_s26   ;;  %s21137_s25 = sphi %s21203_s25, %s23997_s25   ;;  %s21133_s24 = sphi %s21201_s24, %s23996_s24   ;;  %s226_s30 = int_to_ptr.hbm [resolvable:$true] %s225_s30 }
   0x8   : > { %p12502_p0 = scmp.ge.s32.totalorder %s21145_s27, 1  ;;  %p108_p1 = scmp.eq.s32.totalorder %s21225_s8, 0 }
   0x9   : > { %p202_p2 = scmp.lt.s32.totalorder %s21145_s27, 5  ;;  %p12503_p3 = scmp.ne.s32.totalorder %s21225_s8, 0 }
   0xa   : > { %s21147_s10 = smov [#allocation6]   ;;  %s251_s14 = sshll.u32 %s23988_s4, 4  ;;  %s252_s14 = int_to_ptr.hbm [resolvable:$true] %s251_s14 }
   0xb   : > { %p21231_p4 = pnand %p12502_p0, %p202_p2  ;;  %s227_s11 = sshll.u32 %s21147_s10, 4  ;;  %s228_s11 = int_to_ptr.vmem [resolvable:$true] %s227_s11 }
   0xc   : > { %s21148_s16 = smov [#allocation11]   ;;  %s21149_s18 = smov 512  }
   0xd   : > { %p20759_p5 = pneg %p21231_p4  ;;  %s253_s17 = sshll.u32 %s21148_s16, 4  ;;  %s254_s17 = int_to_ptr.vmem [resolvable:$true] %s253_s17 }
   0xe   : > { %s21150_s19 = smov 32   ;;  %s21151_s20 = smov 128  }
   0xf   : > { %p21242_p6 = pnand %p20759_p5, %p108_p1  ;;  %s21152_s21 = smov 8  }
  0x10   : > { %s265_s28 = sshll.u32 %s23989_s5, 4  ;;  %s21153_s29 = smov [#allocation12]   ;;  %s266_s28 = int_to_ptr.hbm [resolvable:$true] %s265_s28 }
  0x11   : > { %20765 = dma.hbm_to_vmem [thread:$0]  (!%p21242_p6), %s226_s30, 32768, %s228_s11, [#allocation7], %s21149_s18, %s21149_s18, %s21150_s19  }
  0x12   : > { %20771 = dma.hbm_to_vmem [thread:$0]  (!%p21242_p6), %s252_s14, 1024, %s254_s17, [#allocation10], %s21151_s20, %s21151_s20, %s21152_s21  }
  0x13   : > { %s267_s10 = sshll.u32 %s21153_s29, 4  ;;  %s214_s16 = sshll.u32 %s23984_s0, 4  ;;  %s268_s10 = int_to_ptr.vmem [resolvable:$true] %s267_s10  ;;  %s215_s16 = int_to_ptr.hbm [resolvable:$true] %s214_s16 }
  0x14   : > { %s21154_s30 = smov 256   ;;  %s21155_s11 = smov 16  }
  0x15   : > { %20774 = dma.hbm_to_vmem [thread:$0]  (!%p21242_p6), %s266_s28, 32768, %s268_s10, [#allocation13], %s21154_s30, %s21154_s30, %s21155_s11  }
  0x16   : > { %s21156_s14 = smov [#allocation3]   ;;  %s240_s22 = sshll.u32 %s23986_s2, 4  ;;  %s241_s22 = int_to_ptr.hbm [resolvable:$true] %s240_s22 }
  0x17   : > { %s216_s17 = sshll.u32 %s21156_s14, 4  ;;  %s280_s28 = sshll.u32 %s23990_s6, 4  ;;  %s217_s17 = int_to_ptr.vmem [resolvable:$true] %s216_s17  ;;  %s281_s28 = int_to_ptr.hbm [resolvable:$true] %s280_s28 }
  0x18   : > { %20762 = dma.hbm_to_vmem [thread:$0]  (!%p21242_p6), %s215_s16, 512, %s217_s17, [#allocation4]  }
  0x19   : > { %s21157_s10 = smov [#allocation8]   ;;  %s21158_s13 = smov [#allocation14]  }
  0x1a   : > { %s242_s12 = sshll.u32 %s21157_s10, 4  ;;  %s282_s16 = sshll.u32 %s21158_s13, 4  ;;  %s243_s12 = int_to_ptr.vmem [resolvable:$true] %s242_s12  ;;  %s283_s16 = int_to_ptr.vmem [resolvable:$true] %s282_s16 }
  0x1b   : > { %20768 = dma.hbm_to_vmem [thread:$0]  (!%p21242_p6), %s241_s22, 128, %s243_s12, [#allocation7]  }
  0x1c   : > { %20777 = dma.hbm_to_vmem [thread:$0]  (!%p21242_p6), %s281_s28, 64, %s283_s16, [#allocation13]  }
  0x1d   : > { %s21274_s30 = sadd.s32 1, %s21145_s27   ;;  %s94_s11 = sadd.s32 1, %s21141_s26 }
  0x1e   : > { %s91_s14 = ssub.s32 %s21145_s27, %s21274_s30  ;;  %p101_p7 = scmp.ne.s32.totalorder %s21141_s26, %s21137_s25 }
  0x1f   : > { %p92_p8 = scmp.eq.s32.totalorder %s91_s14, 0  ;;  %p102_p9 = scmp.eq.s32.totalorder %s21145_s27, 0 }
  0x20   : > { %p107_p10 = scmp.ne.s32.totalorder %s21137_s25, %s21133_s24  ;;  %p20788_p11 = scmp.lt.s32.totalorder %s21145_s27, 4 }
  0x21   : > { %s21286_s17 = scalar_select %p92_p8, %s21141_s26, %s94_s11  }
  0x22   : > { %p103_p12 = por %p102_p9, %p101_p7  ;;  %p21290_p13 = por %p108_p1, %p107_p10 }
  0x23   : > { %s293_s15 = sand.u32 1, %s21145_s27   ;;  %s295_s21 = sand.u32 1, %s21141_s26  }
  0x24   : > { %s12510_s22 = sshll.u32 %s295_s21, 13  ;;  %s19190_s23 = sshll.u32 %s21145_s27, 13 }
  0x25   : > { %s303_s10 = scalar_lea.hbm %s23987_s3, %s19190_s23  ;;  %s297_s12 = scalar_lea.vmem [#allocation9], %s12510_s22 }
  0x26   : > { %s306_s13 = sshll.u32 %s297_s12, 4  ;;  %s304_s24 = sshll.u32 %s303_s10, 4  ;;  %s307_s13 = int_to_ptr.vmem [resolvable:$true] %s306_s13  ;;  %s305_s24 = int_to_ptr.hbm [resolvable:$true] %s304_s24 }
  0x27   : > { %p21302_p0 = pnand %p20788_p11, %p103_p12  ;;  %s294_s11 = scalar_lea.sflag [#allocation10], %s293_s15 }
  0x28   : > { %s21033_s14 = sshra.s32 %s305_s24, 4  ;;  %s21040_s29 = scalar_lea.hbm %s23987_s3, 32768  ;;  %s21034_s14 = int_to_ptr.hbm [resolvable:$true] %s21033_s14 }
  0x29   : > { %s21035_s21 = scalar_lea.hbm %s21034_s14, 8192  ;;  %p21037_p5 = pneg %p21302_p0 }
  0x2a   : > { %p21036_p2 = scmp.ne.s32.totalorder %s21034_s14, %s21035_s21  ;;  %p21041_p8 = scmp.lt.s32.totalorder %s21034_s14, %s23987_s3 }
  0x2b   : > { %p21042_p9 = scmp.lt.s32.totalorder %s21040_s29, %s21035_s21 }
  0x2c   : > { %p21038_p6 = pnand %p21037_p5, %p21036_p2 }
  0x2d   : > { %p21043_p10 = por %p21042_p9, %p21041_p8 }
  0x2e   : > { %p21039_p7 = pneg %p21038_p6 }
  0x30   : > { %p21044_p11 = pnand %p21043_p10, %p21039_p7 }
  0x32   : > { %21047 = shalt.err (!%p21044_p11)
}
  0x33   : > { %20781 = dma.hbm_to_vmem [thread:$0]  (!%p21302_p0), %s305_s24, 131072, %s307_s13, %s294_s11, %s21149_s18, %s21149_s18, %s21150_s19  }
  0x34   : > { %318 = sbr.rel (%p21231_p4) target bundleno = 2524 (0x9dc), region = 48 }
  0x39   : > { %21108 = dma.done.wait (%p108_p1), [#allocation4], 512  }
  0x3a   : > { %21110 = vsyncadd (%p108_p1), [#allocation4], 4294966784 }
  0x3b   : > { %21112 = dma.done.wait (%p108_p1), [#allocation7], 32896  }
  0x3c   : > { %21114 = vsyncadd (%p108_p1), [#allocation7], 4294934400  ;;  %s335_s15 = sand.u32 1, %s21225_s8   ;;  %s337_s18 = sand.u32 1, %s21137_s25  }
  0x3d   : > { %s12518_s19 = sshll.u32 %s337_s18, 13  ;;  %s336_s9 = scalar_lea.sflag [#allocation10], %s335_s15 }
  0x3e   : > { %s21331_s10 = scalar_lea.vmem [#allocation9], %s12518_s19 }
  0x3f   : > { %21116 = dma.done.wait (%p21290_p13), %s336_s9, 131072  }
  0x40   : > { %21118 = vsyncadd (%p21290_p13), %s336_s9, 4294836224 }
  0x41   : > { %21120 = dma.done.wait (%p108_p1), [#allocation10], 1024  }
  0x42   : > { %21122 = vsyncadd (%p108_p1), [#allocation10], 4294966272 }
  0x43   : > { %21124 = dma.done.wait (%p108_p1), [#allocation13], 32832  }
  0x44   : > { %21126 = vsyncadd (%p108_p1), [#allocation13], 4294934464  ;;  %385 = sbr.rel (%p12503_p3) target bundleno = 562 (0x232), region = 80 }
  0x49   : > { %v21347_v0 = vld [vmem:[#allocation3] sm:$0xff]  ;;  %v21349_v1 = vld [vmem:[#allocation3 + $0x8] sm:$0xff]  ;;  %v21351_v2 = vld [vmem:[#allocation3 + $0x10] sm:$0xff] }
  0x4a   : > { %v21353_v3 = vld [vmem:[#allocation3 + $0x18] sm:$0xff]  ;;  %v390_v4 = vmul.f32 %v21347_v0, %v21347_v0  ;;  %v391_v5 = vmul.f32 %v21349_v1, %v21349_v1  ;;  %v392_v6 = vmul.f32 %v21351_v2, %v21351_v2  ;;  %v12749_v7 = vld [vmem:[#allocation6 + $0x1c0] sm:$0xf] }
  0x4b   : > { %v19251_v8 = vld [vmem:[#allocation6 + $0x1dc] sm:$0xf0]  ;;  %v393_v13 = vmul.f32 %v21353_v3, %v21353_v3 }
  0x4c   : > { %v12750_v9 = vor.u32 %v19251_v8, %v12749_v7  ;;  %v13005_v10 = vld [vmem:[#allocation6 + $0x3c0] sm:$0xf]  ;;  %v394_v14 = vadd.f32 %v391_v5, %v390_v4 }
  0x4d   : > { %v19315_v11 = vld [vmem:[#allocation6 + $0x3dc] sm:$0xf0] }
  0x4e   : > { %v13261_v12 = vld [vmem:[#allocation6 + $0x5c0] sm:$0xf]  ;;  %v13006_v15 = vor.u32 %v19315_v11, %v13005_v10  ;;  %1980 = vmatpush.bf16.msra.mxu0 %v12750_v9  ;;  %v395_v24 = vadd.f32 %v394_v14, %v392_v6 }
  0x4f   : > { %v19379_v16 = vld [vmem:[#allocation6 + $0x5dc] sm:$0xf0] }
  0x50   : > { %v13517_v17 = vld [vmem:[#allocation6 + $0x7c0] sm:$0xf]  ;;  %v13262_v19 = vor.u32 %v19379_v16, %v13261_v12  ;;  %1993 = vmatpush.bf16.msra.mxu1 %v13006_v15  ;;  %v396_v34 = vadd.f32 %v395_v24, %v393_v13 }
  0x51   : > { %v19443_v18 = vld [vmem:[#allocation6 + $0x7dc] sm:$0xf0] }
  0x52   : > { %v13518_v20 = vor.u32 %v19443_v18, %v13517_v17  ;;  %v12717_v21 = vld [vmem:[#allocation6 + $0x180] sm:$0xf]  ;;  %2006 = vmatpush.bf16.msra.mxu2 %v13262_v19  ;;  %397 = vadd.xlane.f32.xlu0 %v396_v34 }
  0x53   : > { %v19243_v22 = vld [vmem:[#allocation6 + $0x19c] sm:$0xf0] }
  0x54   : > { %v12973_v23 = vld [vmem:[#allocation6 + $0x380] sm:$0xf]  ;;  %v12718_v25 = vor.u32 %v19243_v22, %v12717_v21  ;;  %2019 = vmatpush.bf16.msra.mxu3 %v13518_v20 }
  0x55   : > { %v19307_v26 = vld [vmem:[#allocation6 + $0x39c] sm:$0xf0] }
  0x56   : > { %v13229_v27 = vld [vmem:[#allocation6 + $0x580] sm:$0xf]  ;;  %v12974_v29 = vor.u32 %v19307_v26, %v12973_v23  ;;  %1981 = vmatpush.bf16.msra.mxu0 %v12718_v25 }
  0x57   : > { %v19371_v28 = vld [vmem:[#allocation6 + $0x59c] sm:$0xf0] }
  0x58   : > { %v13230_v30 = vor.u32 %v19371_v28, %v13229_v27  ;;  %v13485_v31 = vld [vmem:[#allocation6 + $0x780] sm:$0xf]  ;;  %1994 = vmatpush.bf16.msra.mxu1 %v12974_v29 }
  0x59   : > { %v19435_v32 = vld [vmem:[#allocation6 + $0x79c] sm:$0xf0] }
  0x5a   : > { %v12685_v33 = vld [vmem:[#allocation6 + $0x140] sm:$0xf]  ;;  %v13486_v35 = vor.u32 %v19435_v32, %v13485_v31  ;;  %2007 = vmatpush.bf16.msra.mxu2 %v13230_v30 }
  0x5b   : > { %v19235_v36 = vld [vmem:[#allocation6 + $0x15c] sm:$0xf0] }
  0x5c   : > { %v12941_v37 = vld [vmem:[#allocation6 + $0x340] sm:$0xf]  ;;  %v12686_v39 = vor.u32 %v19235_v36, %v12685_v33  ;;  %2020 = vmatpush.bf16.msra.mxu3 %v13486_v35 }
  0x5d   : > { %v19299_v38 = vld [vmem:[#allocation6 + $0x35c] sm:$0xf0] }
  0x5e   : > { %v13197_v40 = vld [vmem:[#allocation6 + $0x540] sm:$0xf]  ;;  %v12942_v43 = vor.u32 %v19299_v38, %v12941_v37  ;;  %1982 = vmatpush.bf16.msra.mxu0 %v12686_v39 }
  0x5f   : > { %v19363_v41 = vld [vmem:[#allocation6 + $0x55c] sm:$0xf0] }
  0x60   : > { %v13453_v42 = vld [vmem:[#allocation6 + $0x740] sm:$0xf]  ;;  %v13198_v47 = vor.u32 %v19363_v41, %v13197_v40  ;;  %1995 = vmatpush.bf16.msra.mxu1 %v12942_v43  ;;  %v19247_v41 = vld [vmem:[#allocation6 + $0x1c4] sm:$0xf] }
  0x61   : > { %v19427_v44 = vld [vmem:[#allocation6 + $0x75c] sm:$0xf0] }
  0x62   : > { %v12653_v45 = vld [vmem:[#allocation6 + $0x100] sm:$0xf]  ;;  %v13454_v48 = vor.u32 %v19427_v44, %v13453_v42  ;;  %2008 = vmatpush.bf16.msra.mxu2 %v13198_v47  ;;  %v12751_v42 = vld [vmem:[#allocation6 + $0x1e0] sm:$0xf0] }
  0x63   : > { %v19227_v46 = vld [vmem:[#allocation6 + $0x11c] sm:$0xf0]  ;;  %v13007_v47 = vld [vmem:[#allocation6 + $0x3e0] sm:$0xf0] }
  0x64   : > { %v12909_v49 = vld [vmem:[#allocation6 + $0x300] sm:$0xf]  ;;  %v12654_v55 = vor.u32 %v19227_v46, %v12653_v45  ;;  %2021 = vmatpush.bf16.msra.mxu3 %v13454_v48  ;;  %v19311_v45 = vld [vmem:[#allocation6 + $0x3c4] sm:$0xf] }
  0x65   : > { %v19291_v50 = vld [vmem:[#allocation6 + $0x31c] sm:$0xf0]  ;;  %v19375_v48 = vld [vmem:[#allocation6 + $0x5c4] sm:$0xf] }
  0x66   : > { %v13165_v51 = vld [vmem:[#allocation6 + $0x500] sm:$0xf]  ;;  %v12910_v56 = vor.u32 %v19291_v50, %v12909_v49  ;;  %1983 = vmatpush.bf16.msra.mxu0 %v12654_v55  ;;  %v13263_v49 = vld [vmem:[#allocation6 + $0x5e0] sm:$0xf0] }
  0x67   : > { %v19355_v52 = vld [vmem:[#allocation6 + $0x51c] sm:$0xf0] }
  0x68   : > { %v13421_v53 = vld [vmem:[#allocation6 + $0x700] sm:$0xf]  ;;  %v13166_v59 = vor.u32 %v19355_v52, %v13165_v51  ;;  %1996 = vmatpush.bf16.msra.mxu1 %v12910_v56  ;;  %v12754_v51 = vor.u32 %v19247_v41, %v12751_v42  ;;  %v19439_v52 = vld [vmem:[#allocation6 + $0x7c4] sm:$0xf]  ;;  %v13010_v56 = vor.u32 %v19311_v45, %v13007_v47 }
  0x69   : > { %v19419_v54 = vld [vmem:[#allocation6 + $0x71c] sm:$0xf0]  ;;  %v12879_v41 = vld [vmem:[#allocation6 + $0x2e0] sm:$0xf0] }
  0x6a   : > { %v12621_v57 = vld [vmem:[#allocation6 + $0xc0] sm:$0xf]  ;;  %v13422_v60 = vor.u32 %v19419_v54, %v13421_v53  ;;  %2009 = vmatpush.bf16.msra.mxu2 %v13166_v59  ;;  %v13519_v53 = vld [vmem:[#allocation6 + $0x7e0] sm:$0xf0] }
  0x6b   : > { %v19219_v58 = vld [vmem:[#allocation6 + $0xdc] sm:$0xf0]  ;;  %v19239_v59 = vld [vmem:[#allocation6 + $0x184] sm:$0xf] }
  0x6c   : > { %v12877_v61 = vld [vmem:[#allocation6 + $0x2c0] sm:$0xf]  ;;  %v12622_v7 = vor.u32 %v19219_v58, %v12621_v57  ;;  %2022 = vmatpush.bf16.msra.mxu3 %v13422_v60  ;;  %v13266_v57 = vor.u32 %v19375_v48, %v13263_v49  ;;  %v13522_v58 = vor.u32 %v19439_v52, %v13519_v53  ;;  %v12719_v60 = vld [vmem:[#allocation6 + $0x1a0] sm:$0xf0] }
  0x6d   : > { %v19283_v62 = vld [vmem:[#allocation6 + $0x2dc] sm:$0xf0]  ;;  %v19343_v42 = vld [vmem:[#allocation6 + $0x4c4] sm:$0xf] }
  0x6e   : > { %v13133_v63 = vld [vmem:[#allocation6 + $0x4c0] sm:$0xf]  ;;  %v12878_v8 = vor.u32 %v19283_v62, %v12877_v61  ;;  %1984 = vmatpush.bf16.msra.mxu0 %v12622_v7  ;;  %v19303_v61 = vld [vmem:[#allocation6 + $0x384] sm:$0xf]  ;;  %v12722_v62 = vor.u32 %v19239_v59, %v12719_v60 }
  0x6f   : > { %v19347_v4 = vld [vmem:[#allocation6 + $0x4dc] sm:$0xf0]  ;;  %v13391_v47 = vld [vmem:[#allocation6 + $0x6e0] sm:$0xf0] }
  0x70   : > { %v13389_v5 = vld [vmem:[#allocation6 + $0x6c0] sm:$0xf]  ;;  %v13134_v11 = vor.u32 %v19347_v4, %v13133_v63  ;;  %1997 = vmatpush.bf16.msra.mxu1 %v12878_v8  ;;  %v12975_v63 = vld [vmem:[#allocation6 + $0x3a0] sm:$0xf0] }
  0x71   : > { %v19411_v6 = vld [vmem:[#allocation6 + $0x6dc] sm:$0xf0]  ;;  %v19367_v4 = vld [vmem:[#allocation6 + $0x584] sm:$0xf] }
  0x72   : > { %v12589_v9 = vld [vmem:[#allocation6 + $0x80] sm:$0xf]  ;;  %v13390_v12 = vor.u32 %v19411_v6, %v13389_v5  ;;  %2010 = vmatpush.bf16.msra.mxu2 %v13134_v11  ;;  %v13231_v5 = vld [vmem:[#allocation6 + $0x5a0] sm:$0xf0]  ;;  %v12978_v6 = vor.u32 %v19303_v61, %v12975_v63 }
  0x73   : > { %v19211_v10 = vld [vmem:[#allocation6 + $0x9c] sm:$0xf0]  ;;  %v13234_v7 = vor.u32 %v19367_v4, %v13231_v5  ;;  %v19431_v8 = vld [vmem:[#allocation6 + $0x784] sm:$0xf] }
  0x74   : > { %v12845_v13 = vld [vmem:[#allocation6 + $0x280] sm:$0xf]  ;;  %v12590_v19 = vor.u32 %v19211_v10, %v12589_v9  ;;  %2023 = vmatpush.bf16.msra.mxu3 %v13390_v12  ;;  %v13487_v9 = vld [vmem:[#allocation6 + $0x7a0] sm:$0xf0] }
  0x75   : > { %v19275_v14 = vld [vmem:[#allocation6 + $0x29c] sm:$0xf0]  ;;  %v13490_v10 = vor.u32 %v19431_v8, %v13487_v9  ;;  %v19231_v11 = vld [vmem:[#allocation6 + $0x144] sm:$0xf] }
  0x76   : > { %v13101_v15 = vld [vmem:[#allocation6 + $0x480] sm:$0xf]  ;;  %v12846_v20 = vor.u32 %v19275_v14, %v12845_v13  ;;  %1985 = vmatpush.bf16.msra.mxu0 %v12590_v19  ;;  %v12687_v12 = vld [vmem:[#allocation6 + $0x160] sm:$0xf0] }
  0x77   : > { %v19339_v16 = vld [vmem:[#allocation6 + $0x49c] sm:$0xf0]  ;;  %v19295_v13 = vld [vmem:[#allocation6 + $0x344] sm:$0xf]  ;;  %v12690_v14 = vor.u32 %v19231_v11, %v12687_v12 }
  0x78   : > { %v13357_v17 = vld [vmem:[#allocation6 + $0x680] sm:$0xf]  ;;  %v13102_v23 = vor.u32 %v19339_v16, %v13101_v15  ;;  %1998 = vmatpush.bf16.msra.mxu1 %v12846_v20  ;;  %v12943_v15 = vld [vmem:[#allocation6 + $0x360] sm:$0xf0] }
  0x79   : > { %v19403_v18 = vld [vmem:[#allocation6 + $0x69c] sm:$0xf0]  ;;  %v19359_v16 = vld [vmem:[#allocation6 + $0x544] sm:$0xf]  ;;  %v12946_v19 = vor.u32 %v19295_v13, %v12943_v15 }
  0x7a   : > { %v12557_v21 = vld [vmem:[#allocation6 + $0x40] sm:$0xf]  ;;  %v13358_v24 = vor.u32 %v19403_v18, %v13357_v17  ;;  %2011 = vmatpush.bf16.msra.mxu2 %v13102_v23  ;;  %v13199_v17 = vld [vmem:[#allocation6 + $0x560] sm:$0xf0]  ;;  %v21159_v18 = vmov 512.0  }
  0x7b   : > { %v19203_v22 = vld [vmem:[#allocation6 + $0x5c] sm:$0xf0]  ;;  %20843 = vrcp.f32 %v21159_v18  ;;  %v13202_v20 = vor.u32 %v19359_v16, %v13199_v17  ;;  %v19271_v52 = vld [vmem:[#allocation6 + $0x284] sm:$0xf] }
  0x7c   : > { %v12813_v25 = vld [vmem:[#allocation6 + $0x240] sm:$0xf]  ;;  %v12558_v31 = vor.u32 %v19203_v22, %v12557_v21  ;;  %2024 = vmatpush.bf16.msra.mxu3 %v13358_v24  ;;  %v19423_v21 = vld [vmem:[#allocation6 + $0x744] sm:$0xf] }
  0x7d   : > { %v19267_v26 = vld [vmem:[#allocation6 + $0x25c] sm:$0xf0]  ;;  %v13455_v22 = vld [vmem:[#allocation6 + $0x760] sm:$0xf0] }
  0x7e   : > { %v13069_v27 = vld [vmem:[#allocation6 + $0x440] sm:$0xf]  ;;  %v12814_v34 = vor.u32 %v19267_v26, %v12813_v25  ;;  %1986 = vmatpush.bf16.msra.mxu0 %v12558_v31  ;;  %v13458_v23 = vor.u32 %v19423_v21, %v13455_v22  ;;  %v19223_v24 = vld [vmem:[#allocation6 + $0x104] sm:$0xf] }
  0x7f   : > { %v19331_v28 = vld [vmem:[#allocation6 + $0x45c] sm:$0xf0]  ;;  %v12655_v25 = vld [vmem:[#allocation6 + $0x120] sm:$0xf0] }
  0x80   : > { %v13325_v29 = vld [vmem:[#allocation6 + $0x640] sm:$0xf]  ;;  %v13070_v38 = vor.u32 %v19331_v28, %v13069_v27  ;;  %1999 = vmatpush.bf16.msra.mxu1 %v12814_v34  ;;  %v19287_v26 = vld [vmem:[#allocation6 + $0x304] sm:$0xf]  ;;  %v12658_v27 = vor.u32 %v19223_v24, %v12655_v25 }
  0x81   : > { %v19395_v30 = vld [vmem:[#allocation6 + $0x65c] sm:$0xf0]  ;;  %v12911_v28 = vld [vmem:[#allocation6 + $0x320] sm:$0xf0] }
  0x82   : > { %v12525_v32 = vld [vmem:[#allocation6] sm:$0xf]  ;;  %v13326_v39 = vor.u32 %v19395_v30, %v13325_v29  ;;  %2012 = vmatpush.bf16.msra.mxu2 %v13070_v38  ;;  %v19351_v29 = vld [vmem:[#allocation6 + $0x504] sm:$0xf]  ;;  %v12914_v31 = vor.u32 %v19287_v26, %v12911_v28 }
  0x83   : > { %v19195_v33 = vld [vmem:[#allocation6 + $0x1c] sm:$0xf0]  ;;  %v13167_v30 = vld [vmem:[#allocation6 + $0x520] sm:$0xf0] }
  0x84   : > { %v12781_v35 = vld [vmem:[#allocation6 + $0x200] sm:$0xf]  ;;  %v12526_v46 = vor.u32 %v19195_v33, %v12525_v32  ;;  %2025 = vmatpush.bf16.msra.mxu3 %v13326_v39  ;;  %v13170_v32 = vor.u32 %v19351_v29, %v13167_v30  ;;  %v19415_v33 = vld [vmem:[#allocation6 + $0x704] sm:$0xf] }
  0x85   : > { %v19259_v36 = vld [vmem:[#allocation6 + $0x21c] sm:$0xf0]  ;;  %v13423_v34 = vld [vmem:[#allocation6 + $0x720] sm:$0xf0] }
  0x86   : > { %v13037_v37 = vld [vmem:[#allocation6 + $0x400] sm:$0xf]  ;;  %v12782_v50 = vor.u32 %v19259_v36, %v12781_v35  ;;  %1987 = vmatpush.bf16.msra.mxu0 %v12526_v46  ;;  %v13426_v35 = vor.u32 %v19415_v33, %v13423_v34  ;;  %v21363_v36 = vpop.eup %20843  ;;  %v12623_v38 = vld [vmem:[#allocation6 + $0xe0] sm:$0xf0] }
  0x87   : > { %v19323_v40 = vld [vmem:[#allocation6 + $0x41c] sm:$0xf0]  ;;  %v19279_v39 = vld [vmem:[#allocation6 + $0x2c4] sm:$0xf]  ;;  %v400_v48 = vmul.f32 512.0, %v21363_v36  ;;  %vm404_vm0 = vweird.f32 %v21363_v36 }
  0x88   : > { %v13293_v43 = vld [vmem:[#allocation6 + $0x600] sm:$0xf]  ;;  %v13038_v54 = vor.u32 %v19323_v40, %v13037_v37  ;;  %2000 = vmatpush.bf16.msra.mxu1 %v12782_v50  ;;  %v19215_v37 = vld [vmem:[#allocation6 + $0xc4] sm:$0xf] }
  0x89   : > { %v19387_v44 = vld [vmem:[#allocation6 + $0x61c] sm:$0xf0]  ;;  %v12626_v40 = vor.u32 %v19215_v37, %v12623_v38  ;;  %v19407_v46 = vld [vmem:[#allocation6 + $0x6c4] sm:$0xf]  ;;  %v401_v61 = vsub.f32 1.0, %v400_v48 }
  0x8a   : > { %v13294_v55 = vor.u32 %v19387_v44, %v13293_v43  ;;  %2032 = vmatpush.bf16.msrb.mxu0 %v12754_v51  ;;  %2013 = vmatpush.bf16.msra.mxu2 %v13038_v54  ;;  %v13135_v43 = vld [vmem:[#allocation6 + $0x4e0] sm:$0xf0]  ;;  %v12882_v44 = vor.u32 %v19279_v39, %v12879_v41  ;;  %v13394_v49 = vor.u32 %v19407_v46, %v13391_v47  ;;  %v19252_v41 = vld [vmem:[#allocation6 + $0x1e4] sm:$0xf0] }
  0x8b   : > { %v13138_v45 = vor.u32 %v19343_v42, %v13135_v43  ;;  %v19207_v50 = vld [vmem:[#allocation6 + $0x84] sm:$0xf]  ;;  %v13013_v42 = vld [vmem:[#allocation6 + $0x3c8] sm:$0xf] }
  0x8c   : > { %2026 = vmatpush.bf16.msra.mxu3 %v13294_v55  ;;  %2045 = vmatpush.bf16.msrb.mxu1 %v13010_v56  ;;  %v12591_v51 = vld [vmem:[#allocation6 + $0xa0] sm:$0xf0]  ;;  %v19316_v43 = vld [vmem:[#allocation6 + $0x3e4] sm:$0xf0] }
  0x8d   : > { %v12594_v53 = vor.u32 %v19207_v50, %v12591_v51  ;;  %v12847_v54 = vld [vmem:[#allocation6 + $0x2a0] sm:$0xf0]  ;;  %v13525_v50 = vld [vmem:[#allocation6 + $0x7c8] sm:$0xf] }
  0x8e   : > { %2058 = vmatpush.bf16.msrb.mxu2 %v13266_v57  ;;  %2033 = vmatpush.bf16.msrb.mxu0 %v12722_v62  ;;  %v19335_v55 = vld [vmem:[#allocation6 + $0x484] sm:$0xf]  ;;  %v12850_v57 = vor.u32 %v19271_v52, %v12847_v54  ;;  %v19444_v51 = vld [vmem:[#allocation6 + $0x7e4] sm:$0xf0] }
  0x8f   : > { %v13103_v56 = vld [vmem:[#allocation6 + $0x4a0] sm:$0xf0] }
  0x90   : > { %2071 = vmatpush.bf16.msrb.mxu3 %v13522_v58  ;;  %2046 = vmatpush.bf16.msrb.mxu1 %v12978_v6  ;;  %v13106_v58 = vor.u32 %v19335_v55, %v13103_v56  ;;  %v19399_v59 = vld [vmem:[#allocation6 + $0x684] sm:$0xf] }
  0x91   : > { %v13359_v60 = vld [vmem:[#allocation6 + $0x6a0] sm:$0xf0] }
  0x92   : > { %2059 = vmatpush.bf16.msrb.mxu2 %v13234_v7  ;;  %2034 = vmatpush.bf16.msrb.mxu0 %v12690_v14  ;;  %v13362_v62 = vor.u32 %v19399_v59, %v13359_v60  ;;  %v19199_v63 = vld [vmem:[#allocation6 + $0x44] sm:$0xf]  ;;  %v402_v14 = vmul.f32 %v21363_v36, %v401_v61  ;;  %v13526_v59 = vor.u32 %v19444_v51, %v13525_v50  ;;  %v19308_v60 = vld [vmem:[#allocation6 + $0x3a4] sm:$0xf0] }
  0x93   : > { %v12559_v4 = vld [vmem:[#allocation6 + $0x60] sm:$0xf0]  ;;  %v19372_v61 = vld [vmem:[#allocation6 + $0x5a4] sm:$0xf0] }
  0x94   : > { %2072 = vmatpush.bf16.msrb.mxu3 %v13490_v10  ;;  %2047 = vmatpush.bf16.msrb.mxu1 %v12946_v19  ;;  %v19263_v5 = vld [vmem:[#allocation6 + $0x244] sm:$0xf]  ;;  %v12562_v6 = vor.u32 %v19199_v63, %v12559_v4  ;;  %v19436_v63 = vld [vmem:[#allocation6 + $0x7a4] sm:$0xf0] }
  0x95   : > { %v12815_v7 = vld [vmem:[#allocation6 + $0x260] sm:$0xf0]  ;;  %v13365_v50 = vld [vmem:[#allocation6 + $0x688] sm:$0xf] }
  0x96   : > { %2060 = vmatpush.bf16.msrb.mxu2 %v13202_v20  ;;  %2035 = vmatpush.bf16.msrb.mxu0 %v12658_v27  ;;  %v19327_v8 = vld [vmem:[#allocation6 + $0x444] sm:$0xf]  ;;  %v12818_v10 = vor.u32 %v19263_v5, %v12815_v7  ;;  %v403_v27 = vadd.f32 %v21363_v36, %v402_v14  ;;  %v19236_v7 = vld [vmem:[#allocation6 + $0x164] sm:$0xf0] }
  0x97   : > { %v13071_v9 = vld [vmem:[#allocation6 + $0x460] sm:$0xf0]  ;;  %v13461_v14 = vld [vmem:[#allocation6 + $0x748] sm:$0xf] }
  0x98   : > { %2073 = vmatpush.bf16.msrb.mxu3 %v13458_v23  ;;  %2048 = vmatpush.bf16.msrb.mxu1 %v12914_v31  ;;  %v13074_v11 = vor.u32 %v19327_v8, %v13071_v9  ;;  %v19391_v12 = vld [vmem:[#allocation6 + $0x644] sm:$0xf]  ;;  %v405_v29 = vsel %vm404_vm0, %v21363_v36, %v403_v27  ;;  %v19420_v27 = vld [vmem:[#allocation6 + $0x724] sm:$0xf0] }
  0x99   : > { %v13327_v13 = vld [vmem:[#allocation6 + $0x660] sm:$0xf0]  ;;  %v19404_v51 = vld [vmem:[#allocation6 + $0x6a4] sm:$0xf0] }
  0x9a   : > { %2061 = vmatpush.bf16.msrb.mxu2 %v13170_v32  ;;  %2036 = vmatpush.bf16.msrb.mxu0 %v12626_v40  ;;  %v13330_v15 = vor.u32 %v19391_v12, %v13327_v13  ;;  %v19191_v16 = vld [vmem:[#allocation6 + $0x4] sm:$0xf]  ;;  %v12757_v40 = vld [vmem:[#allocation6 + $0x1c8] sm:$0xf] }
  0x9b   : > { %v12527_v17 = vld [vmem:[#allocation6 + $0x20] sm:$0xf0]  ;;  %v12758_v52 = vor.u32 %v19252_v41, %v12757_v40  ;;  %v13205_v12 = vld [vmem:[#allocation6 + $0x548] sm:$0xf] }
  0x9c   : > { %2074 = vmatpush.bf16.msrb.mxu3 %v13426_v35  ;;  %2049 = vmatpush.bf16.msrb.mxu1 %v12882_v44  ;;  %v19255_v18 = vld [vmem:[#allocation6 + $0x204] sm:$0xf]  ;;  %v12530_v19 = vor.u32 %v19191_v16, %v12527_v17  ;;  %v19364_v13 = vld [vmem:[#allocation6 + $0x564] sm:$0xf0] }
  0x9d   : > { %v12783_v20 = vld [vmem:[#allocation6 + $0x220] sm:$0xf0]  ;;  %v19412_v40 = vld [vmem:[#allocation6 + $0x6e4] sm:$0xf0] }
  0x9e   : > { %2062 = vmatpush.bf16.msrb.mxu2 %v13138_v45  ;;  %2037 = vmatpush.bf16.msrb.mxu0 %v12594_v53  ;;  %v19319_v21 = vld [vmem:[#allocation6 + $0x404] sm:$0xf]  ;;  %v12786_v23 = vor.u32 %v19255_v18, %v12783_v20  ;;  %v13269_v45 = vld [vmem:[#allocation6 + $0x5c8] sm:$0xf]  ;;  %v13014_v53 = vor.u32 %v19316_v43, %v13013_v42  ;;  %v13206_v20 = vor.u32 %v19364_v13, %v13205_v12 }
  0x9f   : > { %v13039_v22 = vld [vmem:[#allocation6 + $0x420] sm:$0xf0]  ;;  %v12661_v18 = vld [vmem:[#allocation6 + $0x108] sm:$0xf] }
  0xa0   : > { %2075 = vmatpush.bf16.msrb.mxu3 %v13394_v49  ;;  %2050 = vmatpush.bf16.msrb.mxu1 %v12850_v57  ;;  %v13042_v24 = vor.u32 %v19319_v21, %v13039_v22  ;;  %v19383_v25 = vld [vmem:[#allocation6 + $0x604] sm:$0xf]  ;;  %v19380_v49 = vld [vmem:[#allocation6 + $0x5e4] sm:$0xf0] }
  0xa1   : > { %v13295_v26 = vld [vmem:[#allocation6 + $0x620] sm:$0xf0]  ;;  %v12917_v22 = vld [vmem:[#allocation6 + $0x308] sm:$0xf] }
  0xa2   : > { %2063 = vmatpush.bf16.msrb.mxu2 %v13106_v58  ;;  %2038 = vmatpush.bf16.msrb.mxu0 %v12562_v6  ;;  %v13298_v28 = vor.u32 %v19383_v25, %v13295_v26  ;;  %v19244_v58 = vld [vmem:[#allocation6 + $0x1a4] sm:$0xf0] }
  0xa3   : > { %v12693_v6 = vld [vmem:[#allocation6 + $0x148] sm:$0xf] }
  0xa4   : > { %2076 = vmatpush.bf16.msrb.mxu3 %v13362_v62  ;;  %2051 = vmatpush.bf16.msrb.mxu1 %v12818_v10  ;;  %v13493_v62 = vld [vmem:[#allocation6 + $0x788] sm:$0xf]  ;;  %v12694_v16 = vor.u32 %v19236_v7, %v12693_v6 }
  0xa5   : > { %v13494_v9 = vor.u32 %v19436_v63, %v13493_v62  ;;  %v12949_v10 = vld [vmem:[#allocation6 + $0x348] sm:$0xf] }
  0xa6   : > { %2064 = vmatpush.bf16.msrb.mxu2 %v13074_v11  ;;  %2039 = vmatpush.bf16.msrb.mxu0 %v12530_v19  ;;  %v19300_v11 = vld [vmem:[#allocation6 + $0x364] sm:$0xf0] }
  0xa7   : > { %v12950_v17 = vor.u32 %v19300_v11, %v12949_v10  ;;  %v19228_v19 = vld [vmem:[#allocation6 + $0x124] sm:$0xf0] }
  0xa8   : > { %2077 = vmatpush.bf16.msrb.mxu3 %v13330_v15  ;;  %2052 = vmatpush.bf16.msrb.mxu1 %v12786_v23  ;;  %v19428_v15 = vld [vmem:[#allocation6 + $0x764] sm:$0xf0] }
  0xa9   : > { %v13462_v21 = vor.u32 %v19428_v15, %v13461_v14  ;;  %v19292_v23 = vld [vmem:[#allocation6 + $0x324] sm:$0xf0] }
  0xaa   : > { %2065 = vmatpush.bf16.msrb.mxu2 %v13042_v24  ;;  %v13173_v24 = vld [vmem:[#allocation6 + $0x508] sm:$0xf] }
  0xab   : > { %v19356_v25 = vld [vmem:[#allocation6 + $0x524] sm:$0xf0] }
  0xac   : > { %2078 = vmatpush.bf16.msrb.mxu3 %v13298_v28  ;;  %v13429_v26 = vld [vmem:[#allocation6 + $0x708] sm:$0xf]  ;;  %v12662_v28 = vor.u32 %v19228_v19, %v12661_v18  ;;  %v19312_v18 = vld [vmem:[#allocation6 + $0x3cc] sm:$0xf] }
  0xad   : > { %v12597_v43 = vld [vmem:[#allocation6 + $0x88] sm:$0xf]  ;;  %v13015_v19 = vld [vmem:[#allocation6 + $0x3e8] sm:$0xf0] }
  0xae   : > { %v13333_v62 = vld [vmem:[#allocation6 + $0x648] sm:$0xf] }
  0xaf   : > { %v19396_v63 = vld [vmem:[#allocation6 + $0x664] sm:$0xf0] }
  0xb0   : > { %v19196_v7 = vld [vmem:[#allocation6 + $0x24] sm:$0xf0]  ;;  %v13334_v11 = vor.u32 %v19396_v63, %v13333_v62  ;;  %v19416_v62 = vld [vmem:[#allocation6 + $0x70c] sm:$0xf] }
  0xb1   : > { %v13045_v12 = vld [vmem:[#allocation6 + $0x408] sm:$0xf]  ;;  %v13431_v63 = vld [vmem:[#allocation6 + $0x728] sm:$0xf0] }
  0xb2   : > { %v19324_v13 = vld [vmem:[#allocation6 + $0x424] sm:$0xf0] }
  0xb3   : > { %v13301_v14 = vld [vmem:[#allocation6 + $0x608] sm:$0xf] }
  0xb4   : > { %v19388_v15 = vld [vmem:[#allocation6 + $0x624] sm:$0xf0] }
  0xc5   : > { %v398_v30 = vpop.xlane.xlu0 %397 }
  0xc6   : > { %v406_v31 = vmul.f32 %v405_v29, %v398_v30  ;;  %v12918_v29 = vor.u32 %v19292_v23, %v12917_v22  ;;  %v12629_v30 = vld [vmem:[#allocation6 + $0xc8] sm:$0xf]  ;;  %v13271_v23 = vld [vmem:[#allocation6 + $0x5e8] sm:$0xf0] }
  0xc8   : > { %v407_v32 = vadd.f32 1e-08, %v406_v31  ;;  %v19220_v31 = vld [vmem:[#allocation6 + $0xe4] sm:$0xf0] }
  0xc9   : > { %v12630_v41 = vor.u32 %v19220_v31, %v12629_v30  ;;  %v19240_v30 = vld [vmem:[#allocation6 + $0x18c] sm:$0xf] }
  0xca   : > { %20845 = vrsqrt.f32 %v407_v32  ;;  %vm414_vm2 = vweird.f32 %v407_v32  ;;  %v12727_v31 = vld [vmem:[#allocation6 + $0x1a8] sm:$0xf0] }
  0xd0   : > { %v20846_v33 = vpop.eup %20845 }
  0xd1   : > { %v409_v34 = vmul.f32 %v20846_v33, %v407_v32  ;;  %vm415_vm1 = vweird.f32 %v20846_v33  ;;  %v13174_v32 = vor.u32 %v19356_v25, %v13173_v24  ;;  %v19440_v24 = vld [vmem:[#allocation6 + $0x7cc] sm:$0xf] }
  0xd2   : > { %vm416_vm3 = vmor %vm414_vm2, %vm415_vm1  ;;  %v13527_v25 = vld [vmem:[#allocation6 + $0x7e8] sm:$0xf0] }
  0xd3   : > { %v410_v35 = vmul.f32 %v20846_v33, %v409_v34  ;;  %v12885_v34 = vld [vmem:[#allocation6 + $0x2c8] sm:$0xf] }
  0xd5   : > { %v411_v37 = vmul.f32 0.5, %v410_v35  ;;  %v19284_v35 = vld [vmem:[#allocation6 + $0x2e4] sm:$0xf0] }
  0xd6   : > { %v12886_v42 = vor.u32 %v19284_v35, %v12885_v34  ;;  %v19304_v34 = vld [vmem:[#allocation6 + $0x38c] sm:$0xf] }
  0xd7   : > { %v412_v38 = vsub.f32 1.5, %v411_v37  ;;  %v13141_v37 = vld [vmem:[#allocation6 + $0x4c8] sm:$0xf]  ;;  %v12983_v35 = vld [vmem:[#allocation6 + $0x3a8] sm:$0xf0] }
  0xd9   : > { %v413_v39 = vmul.f32 %v20846_v33, %v412_v38  ;;  %v19348_v38 = vld [vmem:[#allocation6 + $0x4e4] sm:$0xf0] }
  0xdb   : > { %v417_v44 = vsel %vm416_vm3, %v20846_v33, %v413_v39  ;;  %v13430_v33 = vor.u32 %v19420_v27, %v13429_v26  ;;  %v13397_v39 = vld [vmem:[#allocation6 + $0x6c8] sm:$0xf]  ;;  %v13046_v26 = vor.u32 %v19324_v13, %v13045_v12  ;;  %v13302_v27 = vor.u32 %v19388_v15, %v13301_v14  ;;  %v19344_v12 = vld [vmem:[#allocation6 + $0x4cc] sm:$0xf] }
  0xdc   : > { %v418_v36 = vmul.f32 %v417_v44, %v21347_v0  ;;  %v419_v46 = vmul.f32 %v417_v44, %v21349_v1  ;;  %v420_v47 = vmul.f32 %v417_v44, %v21351_v2  ;;  %v421_v48 = vmul.f32 %v417_v44, %v21353_v3  ;;  %v12725_v0 = vld [vmem:[#allocation6 + $0x188] sm:$0xf]  ;;  %v13143_v13 = vld [vmem:[#allocation6 + $0x4e8] sm:$0xf0] }
  0xdd   : > { %v13270_v1 = vor.u32 %v19380_v49, %v13269_v45  ;;  %v12981_v2 = vld [vmem:[#allocation6 + $0x388] sm:$0xf]  ;;  %v12726_v4 = vor.u32 %v19244_v58, %v12725_v0  ;;  %v13142_v45 = vor.u32 %v19348_v38, %v13141_v37  ;;  %v19368_v37 = vld [vmem:[#allocation6 + $0x58c] sm:$0xf] }
  0xde   : > { %v21374_v54 = vpack.c.bf16 %v418_v36, %v418_v36  ;;  %v21376_v55 = vpack.c.bf16 %v419_v46, %v419_v46  ;;  %v21378_v56 = vpack.c.bf16 %v420_v47, %v420_v47  ;;  %v21380_v57 = vpack.c.bf16 %v421_v48, %v421_v48  ;;  %v13237_v3 = vld [vmem:[#allocation6 + $0x588] sm:$0xf]  ;;  %v13239_v38 = vld [vmem:[#allocation6 + $0x5a8] sm:$0xf0] }
  0xdf   : > { %v12982_v5 = vor.u32 %v19308_v60, %v12981_v2  ;;  %v13238_v8 = vor.u32 %v19372_v61, %v13237_v3  ;;  %v19212_v44 = vld [vmem:[#allocation6 + $0xa4] sm:$0xf0]  ;;  %v13398_v36 = vor.u32 %v19412_v40, %v13397_v39  ;;  %v19432_v39 = vld [vmem:[#allocation6 + $0x78c] sm:$0xf] }
  0xe0   : > { %1988 = vmatmul.bf16.vlgmr.msra.gmra.mxu0 %v21374_v54  ;;  %2001 = vmatmul.bf16.vlgmr.msra.gmra.mxu1 %v21376_v55  ;;  %v12853_v46 = vld [vmem:[#allocation6 + $0x288] sm:$0xf]  ;;  %v13495_v40 = vld [vmem:[#allocation6 + $0x7a8] sm:$0xf0] }
  0xe1   : > { %2014 = vmatmul.bf16.vlgmr.msra.gmra.mxu2 %v21378_v56  ;;  %2027 = vmatmul.bf16.vlgmr.msra.gmra.mxu3 %v21380_v57  ;;  %v19276_v47 = vld [vmem:[#allocation6 + $0x2a4] sm:$0xf0]  ;;  %v19408_v14 = vld [vmem:[#allocation6 + $0x6cc] sm:$0xf] }
  0xe2   : > { %2084 = vmatpush.bf16.msra.mxu0 %v12758_v52  ;;  %2097 = vmatpush.bf16.msra.mxu1 %v13014_v53  ;;  %v13109_v48 = vld [vmem:[#allocation6 + $0x488] sm:$0xf]  ;;  %v12598_v52 = vor.u32 %v19212_v44, %v12597_v43  ;;  %v12854_v53 = vor.u32 %v19276_v47, %v12853_v46  ;;  %v19232_v43 = vld [vmem:[#allocation6 + $0x14c] sm:$0xf] }
  0xe3   : > { %2110 = vmatpush.bf16.msra.mxu2 %v13270_v1  ;;  %2123 = vmatpush.bf16.msra.mxu3 %v13526_v59  ;;  %v19340_v49 = vld [vmem:[#allocation6 + $0x4a4] sm:$0xf0]  ;;  %v13366_v59 = vor.u32 %v19404_v51, %v13365_v50  ;;  %v12695_v44 = vld [vmem:[#allocation6 + $0x168] sm:$0xf0] }
  0xe4   : > { %v12565_v0 = vld [vmem:[#allocation6 + $0x48] sm:$0xf]  ;;  %v13110_v1 = vor.u32 %v19340_v49, %v13109_v48  ;;  %v19296_v46 = vld [vmem:[#allocation6 + $0x34c] sm:$0xf] }
  0xe5   : > { %v19204_v58 = vld [vmem:[#allocation6 + $0x64] sm:$0xf0]  ;;  %v12951_v47 = vld [vmem:[#allocation6 + $0x368] sm:$0xf0] }
  0xe6   : > { %2085 = vmatpush.bf16.msra.mxu0 %v12726_v4  ;;  %2098 = vmatpush.bf16.msra.mxu1 %v12982_v5  ;;  %v12821_v2 = vld [vmem:[#allocation6 + $0x248] sm:$0xf]  ;;  %v12566_v5 = vor.u32 %v19204_v58, %v12565_v0  ;;  %v19360_v48 = vld [vmem:[#allocation6 + $0x54c] sm:$0xf] }
  0xe7   : > { %2111 = vmatpush.bf16.msra.mxu2 %v13238_v8  ;;  %2124 = vmatpush.bf16.msra.mxu3 %v13494_v9  ;;  %v19268_v60 = vld [vmem:[#allocation6 + $0x264] sm:$0xf0]  ;;  %v13207_v49 = vld [vmem:[#allocation6 + $0x568] sm:$0xf0] }
  0xe8   : > { %v13077_v3 = vld [vmem:[#allocation6 + $0x448] sm:$0xf]  ;;  %v12822_v6 = vor.u32 %v19268_v60, %v12821_v2  ;;  %v19424_v50 = vld [vmem:[#allocation6 + $0x74c] sm:$0xf] }
  0xe9   : > { %v19332_v61 = vld [vmem:[#allocation6 + $0x464] sm:$0xf0]  ;;  %v13463_v51 = vld [vmem:[#allocation6 + $0x768] sm:$0xf0] }
  0xea   : > { %2086 = vmatpush.bf16.msra.mxu0 %v12694_v16  ;;  %2099 = vmatpush.bf16.msra.mxu1 %v12950_v17  ;;  %v12533_v4 = vld [vmem:[#allocation6 + $0x8] sm:$0xf]  ;;  %v13078_v10 = vor.u32 %v19332_v61, %v13077_v3  ;;  %v19248_v16 = vld [vmem:[#allocation6 + $0x1cc] sm:$0xf] }
  0xeb   : > { %2112 = vmatpush.bf16.msra.mxu2 %v13206_v20  ;;  %2125 = vmatpush.bf16.msra.mxu3 %v13462_v21  ;;  %v12789_v8 = vld [vmem:[#allocation6 + $0x208] sm:$0xf]  ;;  %v12759_v17 = vld [vmem:[#allocation6 + $0x1e8] sm:$0xf0]  ;;  %v12534_v21 = vor.u32 %v19196_v7, %v12533_v4 }
  0xec   : > { %v19260_v9 = vld [vmem:[#allocation6 + $0x224] sm:$0xf0]  ;;  %v19376_v20 = vld [vmem:[#allocation6 + $0x5cc] sm:$0xf] }
  0xed   : > { %v12790_v22 = vor.u32 %v19260_v9, %v12789_v8  ;;  %v19224_v0 = vld [vmem:[#allocation6 + $0x10c] sm:$0xf]  ;;  %v13434_v9 = vor.u32 %v19416_v62, %v13431_v63 }
  0xee   : > { %2087 = vmatpush.bf16.msra.mxu0 %v12662_v28  ;;  %2100 = vmatpush.bf16.msra.mxu1 %v12918_v29  ;;  %v12762_v28 = vor.u32 %v19248_v16, %v12759_v17  ;;  %v13018_v29 = vor.u32 %v19312_v18, %v13015_v19  ;;  %v12663_v58 = vld [vmem:[#allocation6 + $0x128] sm:$0xf0] }
  0xef   : > { %2113 = vmatpush.bf16.msra.mxu2 %v13174_v32  ;;  %2126 = vmatpush.bf16.msra.mxu3 %v13430_v33  ;;  %v13274_v32 = vor.u32 %v19376_v20, %v13271_v23  ;;  %v13530_v33 = vor.u32 %v19440_v24, %v13527_v25  ;;  %v19288_v2 = vld [vmem:[#allocation6 + $0x30c] sm:$0xf]  ;;  %v12666_v4 = vor.u32 %v19224_v0, %v12663_v58  ;;  %v13021_v0 = vld [vmem:[#allocation6 + $0x3d0] sm:$0xf] }
  0xf0   : > { %2040 = vmatmul.bf16.vlgmr.msrb.gmra.mxu0 %v21374_v54  ;;  %2053 = vmatmul.bf16.vlgmr.msrb.gmra.mxu1 %v21376_v55  ;;  %v12919_v60 = vld [vmem:[#allocation6 + $0x328] sm:$0xf0]  ;;  %v13146_v20 = vor.u32 %v19344_v12, %v13143_v13  ;;  %v19317_v58 = vld [vmem:[#allocation6 + $0x3ec] sm:$0xf0] }
  0xf1   : > { %2066 = vmatmul.bf16.vlgmr.msrb.gmra.mxu2 %v21378_v56  ;;  %2079 = vmatmul.bf16.vlgmr.msrb.gmra.mxu3 %v21380_v57  ;;  %v19352_v3 = vld [vmem:[#allocation6 + $0x50c] sm:$0xf]  ;;  %v13245_v12 = vld [vmem:[#allocation6 + $0x590] sm:$0xf] }
  0xf2   : > { %2088 = vmatpush.bf16.msra.mxu0 %v12630_v41  ;;  %2101 = vmatpush.bf16.msra.mxu1 %v12886_v42  ;;  %v12730_v41 = vor.u32 %v19240_v30, %v12727_v31  ;;  %v12986_v42 = vor.u32 %v19304_v34, %v12983_v35  ;;  %v13175_v61 = vld [vmem:[#allocation6 + $0x528] sm:$0xf0]  ;;  %v19373_v13 = vld [vmem:[#allocation6 + $0x5ac] sm:$0xf0] }
  0xf3   : > { %2114 = vmatpush.bf16.msra.mxu2 %v13142_v45  ;;  %2127 = vmatpush.bf16.msra.mxu3 %v13398_v36  ;;  %v13242_v45 = vor.u32 %v19368_v37, %v13239_v38  ;;  %v13498_v36 = vor.u32 %v19432_v39, %v13495_v40  ;;  %v12631_v7 = vld [vmem:[#allocation6 + $0xe8] sm:$0xf0]  ;;  %v13178_v8 = vor.u32 %v19352_v3, %v13175_v61  ;;  %v13533_v3 = vld [vmem:[#allocation6 + $0x7d0] sm:$0xf] }
  0xf4   : > { %v13399_v15 = vld [vmem:[#allocation6 + $0x6e8] sm:$0xf0]  ;;  %v19445_v61 = vld [vmem:[#allocation6 + $0x7ec] sm:$0xf0] }
  0xf5   : > { %v19208_v18 = vld [vmem:[#allocation6 + $0x8c] sm:$0xf] }
  0xf6   : > { %2089 = vmatpush.bf16.msra.mxu0 %v12598_v52  ;;  %2102 = vmatpush.bf16.msra.mxu1 %v12854_v53  ;;  %v12698_v52 = vor.u32 %v19232_v43, %v12695_v44  ;;  %v12954_v53 = vor.u32 %v19296_v46, %v12951_v47  ;;  %v12599_v19 = vld [vmem:[#allocation6 + $0xa8] sm:$0xf0] }
  0xf7   : > { %2115 = vmatpush.bf16.msra.mxu2 %v13110_v1  ;;  %2128 = vmatpush.bf16.msra.mxu3 %v13366_v59  ;;  %v13210_v1 = vor.u32 %v19360_v48, %v13207_v49  ;;  %v13466_v59 = vor.u32 %v19424_v50, %v13463_v51  ;;  %v12855_v23 = vld [vmem:[#allocation6 + $0x2a8] sm:$0xf0] }
  0xf8   : > { %v19336_v24 = vld [vmem:[#allocation6 + $0x48c] sm:$0xf] }
  0xf9   : > { %v13111_v25 = vld [vmem:[#allocation6 + $0x4a8] sm:$0xf0] }
  0xfa   : > { %2090 = vmatpush.bf16.msra.mxu0 %v12566_v5  ;;  %2103 = vmatpush.bf16.msra.mxu1 %v12822_v6  ;;  %v12922_v5 = vor.u32 %v19288_v2, %v12919_v60  ;;  %v19216_v6 = vld [vmem:[#allocation6 + $0xcc] sm:$0xf]  ;;  %v19381_v60 = vld [vmem:[#allocation6 + $0x5ec] sm:$0xf0] }
  0xfb   : > { %2116 = vmatpush.bf16.msra.mxu2 %v13078_v10  ;;  %2129 = vmatpush.bf16.msra.mxu3 %v13334_v11  ;;  %v19280_v10 = vld [vmem:[#allocation6 + $0x2cc] sm:$0xf]  ;;  %v12634_v16 = vor.u32 %v19216_v6, %v12631_v7  ;;  %v12733_v6 = vld [vmem:[#allocation6 + $0x190] sm:$0xf] }
  0xfc   : > { %v12887_v11 = vld [vmem:[#allocation6 + $0x2e8] sm:$0xf0]  ;;  %v19245_v7 = vld [vmem:[#allocation6 + $0x1ac] sm:$0xf0] }
  0xfd   : > { %v12890_v17 = vor.u32 %v19280_v10, %v12887_v11  ;;  %v19200_v30 = vld [vmem:[#allocation6 + $0x4c] sm:$0xf]  ;;  %v12989_v10 = vld [vmem:[#allocation6 + $0x390] sm:$0xf] }
  0xfe   : > { %2091 = vmatpush.bf16.msra.mxu0 %v12534_v21  ;;  %2104 = vmatpush.bf16.msra.mxu1 %v12790_v22  ;;  %v13402_v21 = vor.u32 %v19408_v14, %v13399_v15  ;;  %v19272_v22 = vld [vmem:[#allocation6 + $0x28c] sm:$0xf]  ;;  %v19309_v11 = vld [vmem:[#allocation6 + $0x3ac] sm:$0xf0] }
  0xff   : > { %2117 = vmatpush.bf16.msra.mxu2 %v13046_v26  ;;  %2130 = vmatpush.bf16.msra.mxu3 %v13302_v27  ;;  %v19400_v26 = vld [vmem:[#allocation6 + $0x68c] sm:$0xf]  ;;  %v13501_v14 = vld [vmem:[#allocation6 + $0x790] sm:$0xf] }
 0x100   : > { %v13367_v27 = vld [vmem:[#allocation6 + $0x6a8] sm:$0xf0]  ;;  %v19437_v15 = vld [vmem:[#allocation6 + $0x7ac] sm:$0xf0] }
 0x101   : > { %2092 = vmatmul.bf16.vlgmr.msra.gmra.mxu0 %v21374_v54  ;;  %2105 = vmatmul.bf16.vlgmr.msra.gmra.mxu1 %v21376_v55  ;;  %v12567_v31 = vld [vmem:[#allocation6 + $0x68] sm:$0xf0] }
 0x102   : > { %2136 = vmatpush.bf16.msrb.mxu0 %v12762_v28  ;;  %2149 = vmatpush.bf16.msrb.mxu1 %v13018_v29  ;;  %v12602_v28 = vor.u32 %v19208_v18, %v12599_v19  ;;  %v12858_v29 = vor.u32 %v19272_v22, %v12855_v23  ;;  %v19264_v34 = vld [vmem:[#allocation6 + $0x24c] sm:$0xf]  ;;  %v12701_v18 = vld [vmem:[#allocation6 + $0x150] sm:$0xf] }
 0x103   : > { %2162 = vmatpush.bf16.msrb.mxu2 %v13274_v32  ;;  %2175 = vmatpush.bf16.msrb.mxu3 %v13530_v33  ;;  %v13114_v32 = vor.u32 %v19336_v24, %v13111_v25  ;;  %v13370_v33 = vor.u32 %v19400_v26, %v13367_v27  ;;  %v12823_v35 = vld [vmem:[#allocation6 + $0x268] sm:$0xf0]  ;;  %v19237_v19 = vld [vmem:[#allocation6 + $0x16c] sm:$0xf0] }
 0x104   : > { %2118 = vmatmul.bf16.vlgmr.msra.gmra.mxu2 %v21378_v56  ;;  %2131 = vmatmul.bf16.vlgmr.msra.gmra.mxu3 %v21380_v57  ;;  %v19328_v37 = vld [vmem:[#allocation6 + $0x44c] sm:$0xf]  ;;  %v12826_v43 = vor.u32 %v19264_v34, %v12823_v35  ;;  %v12957_v22 = vld [vmem:[#allocation6 + $0x350] sm:$0xf] }
 0x105   : > { %v13079_v38 = vld [vmem:[#allocation6 + $0x468] sm:$0xf0]  ;;  %v19301_v23 = vld [vmem:[#allocation6 + $0x36c] sm:$0xf0] }
 0x106   : > { %2137 = vmatpush.bf16.msrb.mxu0 %v12730_v41  ;;  %2150 = vmatpush.bf16.msrb.mxu1 %v12986_v42  ;;  %v19392_v39 = vld [vmem:[#allocation6 + $0x64c] sm:$0xf]  ;;  %v12570_v42 = vor.u32 %v19200_v30, %v12567_v31  ;;  %v13082_v46 = vor.u32 %v19328_v37, %v13079_v38  ;;  %v13213_v24 = vld [vmem:[#allocation6 + $0x550] sm:$0xf] }
 0x107   : > { %2163 = vmatpush.bf16.msrb.mxu2 %v13242_v45  ;;  %2176 = vmatpush.bf16.msrb.mxu3 %v13498_v36  ;;  %v13335_v40 = vld [vmem:[#allocation6 + $0x668] sm:$0xf0]  ;;  %v19365_v25 = vld [vmem:[#allocation6 + $0x56c] sm:$0xf0] }
 0x108   : > { %v19192_v41 = vld [vmem:[#allocation6 + $0xc] sm:$0xf]  ;;  %v13338_v47 = vor.u32 %v19392_v39, %v13335_v40  ;;  %v13469_v26 = vld [vmem:[#allocation6 + $0x750] sm:$0xf] }
 0x109   : > { %v12535_v44 = vld [vmem:[#allocation6 + $0x28] sm:$0xf0]  ;;  %v19429_v27 = vld [vmem:[#allocation6 + $0x76c] sm:$0xf0] }
 0x10a   : > { %2138 = vmatpush.bf16.msrb.mxu0 %v12698_v52  ;;  %2151 = vmatpush.bf16.msrb.mxu1 %v12954_v53  ;;  %v19256_v45 = vld [vmem:[#allocation6 + $0x20c] sm:$0xf]  ;;  %v12765_v52 = vld [vmem:[#allocation6 + $0x1d0] sm:$0xf] }
 0x10b   : > { %2164 = vmatpush.bf16.msrb.mxu2 %v13210_v1  ;;  %2177 = vmatpush.bf16.msrb.mxu3 %v13466_v59  ;;  %v12791_v36 = vld [vmem:[#allocation6 + $0x228] sm:$0xf0]  ;;  %v19253_v53 = vld [vmem:[#allocation6 + $0x1ec] sm:$0xf0]  ;;  %v12538_v59 = vor.u32 %v19192_v41, %v12535_v44 }
 0x10c   : > { %v19320_v48 = vld [vmem:[#allocation6 + $0x40c] sm:$0xf]  ;;  %v13277_v1 = vld [vmem:[#allocation6 + $0x5d0] sm:$0xf]  ;;  %v12794_v2 = vor.u32 %v19256_v45, %v12791_v36 }
 0x10d   : > { %v13047_v49 = vld [vmem:[#allocation6 + $0x428] sm:$0xf0]  ;;  %v12669_v30 = vld [vmem:[#allocation6 + $0x110] sm:$0xf] }
 0x10e   : > { %2139 = vmatpush.bf16.msrb.mxu0 %v12666_v4  ;;  %2152 = vmatpush.bf16.msrb.mxu1 %v12922_v5  ;;  %v19384_v50 = vld [vmem:[#allocation6 + $0x60c] sm:$0xf]  ;;  %v13050_v62 = vor.u32 %v19320_v48, %v13047_v49  ;;  %v12766_v4 = vor.u32 %v19253_v53, %v12765_v52  ;;  %v13022_v5 = vor.u32 %v19317_v58, %v13021_v0  ;;  %v19229_v31 = vld [vmem:[#allocation6 + $0x12c] sm:$0xf0] }
 0x10f   : > { %2165 = vmatpush.bf16.msrb.mxu2 %v13178_v8  ;;  %2178 = vmatpush.bf16.msrb.mxu3 %v13434_v9  ;;  %v13303_v51 = vld [vmem:[#allocation6 + $0x628] sm:$0xf0]  ;;  %v13278_v8 = vor.u32 %v19381_v60, %v13277_v1  ;;  %v13534_v9 = vor.u32 %v19445_v61, %v13533_v3  ;;  %v12925_v34 = vld [vmem:[#allocation6 + $0x310] sm:$0xf]  ;;  %v12670_v41 = vor.u32 %v19229_v31, %v12669_v30  ;;  %v19313_v30 = vld [vmem:[#allocation6 + $0x3d4] sm:$0xf] }
 0x110   : > { %v13306_v63 = vor.u32 %v19384_v50, %v13303_v51  ;;  %v19293_v35 = vld [vmem:[#allocation6 + $0x32c] sm:$0xf0]  ;;  %v13023_v31 = vld [vmem:[#allocation6 + $0x3f0] sm:$0xf0] }
 0x111   : > { %v13181_v37 = vld [vmem:[#allocation6 + $0x510] sm:$0xf] }
 0x112   : > { %2140 = vmatpush.bf16.msrb.mxu0 %v12634_v16  ;;  %2153 = vmatpush.bf16.msrb.mxu1 %v12890_v17  ;;  %v12734_v16 = vor.u32 %v19245_v7, %v12733_v6  ;;  %v12990_v17 = vor.u32 %v19309_v11, %v12989_v10  ;;  %v19357_v38 = vld [vmem:[#allocation6 + $0x52c] sm:$0xf0] }
 0x113   : > { %2166 = vmatpush.bf16.msrb.mxu2 %v13146_v20  ;;  %2179 = vmatpush.bf16.msrb.mxu3 %v13402_v21  ;;  %v13246_v20 = vor.u32 %v19373_v13, %v13245_v12  ;;  %v13502_v21 = vor.u32 %v19437_v15, %v13501_v14  ;;  %v13437_v39 = vld [vmem:[#allocation6 + $0x710] sm:$0xf]  ;;  %v13182_v45 = vor.u32 %v19357_v38, %v13181_v37  ;;  %v19441_v37 = vld [vmem:[#allocation6 + $0x7d4] sm:$0xf] }
 0x114   : > { %v19421_v40 = vld [vmem:[#allocation6 + $0x72c] sm:$0xf0]  ;;  %v13535_v38 = vld [vmem:[#allocation6 + $0x7f0] sm:$0xf0] }
 0x115   : > { %v19221_v44 = vld [vmem:[#allocation6 + $0xec] sm:$0xf0]  ;;  %v13438_v36 = vor.u32 %v19421_v40, %v13437_v39 }
 0x116   : > { %2141 = vmatpush.bf16.msrb.mxu0 %v12602_v28  ;;  %2154 = vmatpush.bf16.msrb.mxu1 %v12858_v29  ;;  %v12702_v28 = vor.u32 %v19237_v19, %v12701_v18  ;;  %v12958_v29 = vor.u32 %v19301_v23, %v12957_v22  ;;  %v13149_v48 = vld [vmem:[#allocation6 + $0x4d0] sm:$0xf] }
 0x117   : > { %2167 = vmatpush.bf16.msrb.mxu2 %v13114_v32  ;;  %2180 = vmatpush.bf16.msrb.mxu3 %v13370_v33  ;;  %v13214_v32 = vor.u32 %v19365_v25, %v13213_v24  ;;  %v13470_v33 = vor.u32 %v19429_v27, %v13469_v26  ;;  %v19349_v49 = vld [vmem:[#allocation6 + $0x4ec] sm:$0xf0] }
 0x118   : > { %v13405_v50 = vld [vmem:[#allocation6 + $0x6d0] sm:$0xf]  ;;  %v13150_v1 = vor.u32 %v19349_v49, %v13149_v48  ;;  %v19369_v48 = vld [vmem:[#allocation6 + $0x594] sm:$0xf] }
 0x119   : > { %v19413_v51 = vld [vmem:[#allocation6 + $0x6ec] sm:$0xf0]  ;;  %v13247_v49 = vld [vmem:[#allocation6 + $0x5b0] sm:$0xf0] }
 0x11a   : > { %2142 = vmatpush.bf16.msrb.mxu0 %v12570_v42  ;;  %2155 = vmatpush.bf16.msrb.mxu1 %v12826_v43  ;;  %v12926_v42 = vor.u32 %v19293_v35, %v12925_v34  ;;  %v12637_v43 = vld [vmem:[#allocation6 + $0xd0] sm:$0xf]  ;;  %v13279_v35 = vld [vmem:[#allocation6 + $0x5f0] sm:$0xf0] }
 0x11b   : > { %2168 = vmatpush.bf16.msrb.mxu2 %v13082_v46  ;;  %2181 = vmatpush.bf16.msrb.mxu3 %v13338_v47  ;;  %v12893_v46 = vld [vmem:[#allocation6 + $0x2d0] sm:$0xf]  ;;  %v12638_v52 = vor.u32 %v19221_v44, %v12637_v43  ;;  %v19241_v43 = vld [vmem:[#allocation6 + $0x194] sm:$0xf] }
 0x11c   : > { %v19285_v47 = vld [vmem:[#allocation6 + $0x2ec] sm:$0xf0]  ;;  %v12735_v44 = vld [vmem:[#allocation6 + $0x1b0] sm:$0xf0] }
 0x11d   : > { %v12894_v53 = vor.u32 %v19285_v47, %v12893_v46  ;;  %v12605_v0 = vld [vmem:[#allocation6 + $0x90] sm:$0xf]  ;;  %v19305_v46 = vld [vmem:[#allocation6 + $0x394] sm:$0xf] }
 0x11e   : > { %2143 = vmatpush.bf16.msrb.mxu0 %v12538_v59  ;;  %2156 = vmatpush.bf16.msrb.mxu1 %v12794_v2  ;;  %v19213_v58 = vld [vmem:[#allocation6 + $0xac] sm:$0xf0]  ;;  %v13406_v59 = vor.u32 %v19413_v51, %v13405_v50  ;;  %v12991_v47 = vld [vmem:[#allocation6 + $0x3b0] sm:$0xf0] }
 0x11f   : > { %2169 = vmatpush.bf16.msrb.mxu2 %v13050_v62  ;;  %2182 = vmatpush.bf16.msrb.mxu3 %v13306_v63  ;;  %v12861_v2 = vld [vmem:[#allocation6 + $0x290] sm:$0xf]  ;;  %v19433_v50 = vld [vmem:[#allocation6 + $0x794] sm:$0xf] }
 0x120   : > { %v19277_v60 = vld [vmem:[#allocation6 + $0x2ac] sm:$0xf0]  ;;  %v13503_v51 = vld [vmem:[#allocation6 + $0x7b0] sm:$0xf0] }
 0x121   : > { %2144 = vmatmul.bf16.vlgmr.msrb.gmra.mxu0 %v21374_v54  ;;  %2157 = vmatmul.bf16.vlgmr.msrb.gmra.mxu1 %v21376_v55  ;;  %v13117_v3 = vld [vmem:[#allocation6 + $0x490] sm:$0xf] }
 0x122   : > { %2188 = vmatpush.bf16.msra.mxu0 %v12766_v4  ;;  %2201 = vmatpush.bf16.msra.mxu1 %v13022_v5  ;;  %v19341_v61 = vld [vmem:[#allocation6 + $0x4ac] sm:$0xf0]  ;;  %v12606_v4 = vor.u32 %v19213_v58, %v12605_v0  ;;  %v12862_v5 = vor.u32 %v19277_v60, %v12861_v2  ;;  %v19233_v0 = vld [vmem:[#allocation6 + $0x154] sm:$0xf] }
 0x123   : > { %2214 = vmatpush.bf16.msra.mxu2 %v13278_v8  ;;  %2227 = vmatpush.bf16.msra.mxu3 %v13534_v9  ;;  %v13373_v62 = vld [vmem:[#allocation6 + $0x690] sm:$0xf]  ;;  %v13118_v8 = vor.u32 %v19341_v61, %v13117_v3  ;;  %v12703_v58 = vld [vmem:[#allocation6 + $0x170] sm:$0xf0] }
 0x124   : > { %2170 = vmatmul.bf16.vlgmr.msrb.gmra.mxu2 %v21378_v56  ;;  %2183 = vmatmul.bf16.vlgmr.msrb.gmra.mxu3 %v21380_v57  ;;  %v19405_v63 = vld [vmem:[#allocation6 + $0x6ac] sm:$0xf0]  ;;  %v19297_v2 = vld [vmem:[#allocation6 + $0x354] sm:$0xf] }
 0x125   : > { %v12573_v6 = vld [vmem:[#allocation6 + $0x50] sm:$0xf]  ;;  %v13374_v9 = vor.u32 %v19405_v63, %v13373_v62  ;;  %v12959_v60 = vld [vmem:[#allocation6 + $0x370] sm:$0xf0] }
 0x126   : > { %2189 = vmatpush.bf16.msra.mxu0 %v12734_v16  ;;  %2202 = vmatpush.bf16.msra.mxu1 %v12990_v17  ;;  %v19205_v7 = vld [vmem:[#allocation6 + $0x6c] sm:$0xf0]  ;;  %v19361_v3 = vld [vmem:[#allocation6 + $0x554] sm:$0xf] }
 0x127   : > { %2215 = vmatpush.bf16.msra.mxu2 %v13246_v20  ;;  %2228 = vmatpush.bf16.msra.mxu3 %v13502_v21  ;;  %v12829_v10 = vld [vmem:[#allocation6 + $0x250] sm:$0xf]  ;;  %v12574_v17 = vor.u32 %v19205_v7, %v12573_v6  ;;  %v13215_v61 = vld [vmem:[#allocation6 + $0x570] sm:$0xf0] }
 0x128   : > { %v19269_v11 = vld [vmem:[#allocation6 + $0x26c] sm:$0xf0]  ;;  %v19425_v62 = vld [vmem:[#allocation6 + $0x754] sm:$0xf] }
 0x129   : > { %v13085_v12 = vld [vmem:[#allocation6 + $0x450] sm:$0xf]  ;;  %v12830_v18 = vor.u32 %v19269_v11, %v12829_v10  ;;  %v13471_v63 = vld [vmem:[#allocation6 + $0x770] sm:$0xf0] }
 0x12a   : > { %2190 = vmatpush.bf16.msra.mxu0 %v12702_v28  ;;  %2203 = vmatpush.bf16.msra.mxu1 %v12958_v29  ;;  %v19333_v13 = vld [vmem:[#allocation6 + $0x46c] sm:$0xf0]  ;;  %v19249_v28 = vld [vmem:[#allocation6 + $0x1d4] sm:$0xf] }
 0x12b   : > { %2216 = vmatpush.bf16.msra.mxu2 %v13214_v32  ;;  %2229 = vmatpush.bf16.msra.mxu3 %v13470_v33  ;;  %v13341_v14 = vld [vmem:[#allocation6 + $0x650] sm:$0xf]  ;;  %v13086_v22 = vor.u32 %v19333_v13, %v13085_v12  ;;  %v12767_v29 = vld [vmem:[#allocation6 + $0x1f0] sm:$0xf0] }
 0x12c   : > { %v19397_v15 = vld [vmem:[#allocation6 + $0x66c] sm:$0xf0]  ;;  %v19377_v32 = vld [vmem:[#allocation6 + $0x5d4] sm:$0xf] }
 0x12d   : > { %v12541_v16 = vld [vmem:[#allocation6 + $0x10] sm:$0xf]  ;;  %v13342_v23 = vor.u32 %v19397_v15, %v13341_v14  ;;  %v19225_v6 = vld [vmem:[#allocation6 + $0x114] sm:$0xf] }
 0x12e   : > { %2191 = vmatpush.bf16.msra.mxu0 %v12670_v41  ;;  %2204 = vmatpush.bf16.msra.mxu1 %v12926_v42  ;;  %v19197_v19 = vld [vmem:[#allocation6 + $0x2c] sm:$0xf0]  ;;  %v12770_v41 = vor.u32 %v19249_v28, %v12767_v29  ;;  %v13026_v42 = vor.u32 %v19313_v30, %v13023_v31  ;;  %v12671_v7 = vld [vmem:[#allocation6 + $0x130] sm:$0xf0] }
 0x12f   : > { %2217 = vmatpush.bf16.msra.mxu2 %v13182_v45  ;;  %2230 = vmatpush.bf16.msra.mxu3 %v13438_v36  ;;  %v12797_v20 = vld [vmem:[#allocation6 + $0x210] sm:$0xf]  ;;  %v12542_v33 = vor.u32 %v19197_v19, %v12541_v16  ;;  %v13282_v45 = vor.u32 %v19377_v32, %v13279_v35  ;;  %v13538_v36 = vor.u32 %v19441_v37, %v13535_v38  ;;  %v19289_v10 = vld [vmem:[#allocation6 + $0x314] sm:$0xf] }
 0x130   : > { %v19261_v21 = vld [vmem:[#allocation6 + $0x22c] sm:$0xf0]  ;;  %v12927_v11 = vld [vmem:[#allocation6 + $0x330] sm:$0xf0]  ;;  %v12674_v16 = vor.u32 %v19225_v6, %v12671_v7  ;;  %v13029_v6 = vld [vmem:[#allocation6 + $0x3d8] sm:$0xf] }
 0x131   : > { %v13053_v24 = vld [vmem:[#allocation6 + $0x410] sm:$0xf]  ;;  %v12798_v34 = vor.u32 %v19261_v21, %v12797_v20  ;;  %v19353_v12 = vld [vmem:[#allocation6 + $0x514] sm:$0xf]  ;;  %v19318_v7 = vld [vmem:[#allocation6 + $0x3f4] sm:$0xf0] }
 0x132   : > { %2192 = vmatpush.bf16.msra.mxu0 %v12638_v52  ;;  %2205 = vmatpush.bf16.msra.mxu1 %v12894_v53  ;;  %v19325_v25 = vld [vmem:[#allocation6 + $0x42c] sm:$0xf0]  ;;  %v12738_v52 = vor.u32 %v19241_v43, %v12735_v44  ;;  %v12994_v53 = vor.u32 %v19305_v46, %v12991_v47  ;;  %v13183_v13 = vld [vmem:[#allocation6 + $0x530] sm:$0xf0] }
 0x133   : > { %2218 = vmatpush.bf16.msra.mxu2 %v13150_v1  ;;  %2231 = vmatpush.bf16.msra.mxu3 %v13406_v59  ;;  %v13309_v26 = vld [vmem:[#allocation6 + $0x610] sm:$0xf]  ;;  %v13054_v39 = vor.u32 %v19325_v25, %v13053_v24  ;;  %v13250_v1 = vor.u32 %v19369_v48, %v13247_v49  ;;  %v13506_v59 = vor.u32 %v19433_v50, %v13503_v51  ;;  %v19417_v14 = vld [vmem:[#allocation6 + $0x714] sm:$0xf] }
 0x134   : > { %v19389_v27 = vld [vmem:[#allocation6 + $0x62c] sm:$0xf0]  ;;  %v13439_v15 = vld [vmem:[#allocation6 + $0x730] sm:$0xf0]  ;;  %v13186_v20 = vor.u32 %v19353_v12, %v13183_v13  ;;  %v13541_v12 = vld [vmem:[#allocation6 + $0x7d8] sm:$0xf] }
 0x135   : > { %v13310_v40 = vor.u32 %v19389_v27, %v13309_v26  ;;  %v12639_v19 = vld [vmem:[#allocation6 + $0xf0] sm:$0xf0]  ;;  %v13442_v21 = vor.u32 %v19417_v14, %v13439_v15  ;;  %v19446_v13 = vld [vmem:[#allocation6 + $0x7f4] sm:$0xf0] }
 0x136   : > { %2193 = vmatpush.bf16.msra.mxu0 %v12606_v4  ;;  %2206 = vmatpush.bf16.msra.mxu1 %v12862_v5  ;;  %v12706_v4 = vor.u32 %v19233_v0, %v12703_v58  ;;  %v12962_v5 = vor.u32 %v19297_v2, %v12959_v60  ;;  %v19345_v24 = vld [vmem:[#allocation6 + $0x4d4] sm:$0xf] }
 0x137   : > { %2219 = vmatpush.bf16.msra.mxu2 %v13118_v8  ;;  %2232 = vmatpush.bf16.msra.mxu3 %v13374_v9  ;;  %v13218_v8 = vor.u32 %v19361_v3, %v13215_v61  ;;  %v13474_v9 = vor.u32 %v19425_v62, %v13471_v63  ;;  %v13151_v25 = vld [vmem:[#allocation6 + $0x4f0] sm:$0xf0] }
 0x138   : > { %v19409_v26 = vld [vmem:[#allocation6 + $0x6d4] sm:$0xf]  ;;  %v13154_v32 = vor.u32 %v19345_v24, %v13151_v25  ;;  %v13253_v24 = vld [vmem:[#allocation6 + $0x598] sm:$0xf] }
 0x139   : > { %v13407_v27 = vld [vmem:[#allocation6 + $0x6f0] sm:$0xf0]  ;;  %v19374_v25 = vld [vmem:[#allocation6 + $0x5b4] sm:$0xf0] }
 0x13a   : > { %2194 = vmatpush.bf16.msra.mxu0 %v12574_v17  ;;  %2207 = vmatpush.bf16.msra.mxu1 %v12830_v18  ;;  %v12930_v17 = vor.u32 %v19289_v10, %v12927_v11  ;;  %v19217_v18 = vld [vmem:[#allocation6 + $0xd4] sm:$0xf]  ;;  %v19382_v11 = vld [vmem:[#allocation6 + $0x5f4] sm:$0xf0] }
 0x13b   : > { %2220 = vmatpush.bf16.msra.mxu2 %v13086_v22  ;;  %2233 = vmatpush.bf16.msra.mxu3 %v13342_v23  ;;  %v19281_v22 = vld [vmem:[#allocation6 + $0x2d4] sm:$0xf]  ;;  %v12642_v28 = vor.u32 %v19217_v18, %v12639_v19  ;;  %v12741_v18 = vld [vmem:[#allocation6 + $0x198] sm:$0xf] }
 0x13c   : > { %v12895_v23 = vld [vmem:[#allocation6 + $0x2f0] sm:$0xf0]  ;;  %v19246_v19 = vld [vmem:[#allocation6 + $0x1b4] sm:$0xf0] }
 0x13d   : > { %v12898_v29 = vor.u32 %v19281_v22, %v12895_v23  ;;  %v19209_v30 = vld [vmem:[#allocation6 + $0x94] sm:$0xf]  ;;  %v13542_v22 = vor.u32 %v19446_v13, %v13541_v12  ;;  %v19310_v23 = vld [vmem:[#allocation6 + $0x3b4] sm:$0xf0] }
 0x13e   : > { %2195 = vmatpush.bf16.msra.mxu0 %v12542_v33  ;;  %2208 = vmatpush.bf16.msra.mxu1 %v12798_v34  ;;  %v12607_v31 = vld [vmem:[#allocation6 + $0xb0] sm:$0xf0]  ;;  %v13410_v33 = vor.u32 %v19409_v26, %v13407_v27  ;;  %v13509_v26 = vld [vmem:[#allocation6 + $0x798] sm:$0xf] }
 0x13f   : > { %2221 = vmatpush.bf16.msra.mxu2 %v13054_v39  ;;  %2234 = vmatpush.bf16.msra.mxu3 %v13310_v40  ;;  %v19273_v34 = vld [vmem:[#allocation6 + $0x294] sm:$0xf]  ;;  %v19438_v27 = vld [vmem:[#allocation6 + $0x7b4] sm:$0xf0] }
 0x140   : > { %v12863_v35 = vld [vmem:[#allocation6 + $0x2b0] sm:$0xf0] }
 0x141   : > { %2196 = vmatmul.bf16.vlgmr.msra.gmra.mxu0 %v21374_v54  ;;  %2209 = vmatmul.bf16.vlgmr.msra.gmra.mxu1 %v21376_v55  ;;  %v19337_v37 = vld [vmem:[#allocation6 + $0x494] sm:$0xf] }
 0x142   : > { %2240 = vmatpush.bf16.msrb.mxu0 %v12770_v41  ;;  %2253 = vmatpush.bf16.msrb.mxu1 %v13026_v42  ;;  %v13119_v38 = vld [vmem:[#allocation6 + $0x4b0] sm:$0xf0]  ;;  %v12610_v41 = vor.u32 %v19209_v30, %v12607_v31  ;;  %v12866_v42 = vor.u32 %v19273_v34, %v12863_v35  ;;  %v12709_v31 = vld [vmem:[#allocation6 + $0x158] sm:$0xf]  ;;  %v13254_v34 = vor.u32 %v19374_v25, %v13253_v24 }
 0x143   : > { %2266 = vmatpush.bf16.msrb.mxu2 %v13282_v45  ;;  %2279 = vmatpush.bf16.msrb.mxu3 %v13538_v36  ;;  %v19401_v39 = vld [vmem:[#allocation6 + $0x694] sm:$0xf]  ;;  %v13122_v45 = vor.u32 %v19337_v37, %v13119_v38  ;;  %v13510_v35 = vor.u32 %v19438_v27, %v13509_v26  ;;  %v19302_v37 = vld [vmem:[#allocation6 + $0x374] sm:$0xf0] }
 0x144   : > { %2222 = vmatmul.bf16.vlgmr.msra.gmra.mxu2 %v21378_v56  ;;  %2235 = vmatmul.bf16.vlgmr.msra.gmra.mxu3 %v21380_v57  ;;  %v13375_v40 = vld [vmem:[#allocation6 + $0x6b0] sm:$0xf0]  ;;  %v13221_v38 = vld [vmem:[#allocation6 + $0x558] sm:$0xf] }
 0x145   : > { %v19201_v43 = vld [vmem:[#allocation6 + $0x54] sm:$0xf]  ;;  %v13378_v36 = vor.u32 %v19401_v39, %v13375_v40  ;;  %v19366_v40 = vld [vmem:[#allocation6 + $0x574] sm:$0xf0] }
 0x146   : > { %2241 = vmatpush.bf16.msrb.mxu0 %v12738_v52  ;;  %2254 = vmatpush.bf16.msrb.mxu1 %v12994_v53  ;;  %v12575_v44 = vld [vmem:[#allocation6 + $0x70] sm:$0xf0]  ;;  %v13125_v24 = vld [vmem:[#allocation6 + $0x498] sm:$0xf] }
 0x147   : > { %2267 = vmatpush.bf16.msrb.mxu2 %v13250_v1  ;;  %2280 = vmatpush.bf16.msrb.mxu3 %v13506_v59  ;;  %v19265_v46 = vld [vmem:[#allocation6 + $0x254] sm:$0xf]  ;;  %v12578_v53 = vor.u32 %v19201_v43, %v12575_v44  ;;  %v19342_v25 = vld [vmem:[#allocation6 + $0x4b4] sm:$0xf0] }
 0x148   : > { %v12831_v47 = vld [vmem:[#allocation6 + $0x270] sm:$0xf0]  ;;  %v13381_v26 = vld [vmem:[#allocation6 + $0x698] sm:$0xf] }
 0x149   : > { %v19329_v48 = vld [vmem:[#allocation6 + $0x454] sm:$0xf]  ;;  %v12834_v0 = vor.u32 %v19265_v46, %v12831_v47  ;;  %v12677_v46 = vld [vmem:[#allocation6 + $0x118] sm:$0xf] }
 0x14a   : > { %2242 = vmatpush.bf16.msrb.mxu0 %v12706_v4  ;;  %2255 = vmatpush.bf16.msrb.mxu1 %v12962_v5  ;;  %v13087_v49 = vld [vmem:[#allocation6 + $0x470] sm:$0xf0]  ;;  %v12773_v4 = vld [vmem:[#allocation6 + $0x1d8] sm:$0xf] }
 0x14b   : > { %2268 = vmatpush.bf16.msrb.mxu2 %v13218_v8  ;;  %2281 = vmatpush.bf16.msrb.mxu3 %v13474_v9  ;;  %v19393_v50 = vld [vmem:[#allocation6 + $0x654] sm:$0xf]  ;;  %v13090_v2 = vor.u32 %v19329_v48, %v13087_v49  ;;  %v19254_v5 = vld [vmem:[#allocation6 + $0x1f4] sm:$0xf0]  ;;  %v13222_v48 = vor.u32 %v19366_v40, %v13221_v38  ;;  %v13126_v38 = vor.u32 %v19342_v25, %v13125_v24 }
 0x14c   : > { %v13343_v51 = vld [vmem:[#allocation6 + $0x670] sm:$0xf0]  ;;  %v13285_v8 = vld [vmem:[#allocation6 + $0x5d8] sm:$0xf] }
 0x14d   : > { %v19193_v52 = vld [vmem:[#allocation6 + $0x14] sm:$0xf]  ;;  %v13346_v60 = vor.u32 %v19393_v50, %v13343_v51  ;;  %v19230_v47 = vld [vmem:[#allocation6 + $0x134] sm:$0xf0] }
 0x14e   : > { %2243 = vmatpush.bf16.msrb.mxu0 %v12674_v16  ;;  %2256 = vmatpush.bf16.msrb.mxu1 %v12930_v17  ;;  %v12543_v58 = vld [vmem:[#allocation6 + $0x30] sm:$0xf0]  ;;  %v12774_v16 = vor.u32 %v19254_v5, %v12773_v4  ;;  %v13030_v17 = vor.u32 %v19318_v7, %v13029_v6  ;;  %v12933_v51 = vld [vmem:[#allocation6 + $0x318] sm:$0xf] }
 0x14f   : > { %2269 = vmatpush.bf16.msrb.mxu2 %v13186_v20  ;;  %2282 = vmatpush.bf16.msrb.mxu3 %v13442_v21  ;;  %v19257_v1 = vld [vmem:[#allocation6 + $0x214] sm:$0xf]  ;;  %v12546_v9 = vor.u32 %v19193_v52, %v12543_v58  ;;  %v12997_v20 = vld [vmem:[#allocation6 + $0x398] sm:$0xf]  ;;  %v13286_v21 = vor.u32 %v19382_v11, %v13285_v8 }
 0x150   : > { %v12799_v59 = vld [vmem:[#allocation6 + $0x230] sm:$0xf0]  ;;  %v12998_v30 = vor.u32 %v19310_v23, %v12997_v20  ;;  %v19294_v52 = vld [vmem:[#allocation6 + $0x334] sm:$0xf0] }
 0x151   : > { %v19321_v3 = vld [vmem:[#allocation6 + $0x414] sm:$0xf]  ;;  %v12802_v10 = vor.u32 %v19257_v1, %v12799_v59  ;;  %v13445_v58 = vld [vmem:[#allocation6 + $0x718] sm:$0xf]  ;;  %v12678_v59 = vor.u32 %v19230_v47, %v12677_v46 }
 0x152   : > { %2244 = vmatpush.bf16.msrb.mxu0 %v12642_v28  ;;  %2257 = vmatpush.bf16.msrb.mxu1 %v12898_v29  ;;  %v13055_v61 = vld [vmem:[#allocation6 + $0x430] sm:$0xf0]  ;;  %v21402_v28 = vld [vmem:[#allocation8] sm:$0xff]  ;;  %v12742_v29 = vor.u32 %v19246_v19, %v12741_v18  ;;  %v19422_v1 = vld [vmem:[#allocation6 + $0x734] sm:$0xf0] }
 0x153   : > { %2270 = vmatpush.bf16.msrb.mxu2 %v13154_v32  ;;  %2283 = vmatpush.bf16.msrb.mxu3 %v13410_v33  ;;  %v19385_v62 = vld [vmem:[#allocation6 + $0x614] sm:$0xf]  ;;  %v13058_v14 = vor.u32 %v19321_v3, %v13055_v61  ;;  %v19238_v32 = vld [vmem:[#allocation6 + $0x174] sm:$0xf0]  ;;  %v684_v39 = vperm.slane %v21402_v28, 0 }
 0x154   : > { %v13311_v63 = vld [vmem:[#allocation6 + $0x630] sm:$0xf0]  ;;  %v12965_v33 = vld [vmem:[#allocation6 + $0x358] sm:$0xf] }
 0x155   : > { %v13314_v15 = vor.u32 %v19385_v62, %v13311_v63  ;;  %v19222_v3 = vld [vmem:[#allocation6 + $0xf4] sm:$0xf0]  ;;  %v13446_v63 = vor.u32 %v19422_v1, %v13445_v58 }
 0x156   : > { %2245 = vmatpush.bf16.msrb.mxu0 %v12610_v41  ;;  %2258 = vmatpush.bf16.msrb.mxu1 %v12866_v42  ;;  %v13477_v41 = vld [vmem:[#allocation6 + $0x758] sm:$0xf] }
 0x157   : > { %2271 = vmatpush.bf16.msrb.mxu2 %v13122_v45  ;;  %2284 = vmatpush.bf16.msrb.mxu3 %v13378_v36  ;;  %v19430_v42 = vld [vmem:[#allocation6 + $0x774] sm:$0xf0]  ;;  %v12710_v45 = vor.u32 %v19238_v32, %v12709_v31  ;;  %v12966_v36 = vor.u32 %v19302_v37, %v12965_v33 }
 0x158   : > { %v13478_v49 = vor.u32 %v19430_v42, %v13477_v41  ;;  %v12901_v4 = vld [vmem:[#allocation6 + $0x2d8] sm:$0xf]  ;;  %v685_v42 = vperm.slane %v21402_v28, 1 }
 0x159   : > { %v19286_v5 = vld [vmem:[#allocation6 + $0x2f4] sm:$0xf0] }
 0x15a   : > { %2246 = vmatpush.bf16.msrb.mxu0 %v12578_v53  ;;  %2259 = vmatpush.bf16.msrb.mxu1 %v12834_v0  ;;  %v13189_v53 = vld [vmem:[#allocation6 + $0x518] sm:$0xf] }
 0x15b   : > { %2272 = vmatpush.bf16.msrb.mxu2 %v13090_v2  ;;  %2285 = vmatpush.bf16.msrb.mxu3 %v13346_v60  ;;  %v19358_v0 = vld [vmem:[#allocation6 + $0x534] sm:$0xf0]  ;;  %v12934_v2 = vor.u32 %v19294_v52, %v12933_v51 }
 0x15c   : > { %v12645_v60 = vld [vmem:[#allocation6 + $0xd8] sm:$0xf]  ;;  %v13190_v62 = vor.u32 %v19358_v0, %v13189_v53 }
 0x15d   : > { %v1989_v43 = vpop.f32.mrf.mxu0  ;;  %v2002_v44 = vpop.f32.mrf.mxu1  ;;  %v13157_v6 = vld [vmem:[#allocation6 + $0x4d8] sm:$0xf] }
 0x15e   : > { %2247 = vmatpush.bf16.msrb.mxu0 %v12546_v9  ;;  %2260 = vmatpush.bf16.msrb.mxu1 %v12802_v10  ;;  %v1990_v50 = vadd.f32 %v1989_v43, %v684_v39  ;;  %v19350_v9 = vld [vmem:[#allocation6 + $0x4f4] sm:$0xf0] }
 0x15f   : > { %2273 = vmatpush.bf16.msrb.mxu2 %v13058_v14  ;;  %2286 = vmatpush.bf16.msrb.mxu3 %v13314_v15  ;;  %v13413_v10 = vld [vmem:[#allocation6 + $0x6d8] sm:$0xf]  ;;  %v12646_v15 = vor.u32 %v19222_v3, %v12645_v60  ;;  %v13158_v20 = vor.u32 %v19350_v9, %v13157_v6  ;;  %v19378_v6 = vld [vmem:[#allocation6 + $0x5dc] sm:$0xf] }
 0x160   : > { %v2003_v61 = vadd.f32 %v2002_v44, %v1990_v50  ;;  %v19414_v11 = vld [vmem:[#allocation6 + $0x6f4] sm:$0xf0]  ;;  %v13287_v9 = vld [vmem:[#allocation6 + $0x5f8] sm:$0xf0] }
 0x161   : > { %2248 = vmatmul.bf16.vlgmr.msrb.gmra.mxu0 %v21374_v54  ;;  %2261 = vmatmul.bf16.vlgmr.msrb.gmra.mxu1 %v21376_v55  ;;  %v19214_v18 = vld [vmem:[#allocation6 + $0xb4] sm:$0xf0] }
 0x162   : > { %2292 = vmatpush.bf16.msra.mxu0 %v12774_v16  ;;  %2305 = vmatpush.bf16.msra.mxu1 %v13030_v17  ;;  %v12902_v16 = vor.u32 %v19286_v5, %v12901_v4  ;;  %v12613_v17 = vld [vmem:[#allocation6 + $0x98] sm:$0xf]  ;;  %v19314_v4 = vld [vmem:[#allocation6 + $0x3dc] sm:$0xf] }
 0x163   : > { %2318 = vmatpush.bf16.msra.mxu2 %v13286_v21  ;;  %2331 = vmatpush.bf16.msra.mxu3 %v13542_v22  ;;  %v13414_v21 = vor.u32 %v19414_v11, %v13413_v10  ;;  %v12869_v22 = vld [vmem:[#allocation6 + $0x298] sm:$0xf]  ;;  %v12614_v31 = vor.u32 %v19214_v18, %v12613_v17  ;;  %v13031_v5 = vld [vmem:[#allocation6 + $0x3f8] sm:$0xf0] }
 0x164   : > { %2274 = vmatmul.bf16.vlgmr.msrb.gmra.mxu2 %v21378_v56  ;;  %2287 = vmatmul.bf16.vlgmr.msrb.gmra.mxu3 %v21380_v57  ;;  %v2015_v7 = vpop.f32.mrf.mxu2  ;;  %v2028_v8 = vpop.f32.mrf.mxu3  ;;  %v19278_v23 = vld [vmem:[#allocation6 + $0x2b4] sm:$0xf0]  ;;  %v19442_v10 = vld [vmem:[#allocation6 + $0x7dc] sm:$0xf] }
 0x165   : > { %v2016_v12 = vadd.f32 %v2015_v7, %v2003_v61  ;;  %v1991_v13 = vpop.f32.mrf.mxu0  ;;  %v2004_v14 = vpop.f32.mrf.mxu1  ;;  %v19406_v27 = vld [vmem:[#allocation6 + $0x6b4] sm:$0xf0]  ;;  %v12870_v32 = vor.u32 %v19278_v23, %v12869_v22  ;;  %v13543_v11 = vld [vmem:[#allocation6 + $0x7f8] sm:$0xf0] }
 0x166   : > { %2293 = vmatpush.bf16.msra.mxu0 %v12742_v29  ;;  %2306 = vmatpush.bf16.msra.mxu1 %v12998_v30  ;;  %v12581_v30 = vld [vmem:[#allocation6 + $0x58] sm:$0xf]  ;;  %v13382_v39 = vor.u32 %v19406_v27, %v13381_v26  ;;  %v13546_v22 = vor.u32 %v19442_v10, %v13543_v11  ;;  %v19306_v26 = vld [vmem:[#allocation6 + $0x39c] sm:$0xf] }
 0x167   : > { %2319 = vmatpush.bf16.msra.mxu2 %v13254_v34  ;;  %2332 = vmatpush.bf16.msra.mxu3 %v13510_v35  ;;  %v2029_v19 = vadd.f32 %v2028_v8, %v2016_v12  ;;  %v19206_v33 = vld [vmem:[#allocation6 + $0x74] sm:$0xf0]  ;;  %v12999_v27 = vld [vmem:[#allocation6 + $0x3b8] sm:$0xf0] }
 0x168   : > { %v12837_v34 = vld [vmem:[#allocation6 + $0x258] sm:$0xf]  ;;  %v12582_v51 = vor.u32 %v19206_v33, %v12581_v30  ;;  %v13255_v30 = vld [vmem:[#allocation6 + $0x5b8] sm:$0xf0] }
 0x169   : > { %vm2396_vm4 = vcmp.ge.f32.partialorder %v2029_v19, 0.0  ;;  %v2404_v29 = vmul.f32 0.2, %v2029_v19  ;;  %v19270_v35 = vld [vmem:[#allocation6 + $0x274] sm:$0xf0] }
 0x16a   : > { %2294 = vmatpush.bf16.msra.mxu0 %v12710_v45  ;;  %2307 = vmatpush.bf16.msra.mxu1 %v12966_v36  ;;  %v13093_v40 = vld [vmem:[#allocation6 + $0x458] sm:$0xf]  ;;  %v12838_v52 = vor.u32 %v19270_v35, %v12837_v34  ;;  %v19234_v34 = vld [vmem:[#allocation6 + $0x15c] sm:$0xf] }
 0x16b   : > { %2320 = vmatpush.bf16.msra.mxu2 %v13222_v48  ;;  %2333 = vmatpush.bf16.msra.mxu3 %v13478_v49  ;;  %v2412_v37 = vsel %vm2396_vm4, %v2029_v19, %v2404_v29  ;;  %v19334_v41 = vld [vmem:[#allocation6 + $0x474] sm:$0xf0]  ;;  %v19242_v19 = vld [vmem:[#allocation6 + $0x19c] sm:$0xf] }
 0x16c   : > { %v2420_v43 = vmul.f32 1.4142135, %v2412_v37  ;;  %v2017_v44 = vpop.f32.mrf.mxu2  ;;  %v2030_v45 = vpop.f32.mrf.mxu3  ;;  %v13349_v36 = vld [vmem:[#allocation6 + $0x658] sm:$0xf]  ;;  %v13094_v58 = vor.u32 %v19334_v41, %v13093_v40  ;;  %v19370_v29 = vld [vmem:[#allocation6 + $0x59c] sm:$0xf]  ;;  %v13002_v37 = vor.u32 %v19306_v26, %v12999_v27 }
 0x16d   : > { %v19398_v46 = vld [vmem:[#allocation6 + $0x674] sm:$0xf0]  ;;  %v2041_v47 = vpop.f32.mrf.mxu0  ;;  %v2054_v48 = vpop.f32.mrf.mxu1  ;;  %v12967_v40 = vld [vmem:[#allocation6 + $0x378] sm:$0xf0] }
 0x16e   : > { %2295 = vmatpush.bf16.msra.mxu0 %v12678_v59  ;;  %2308 = vmatpush.bf16.msra.mxu1 %v12934_v2  ;;  %v12549_v49 = vld [vmem:[#allocation6 + $0x18] sm:$0xf]  ;;  %2428 = vst [vmem:[#allocation2 + $0x30] sm:$0xff] %v2420_v43  ;;  %v13350_v1 = vor.u32 %v19398_v46, %v13349_v36  ;;  %v2042_v59 = vadd.f32 %v2041_v47, %v685_v42  ;;  %v19362_v44 = vld [vmem:[#allocation6 + $0x55c] sm:$0xf] }
 0x16f   : > { %2321 = vmatpush.bf16.msra.mxu2 %v13190_v62  ;;  %2334 = vmatpush.bf16.msra.mxu3 %v13446_v63  ;;  %v19198_v50 = vld [vmem:[#allocation6 + $0x34] sm:$0xf0]  ;;  %v19250_v62 = vld [vmem:[#allocation6 + $0x1dc] sm:$0xf]  ;;  %v13258_v42 = vor.u32 %v19370_v29, %v13255_v30 }
 0x170   : > { %v12805_v53 = vld [vmem:[#allocation6 + $0x218] sm:$0xf]  ;;  %v12775_v63 = vld [vmem:[#allocation6 + $0x1f8] sm:$0xf0]  ;;  %v12550_v7 = vor.u32 %v19198_v50, %v12549_v49  ;;  %v2055_v12 = vadd.f32 %v2054_v48, %v2042_v59  ;;  %v686_v48 = vperm.slane %v21402_v28, 2 }
 0x171   : > { %v19262_v0 = vld [vmem:[#allocation6 + $0x234] sm:$0xf0]  ;;  %v13223_v45 = vld [vmem:[#allocation6 + $0x578] sm:$0xf0] }
 0x172   : > { %2296 = vmatpush.bf16.msra.mxu0 %v12646_v15  ;;  %2309 = vmatpush.bf16.msra.mxu1 %v12902_v16  ;;  %v13061_v2 = vld [vmem:[#allocation6 + $0x418] sm:$0xf]  ;;  %v12806_v8 = vor.u32 %v19262_v0, %v12805_v53  ;;  %v12778_v15 = vor.u32 %v19250_v62, %v12775_v63  ;;  %v13034_v16 = vor.u32 %v19314_v4, %v13031_v5  ;;  %v19426_v36 = vld [vmem:[#allocation6 + $0x75c] sm:$0xf] }
 0x173   : > { %2322 = vmatpush.bf16.msra.mxu2 %v13158_v20  ;;  %2335 = vmatpush.bf16.msra.mxu3 %v13414_v21  ;;  %v19326_v60 = vld [vmem:[#allocation6 + $0x434] sm:$0xf0]  ;;  %v12743_v20 = vld [vmem:[#allocation6 + $0x1b8] sm:$0xf0]  ;;  %v13290_v21 = vor.u32 %v19378_v6, %v13287_v9  ;;  %v13226_v59 = vor.u32 %v19362_v44, %v13223_v45 }
 0x174   : > { %v13317_v3 = vld [vmem:[#allocation6 + $0x618] sm:$0xf]  ;;  %v13062_v13 = vor.u32 %v19326_v60, %v13061_v2  ;;  %v2067_v17 = vpop.f32.mrf.mxu2  ;;  %v2080_v18 = vpop.f32.mrf.mxu3  ;;  %v12746_v35 = vor.u32 %v19242_v19, %v12743_v20  ;;  %v13479_v46 = vld [vmem:[#allocation6 + $0x778] sm:$0xf0] }
 0x175   : > { %v19390_v61 = vld [vmem:[#allocation6 + $0x634] sm:$0xf0]  ;;  %v2068_v23 = vadd.f32 %v2067_v17, %v2055_v12  ;;  %v2043_v24 = vpop.f32.mrf.mxu0  ;;  %v2056_v25 = vpop.f32.mrf.mxu1  ;;  %v19226_v49 = vld [vmem:[#allocation6 + $0x11c] sm:$0xf]  ;;  %v13482_v2 = vor.u32 %v19426_v36, %v13479_v46 }
 0x176   : > { %2297 = vmatpush.bf16.msra.mxu0 %v12614_v31  ;;  %2310 = vmatpush.bf16.msra.mxu1 %v12870_v32  ;;  %v13318_v14 = vor.u32 %v19390_v61, %v13317_v3  ;;  %v19434_v31 = vld [vmem:[#allocation6 + $0x79c] sm:$0xf] }
 0x177   : > { %2323 = vmatpush.bf16.msra.mxu2 %v13126_v38  ;;  %2336 = vmatpush.bf16.msra.mxu3 %v13382_v39  ;;  %v13511_v32 = vld [vmem:[#allocation6 + $0x7b8] sm:$0xf0]  ;;  %v2081_v33 = vadd.f32 %v2080_v18, %v2068_v23 }
 0x178   : > { %v12711_v38 = vld [vmem:[#allocation6 + $0x178] sm:$0xf0]  ;;  %v13514_v43 = vor.u32 %v19434_v31, %v13511_v32 }
 0x179   : > { %v19298_v39 = vld [vmem:[#allocation6 + $0x35c] sm:$0xf]  ;;  %vm2397_vm5 = vcmp.ge.f32.partialorder %v2081_v33, 0.0  ;;  %v2405_v41 = vmul.f32 0.2, %v2081_v33 }
 0x17a   : > { %2298 = vmatpush.bf16.msra.mxu0 %v12582_v51  ;;  %2311 = vmatpush.bf16.msra.mxu1 %v12838_v52  ;;  %v12714_v51 = vor.u32 %v19234_v34, %v12711_v38  ;;  %v12970_v52 = vor.u32 %v19298_v39, %v12967_v40  ;;  %v12935_v60 = vld [vmem:[#allocation6 + $0x338] sm:$0xf0] }
 0x17b   : > { %2324 = vmatpush.bf16.msra.mxu2 %v13094_v58  ;;  %2337 = vmatpush.bf16.msra.mxu3 %v13350_v1  ;;  %v2413_v47 = vsel %vm2397_vm5, %v2081_v33, %v2405_v41  ;;  %v12679_v58 = vld [vmem:[#allocation6 + $0x138] sm:$0xf0] }
 0x17c   : > { %v2421_v50 = vmul.f32 1.4142135, %v2413_v47  ;;  %v2069_v53 = vpop.f32.mrf.mxu2  ;;  %v2082_v0 = vpop.f32.mrf.mxu3  ;;  %v19290_v1 = vld [vmem:[#allocation6 + $0x31c] sm:$0xf]  ;;  %v12682_v6 = vor.u32 %v19226_v49, %v12679_v58 }
 0x17d   : > { %v19354_v3 = vld [vmem:[#allocation6 + $0x51c] sm:$0xf] }
 0x17e   : > { %2299 = vmatpush.bf16.msra.mxu0 %v12550_v7  ;;  %2312 = vmatpush.bf16.msra.mxu1 %v12806_v8  ;;  %v13191_v61 = vld [vmem:[#allocation6 + $0x538] sm:$0xf0]  ;;  %2429 = vst [vmem:[#allocation2] sm:$0xff] %v2421_v50  ;;  %v2093_v4 = vpop.f32.mrf.mxu0  ;;  %v2106_v5 = vpop.f32.mrf.mxu1  ;;  %v12938_v7 = vor.u32 %v19290_v1, %v12935_v60 }
 0x17f   : > { %2325 = vmatpush.bf16.msra.mxu2 %v13062_v13  ;;  %2338 = vmatpush.bf16.msra.mxu3 %v13318_v14  ;;  %v19418_v62 = vld [vmem:[#allocation6 + $0x71c] sm:$0xf]  ;;  %v2094_v10 = vadd.f32 %v2093_v4, %v686_v48  ;;  %v13194_v11 = vor.u32 %v19354_v3, %v13191_v61 }
 0x180   : > { %v13447_v63 = vld [vmem:[#allocation6 + $0x738] sm:$0xf0] }
 0x181   : > { %2300 = vmatmul.bf16.vlgmr.msra.gmra.mxu0 %v21374_v54  ;;  %2313 = vmatmul.bf16.vlgmr.msra.gmra.mxu1 %v21376_v55  ;;  %v19218_v8 = vld [vmem:[#allocation6 + $0xdc] sm:$0xf]  ;;  %v13450_v12 = vor.u32 %v19418_v62, %v13447_v63  ;;  %v2107_v23 = vadd.f32 %v2106_v5, %v2094_v10 }
 0x182   : > { %2344 = vmatpush.bf16.msrb.mxu0 %v12778_v15  ;;  %2357 = vmatpush.bf16.msrb.mxu1 %v13034_v16  ;;  %v12647_v9 = vld [vmem:[#allocation6 + $0xf8] sm:$0xf0] }
 0x183   : > { %2370 = vmatpush.bf16.msrb.mxu2 %v13290_v21  ;;  %2383 = vmatpush.bf16.msrb.mxu3 %v13546_v22  ;;  %v19282_v13 = vld [vmem:[#allocation6 + $0x2dc] sm:$0xf]  ;;  %v12650_v19 = vor.u32 %v19218_v8, %v12647_v9 }
 0x184   : > { %2326 = vmatmul.bf16.vlgmr.msra.gmra.mxu2 %v21378_v56  ;;  %2339 = vmatmul.bf16.vlgmr.msra.gmra.mxu3 %v21380_v57  ;;  %v12903_v14 = vld [vmem:[#allocation6 + $0x2f8] sm:$0xf0] }
 0x185   : > { %v19346_v15 = vld [vmem:[#allocation6 + $0x4dc] sm:$0xf]  ;;  %v12906_v20 = vor.u32 %v19282_v13, %v12903_v14 }
 0x186   : > { %2345 = vmatpush.bf16.msrb.mxu0 %v12746_v35  ;;  %2358 = vmatpush.bf16.msrb.mxu1 %v13002_v37  ;;  %v13159_v16 = vld [vmem:[#allocation6 + $0x4f8] sm:$0xf0]  ;;  %v2095_v37 = vpop.f32.mrf.mxu0  ;;  %v2108_v38 = vpop.f32.mrf.mxu1 }
 0x187   : > { %2371 = vmatpush.bf16.msrb.mxu2 %v13258_v42  ;;  %2384 = vmatpush.bf16.msrb.mxu3 %v13514_v43  ;;  %v19410_v17 = vld [vmem:[#allocation6 + $0x6dc] sm:$0xf]  ;;  %v13162_v24 = vor.u32 %v19346_v15, %v13159_v16  ;;  %v2119_v30 = vpop.f32.mrf.mxu2  ;;  %v2132_v31 = vpop.f32.mrf.mxu3 }
 0x188   : > { %v13415_v18 = vld [vmem:[#allocation6 + $0x6f8] sm:$0xf0]  ;;  %v2120_v35 = vadd.f32 %v2119_v30, %v2107_v23 }
 0x189   : > { %v19210_v21 = vld [vmem:[#allocation6 + $0x9c] sm:$0xf]  ;;  %v13418_v25 = vor.u32 %v19410_v17, %v13415_v18 }
 0x18a   : > { %2346 = vmatpush.bf16.msrb.mxu0 %v12714_v51  ;;  %2359 = vmatpush.bf16.msrb.mxu1 %v12970_v52  ;;  %v12615_v22 = vld [vmem:[#allocation6 + $0xb8] sm:$0xf0]  ;;  %v2133_v43 = vadd.f32 %v2132_v31, %v2120_v35 }
 0x18b   : > { %2372 = vmatpush.bf16.msrb.mxu2 %v13226_v59  ;;  %2385 = vmatpush.bf16.msrb.mxu3 %v13482_v2  ;;  %v19274_v26 = vld [vmem:[#allocation6 + $0x29c] sm:$0xf]  ;;  %v12618_v39 = vor.u32 %v19210_v21, %v12615_v22 }
 0x18c   : > { %v12871_v27 = vld [vmem:[#allocation6 + $0x2b8] sm:$0xf0]  ;;  %vm2398_vm6 = vcmp.ge.f32.partialorder %v2133_v43, 0.0  ;;  %v2406_v51 = vmul.f32 0.2, %v2133_v43 }
 0x18d   : > { %v19338_v29 = vld [vmem:[#allocation6 + $0x49c] sm:$0xf]  ;;  %v12874_v40 = vor.u32 %v19274_v26, %v12871_v27 }
 0x18e   : > { %2347 = vmatpush.bf16.msrb.mxu0 %v12682_v6  ;;  %2360 = vmatpush.bf16.msrb.mxu1 %v12938_v7  ;;  %v13127_v32 = vld [vmem:[#allocation6 + $0x4b8] sm:$0xf0]  ;;  %v2414_v59 = vsel %vm2398_vm6, %v2133_v43, %v2406_v51 }
 0x18f   : > { %2373 = vmatpush.bf16.msrb.mxu2 %v13194_v11  ;;  %2386 = vmatpush.bf16.msrb.mxu3 %v13450_v12  ;;  %v19402_v33 = vld [vmem:[#allocation6 + $0x69c] sm:$0xf]  ;;  %v13130_v44 = vor.u32 %v19338_v29, %v13127_v32  ;;  %v2422_v63 = vmul.f32 1.4142135, %v2414_v59  ;;  %v2121_v4 = vpop.f32.mrf.mxu2  ;;  %v2134_v5 = vpop.f32.mrf.mxu3  ;;  %v687_v12 = vperm.slane %v21402_v28, 3  ;;  %v690_v59 = vperm.slane %v21402_v28, 6 }
 0x190   : > { %v13383_v34 = vld [vmem:[#allocation6 + $0x6b8] sm:$0xf0] }
 0x191   : > { %v19202_v41 = vld [vmem:[#allocation6 + $0x5c] sm:$0xf]  ;;  %v13386_v45 = vor.u32 %v19402_v33, %v13383_v34  ;;  %2430 = vst [vmem:[#allocation2 + $0x18] sm:$0xff] %v2422_v63 }
 0x192   : > { %2348 = vmatpush.bf16.msrb.mxu0 %v12650_v19  ;;  %2361 = vmatpush.bf16.msrb.mxu1 %v12906_v20  ;;  %v12583_v42 = vld [vmem:[#allocation6 + $0x78] sm:$0xf0] }
 0x193   : > { %2374 = vmatpush.bf16.msrb.mxu2 %v13162_v24  ;;  %2387 = vmatpush.bf16.msrb.mxu3 %v13418_v25  ;;  %v19266_v36 = vld [vmem:[#allocation6 + $0x25c] sm:$0xf]  ;;  %v12586_v52 = vor.u32 %v19202_v41, %v12583_v42  ;;  %v689_v42 = vperm.slane %v21402_v28, 5 }
 0x194   : > { %v12839_v46 = vld [vmem:[#allocation6 + $0x278] sm:$0xf0] }
 0x195   : > { %v19330_v47 = vld [vmem:[#allocation6 + $0x45c] sm:$0xf]  ;;  %v12842_v53 = vor.u32 %v19266_v36, %v12839_v46 }
 0x196   : > { %v13095_v48 = vld [vmem:[#allocation6 + $0x478] sm:$0xf0]  ;;  %2349 = vmatpush.bf16.msrb.mxu0 %v12618_v39  ;;  %2362 = vmatpush.bf16.msrb.mxu1 %v12874_v40 }
 0x197   : > { %v19394_v49 = vld [vmem:[#allocation6 + $0x65c] sm:$0xf]  ;;  %2375 = vmatpush.bf16.msrb.mxu2 %v13130_v44  ;;  %2388 = vmatpush.bf16.msrb.mxu3 %v13386_v45  ;;  %v13098_v2 = vor.u32 %v19330_v47, %v13095_v48 }
 0x198   : > { %v13351_v50 = vld [vmem:[#allocation6 + $0x678] sm:$0xf0] }
 0x199   : > { %v19194_v0 = vld [vmem:[#allocation6 + $0x1c] sm:$0xf]  ;;  %v13354_v60 = vor.u32 %v19394_v49, %v13351_v50 }
 0x19a   : > { %v12551_v58 = vld [vmem:[#allocation6 + $0x38] sm:$0xf0]  ;;  %2350 = vmatpush.bf16.msrb.mxu0 %v12586_v52  ;;  %2363 = vmatpush.bf16.msrb.mxu1 %v12842_v53 }
 0x19b   : > { %v19258_v1 = vld [vmem:[#allocation6 + $0x21c] sm:$0xf]  ;;  %v12554_v8 = vor.u32 %v19194_v0, %v12551_v58  ;;  %2376 = vmatpush.bf16.msrb.mxu2 %v13098_v2  ;;  %2389 = vmatpush.bf16.msrb.mxu3 %v13354_v60 }
 0x19c   : > { %v12807_v3 = vld [vmem:[#allocation6 + $0x238] sm:$0xf0] }
 0x19d   : > { %v19322_v61 = vld [vmem:[#allocation6 + $0x41c] sm:$0xf]  ;;  %v12810_v9 = vor.u32 %v19258_v1, %v12807_v3 }
 0x19e   : > { %v13063_v62 = vld [vmem:[#allocation6 + $0x438] sm:$0xf0]  ;;  %2351 = vmatpush.bf16.msrb.mxu0 %v12554_v8  ;;  %v2145_v13 = vpop.f32.mrf.mxu0  ;;  %v2158_v14 = vpop.f32.mrf.mxu1 }
 0x19f   : > { %v19386_v6 = vld [vmem:[#allocation6 + $0x61c] sm:$0xf]  ;;  %v13066_v10 = vor.u32 %v19322_v61, %v13063_v62  ;;  %2364 = vmatpush.bf16.msrb.mxu1 %v12810_v9  ;;  %v2146_v15 = vadd.f32 %v2145_v13, %v687_v12  ;;  %v691_v13 = vperm.slane %v21402_v28, 7 }
 0x1a0   : > { %v13319_v7 = vld [vmem:[#allocation6 + $0x638] sm:$0xf0] }
 0x1a1   : > { %v13322_v11 = vor.u32 %v19386_v6, %v13319_v7  ;;  %2377 = vmatpush.bf16.msrb.mxu2 %v13066_v10  ;;  %2352 = vmatmul.bf16.vlgmr.msrb.gmra.mxu0 %v21374_v54  ;;  %v2159_v16 = vadd.f32 %v2158_v14, %v2146_v15 }
 0x1a2   : > { %2365 = vmatmul.bf16.vlgmr.msrb.gmra.mxu1 %v21376_v55 }
 0x1a3   : > { %2390 = vmatpush.bf16.msrb.mxu3 %v13322_v11 }
 0x1a4   : > { %2378 = vmatmul.bf16.vlgmr.msrb.gmra.mxu2 %v21378_v56 }
 0x1a6   : > { %2391 = vmatmul.bf16.vlgmr.msrb.gmra.mxu3 %v21380_v57  ;;  %v2147_v20 = vpop.f32.mrf.mxu0  ;;  %v2160_v21 = vpop.f32.mrf.mxu1  ;;  %v688_v57 = vperm.slane %v21402_v28, 4 }
 0x1a7   : > { %v2171_v17 = vpop.f32.mrf.mxu2  ;;  %v2184_v18 = vpop.f32.mrf.mxu3 }
 0x1a8   : > { %v2172_v19 = vadd.f32 %v2171_v17, %v2159_v16 }
 0x1aa   : > { %v2185_v22 = vadd.f32 %v2184_v18, %v2172_v19 }
 0x1ac   : > { %vm2399_vm7 = vcmp.ge.f32.partialorder %v2185_v22, 0.0  ;;  %v2407_v54 = vmul.f32 0.2, %v2185_v22 }
 0x1ae   : > { %v2415_v23 = vsel %vm2399_vm7, %v2185_v22, %v2407_v54 }
 0x1af   : > { %v2423_v55 = vmul.f32 1.4142135, %v2415_v23  ;;  %v2173_v24 = vpop.f32.mrf.mxu2  ;;  %v2186_v56 = vpop.f32.mrf.mxu3 }
 0x1b1   : > { %2431 = vst [vmem:[#allocation2 + $0x10] sm:$0xff] %v2423_v55 }
 0x1be   : > { %v2197_v25 = vpop.f32.mrf.mxu0  ;;  %v2210_v26 = vpop.f32.mrf.mxu1 }
 0x1bf   : > { %v2198_v27 = vadd.f32 %v2197_v25, %v688_v57 }
 0x1c1   : > { %v2211_v29 = vadd.f32 %v2210_v26, %v2198_v27 }
 0x1c6   : > { %v2199_v33 = vpop.f32.mrf.mxu0  ;;  %v2212_v34 = vpop.f32.mrf.mxu1 }
 0x1c7   : > { %v2223_v30 = vpop.f32.mrf.mxu2  ;;  %v2236_v31 = vpop.f32.mrf.mxu3 }
 0x1c8   : > { %v2224_v32 = vadd.f32 %v2223_v30, %v2211_v29 }
 0x1ca   : > { %v2237_v35 = vadd.f32 %v2236_v31, %v2224_v32 }
 0x1cc   : > { %vm2400_vm8 = vcmp.ge.f32.partialorder %v2237_v35, 0.0  ;;  %v2408_v37 = vmul.f32 0.2, %v2237_v35 }
 0x1ce   : > { %v2416_v38 = vsel %vm2400_vm8, %v2237_v35, %v2408_v37 }
 0x1cf   : > { %v2424_v39 = vmul.f32 1.4142135, %v2416_v38  ;;  %v2225_v40 = vpop.f32.mrf.mxu2  ;;  %v2238_v41 = vpop.f32.mrf.mxu3 }
 0x1d1   : > { %2432 = vst [vmem:[#allocation2 + $0x8] sm:$0xff] %v2424_v39 }
 0x1de   : > { %v2249_v43 = vpop.f32.mrf.mxu0  ;;  %v2262_v44 = vpop.f32.mrf.mxu1 }
 0x1df   : > { %v2250_v45 = vadd.f32 %v2249_v43, %v689_v42 }
 0x1e1   : > { %v2263_v36 = vadd.f32 %v2262_v44, %v2250_v45 }
 0x1e6   : > { %v2251_v49 = vpop.f32.mrf.mxu0  ;;  %v2264_v50 = vpop.f32.mrf.mxu1 }
 0x1e7   : > { %v2275_v46 = vpop.f32.mrf.mxu2  ;;  %v2288_v47 = vpop.f32.mrf.mxu3 }
 0x1e8   : > { %v2276_v48 = vadd.f32 %v2275_v46, %v2263_v36 }
 0x1ea   : > { %v2289_v51 = vadd.f32 %v2288_v47, %v2276_v48 }
 0x1ec   : > { %vm2401_vm9 = vcmp.ge.f32.partialorder %v2289_v51, 0.0  ;;  %v2409_v52 = vmul.f32 0.2, %v2289_v51 }
 0x1ee   : > { %v2417_v53 = vsel %vm2401_vm9, %v2289_v51, %v2409_v52 }
 0x1ef   : > { %v2425_v0 = vmul.f32 1.4142135, %v2417_v53  ;;  %v2277_v58 = vpop.f32.mrf.mxu2  ;;  %v2290_v1 = vpop.f32.mrf.mxu3 }
 0x1f1   : > { %2433 = vst [vmem:[#allocation2 + $0x20] sm:$0xff] %v2425_v0 }
 0x1fe   : > { %v2301_v2 = vpop.f32.mrf.mxu0  ;;  %v2314_v60 = vpop.f32.mrf.mxu1 }
 0x1ff   : > { %v2302_v3 = vadd.f32 %v2301_v2, %v690_v59 }
 0x201   : > { %v2315_v61 = vadd.f32 %v2314_v60, %v2302_v3 }
 0x206   : > { %v2303_v5 = vpop.f32.mrf.mxu0  ;;  %v2316_v6 = vpop.f32.mrf.mxu1 }
 0x207   : > { %v2327_v62 = vpop.f32.mrf.mxu2  ;;  %v2340_v63 = vpop.f32.mrf.mxu3 }
 0x208   : > { %v2328_v4 = vadd.f32 %v2327_v62, %v2315_v61 }
 0x20a   : > { %v2341_v7 = vadd.f32 %v2340_v63, %v2328_v4 }
 0x20c   : > { %vm2402_vm10 = vcmp.ge.f32.partialorder %v2341_v7, 0.0  ;;  %v2410_v8 = vmul.f32 0.2, %v2341_v7 }
 0x20e   : > { %v2418_v9 = vsel %vm2402_vm10, %v2341_v7, %v2410_v8 }
 0x20f   : > { %v2426_v10 = vmul.f32 1.4142135, %v2418_v9  ;;  %v2329_v11 = vpop.f32.mrf.mxu2  ;;  %v2342_v12 = vpop.f32.mrf.mxu3 }
 0x211   : > { %2434 = vst [vmem:[#allocation2 + $0x28] sm:$0xff] %v2426_v10 }
 0x21e   : > { %v2353_v14 = vpop.f32.mrf.mxu0 }
 0x21f   : > { %v2366_v15 = vpop.f32.mrf.mxu1  ;;  %v2354_v16 = vadd.f32 %v2353_v14, %v691_v13 }
 0x221   : > { %v2367_v17 = vadd.f32 %v2366_v15, %v2354_v16 }
 0x226   : > { %v2355_v21 = vpop.f32.mrf.mxu0 }
 0x227   : > { %v2379_v18 = vpop.f32.mrf.mxu2  ;;  %v2368_v22 = vpop.f32.mrf.mxu1 }
 0x228   : > { %v2380_v20 = vadd.f32 %v2379_v18, %v2367_v17 }
 0x229   : > { %v2392_v19 = vpop.f32.mrf.mxu3 }
 0x22a   : > { %v2393_v54 = vadd.f32 %v2392_v19, %v2380_v20 }
 0x22c   : > { %vm2403_vm11 = vcmp.ge.f32.partialorder %v2393_v54, 0.0  ;;  %v2411_v23 = vmul.f32 0.2, %v2393_v54 }
 0x22e   : > { %v2419_v55 = vsel %vm2403_vm11, %v2393_v54, %v2411_v23 }
 0x22f   : > { %v2427_v24 = vmul.f32 1.4142135, %v2419_v55  ;;  %v2381_v56 = vpop.f32.mrf.mxu2 }
 0x231   : > { %v2394_v57 = vpop.f32.mrf.mxu3  ;;  %2435 = vst [vmem:[#allocation2 + $0x38] sm:$0xff] %v2427_v24 }
 0x232 PF: > { %v13775_v28 = vld [vmem:[%s21331_s10 + $0x1c0] sm:$0xf]  ;;  %s19959_s20 = sshll.u32 %s21225_s8, 4  ;;  %p18160_p1 = scmp.ne.s32.totalorder %s21225_s8, 3 }
 0x233   : > { %v19507_v25 = vld [vmem:[%s21331_s10 + $0x1dc] sm:$0xf0]  ;;  %s21813_s12 = scalar_lea.vmem [#allocation11], %s19959_s20 }
 0x234   : > { %v14031_v26 = vld [vmem:[%s21331_s10 + $0x3c0] sm:$0xf]  ;;  %v13776_v27 = vor.u32 %v19507_v25, %v13775_v28 }
 0x235   : > { %v19571_v29 = vld [vmem:[%s21331_s10 + $0x3dc] sm:$0xf0] }
 0x236   : > { %v14287_v30 = vld [vmem:[%s21331_s10 + $0x5c0] sm:$0xf]  ;;  %v14032_v32 = vor.u32 %v19571_v29, %v14031_v26  ;;  %5545 = vmatpush.bf16.msra.mxu0 %v13776_v27 }
 0x237   : > { %v19635_v31 = vld [vmem:[%s21331_s10 + $0x5dc] sm:$0xf0] }
 0x238   : > { %v14288_v33 = vor.u32 %v19635_v31, %v14287_v30  ;;  %v14543_v34 = vld [vmem:[%s21331_s10 + $0x7c0] sm:$0xf]  ;;  %5558 = vmatpush.bf16.msra.mxu1 %v14032_v32 }
 0x239   : > { %v19699_v35 = vld [vmem:[%s21331_s10 + $0x7dc] sm:$0xf0] }
 0x23a   : > { %v13743_v37 = vld [vmem:[%s21331_s10 + $0x180] sm:$0xf]  ;;  %v14544_v38 = vor.u32 %v19699_v35, %v14543_v34  ;;  %5571 = vmatpush.bf16.msra.mxu2 %v14288_v33 }
 0x23b   : > { %v19499_v39 = vld [vmem:[%s21331_s10 + $0x19c] sm:$0xf0] }
 0x23c   : > { %v13999_v40 = vld [vmem:[%s21331_s10 + $0x380] sm:$0xf]  ;;  %v13744_v42 = vor.u32 %v19499_v39, %v13743_v37  ;;  %5584 = vmatpush.bf16.msra.mxu3 %v14544_v38 }
 0x23d   : > { %v19563_v41 = vld [vmem:[%s21331_s10 + $0x39c] sm:$0xf0] }
 0x23e   : > { %v14000_v43 = vor.u32 %v19563_v41, %v13999_v40  ;;  %v14255_v44 = vld [vmem:[%s21331_s10 + $0x580] sm:$0xf]  ;;  %5546 = vmatpush.bf16.msra.mxu0 %v13744_v42 }
 0x23f   : > { %v19627_v45 = vld [vmem:[%s21331_s10 + $0x59c] sm:$0xf0] }
 0x240   : > { %v14511_v36 = vld [vmem:[%s21331_s10 + $0x780] sm:$0xf]  ;;  %v14256_v46 = vor.u32 %v19627_v45, %v14255_v44  ;;  %5559 = vmatpush.bf16.msra.mxu1 %v14000_v43 }
 0x241   : > { %v19691_v47 = vld [vmem:[%s21331_s10 + $0x79c] sm:$0xf0] }
 0x242   : > { %v13711_v48 = vld [vmem:[%s21331_s10 + $0x140] sm:$0xf]  ;;  %v14512_v50 = vor.u32 %v19691_v47, %v14511_v36  ;;  %5572 = vmatpush.bf16.msra.mxu2 %v14256_v46 }
 0x243   : > { %v19491_v49 = vld [vmem:[%s21331_s10 + $0x15c] sm:$0xf0] }
 0x244   : > { %v13967_v51 = vld [vmem:[%s21331_s10 + $0x340] sm:$0xf]  ;;  %v13712_v0 = vor.u32 %v19491_v49, %v13711_v48  ;;  %5585 = vmatpush.bf16.msra.mxu3 %v14512_v50 }
 0x245   : > { %v19555_v52 = vld [vmem:[%s21331_s10 + $0x35c] sm:$0xf0] }
 0x246   : > { %v14223_v53 = vld [vmem:[%s21331_s10 + $0x540] sm:$0xf]  ;;  %v13968_v2 = vor.u32 %v19555_v52, %v13967_v51  ;;  %5547 = vmatpush.bf16.msra.mxu0 %v13712_v0 }
 0x247   : > { %v19619_v58 = vld [vmem:[%s21331_s10 + $0x55c] sm:$0xf0] }
 0x248   : > { %v14479_v1 = vld [vmem:[%s21331_s10 + $0x740] sm:$0xf]  ;;  %v14224_v60 = vor.u32 %v19619_v58, %v14223_v53  ;;  %5560 = vmatpush.bf16.msra.mxu1 %v13968_v2 }
 0x249   : > { %v19683_v59 = vld [vmem:[%s21331_s10 + $0x75c] sm:$0xf0] }
 0x24a   : > { %v13679_v3 = vld [vmem:[%s21331_s10 + $0x100] sm:$0xf]  ;;  %v14480_v63 = vor.u32 %v19683_v59, %v14479_v1  ;;  %5573 = vmatpush.bf16.msra.mxu2 %v14224_v60 }
 0x24b   : > { %v19483_v61 = vld [vmem:[%s21331_s10 + $0x11c] sm:$0xf0] }
 0x24c   : > { %v13935_v62 = vld [vmem:[%s21331_s10 + $0x300] sm:$0xf]  ;;  %v13680_v9 = vor.u32 %v19483_v61, %v13679_v3  ;;  %5586 = vmatpush.bf16.msra.mxu3 %v14480_v63 }
 0x24d   : > { %v19547_v4 = vld [vmem:[%s21331_s10 + $0x31c] sm:$0xf0] }
 0x24e   : > { %v14191_v5 = vld [vmem:[%s21331_s10 + $0x500] sm:$0xf]  ;;  %v13936_v10 = vor.u32 %v19547_v4, %v13935_v62  ;;  %5548 = vmatpush.bf16.msra.mxu0 %v13680_v9 }
 0x24f   : > { %v19611_v6 = vld [vmem:[%s21331_s10 + $0x51c] sm:$0xf0] }
 0x250   : > { %v14447_v7 = vld [vmem:[%s21331_s10 + $0x700] sm:$0xf]  ;;  %v14192_v11 = vor.u32 %v19611_v6, %v14191_v5  ;;  %5561 = vmatpush.bf16.msra.mxu1 %v13936_v10 }
 0x251   : > { %v19675_v8 = vld [vmem:[%s21331_s10 + $0x71c] sm:$0xf0] }
 0x252   : > { %v13647_v12 = vld [vmem:[%s21331_s10 + $0xc0] sm:$0xf]  ;;  %v14448_v15 = vor.u32 %v19675_v8, %v14447_v7  ;;  %5574 = vmatpush.bf16.msra.mxu2 %v14192_v11 }
 0x253   : > { %v19475_v13 = vld [vmem:[%s21331_s10 + $0xdc] sm:$0xf0] }
 0x254   : > { %v13903_v14 = vld [vmem:[%s21331_s10 + $0x2c0] sm:$0xf]  ;;  %v13648_v21 = vor.u32 %v19475_v13, %v13647_v12  ;;  %5587 = vmatpush.bf16.msra.mxu3 %v14448_v15 }
 0x255   : > { %v19539_v16 = vld [vmem:[%s21331_s10 + $0x2dc] sm:$0xf0] }
 0x256   : > { %v14159_v17 = vld [vmem:[%s21331_s10 + $0x4c0] sm:$0xf]  ;;  %v13904_v22 = vor.u32 %v19539_v16, %v13903_v14  ;;  %5549 = vmatpush.bf16.msra.mxu0 %v13648_v21 }
 0x257   : > { %v19603_v18 = vld [vmem:[%s21331_s10 + $0x4dc] sm:$0xf0] }
 0x258   : > { %v14415_v19 = vld [vmem:[%s21331_s10 + $0x6c0] sm:$0xf]  ;;  %v14160_v54 = vor.u32 %v19603_v18, %v14159_v17  ;;  %5562 = vmatpush.bf16.msra.mxu1 %v13904_v22 }
 0x259   : > { %v19667_v20 = vld [vmem:[%s21331_s10 + $0x6dc] sm:$0xf0] }
 0x25a   : > { %v13615_v23 = vld [vmem:[%s21331_s10 + $0x80] sm:$0xf]  ;;  %v14416_v56 = vor.u32 %v19667_v20, %v14415_v19  ;;  %5575 = vmatpush.bf16.msra.mxu2 %v14160_v54  ;;  %v2438_v54 = vld [vmem:[#allocation2 + $0x18] sm:$0xff] }
 0x25b   : > { %v19467_v55 = vld [vmem:[%s21331_s10 + $0x9c] sm:$0xf0] }
 0x25c   : > { %v13871_v24 = vld [vmem:[%s21331_s10 + $0x280] sm:$0xf]  ;;  %v13616_v29 = vor.u32 %v19467_v55, %v13615_v23  ;;  %5588 = vmatpush.bf16.msra.mxu3 %v14416_v56 }
 0x25d   : > { %v19531_v57 = vld [vmem:[%s21331_s10 + $0x29c] sm:$0xf0] }
 0x25e   : > { %v14127_v28 = vld [vmem:[%s21331_s10 + $0x480] sm:$0xf]  ;;  %v13872_v30 = vor.u32 %v19531_v57, %v13871_v24  ;;  %5550 = vmatpush.bf16.msra.mxu0 %v13616_v29  ;;  %v21510_v57 = vpack.c.bf16 %v2438_v54, %v2438_v54 }
 0x25f   : > { %v19595_v25 = vld [vmem:[%s21331_s10 + $0x49c] sm:$0xf0] }
 0x260   : > { %v14383_v26 = vld [vmem:[%s21331_s10 + $0x680] sm:$0xf]  ;;  %v14128_v31 = vor.u32 %v19595_v25, %v14127_v28  ;;  %5563 = vmatpush.bf16.msra.mxu1 %v13872_v30  ;;  %v2436_v30 = vld [vmem:[#allocation2 + $0x30] sm:$0xff] }
 0x261   : > { %v19659_v27 = vld [vmem:[%s21331_s10 + $0x69c] sm:$0xf0] }
 0x262   : > { %v13583_v32 = vld [vmem:[%s21331_s10 + $0x40] sm:$0xf]  ;;  %v14384_v35 = vor.u32 %v19659_v27, %v14383_v26  ;;  %5576 = vmatpush.bf16.msra.mxu2 %v14128_v31 }
 0x263   : > { %v19459_v33 = vld [vmem:[%s21331_s10 + $0x5c] sm:$0xf0] }
 0x264   : > { %v13839_v34 = vld [vmem:[%s21331_s10 + $0x240] sm:$0xf]  ;;  %v13584_v42 = vor.u32 %v19459_v33, %v13583_v32  ;;  %5589 = vmatpush.bf16.msra.mxu3 %v14384_v35  ;;  %v2439_v35 = vld [vmem:[#allocation2 + $0x10] sm:$0xff] }
 0x265   : > { %v19523_v37 = vld [vmem:[%s21331_s10 + $0x25c] sm:$0xf0] }
 0x266   : > { %v14095_v38 = vld [vmem:[%s21331_s10 + $0x440] sm:$0xf]  ;;  %v13840_v45 = vor.u32 %v19523_v37, %v13839_v34  ;;  %5551 = vmatpush.bf16.msra.mxu0 %v13584_v42  ;;  %v21518_v34 = vpack.c.bf16 %v2436_v30, %v2436_v30  ;;  %v2437_v37 = vld [vmem:[#allocation2] sm:$0xff]  ;;  %v21523_v42 = vpack.c.bf16 %v2439_v35, %v2439_v35  ;;  %v19503_v30 = vld [vmem:[%s21331_s10 + $0x1c4] sm:$0xf] }
 0x267   : > { %v19587_v39 = vld [vmem:[%s21331_s10 + $0x45c] sm:$0xf0]  ;;  %v14033_v35 = vld [vmem:[%s21331_s10 + $0x3e0] sm:$0xf0] }
 0x268   : > { %v14351_v40 = vld [vmem:[%s21331_s10 + $0x640] sm:$0xf]  ;;  %v14096_v36 = vor.u32 %v19587_v39, %v14095_v38  ;;  %5564 = vmatpush.bf16.msra.mxu1 %v13840_v45 }
 0x269   : > { %v19651_v41 = vld [vmem:[%s21331_s10 + $0x65c] sm:$0xf0] }
 0x26a   : > { %v13551_v43 = vld [vmem:[%s21331_s10] sm:$0xf]  ;;  %v14352_v49 = vor.u32 %v19651_v41, %v14351_v40  ;;  %5577 = vmatpush.bf16.msra.mxu2 %v14096_v36 }
 0x26b   : > { %v19451_v44 = vld [vmem:[%s21331_s10 + $0x1c] sm:$0xf0] }
 0x26c   : > { %v13807_v46 = vld [vmem:[%s21331_s10 + $0x200] sm:$0xf]  ;;  %v13552_v1 = vor.u32 %v19451_v44, %v13551_v43  ;;  %5590 = vmatpush.bf16.msra.mxu3 %v14352_v49  ;;  %v21525_v43 = vpack.c.bf16 %v2437_v37, %v2437_v37  ;;  %v19631_v37 = vld [vmem:[%s21331_s10 + $0x5c4] sm:$0xf] }
 0x26d   : > { %v19515_v47 = vld [vmem:[%s21331_s10 + $0x21c] sm:$0xf0] }
 0x26e   : > { %v14063_v48 = vld [vmem:[%s21331_s10 + $0x400] sm:$0xf]  ;;  %v13808_v3 = vor.u32 %v19515_v47, %v13807_v46  ;;  %5552 = vmatpush.bf16.msra.mxu0 %v13552_v1 }
 0x26f   : > { %v19579_v50 = vld [vmem:[%s21331_s10 + $0x41c] sm:$0xf0] }
 0x270   : > { %v14319_v51 = vld [vmem:[%s21331_s10 + $0x600] sm:$0xf]  ;;  %v14064_v61 = vor.u32 %v19579_v50, %v14063_v48  ;;  %5565 = vmatpush.bf16.msra.mxu1 %v13808_v3 }
 0x271   : > { %v19643_v52 = vld [vmem:[%s21331_s10 + $0x61c] sm:$0xf0]  ;;  %5553 = vmatmul.bf16.vlgmr.msra.gmra.mxu0 %v21518_v34 }
 0x272   : > { %v14799_v53 = vld [vmem:[%s21331_s10 + $0x9c0] sm:$0xf]  ;;  %v14320_v4 = vor.u32 %v19643_v52, %v14319_v51  ;;  %5578 = vmatpush.bf16.msra.mxu2 %v14064_v61 }
 0x273   : > { %v19763_v0 = vld [vmem:[%s21331_s10 + $0x9dc] sm:$0xf0]  ;;  %5566 = vmatmul.bf16.vlgmr.msra.gmra.mxu1 %v21525_v43 }
 0x274   : > { %v15055_v58 = vld [vmem:[%s21331_s10 + $0xbc0] sm:$0xf]  ;;  %v14800_v5 = vor.u32 %v19763_v0, %v14799_v53  ;;  %5591 = vmatpush.bf16.msra.mxu3 %v14320_v4 }
 0x275   : > { %v19827_v59 = vld [vmem:[%s21331_s10 + $0xbdc] sm:$0xf0]  ;;  %5579 = vmatmul.bf16.vlgmr.msra.gmra.mxu2 %v21510_v57 }
 0x276   : > { %v15311_v2 = vld [vmem:[%s21331_s10 + $0xdc0] sm:$0xf]  ;;  %v15056_v6 = vor.u32 %v19827_v59, %v15055_v58  ;;  %5597 = vmatpush.bf16.msrb.mxu0 %v14800_v5 }
 0x277   : > { %v19891_v60 = vld [vmem:[%s21331_s10 + $0xddc] sm:$0xf0]  ;;  %5592 = vmatmul.bf16.vlgmr.msra.gmra.mxu3 %v21523_v42 }
 0x278   : > { %v15567_v62 = vld [vmem:[%s21331_s10 + $0xfc0] sm:$0xf]  ;;  %v15312_v7 = vor.u32 %v19891_v60, %v15311_v2  ;;  %5610 = vmatpush.bf16.msrb.mxu1 %v15056_v6 }
 0x279   : > { %v19955_v63 = vld [vmem:[%s21331_s10 + $0xfdc] sm:$0xf0] }
 0x27a   : > { %v14767_v8 = vld [vmem:[%s21331_s10 + $0x980] sm:$0xf]  ;;  %v15568_v11 = vor.u32 %v19955_v63, %v15567_v62  ;;  %5623 = vmatpush.bf16.msrb.mxu2 %v15312_v7 }
 0x27b   : > { %v19755_v9 = vld [vmem:[%s21331_s10 + $0x99c] sm:$0xf0] }
 0x27c   : > { %v15023_v10 = vld [vmem:[%s21331_s10 + $0xb80] sm:$0xf]  ;;  %v14768_v17 = vor.u32 %v19755_v9, %v14767_v8  ;;  %5636 = vmatpush.bf16.msrb.mxu3 %v15568_v11 }
 0x27d   : > { %v19819_v12 = vld [vmem:[%s21331_s10 + $0xb9c] sm:$0xf0] }
 0x27e   : > { %v15279_v13 = vld [vmem:[%s21331_s10 + $0xd80] sm:$0xf]  ;;  %v15024_v19 = vor.u32 %v19819_v12, %v15023_v10  ;;  %5598 = vmatpush.bf16.msrb.mxu0 %v14768_v17 }
 0x27f   : > { %v19883_v14 = vld [vmem:[%s21331_s10 + $0xd9c] sm:$0xf0] }
 0x280   : > { %v15535_v15 = vld [vmem:[%s21331_s10 + $0xf80] sm:$0xf]  ;;  %v15280_v20 = vor.u32 %v19883_v14, %v15279_v13  ;;  %5611 = vmatpush.bf16.msrb.mxu1 %v15024_v19 }
 0x281   : > { %v19947_v16 = vld [vmem:[%s21331_s10 + $0xf9c] sm:$0xf0] }
 0x282   : > { %v14735_v18 = vld [vmem:[%s21331_s10 + $0x940] sm:$0xf]  ;;  %v15536_v23 = vor.u32 %v19947_v16, %v15535_v15  ;;  %5624 = vmatpush.bf16.msrb.mxu2 %v15280_v20 }
 0x283   : > { %v19747_v21 = vld [vmem:[%s21331_s10 + $0x95c] sm:$0xf0] }
 0x284   : > { %v14991_v22 = vld [vmem:[%s21331_s10 + $0xb40] sm:$0xf]  ;;  %v14736_v26 = vor.u32 %v19747_v21, %v14735_v18  ;;  %5637 = vmatpush.bf16.msrb.mxu3 %v15536_v23 }
 0x285   : > { %v19811_v55 = vld [vmem:[%s21331_s10 + $0xb5c] sm:$0xf0] }
 0x286   : > { %v15247_v24 = vld [vmem:[%s21331_s10 + $0xd40] sm:$0xf]  ;;  %v14992_v31 = vor.u32 %v19811_v55, %v14991_v22  ;;  %5599 = vmatpush.bf16.msrb.mxu0 %v14736_v26 }
 0x287   : > { %v19875_v56 = vld [vmem:[%s21331_s10 + $0xd5c] sm:$0xf0] }
 0x288   : > { %v15503_v28 = vld [vmem:[%s21331_s10 + $0xf40] sm:$0xf]  ;;  %v15248_v32 = vor.u32 %v19875_v56, %v15247_v24  ;;  %5612 = vmatpush.bf16.msrb.mxu1 %v14992_v31  ;;  %v13777_v31 = vld [vmem:[%s21331_s10 + $0x1e0] sm:$0xf0] }
 0x289   : > { %v19939_v25 = vld [vmem:[%s21331_s10 + $0xf5c] sm:$0xf0] }
 0x28a   : > { %v14703_v27 = vld [vmem:[%s21331_s10 + $0x900] sm:$0xf]  ;;  %v15504_v38 = vor.u32 %v19939_v25, %v15503_v28  ;;  %5625 = vmatpush.bf16.msrb.mxu2 %v15248_v32  ;;  %v19567_v32 = vld [vmem:[%s21331_s10 + $0x3c4] sm:$0xf] }
 0x28b   : > { %v19739_v29 = vld [vmem:[%s21331_s10 + $0x91c] sm:$0xf0] }
 0x28c   : > { %v14959_v33 = vld [vmem:[%s21331_s10 + $0xb00] sm:$0xf]  ;;  %v14704_v36 = vor.u32 %v19739_v29, %v14703_v27  ;;  %5638 = vmatpush.bf16.msrb.mxu3 %v15504_v38  ;;  %v14289_v38 = vld [vmem:[%s21331_s10 + $0x5e0] sm:$0xf0] }
 0x28d   : > { %v19803_v39 = vld [vmem:[%s21331_s10 + $0xb1c] sm:$0xf0] }
 0x28e   : > { %v15215_v40 = vld [vmem:[%s21331_s10 + $0xd00] sm:$0xf]  ;;  %v14960_v46 = vor.u32 %v19803_v39, %v14959_v33  ;;  %5600 = vmatpush.bf16.msrb.mxu0 %v14704_v36 }
 0x28f   : > { %v19867_v41 = vld [vmem:[%s21331_s10 + $0xd1c] sm:$0xf0] }
 0x290   : > { %v15471_v44 = vld [vmem:[%s21331_s10 + $0xf00] sm:$0xf]  ;;  %v15216_v47 = vor.u32 %v19867_v41, %v15215_v40  ;;  %5613 = vmatpush.bf16.msrb.mxu1 %v14960_v46  ;;  %v19695_v41 = vld [vmem:[%s21331_s10 + $0x7c4] sm:$0xf]  ;;  %v13780_v46 = vor.u32 %v19503_v30, %v13777_v31 }
 0x291   : > { %v19931_v45 = vld [vmem:[%s21331_s10 + $0xf1c] sm:$0xf0]  ;;  %v13649_v30 = vld [vmem:[%s21331_s10 + $0xe0] sm:$0xf0] }
 0x292   : > { %v14671_v48 = vld [vmem:[%s21331_s10 + $0x8c0] sm:$0xf]  ;;  %v15472_v51 = vor.u32 %v19931_v45, %v15471_v44  ;;  %5626 = vmatpush.bf16.msrb.mxu2 %v15216_v47  ;;  %v14545_v44 = vld [vmem:[%s21331_s10 + $0x7e0] sm:$0xf0] }
 0x293   : > { %v19731_v49 = vld [vmem:[%s21331_s10 + $0x8dc] sm:$0xf0]  ;;  %v19495_v47 = vld [vmem:[%s21331_s10 + $0x184] sm:$0xf] }
 0x294   : > { %v14927_v50 = vld [vmem:[%s21331_s10 + $0xac0] sm:$0xf]  ;;  %v14672_v59 = vor.u32 %v19731_v49, %v14671_v48  ;;  %5639 = vmatpush.bf16.msrb.mxu3 %v15472_v51  ;;  %v2443_v49 = vld [vmem:[#allocation2 + $0x38] sm:$0xff]  ;;  %v14292_v51 = vor.u32 %v19631_v37, %v14289_v38  ;;  %v19535_v31 = vld [vmem:[%s21331_s10 + $0x2c4] sm:$0xf] }
 0x295   : > { %v19795_v52 = vld [vmem:[%s21331_s10 + $0xadc] sm:$0xf0]  ;;  %v14161_v37 = vld [vmem:[%s21331_s10 + $0x4e0] sm:$0xf0] }
 0x296   : > { %v15183_v53 = vld [vmem:[%s21331_s10 + $0xcc0] sm:$0xf]  ;;  %v14928_v2 = vor.u32 %v19795_v52, %v14927_v50  ;;  %5601 = vmatpush.bf16.msrb.mxu0 %v14672_v59  ;;  %v14036_v50 = vor.u32 %v19567_v32, %v14033_v35  ;;  %v13745_v52 = vld [vmem:[%s21331_s10 + $0x1a0] sm:$0xf0] }
 0x297   : > { %v19859_v0 = vld [vmem:[%s21331_s10 + $0xcdc] sm:$0xf0]  ;;  %v19623_v59 = vld [vmem:[%s21331_s10 + $0x584] sm:$0xf] }
 0x298   : > { %v15439_v58 = vld [vmem:[%s21331_s10 + $0xec0] sm:$0xf]  ;;  %v15184_v60 = vor.u32 %v19859_v0, %v15183_v53  ;;  %5614 = vmatpush.bf16.msrb.mxu1 %v14928_v2  ;;  %v19559_v53 = vld [vmem:[%s21331_s10 + $0x384] sm:$0xf]  ;;  %v2441_v0 = vld [vmem:[#allocation2 + $0x20] sm:$0xff] }
 0x299   : > { %v19923_v1 = vld [vmem:[%s21331_s10 + $0xedc] sm:$0xf0]  ;;  %v14257_v2 = vld [vmem:[%s21331_s10 + $0x5a0] sm:$0xf0] }
 0x29a   : > { %v14639_v3 = vld [vmem:[%s21331_s10 + $0x880] sm:$0xf]  ;;  %v15440_v63 = vor.u32 %v19923_v1, %v15439_v58  ;;  %5627 = vmatpush.bf16.msrb.mxu2 %v15184_v60  ;;  %v14548_v58 = vor.u32 %v19695_v41, %v14545_v44  ;;  %v14001_v1 = vld [vmem:[%s21331_s10 + $0x3a0] sm:$0xf0] }
 0x29b   : > { %v19723_v61 = vld [vmem:[%s21331_s10 + $0x89c] sm:$0xf0]  ;;  %v19599_v35 = vld [vmem:[%s21331_s10 + $0x4c4] sm:$0xf] }
 0x29c   : > { %v14895_v62 = vld [vmem:[%s21331_s10 + $0xa80] sm:$0xf]  ;;  %v14640_v9 = vor.u32 %v19723_v61, %v14639_v3  ;;  %5640 = vmatpush.bf16.msrb.mxu3 %v15440_v63  ;;  %v19687_v3 = vld [vmem:[%s21331_s10 + $0x784] sm:$0xf]  ;;  %v21584_v63 = vpack.c.bf16 %v2443_v49, %v2443_v49  ;;  %v14164_v44 = vor.u32 %v19599_v35, %v14161_v37 }
 0x29d   : > { %v19787_v4 = vld [vmem:[%s21331_s10 + $0xa9c] sm:$0xf0]  ;;  %v14513_v61 = vld [vmem:[%s21331_s10 + $0x7a0] sm:$0xf0] }
 0x29e   : > { %v15151_v5 = vld [vmem:[%s21331_s10 + $0xc80] sm:$0xf]  ;;  %v14896_v10 = vor.u32 %v19787_v4, %v14895_v62  ;;  %5602 = vmatpush.bf16.msrb.mxu0 %v14640_v9  ;;  %v13748_v4 = vor.u32 %v19495_v47, %v13745_v52  ;;  %v13713_v9 = vld [vmem:[%s21331_s10 + $0x160] sm:$0xf0] }
 0x29f   : > { %v19851_v6 = vld [vmem:[%s21331_s10 + $0xc9c] sm:$0xf0]  ;;  %v19663_v38 = vld [vmem:[%s21331_s10 + $0x6c4] sm:$0xf] }
 0x2a0   : > { %v15407_v7 = vld [vmem:[%s21331_s10 + $0xe80] sm:$0xf]  ;;  %v15152_v11 = vor.u32 %v19851_v6, %v15151_v5  ;;  %5615 = vmatpush.bf16.msrb.mxu1 %v14896_v10  ;;  %v21586_v5 = vpack.c.bf16 %v2441_v0, %v2441_v0  ;;  %v14004_v6 = vor.u32 %v19559_v53, %v14001_v1  ;;  %v19551_v10 = vld [vmem:[%s21331_s10 + $0x344] sm:$0xf] }
 0x2a1   : > { %v19915_v8 = vld [vmem:[%s21331_s10 + $0xe9c] sm:$0xf0]  ;;  %v19591_v49 = vld [vmem:[%s21331_s10 + $0x484] sm:$0xf] }
 0x2a2   : > { %v14607_v12 = vld [vmem:[%s21331_s10 + $0x840] sm:$0xf]  ;;  %v15408_v15 = vor.u32 %v19915_v8, %v15407_v7  ;;  %5628 = vmatpush.bf16.msrb.mxu2 %v15152_v11  ;;  %v14260_v7 = vor.u32 %v19623_v59, %v14257_v2  ;;  %v19487_v8 = vld [vmem:[%s21331_s10 + $0x144] sm:$0xf]  ;;  %v14516_v11 = vor.u32 %v19687_v3, %v14513_v61 }
 0x2a3   : > { %v19715_v13 = vld [vmem:[%s21331_s10 + $0x85c] sm:$0xf0]  ;;  %v14385_v52 = vld [vmem:[%s21331_s10 + $0x6a0] sm:$0xf0] }
 0x2a4   : > { %v14863_v14 = vld [vmem:[%s21331_s10 + $0xa40] sm:$0xf]  ;;  %v14608_v21 = vor.u32 %v19715_v13, %v14607_v12  ;;  %5641 = vmatpush.bf16.msrb.mxu3 %v15408_v15  ;;  %v13969_v12 = vld [vmem:[%s21331_s10 + $0x360] sm:$0xf0] }
 0x2a5   : > { %v19779_v16 = vld [vmem:[%s21331_s10 + $0xa5c] sm:$0xf0]  ;;  %v19615_v13 = vld [vmem:[%s21331_s10 + $0x544] sm:$0xf] }
 0x2a6   : > { %v15119_v17 = vld [vmem:[%s21331_s10 + $0xc40] sm:$0xf]  ;;  %v14864_v23 = vor.u32 %v19779_v16, %v14863_v14  ;;  %5603 = vmatpush.bf16.msrb.mxu0 %v14608_v21  ;;  %v14225_v14 = vld [vmem:[%s21331_s10 + $0x560] sm:$0xf0] }
 0x2a7   : > { %v19843_v18 = vld [vmem:[%s21331_s10 + $0xc5c] sm:$0xf0]  ;;  %v19679_v15 = vld [vmem:[%s21331_s10 + $0x744] sm:$0xf] }
 0x2a8   : > { %v15375_v19 = vld [vmem:[%s21331_s10 + $0xe40] sm:$0xf]  ;;  %v15120_v55 = vor.u32 %v19843_v18, %v15119_v17  ;;  %5616 = vmatpush.bf16.msrb.mxu1 %v14864_v23  ;;  %v14481_v16 = vld [vmem:[%s21331_s10 + $0x760] sm:$0xf0]  ;;  %v13716_v17 = vor.u32 %v19487_v8, %v13713_v9  ;;  %v13972_v18 = vor.u32 %v19551_v10, %v13969_v12 }
 0x2a9   : > { %v19907_v20 = vld [vmem:[%s21331_s10 + $0xe5c] sm:$0xf0]  ;;  %v13681_v21 = vld [vmem:[%s21331_s10 + $0x120] sm:$0xf0] }
 0x2aa   : > { %v14575_v22 = vld [vmem:[%s21331_s10 + $0x800] sm:$0xf]  ;;  %v15376_v25 = vor.u32 %v19907_v20, %v15375_v19  ;;  %5629 = vmatpush.bf16.msrb.mxu2 %v15120_v55  ;;  %v14228_v19 = vor.u32 %v19615_v13, %v14225_v14  ;;  %v19479_v20 = vld [vmem:[%s21331_s10 + $0x104] sm:$0xf] }
 0x2ab   : > { %v19707_v54 = vld [vmem:[%s21331_s10 + $0x81c] sm:$0xf0]  ;;  %v13937_v23 = vld [vmem:[%s21331_s10 + $0x320] sm:$0xf0] }
 0x2ac   : > { %v14831_v24 = vld [vmem:[%s21331_s10 + $0xa00] sm:$0xf]  ;;  %v14576_v33 = vor.u32 %v19707_v54, %v14575_v22  ;;  %5642 = vmatpush.bf16.msrb.mxu3 %v15376_v25  ;;  %v19543_v22 = vld [vmem:[%s21331_s10 + $0x304] sm:$0xf]  ;;  %v14484_v54 = vor.u32 %v19679_v15, %v14481_v16  ;;  %v13684_v25 = vor.u32 %v19479_v20, %v13681_v21 }
 0x2ad   : > { %v19771_v56 = vld [vmem:[%s21331_s10 + $0xa1c] sm:$0xf0]  ;;  %v19607_v55 = vld [vmem:[%s21331_s10 + $0x504] sm:$0xf] }
 0x2ae   : > { %v15087_v28 = vld [vmem:[%s21331_s10 + $0xc00] sm:$0xf]  ;;  %v14832_v39 = vor.u32 %v19771_v56, %v14831_v24  ;;  %5604 = vmatpush.bf16.msrb.mxu0 %v14576_v33  ;;  %v14193_v24 = vld [vmem:[%s21331_s10 + $0x520] sm:$0xf0] }
 0x2af   : > { %v19835_v26 = vld [vmem:[%s21331_s10 + $0xc1c] sm:$0xf0]  ;;  %v19671_v56 = vld [vmem:[%s21331_s10 + $0x704] sm:$0xf] }
 0x2b0   : > { %v15343_v27 = vld [vmem:[%s21331_s10 + $0xe00] sm:$0xf]  ;;  %v15088_v40 = vor.u32 %v19835_v26, %v15087_v28  ;;  %5617 = vmatpush.bf16.msrb.mxu1 %v14832_v39  ;;  %v14449_v28 = vld [vmem:[%s21331_s10 + $0x720] sm:$0xf0]  ;;  %v13940_v26 = vor.u32 %v19543_v22, %v13937_v23 }
 0x2b1   : > { %v19899_v29 = vld [vmem:[%s21331_s10 + $0xe1c] sm:$0xf0]  ;;  %v14452_v32 = vor.u32 %v19671_v56, %v14449_v28  ;;  %v13905_v33 = vld [vmem:[%s21331_s10 + $0x2e0] sm:$0xf0] }
 0x2b2   : > { %v2442_v45 = vld [vmem:[#allocation2 + $0x28] sm:$0xff]  ;;  %v15344_v36 = vor.u32 %v19899_v29, %v15343_v27  ;;  %5630 = vmatpush.bf16.msrb.mxu2 %v15088_v40  ;;  %5649 = vmatpush.bf16.msra.mxu0 %v13780_v46  ;;  %v14196_v27 = vor.u32 %v19607_v55, %v14193_v24  ;;  %v13908_v41 = vor.u32 %v19535_v31, %v13905_v33 }
 0x2b3   : > { %v2440_v48 = vld [vmem:[#allocation2 + $0x8] sm:$0xff]  ;;  %v21578_v60 = vpack.c.bf16 %v2442_v45, %v2442_v45  ;;  %5618 = vmatmul.bf16.vlgmr.msrb.gmra.mxu1 %v21586_v5 }
 0x2b4   : > { %v21582_v62 = vpack.c.bf16 %v2440_v48, %v2440_v48  ;;  %5643 = vmatpush.bf16.msrb.mxu3 %v15344_v36  ;;  %5662 = vmatpush.bf16.msra.mxu1 %v14036_v50  ;;  %v19471_v29 = vld [vmem:[%s21331_s10 + $0xc4] sm:$0xf] }
 0x2b5   : > { %5631 = vmatmul.bf16.vlgmr.msrb.gmra.mxu2 %v21578_v60  ;;  %v14417_v39 = vld [vmem:[%s21331_s10 + $0x6e0] sm:$0xf0]  ;;  %v13652_v40 = vor.u32 %v19471_v29, %v13649_v30 }
 0x2b6   : > { %5675 = vmatpush.bf16.msra.mxu2 %v14292_v51  ;;  %5605 = vmatmul.bf16.vlgmr.msrb.gmra.mxu0 %v21582_v62  ;;  %v19463_v45 = vld [vmem:[%s21331_s10 + $0x84] sm:$0xf]  ;;  %v14420_v47 = vor.u32 %v19663_v38, %v14417_v39 }
 0x2b7   : > { %5644 = vmatmul.bf16.vlgmr.msrb.gmra.mxu3 %v21584_v63  ;;  %5650 = vmatpush.bf16.msra.mxu0 %v13748_v4  ;;  %v13617_v36 = vld [vmem:[%s21331_s10 + $0xa0] sm:$0xf0] }
 0x2b8   : > { %5688 = vmatpush.bf16.msra.mxu3 %v14548_v58  ;;  %5663 = vmatpush.bf16.msra.mxu1 %v14004_v6  ;;  %v19527_v46 = vld [vmem:[%s21331_s10 + $0x284] sm:$0xf]  ;;  %v13620_v53 = vor.u32 %v19463_v45, %v13617_v36 }
 0x2b9   : > { %v13873_v48 = vld [vmem:[%s21331_s10 + $0x2a0] sm:$0xf0] }
 0x2ba   : > { %5676 = vmatpush.bf16.msra.mxu2 %v14260_v7  ;;  %v14129_v50 = vld [vmem:[%s21331_s10 + $0x4a0] sm:$0xf0]  ;;  %v13876_v0 = vor.u32 %v19527_v46, %v13873_v48 }
 0x2bb   : > { %5651 = vmatpush.bf16.msra.mxu0 %v13716_v17  ;;  %v19655_v51 = vld [vmem:[%s21331_s10 + $0x684] sm:$0xf]  ;;  %v14132_v58 = vor.u32 %v19591_v49, %v14129_v50 }
 0x2bc   : > { %5689 = vmatpush.bf16.msra.mxu3 %v14516_v11  ;;  %5664 = vmatpush.bf16.msra.mxu1 %v13972_v18  ;;  %v19455_v1 = vld [vmem:[%s21331_s10 + $0x44] sm:$0xf]  ;;  %v14388_v3 = vor.u32 %v19655_v51, %v14385_v52 }
 0x2bd   : > { %v13585_v59 = vld [vmem:[%s21331_s10 + $0x60] sm:$0xf0] }
 0x2be   : > { %5677 = vmatpush.bf16.msra.mxu2 %v14228_v19  ;;  %v19519_v2 = vld [vmem:[%s21331_s10 + $0x244] sm:$0xf]  ;;  %v13588_v9 = vor.u32 %v19455_v1, %v13585_v59 }
 0x2bf   : > { %5652 = vmatpush.bf16.msra.mxu0 %v13684_v25  ;;  %v13841_v61 = vld [vmem:[%s21331_s10 + $0x260] sm:$0xf0] }
 0x2c0   : > { %5690 = vmatpush.bf16.msra.mxu3 %v14484_v54  ;;  %5665 = vmatpush.bf16.msra.mxu1 %v13940_v26  ;;  %v19583_v4 = vld [vmem:[%s21331_s10 + $0x444] sm:$0xf]  ;;  %v13844_v12 = vor.u32 %v19519_v2, %v13841_v61 }
 0x2c1   : > { %v14097_v6 = vld [vmem:[%s21331_s10 + $0x460] sm:$0xf0] }
 0x2c2   : > { %5678 = vmatpush.bf16.msra.mxu2 %v14196_v27  ;;  %v19647_v7 = vld [vmem:[%s21331_s10 + $0x644] sm:$0xf]  ;;  %v14100_v13 = vor.u32 %v19583_v4, %v14097_v6 }
 0x2c3   : > { %5653 = vmatpush.bf16.msra.mxu0 %v13652_v40  ;;  %v14353_v8 = vld [vmem:[%s21331_s10 + $0x660] sm:$0xf0] }
 0x2c4   : > { %5691 = vmatpush.bf16.msra.mxu3 %v14452_v32  ;;  %5666 = vmatpush.bf16.msra.mxu1 %v13908_v41  ;;  %v19447_v10 = vld [vmem:[%s21331_s10 + $0x4] sm:$0xf]  ;;  %v14356_v17 = vor.u32 %v19647_v7, %v14353_v8 }
 0x2c5   : > { %v13553_v11 = vld [vmem:[%s21331_s10 + $0x20] sm:$0xf0] }
 0x2c6   : > { %5679 = vmatpush.bf16.msra.mxu2 %v14164_v44  ;;  %v19511_v14 = vld [vmem:[%s21331_s10 + $0x204] sm:$0xf]  ;;  %v13556_v23 = vor.u32 %v19447_v10, %v13553_v11 }
 0x2c7   : > { %5654 = vmatpush.bf16.msra.mxu0 %v13620_v53  ;;  %v13809_v15 = vld [vmem:[%s21331_s10 + $0x220] sm:$0xf0] }
 0x2c8   : > { %5692 = vmatpush.bf16.msra.mxu3 %v14420_v47  ;;  %5667 = vmatpush.bf16.msra.mxu1 %v13876_v0  ;;  %v19575_v16 = vld [vmem:[%s21331_s10 + $0x404] sm:$0xf]  ;;  %v13812_v28 = vor.u32 %v19511_v14, %v13809_v15 }
 0x2c9   : > { %v14065_v18 = vld [vmem:[%s21331_s10 + $0x420] sm:$0xf0] }
 0x2ca   : > { %5680 = vmatpush.bf16.msra.mxu2 %v14132_v58  ;;  %v19639_v19 = vld [vmem:[%s21331_s10 + $0x604] sm:$0xf]  ;;  %v14068_v25 = vor.u32 %v19575_v16, %v14065_v18 }
 0x2cb   : > { %v14321_v20 = vld [vmem:[%s21331_s10 + $0x620] sm:$0xf0]  ;;  %5655 = vmatpush.bf16.msra.mxu0 %v13588_v9 }
 0x2cc   : > { %5693 = vmatpush.bf16.msra.mxu3 %v14388_v3  ;;  %v19759_v21 = vld [vmem:[%s21331_s10 + $0x9c4] sm:$0xf]  ;;  %5668 = vmatpush.bf16.msra.mxu1 %v13844_v12  ;;  %v14324_v29 = vor.u32 %v19639_v19, %v14321_v20 }
 0x2cd   : > { %v14801_v22 = vld [vmem:[%s21331_s10 + $0x9e0] sm:$0xf0] }
 0x2ce   : > { %v19823_v54 = vld [vmem:[%s21331_s10 + $0xbc4] sm:$0xf]  ;;  %5681 = vmatpush.bf16.msra.mxu2 %v14100_v13  ;;  %v14804_v30 = vor.u32 %v19759_v21, %v14801_v22 }
 0x2cf   : > { %v15057_v55 = vld [vmem:[%s21331_s10 + $0xbe0] sm:$0xf0]  ;;  %5656 = vmatpush.bf16.msra.mxu0 %v13556_v23 }
 0x2d0   : > { %v19887_v24 = vld [vmem:[%s21331_s10 + $0xdc4] sm:$0xf]  ;;  %5694 = vmatpush.bf16.msra.mxu3 %v14356_v17  ;;  %v15060_v31 = vor.u32 %v19823_v54, %v15057_v55  ;;  %5669 = vmatpush.bf16.msra.mxu1 %v13812_v28 }
 0x2d1   : > { %v15313_v56 = vld [vmem:[%s21331_s10 + $0xde0] sm:$0xf0] }
 0x2d2   : > { %v19951_v26 = vld [vmem:[%s21331_s10 + $0xfc4] sm:$0xf]  ;;  %v15316_v32 = vor.u32 %v19887_v24, %v15313_v56  ;;  %5682 = vmatpush.bf16.msra.mxu2 %v14068_v25  ;;  %5657 = vmatmul.bf16.vlgmr.msra.gmra.mxu0 %v21518_v34 }
 0x2d3   : > { %v15569_v27 = vld [vmem:[%s21331_s10 + $0xfe0] sm:$0xf0]  ;;  %5701 = vmatpush.bf16.msrb.mxu0 %v14804_v30  ;;  %5670 = vmatmul.bf16.vlgmr.msra.gmra.mxu1 %v21525_v43 }
 0x2d4   : > { %v19751_v33 = vld [vmem:[%s21331_s10 + $0x984] sm:$0xf]  ;;  %v15572_v38 = vor.u32 %v19951_v26, %v15569_v27  ;;  %5695 = vmatpush.bf16.msra.mxu3 %v14324_v29  ;;  %5714 = vmatpush.bf16.msrb.mxu1 %v15060_v31 }
 0x2d5   : > { %v14769_v35 = vld [vmem:[%s21331_s10 + $0x9a0] sm:$0xf0]  ;;  %5683 = vmatmul.bf16.vlgmr.msra.gmra.mxu2 %v21510_v57 }
 0x2d6   : > { %v19815_v37 = vld [vmem:[%s21331_s10 + $0xb84] sm:$0xf]  ;;  %v14772_v36 = vor.u32 %v19751_v33, %v14769_v35  ;;  %5727 = vmatpush.bf16.msrb.mxu2 %v15316_v32 }
 0x2d7   : > { %v15025_v39 = vld [vmem:[%s21331_s10 + $0xba0] sm:$0xf0]  ;;  %5696 = vmatmul.bf16.vlgmr.msra.gmra.mxu3 %v21523_v42 }
 0x2d8   : > { %v19879_v40 = vld [vmem:[%s21331_s10 + $0xd84] sm:$0xf]  ;;  %v15028_v46 = vor.u32 %v19815_v37, %v15025_v39  ;;  %5740 = vmatpush.bf16.msrb.mxu3 %v15572_v38  ;;  %5702 = vmatpush.bf16.msrb.mxu0 %v14772_v36 }
 0x2d9   : > { %v15281_v41 = vld [vmem:[%s21331_s10 + $0xda0] sm:$0xf0] }
 0x2da   : > { %v19943_v44 = vld [vmem:[%s21331_s10 + $0xf84] sm:$0xf]  ;;  %v15284_v47 = vor.u32 %v19879_v40, %v15281_v41  ;;  %5715 = vmatpush.bf16.msrb.mxu1 %v15028_v46 }
 0x2db   : > { %v15537_v45 = vld [vmem:[%s21331_s10 + $0xfa0] sm:$0xf0] }
 0x2dc   : > { %v19743_v48 = vld [vmem:[%s21331_s10 + $0x944] sm:$0xf]  ;;  %v15540_v51 = vor.u32 %v19943_v44, %v15537_v45  ;;  %5728 = vmatpush.bf16.msrb.mxu2 %v15284_v47 }
 0x2dd   : > { %v14737_v49 = vld [vmem:[%s21331_s10 + $0x960] sm:$0xf0] }
 0x2de   : > { %v19807_v50 = vld [vmem:[%s21331_s10 + $0xb44] sm:$0xf]  ;;  %v14740_v59 = vor.u32 %v19743_v48, %v14737_v49  ;;  %5741 = vmatpush.bf16.msrb.mxu3 %v15540_v51 }
 0x2df   : > { %v14993_v52 = vld [vmem:[%s21331_s10 + $0xb60] sm:$0xf0] }
 0x2e0   : > { %v19871_v53 = vld [vmem:[%s21331_s10 + $0xd44] sm:$0xf]  ;;  %v14996_v2 = vor.u32 %v19807_v50, %v14993_v52  ;;  %5703 = vmatpush.bf16.msrb.mxu0 %v14740_v59 }
 0x2e1   : > { %v15249_v0 = vld [vmem:[%s21331_s10 + $0xd60] sm:$0xf0] }
 0x2e2   : > { %v19935_v58 = vld [vmem:[%s21331_s10 + $0xf44] sm:$0xf]  ;;  %v15252_v3 = vor.u32 %v19871_v53, %v15249_v0  ;;  %5716 = vmatpush.bf16.msrb.mxu1 %v14996_v2 }
 0x2e3   : > { %v15505_v1 = vld [vmem:[%s21331_s10 + $0xf60] sm:$0xf0] }
 0x2e4   : > { %v19735_v61 = vld [vmem:[%s21331_s10 + $0x904] sm:$0xf]  ;;  %v15508_v7 = vor.u32 %v19935_v58, %v15505_v1  ;;  %5729 = vmatpush.bf16.msrb.mxu2 %v15252_v3 }
 0x2e5   : > { %v14705_v4 = vld [vmem:[%s21331_s10 + $0x920] sm:$0xf0] }
 0x2e6   : > { %v19799_v6 = vld [vmem:[%s21331_s10 + $0xb04] sm:$0xf]  ;;  %v14708_v13 = vor.u32 %v19735_v61, %v14705_v4  ;;  %5742 = vmatpush.bf16.msrb.mxu3 %v15508_v7  ;;  %v13783_v4 = vld [vmem:[%s21331_s10 + $0x1c8] sm:$0xf] }
 0x2e7   : > { %v14961_v8 = vld [vmem:[%s21331_s10 + $0xb20] sm:$0xf0]  ;;  %v14039_v7 = vld [vmem:[%s21331_s10 + $0x3c8] sm:$0xf] }
 0x2e8   : > { %v19863_v9 = vld [vmem:[%s21331_s10 + $0xd04] sm:$0xf]  ;;  %v14964_v14 = vor.u32 %v19799_v6, %v14961_v8  ;;  %5704 = vmatpush.bf16.msrb.mxu0 %v14708_v13  ;;  %v19508_v6 = vld [vmem:[%s21331_s10 + $0x1e4] sm:$0xf0] }
 0x2e9   : > { %v15217_v10 = vld [vmem:[%s21331_s10 + $0xd20] sm:$0xf0] }
 0x2ea   : > { %v19927_v11 = vld [vmem:[%s21331_s10 + $0xf04] sm:$0xf]  ;;  %v15220_v15 = vor.u32 %v19863_v9, %v15217_v10  ;;  %5717 = vmatpush.bf16.msrb.mxu1 %v14964_v14  ;;  %v19572_v9 = vld [vmem:[%s21331_s10 + $0x3e4] sm:$0xf0] }
 0x2eb   : > { %v15473_v12 = vld [vmem:[%s21331_s10 + $0xf20] sm:$0xf0]  ;;  %v14295_v10 = vld [vmem:[%s21331_s10 + $0x5c8] sm:$0xf] }
 0x2ec   : > { %v19727_v16 = vld [vmem:[%s21331_s10 + $0x8c4] sm:$0xf]  ;;  %v15476_v19 = vor.u32 %v19927_v11, %v15473_v12  ;;  %5730 = vmatpush.bf16.msrb.mxu2 %v15220_v15  ;;  %v19636_v11 = vld [vmem:[%s21331_s10 + $0x5e4] sm:$0xf0] }
 0x2ed   : > { %v14673_v17 = vld [vmem:[%s21331_s10 + $0x8e0] sm:$0xf0]  ;;  %v14551_v14 = vld [vmem:[%s21331_s10 + $0x7c8] sm:$0xf] }
 0x2ee   : > { %v19791_v18 = vld [vmem:[%s21331_s10 + $0xac4] sm:$0xf]  ;;  %v14676_v55 = vor.u32 %v19727_v16, %v14673_v17  ;;  %5743 = vmatpush.bf16.msrb.mxu3 %v15476_v19  ;;  %v19700_v15 = vld [vmem:[%s21331_s10 + $0x7e4] sm:$0xf0]  ;;  %v13784_v17 = vor.u32 %v19508_v6, %v13783_v4  ;;  %v14296_v19 = vor.u32 %v19636_v11, %v14295_v10 }
 0x2ef   : > { %v14929_v20 = vld [vmem:[%s21331_s10 + $0xae0] sm:$0xf0]  ;;  %v14167_v4 = vld [vmem:[%s21331_s10 + $0x4c8] sm:$0xf] }
 0x2f0   : > { %v19855_v21 = vld [vmem:[%s21331_s10 + $0xcc4] sm:$0xf]  ;;  %v14932_v24 = vor.u32 %v19791_v18, %v14929_v20  ;;  %5705 = vmatpush.bf16.msrb.mxu0 %v14676_v55  ;;  %v14040_v18 = vor.u32 %v19572_v9, %v14039_v7  ;;  %v13751_v20 = vld [vmem:[%s21331_s10 + $0x188] sm:$0xf] }
 0x2f1   : > { %v15185_v22 = vld [vmem:[%s21331_s10 + $0xce0] sm:$0xf0]  ;;  %v14263_v55 = vld [vmem:[%s21331_s10 + $0x588] sm:$0xf] }
 0x2f2   : > { %v19919_v54 = vld [vmem:[%s21331_s10 + $0xec4] sm:$0xf]  ;;  %v15188_v56 = vor.u32 %v19855_v21, %v15185_v22  ;;  %5718 = vmatpush.bf16.msrb.mxu1 %v14932_v24  ;;  %v19500_v21 = vld [vmem:[%s21331_s10 + $0x1a4] sm:$0xf0] }
 0x2f3   : > { %v15441_v23 = vld [vmem:[%s21331_s10 + $0xee0] sm:$0xf0]  ;;  %v14007_v22 = vld [vmem:[%s21331_s10 + $0x388] sm:$0xf] }
 0x2f4   : > { %v19719_v28 = vld [vmem:[%s21331_s10 + $0x884] sm:$0xf]  ;;  %v15444_v27 = vor.u32 %v19919_v54, %v15441_v23  ;;  %5731 = vmatpush.bf16.msrb.mxu2 %v15188_v56  ;;  %v14552_v54 = vor.u32 %v19700_v15, %v14551_v14  ;;  %v19564_v23 = vld [vmem:[%s21331_s10 + $0x3a4] sm:$0xf0] }
 0x2f5   : > { %v14641_v25 = vld [vmem:[%s21331_s10 + $0x8a0] sm:$0xf0]  ;;  %v19628_v24 = vld [vmem:[%s21331_s10 + $0x5a4] sm:$0xf0] }
 0x2f6   : > { %v19783_v26 = vld [vmem:[%s21331_s10 + $0xa84] sm:$0xf]  ;;  %v14644_v35 = vor.u32 %v19719_v28, %v14641_v25  ;;  %5744 = vmatpush.bf16.msrb.mxu3 %v15444_v27  ;;  %v14519_v56 = vld [vmem:[%s21331_s10 + $0x788] sm:$0xf]  ;;  %v13752_v25 = vor.u32 %v19500_v21, %v13751_v20  ;;  %v14264_v27 = vor.u32 %v19628_v24, %v14263_v55 }
 0x2f7   : > { %v14897_v29 = vld [vmem:[%s21331_s10 + $0xaa0] sm:$0xf0]  ;;  %v19692_v28 = vld [vmem:[%s21331_s10 + $0x7a4] sm:$0xf0] }
 0x2f8   : > { %v19847_v30 = vld [vmem:[%s21331_s10 + $0xc84] sm:$0xf]  ;;  %v14900_v37 = vor.u32 %v19783_v26, %v14897_v29  ;;  %5706 = vmatpush.bf16.msrb.mxu0 %v14644_v35  ;;  %v14008_v26 = vor.u32 %v19564_v23, %v14007_v22  ;;  %v13719_v29 = vld [vmem:[%s21331_s10 + $0x148] sm:$0xf] }
 0x2f9   : > { %v15153_v31 = vld [vmem:[%s21331_s10 + $0xca0] sm:$0xf0]  ;;  %v14231_v35 = vld [vmem:[%s21331_s10 + $0x548] sm:$0xf] }
 0x2fa   : > { %v19911_v32 = vld [vmem:[%s21331_s10 + $0xe84] sm:$0xf]  ;;  %v15156_v38 = vor.u32 %v19847_v30, %v15153_v31  ;;  %5719 = vmatpush.bf16.msrb.mxu1 %v14900_v37  ;;  %v19492_v30 = vld [vmem:[%s21331_s10 + $0x164] sm:$0xf0] }
 0x2fb   : > { %v15409_v33 = vld [vmem:[%s21331_s10 + $0xea0] sm:$0xf0]  ;;  %v13975_v31 = vld [vmem:[%s21331_s10 + $0x348] sm:$0xf] }
 0x2fc   : > { %v19711_v39 = vld [vmem:[%s21331_s10 + $0x844] sm:$0xf]  ;;  %v15412_v44 = vor.u32 %v19911_v32, %v15409_v33  ;;  %5732 = vmatpush.bf16.msrb.mxu2 %v15156_v38  ;;  %v14520_v32 = vor.u32 %v19692_v28, %v14519_v56  ;;  %v19556_v33 = vld [vmem:[%s21331_s10 + $0x364] sm:$0xf0] }
 0x2fd   : > { %v14609_v40 = vld [vmem:[%s21331_s10 + $0x860] sm:$0xf0]  ;;  %v19620_v37 = vld [vmem:[%s21331_s10 + $0x564] sm:$0xf0] }
 0x2fe   : > { %v19775_v41 = vld [vmem:[%s21331_s10 + $0xa44] sm:$0xf]  ;;  %v14612_v49 = vor.u32 %v19711_v39, %v14609_v40  ;;  %5745 = vmatpush.bf16.msrb.mxu3 %v15412_v44  ;;  %v14487_v38 = vld [vmem:[%s21331_s10 + $0x748] sm:$0xf]  ;;  %v13720_v40 = vor.u32 %v19492_v30, %v13719_v29  ;;  %v14232_v44 = vor.u32 %v19620_v37, %v14231_v35 }
 0x2ff   : > { %v14865_v45 = vld [vmem:[%s21331_s10 + $0xa60] sm:$0xf0]  ;;  %v19684_v39 = vld [vmem:[%s21331_s10 + $0x764] sm:$0xf0] }
 0x300   : > { %v19839_v36 = vld [vmem:[%s21331_s10 + $0xc44] sm:$0xf]  ;;  %v14868_v52 = vor.u32 %v19775_v41, %v14865_v45  ;;  %5707 = vmatpush.bf16.msrb.mxu0 %v14612_v49  ;;  %v13976_v41 = vor.u32 %v19556_v33, %v13975_v31  ;;  %v13687_v45 = vld [vmem:[%s21331_s10 + $0x108] sm:$0xf] }
 0x301   : > { %v15121_v46 = vld [vmem:[%s21331_s10 + $0xc60] sm:$0xf0]  ;;  %v14199_v49 = vld [vmem:[%s21331_s10 + $0x508] sm:$0xf] }
 0x302   : > { %v19903_v47 = vld [vmem:[%s21331_s10 + $0xe44] sm:$0xf]  ;;  %v15124_v53 = vor.u32 %v19839_v36, %v15121_v46  ;;  %5720 = vmatpush.bf16.msrb.mxu1 %v14868_v52  ;;  %v19484_v36 = vld [vmem:[%s21331_s10 + $0x124] sm:$0xf0] }
 0x303   : > { %v15377_v48 = vld [vmem:[%s21331_s10 + $0xe60] sm:$0xf0]  ;;  %v13943_v46 = vld [vmem:[%s21331_s10 + $0x308] sm:$0xf] }
 0x304   : > { %v19703_v50 = vld [vmem:[%s21331_s10 + $0x804] sm:$0xf]  ;;  %v15380_v59 = vor.u32 %v19903_v47, %v15377_v48  ;;  %5733 = vmatpush.bf16.msrb.mxu2 %v15124_v53  ;;  %v14488_v47 = vor.u32 %v19684_v39, %v14487_v38  ;;  %v19548_v48 = vld [vmem:[%s21331_s10 + $0x324] sm:$0xf0]  ;;  %v13688_v53 = vor.u32 %v19484_v36, %v13687_v45 }
 0x305   : > { %v14577_v51 = vld [vmem:[%s21331_s10 + $0x820] sm:$0xf0]  ;;  %v19676_v52 = vld [vmem:[%s21331_s10 + $0x724] sm:$0xf0] }
 0x306   : > { %v19767_v0 = vld [vmem:[%s21331_s10 + $0xa04] sm:$0xf]  ;;  %v14580_v8 = vor.u32 %v19703_v50, %v14577_v51  ;;  %5746 = vmatpush.bf16.msrb.mxu3 %v15380_v59  ;;  %v19612_v50 = vld [vmem:[%s21331_s10 + $0x524] sm:$0xf0] }
 0x307   : > { %v14833_v58 = vld [vmem:[%s21331_s10 + $0xa20] sm:$0xf0]  ;;  %v14455_v51 = vld [vmem:[%s21331_s10 + $0x708] sm:$0xf] }
 0x308   : > { %v19831_v1 = vld [vmem:[%s21331_s10 + $0xc04] sm:$0xf]  ;;  %v14836_v12 = vor.u32 %v19767_v0, %v14833_v58  ;;  %5708 = vmatpush.bf16.msrb.mxu0 %v14580_v8  ;;  %v13944_v0 = vor.u32 %v19548_v48, %v13943_v46  ;;  %v14200_v58 = vor.u32 %v19612_v50, %v14199_v49  ;;  %v19476_v59 = vld [vmem:[%s21331_s10 + $0xe4] sm:$0xf0] }
 0x309   : > { %v15089_v2 = vld [vmem:[%s21331_s10 + $0xc20] sm:$0xf0]  ;;  %v19604_v6 = vld [vmem:[%s21331_s10 + $0x4e4] sm:$0xf0] }
 0x30a   : > { %v19895_v3 = vld [vmem:[%s21331_s10 + $0xe04] sm:$0xf]  ;;  %v15092_v13 = vor.u32 %v19831_v1, %v15089_v2  ;;  %5721 = vmatpush.bf16.msrb.mxu1 %v14836_v12  ;;  %v13655_v1 = vld [vmem:[%s21331_s10 + $0xc8] sm:$0xf]  ;;  %v14168_v11 = vor.u32 %v19604_v6, %v14167_v4 }
 0x30b   : > { %v15345_v61 = vld [vmem:[%s21331_s10 + $0xe20] sm:$0xf0]  ;;  %5709 = vmatmul.bf16.vlgmr.msrb.gmra.mxu0 %v21582_v62  ;;  %v13911_v2 = vld [vmem:[%s21331_s10 + $0x2c8] sm:$0xf]  ;;  %v13656_v9 = vor.u32 %v19476_v59, %v13655_v1 }
 0x30c   : > { %v15348_v16 = vor.u32 %v19895_v3, %v15345_v61  ;;  %5734 = vmatpush.bf16.msrb.mxu2 %v15092_v13  ;;  %5753 = vmatpush.bf16.msra.mxu0 %v13784_v17  ;;  %v14456_v3 = vor.u32 %v19676_v52, %v14455_v51  ;;  %v19540_v61 = vld [vmem:[%s21331_s10 + $0x2e4] sm:$0xf0] }
 0x30d   : > { %5722 = vmatmul.bf16.vlgmr.msrb.gmra.mxu1 %v21586_v5  ;;  %v14423_v7 = vld [vmem:[%s21331_s10 + $0x6c8] sm:$0xf]  ;;  %v13912_v10 = vor.u32 %v19540_v61, %v13911_v2 }
 0x30e   : > { %5747 = vmatpush.bf16.msrb.mxu3 %v15348_v16  ;;  %5766 = vmatpush.bf16.msra.mxu1 %v14040_v18  ;;  %v19668_v8 = vld [vmem:[%s21331_s10 + $0x6e4] sm:$0xf0] }
 0x30f   : > { %5735 = vmatmul.bf16.vlgmr.msrb.gmra.mxu2 %v21578_v60  ;;  %v13623_v12 = vld [vmem:[%s21331_s10 + $0x88] sm:$0xf]  ;;  %v14424_v15 = vor.u32 %v19668_v8, %v14423_v7 }
 0x310   : > { %5779 = vmatpush.bf16.msra.mxu2 %v14296_v19  ;;  %5754 = vmatpush.bf16.msra.mxu0 %v13752_v25  ;;  %v19468_v13 = vld [vmem:[%s21331_s10 + $0xa4] sm:$0xf0] }
 0x311   : > { %5748 = vmatmul.bf16.vlgmr.msrb.gmra.mxu3 %v21584_v63  ;;  %v13879_v14 = vld [vmem:[%s21331_s10 + $0x288] sm:$0xf]  ;;  %v13624_v21 = vor.u32 %v19468_v13, %v13623_v12 }
 0x312   : > { %5792 = vmatpush.bf16.msra.mxu3 %v14552_v54  ;;  %5767 = vmatpush.bf16.msra.mxu1 %v14008_v26  ;;  %v19532_v16 = vld [vmem:[%s21331_s10 + $0x2a4] sm:$0xf0] }
 0x313   : > { %v14135_v17 = vld [vmem:[%s21331_s10 + $0x488] sm:$0xf]  ;;  %v13880_v22 = vor.u32 %v19532_v16, %v13879_v14 }
 0x314   : > { %5780 = vmatpush.bf16.msra.mxu2 %v14264_v27  ;;  %5755 = vmatpush.bf16.msra.mxu0 %v13720_v40  ;;  %v19596_v18 = vld [vmem:[%s21331_s10 + $0x4a4] sm:$0xf0] }
 0x315   : > { %v14391_v19 = vld [vmem:[%s21331_s10 + $0x688] sm:$0xf]  ;;  %v14136_v54 = vor.u32 %v19596_v18, %v14135_v17 }
 0x316   : > { %5793 = vmatpush.bf16.msra.mxu3 %v14520_v32  ;;  %5768 = vmatpush.bf16.msra.mxu1 %v13976_v41  ;;  %v19660_v20 = vld [vmem:[%s21331_s10 + $0x6a4] sm:$0xf0] }
 0x317   : > { %v13591_v23 = vld [vmem:[%s21331_s10 + $0x48] sm:$0xf]  ;;  %v14392_v56 = vor.u32 %v19660_v20, %v14391_v19 }
 0x318   : > { %5781 = vmatpush.bf16.msra.mxu2 %v14232_v44  ;;  %5756 = vmatpush.bf16.msra.mxu0 %v13688_v53  ;;  %v19460_v55 = vld [vmem:[%s21331_s10 + $0x64] sm:$0xf0] }
 0x319   : > { %v13847_v24 = vld [vmem:[%s21331_s10 + $0x248] sm:$0xf]  ;;  %v13592_v30 = vor.u32 %v19460_v55, %v13591_v23 }
 0x31a   : > { %5794 = vmatpush.bf16.msra.mxu3 %v14488_v47  ;;  %5769 = vmatpush.bf16.msra.mxu1 %v13944_v0  ;;  %v19524_v28 = vld [vmem:[%s21331_s10 + $0x264] sm:$0xf0] }
 0x31b   : > { %v14103_v25 = vld [vmem:[%s21331_s10 + $0x448] sm:$0xf]  ;;  %v13848_v33 = vor.u32 %v19524_v28, %v13847_v24 }
 0x31c   : > { %5782 = vmatpush.bf16.msra.mxu2 %v14200_v58  ;;  %5757 = vmatpush.bf16.msra.mxu0 %v13656_v9  ;;  %v19588_v26 = vld [vmem:[%s21331_s10 + $0x464] sm:$0xf0] }
 0x31d   : > { %v14359_v27 = vld [vmem:[%s21331_s10 + $0x648] sm:$0xf]  ;;  %v14104_v35 = vor.u32 %v19588_v26, %v14103_v25 }
 0x31e   : > { %5795 = vmatpush.bf16.msra.mxu3 %v14456_v3  ;;  %5770 = vmatpush.bf16.msra.mxu1 %v13912_v10  ;;  %v19652_v29 = vld [vmem:[%s21331_s10 + $0x664] sm:$0xf0] }
 0x31f   : > { %v13559_v31 = vld [vmem:[%s21331_s10 + $0x8] sm:$0xf]  ;;  %v14360_v40 = vor.u32 %v19652_v29, %v14359_v27 }
 0x320   : > { %5783 = vmatpush.bf16.msra.mxu2 %v14168_v11  ;;  %5758 = vmatpush.bf16.msra.mxu0 %v13624_v21  ;;  %v19452_v32 = vld [vmem:[%s21331_s10 + $0x24] sm:$0xf0] }
 0x321   : > { %v13815_v37 = vld [vmem:[%s21331_s10 + $0x208] sm:$0xf]  ;;  %v13560_v48 = vor.u32 %v19452_v32, %v13559_v31  ;;  %v21816_v32 = vld [vmem:[%s21813_s12] sm:$0xff] }
 0x322   : > { %5796 = vmatpush.bf16.msra.mxu3 %v14424_v15  ;;  %5771 = vmatpush.bf16.msra.mxu1 %v13880_v22  ;;  %v19516_v38 = vld [vmem:[%s21331_s10 + $0x224] sm:$0xf0] }
 0x323   : > { %v14071_v39 = vld [vmem:[%s21331_s10 + $0x408] sm:$0xf]  ;;  %v13816_v52 = vor.u32 %v19516_v38, %v13815_v37 }
 0x324   : > { %5784 = vmatpush.bf16.msra.mxu2 %v14136_v54  ;;  %v19580_v41 = vld [vmem:[%s21331_s10 + $0x424] sm:$0xf0]  ;;  %5759 = vmatpush.bf16.msra.mxu0 %v13592_v30 }
 0x325   : > { %v14327_v44 = vld [vmem:[%s21331_s10 + $0x608] sm:$0xf]  ;;  %v14072_v53 = vor.u32 %v19580_v41, %v14071_v39 }
 0x326   : > { %5797 = vmatpush.bf16.msra.mxu3 %v14392_v56  ;;  %v19644_v45 = vld [vmem:[%s21331_s10 + $0x624] sm:$0xf0]  ;;  %5772 = vmatpush.bf16.msra.mxu1 %v13848_v33 }
 0x327   : > { %v14807_v36 = vld [vmem:[%s21331_s10 + $0x9c8] sm:$0xf]  ;;  %v14328_v1 = vor.u32 %v19644_v45, %v14327_v44  ;;  %v2969_v45 = vperm.slane %v21816_v32, 0 }
 0x328   : > { %v19764_v46 = vld [vmem:[%s21331_s10 + $0x9e4] sm:$0xf0]  ;;  %5785 = vmatpush.bf16.msra.mxu2 %v14104_v35  ;;  %5760 = vmatpush.bf16.msra.mxu0 %v13560_v48 }
 0x329   : > { %v15063_v47 = vld [vmem:[%s21331_s10 + $0xbc8] sm:$0xf]  ;;  %v14808_v59 = vor.u32 %v19764_v46, %v14807_v36 }
 0x32a   : > { %v19828_v49 = vld [vmem:[%s21331_s10 + $0xbe4] sm:$0xf0]  ;;  %5798 = vmatpush.bf16.msra.mxu3 %v14360_v40  ;;  %5773 = vmatpush.bf16.msra.mxu1 %v13816_v52  ;;  %v5554_v52 = vpop.f32.mrf.mxu0 }
 0x32b   : > { %v15319_v50 = vld [vmem:[%s21331_s10 + $0xdc8] sm:$0xf]  ;;  %v15064_v2 = vor.u32 %v19828_v49, %v15063_v47  ;;  %5761 = vmatmul.bf16.vlgmr.msra.gmra.mxu0 %v21518_v34 }
 0x32c   : > { %v19892_v51 = vld [vmem:[%s21331_s10 + $0xde4] sm:$0xf0]  ;;  %5786 = vmatpush.bf16.msra.mxu2 %v14072_v53  ;;  %5805 = vmatpush.bf16.msrb.mxu0 %v14808_v59 }
 0x32d   : > { %v15575_v0 = vld [vmem:[%s21331_s10 + $0xfc8] sm:$0xf]  ;;  %v15320_v3 = vor.u32 %v19892_v51, %v15319_v50  ;;  %5774 = vmatmul.bf16.vlgmr.msra.gmra.mxu1 %v21525_v43 }
 0x32e   : > { %v19956_v58 = vld [vmem:[%s21331_s10 + $0xfe4] sm:$0xf0]  ;;  %5799 = vmatpush.bf16.msra.mxu3 %v14328_v1  ;;  %5818 = vmatpush.bf16.msrb.mxu1 %v15064_v2  ;;  %v5555_v2 = vadd.f32 %v5554_v52, %v2969_v45  ;;  %v19696_v52 = vld [vmem:[%s21331_s10 + $0x7cc] sm:$0xf] }
 0x32f   : > { %v14775_v61 = vld [vmem:[%s21331_s10 + $0x988] sm:$0xf]  ;;  %v15576_v7 = vor.u32 %v19956_v58, %v15575_v0  ;;  %5787 = vmatmul.bf16.vlgmr.msra.gmra.mxu2 %v21510_v57 }
 0x330   : > { %v19756_v4 = vld [vmem:[%s21331_s10 + $0x9a4] sm:$0xf0]  ;;  %5831 = vmatpush.bf16.msrb.mxu2 %v15320_v3 }
 0x331   : > { %v15031_v6 = vld [vmem:[%s21331_s10 + $0xb88] sm:$0xf]  ;;  %v14776_v13 = vor.u32 %v19756_v4, %v14775_v61  ;;  %5800 = vmatmul.bf16.vlgmr.msra.gmra.mxu3 %v21523_v42 }
 0x332   : > { %v19820_v8 = vld [vmem:[%s21331_s10 + $0xba4] sm:$0xf0]  ;;  %5844 = vmatpush.bf16.msrb.mxu3 %v15576_v7 }
 0x333   : > { %v15287_v9 = vld [vmem:[%s21331_s10 + $0xd88] sm:$0xf]  ;;  %v15032_v14 = vor.u32 %v19820_v8, %v15031_v6  ;;  %5806 = vmatpush.bf16.msrb.mxu0 %v14776_v13 }
 0x334   : > { %v19884_v10 = vld [vmem:[%s21331_s10 + $0xda4] sm:$0xf0] }
 0x335   : > { %v15543_v11 = vld [vmem:[%s21331_s10 + $0xf88] sm:$0xf]  ;;  %v15288_v15 = vor.u32 %v19884_v10, %v15287_v9  ;;  %5819 = vmatpush.bf16.msrb.mxu1 %v15032_v14  ;;  %v5567_v9 = vpop.f32.mrf.mxu1  ;;  %v5580_v10 = vpop.f32.mrf.mxu2 }
 0x336   : > { %v19948_v12 = vld [vmem:[%s21331_s10 + $0xfa4] sm:$0xf0] }
 0x337   : > { %v14743_v16 = vld [vmem:[%s21331_s10 + $0x948] sm:$0xf]  ;;  %v15544_v19 = vor.u32 %v19948_v12, %v15543_v11  ;;  %5832 = vmatpush.bf16.msrb.mxu2 %v15288_v15  ;;  %v5568_v12 = vadd.f32 %v5567_v9, %v5555_v2  ;;  %v19496_v2 = vld [vmem:[%s21331_s10 + $0x18c] sm:$0xf] }
 0x338   : > { %v19748_v17 = vld [vmem:[%s21331_s10 + $0x964] sm:$0xf0]  ;;  %v14265_v9 = vld [vmem:[%s21331_s10 + $0x5a8] sm:$0xf0] }
 0x339   : > { %v14999_v18 = vld [vmem:[%s21331_s10 + $0xb48] sm:$0xf]  ;;  %v14744_v55 = vor.u32 %v19748_v17, %v14743_v16  ;;  %5845 = vmatpush.bf16.msrb.mxu3 %v15544_v19 }
 0x33a   : > { %v19812_v20 = vld [vmem:[%s21331_s10 + $0xb64] sm:$0xf0] }
 0x33b   : > { %v15255_v21 = vld [vmem:[%s21331_s10 + $0xd48] sm:$0xf]  ;;  %v15000_v56 = vor.u32 %v19812_v20, %v14999_v18  ;;  %5807 = vmatpush.bf16.msrb.mxu0 %v14744_v55  ;;  %v5593_v55 = vpop.f32.mrf.mxu3 }
 0x33c   : > { %v19876_v22 = vld [vmem:[%s21331_s10 + $0xd64] sm:$0xf0] }
 0x33d   : > { %v15511_v54 = vld [vmem:[%s21331_s10 + $0xf48] sm:$0xf]  ;;  %v15256_v28 = vor.u32 %v19876_v22, %v15255_v21  ;;  %5820 = vmatpush.bf16.msrb.mxu1 %v15000_v56  ;;  %v5581_v22 = vadd.f32 %v5580_v10, %v5568_v12  ;;  %v5569_v45 = vpop.f32.mrf.mxu1  ;;  %v19688_v10 = vld [vmem:[%s21331_s10 + $0x78c] sm:$0xf] }
 0x33e   : > { %v19940_v23 = vld [vmem:[%s21331_s10 + $0xf64] sm:$0xf0]  ;;  %v19536_v45 = vld [vmem:[%s21331_s10 + $0x2cc] sm:$0xf] }
 0x33f   : > { %v14711_v24 = vld [vmem:[%s21331_s10 + $0x908] sm:$0xf]  ;;  %v15512_v29 = vor.u32 %v19940_v23, %v15511_v54  ;;  %5833 = vmatpush.bf16.msrb.mxu2 %v15256_v28 }
 0x340   : > { %v19740_v25 = vld [vmem:[%s21331_s10 + $0x924] sm:$0xf0] }
 0x341   : > { %v14967_v26 = vld [vmem:[%s21331_s10 + $0xb08] sm:$0xf]  ;;  %v14712_v37 = vor.u32 %v19740_v25, %v14711_v24  ;;  %5846 = vmatpush.bf16.msrb.mxu3 %v15512_v29  ;;  %v21847_v25 = vadd.f32 %v5593_v55, %v5581_v22  ;;  %v19680_v22 = vld [vmem:[%s21331_s10 + $0x74c] sm:$0xf] }
 0x342   : > { %v19804_v27 = vld [vmem:[%s21331_s10 + $0xb24] sm:$0xf0] }
 0x343   : > { %v15223_v30 = vld [vmem:[%s21331_s10 + $0xd08] sm:$0xf]  ;;  %v14968_v39 = vor.u32 %v19804_v27, %v14967_v26  ;;  %5808 = vmatpush.bf16.msrb.mxu0 %v14712_v37  ;;  %v5556_v26 = vpop.f32.mrf.mxu0 }
 0x344   : > { %v19868_v31 = vld [vmem:[%s21331_s10 + $0xd24] sm:$0xf0]  ;;  %v19544_v26 = vld [vmem:[%s21331_s10 + $0x30c] sm:$0xf] }
 0x345   : > { %v15479_v33 = vld [vmem:[%s21331_s10 + $0xf08] sm:$0xf]  ;;  %v15224_v40 = vor.u32 %v19868_v31, %v15223_v30  ;;  %5821 = vmatpush.bf16.msrb.mxu1 %v14968_v39 }
 0x346   : > { %v19932_v35 = vld [vmem:[%s21331_s10 + $0xf24] sm:$0xf0] }
 0x347   : > { %v14679_v38 = vld [vmem:[%s21331_s10 + $0x8c8] sm:$0xf]  ;;  %v15480_v36 = vor.u32 %v19932_v35, %v15479_v33  ;;  %5834 = vmatpush.bf16.msrb.mxu2 %v15224_v40  ;;  %v19504_v40 = vld [vmem:[%s21331_s10 + $0x1cc] sm:$0xf] }
 0x348   : > { %v19732_v41 = vld [vmem:[%s21331_s10 + $0x8e4] sm:$0xf0] }
 0x349   : > { %v14935_v44 = vld [vmem:[%s21331_s10 + $0xac8] sm:$0xf]  ;;  %v14680_v51 = vor.u32 %v19732_v41, %v14679_v38  ;;  %5847 = vmatpush.bf16.msrb.mxu3 %v15480_v36  ;;  %v13785_v41 = vld [vmem:[%s21331_s10 + $0x1e8] sm:$0xf0]  ;;  %v5582_v36 = vpop.f32.mrf.mxu2 }
 0x34a   : > { %v19796_v46 = vld [vmem:[%s21331_s10 + $0xae4] sm:$0xf0] }
 0x34b   : > { %v15191_v47 = vld [vmem:[%s21331_s10 + $0xcc8] sm:$0xf]  ;;  %v14936_v53 = vor.u32 %v19796_v46, %v14935_v44  ;;  %5809 = vmatpush.bf16.msrb.mxu0 %v14680_v51  ;;  %v19568_v44 = vld [vmem:[%s21331_s10 + $0x3cc] sm:$0xf] }
 0x34c   : > { %v19860_v48 = vld [vmem:[%s21331_s10 + $0xce4] sm:$0xf0] }
 0x34d   : > { %v15447_v49 = vld [vmem:[%s21331_s10 + $0xec8] sm:$0xf]  ;;  %v15192_v0 = vor.u32 %v19860_v48, %v15191_v47  ;;  %5822 = vmatpush.bf16.msrb.mxu1 %v14936_v53  ;;  %v14041_v47 = vld [vmem:[%s21331_s10 + $0x3e8] sm:$0xf0] }
 0x34e   : > { %v19924_v50 = vld [vmem:[%s21331_s10 + $0xee4] sm:$0xf0]  ;;  %v19632_v48 = vld [vmem:[%s21331_s10 + $0x5cc] sm:$0xf] }
 0x34f   : > { %v14647_v58 = vld [vmem:[%s21331_s10 + $0x888] sm:$0xf]  ;;  %v15448_v3 = vor.u32 %v19924_v50, %v15447_v49  ;;  %5835 = vmatpush.bf16.msrb.mxu2 %v15192_v0  ;;  %v14297_v49 = vld [vmem:[%s21331_s10 + $0x5e8] sm:$0xf0] }
 0x350   : > { %v19724_v1 = vld [vmem:[%s21331_s10 + $0x8a4] sm:$0xf0]  ;;  %v14553_v53 = vld [vmem:[%s21331_s10 + $0x7e8] sm:$0xf0] }
 0x351   : > { %v14903_v59 = vld [vmem:[%s21331_s10 + $0xa88] sm:$0xf]  ;;  %v14648_v11 = vor.u32 %v19724_v1, %v14647_v58  ;;  %5848 = vmatpush.bf16.msrb.mxu3 %v15448_v3  ;;  %v13788_v58 = vor.u32 %v19504_v40, %v13785_v41  ;;  %v14044_v1 = vor.u32 %v19568_v44, %v14041_v47  ;;  %v13753_v3 = vld [vmem:[%s21331_s10 + $0x1a8] sm:$0xf0] }
 0x352   : > { %v19788_v61 = vld [vmem:[%s21331_s10 + $0xaa4] sm:$0xf0]  ;;  %v13756_v12 = vor.u32 %v19496_v2, %v13753_v3  ;;  %v19472_v41 = vld [vmem:[%s21331_s10 + $0xcc] sm:$0xf]  ;;  %v5632_v3 = vpop.f32.mrf.mxu2 }
 0x353   : > { %v15159_v4 = vld [vmem:[%s21331_s10 + $0xc88] sm:$0xf]  ;;  %v14904_v13 = vor.u32 %v19788_v61, %v14903_v59  ;;  %5810 = vmatpush.bf16.msrb.mxu0 %v14648_v11  ;;  %v14300_v59 = vor.u32 %v19632_v48, %v14297_v49  ;;  %v19560_v61 = vld [vmem:[%s21331_s10 + $0x38c] sm:$0xf] }
 0x354   : > { %v19852_v6 = vld [vmem:[%s21331_s10 + $0xca4] sm:$0xf0]  ;;  %v14521_v11 = vld [vmem:[%s21331_s10 + $0x7a8] sm:$0xf0] }
 0x355   : > { %v15415_v7 = vld [vmem:[%s21331_s10 + $0xe88] sm:$0xf]  ;;  %v15160_v14 = vor.u32 %v19852_v6, %v15159_v4  ;;  %5823 = vmatpush.bf16.msrb.mxu1 %v14904_v13  ;;  %v5595_v4 = vpop.f32.mrf.mxu3  ;;  %v14556_v6 = vor.u32 %v19696_v52, %v14553_v53  ;;  %v13657_v44 = vld [vmem:[%s21331_s10 + $0xe8] sm:$0xf0] }
 0x356   : > { %v19916_v8 = vld [vmem:[%s21331_s10 + $0xea4] sm:$0xf0]  ;;  %v13913_v48 = vld [vmem:[%s21331_s10 + $0x2e8] sm:$0xf0] }
 0x357   : > { %v14615_v15 = vld [vmem:[%s21331_s10 + $0x848] sm:$0xf]  ;;  %v15416_v18 = vor.u32 %v19916_v8, %v15415_v7  ;;  %5836 = vmatpush.bf16.msrb.mxu2 %v15160_v14  ;;  %v14009_v7 = vld [vmem:[%s21331_s10 + $0x3a8] sm:$0xf0] }
 0x358   : > { %v19716_v16 = vld [vmem:[%s21331_s10 + $0x864] sm:$0xf0]  ;;  %v19624_v8 = vld [vmem:[%s21331_s10 + $0x58c] sm:$0xf]  ;;  %v14012_v13 = vor.u32 %v19560_v61, %v14009_v7 }
 0x359   : > { %v14871_v17 = vld [vmem:[%s21331_s10 + $0xa48] sm:$0xf]  ;;  %v14616_v24 = vor.u32 %v19716_v16, %v14615_v15  ;;  %5849 = vmatpush.bf16.msrb.mxu3 %v15416_v18  ;;  %v14268_v14 = vor.u32 %v19624_v8, %v14265_v9  ;;  %v19488_v15 = vld [vmem:[%s21331_s10 + $0x14c] sm:$0xf]  ;;  %v14524_v18 = vor.u32 %v19688_v10, %v14521_v11 }
 0x35a   : > { %v19780_v19 = vld [vmem:[%s21331_s10 + $0xa64] sm:$0xf0]  ;;  %v13721_v16 = vld [vmem:[%s21331_s10 + $0x168] sm:$0xf0] }
 0x35b   : > { %v15127_v20 = vld [vmem:[%s21331_s10 + $0xc48] sm:$0xf]  ;;  %v14872_v27 = vor.u32 %v19780_v19, %v14871_v17  ;;  %5811 = vmatpush.bf16.msrb.mxu0 %v14616_v24  ;;  %v19552_v17 = vld [vmem:[%s21331_s10 + $0x34c] sm:$0xf] }
 0x35c   : > { %v19844_v21 = vld [vmem:[%s21331_s10 + $0xc64] sm:$0xf0]  ;;  %v13977_v19 = vld [vmem:[%s21331_s10 + $0x368] sm:$0xf0] }
 0x35d   : > { %v15383_v54 = vld [vmem:[%s21331_s10 + $0xe48] sm:$0xf]  ;;  %v15128_v29 = vor.u32 %v19844_v21, %v15127_v20  ;;  %5824 = vmatpush.bf16.msrb.mxu1 %v14872_v27  ;;  %v19616_v20 = vld [vmem:[%s21331_s10 + $0x54c] sm:$0xf]  ;;  %v13980_v55 = vor.u32 %v19552_v17, %v13977_v19  ;;  %v5645_v9 = vpop.f32.mrf.mxu3 }
 0x35e   : > { %v19908_v23 = vld [vmem:[%s21331_s10 + $0xe64] sm:$0xf0]  ;;  %v14233_v21 = vld [vmem:[%s21331_s10 + $0x568] sm:$0xf0] }
 0x35f   : > { %v14583_v56 = vld [vmem:[%s21331_s10 + $0x808] sm:$0xf]  ;;  %v15384_v35 = vor.u32 %v19908_v23, %v15383_v54  ;;  %5837 = vmatpush.bf16.msrb.mxu2 %v15128_v29  ;;  %v14489_v54 = vld [vmem:[%s21331_s10 + $0x768] sm:$0xf0]  ;;  %v13724_v23 = vor.u32 %v19488_v15, %v13721_v16  ;;  %v14236_v24 = vor.u32 %v19616_v20, %v14233_v21 }
 0x360   : > { %v19708_v28 = vld [vmem:[%s21331_s10 + $0x824] sm:$0xf0]  ;;  %v14492_v27 = vor.u32 %v19680_v22, %v14489_v54  ;;  %v13945_v29 = vld [vmem:[%s21331_s10 + $0x328] sm:$0xf0] }
 0x361   : > { %v14839_v30 = vld [vmem:[%s21331_s10 + $0xa08] sm:$0xf]  ;;  %v14584_v46 = vor.u32 %v19708_v28, %v14583_v56  ;;  %5850 = vmatpush.bf16.msrb.mxu3 %v15384_v35  ;;  %v19480_v56 = vld [vmem:[%s21331_s10 + $0x10c] sm:$0xf] }
 0x362   : > { %v19772_v31 = vld [vmem:[%s21331_s10 + $0xa24] sm:$0xf0]  ;;  %v13689_v28 = vld [vmem:[%s21331_s10 + $0x128] sm:$0xf0] }
 0x363   : > { %v15095_v33 = vld [vmem:[%s21331_s10 + $0xc08] sm:$0xf]  ;;  %v14840_v50 = vor.u32 %v19772_v31, %v14839_v30  ;;  %5812 = vmatpush.bf16.msrb.mxu0 %v14584_v46  ;;  %v19608_v30 = vld [vmem:[%s21331_s10 + $0x50c] sm:$0xf]  ;;  %v5619_v46 = vpop.f32.mrf.mxu1 }
 0x364   : > { %v19836_v37 = vld [vmem:[%s21331_s10 + $0xc24] sm:$0xf0]  ;;  %v14201_v31 = vld [vmem:[%s21331_s10 + $0x528] sm:$0xf0] }
 0x365   : > { %v15351_v38 = vld [vmem:[%s21331_s10 + $0xe08] sm:$0xf]  ;;  %v15096_v51 = vor.u32 %v19836_v37, %v15095_v33  ;;  %5825 = vmatpush.bf16.msrb.mxu1 %v14840_v50  ;;  %v19672_v33 = vld [vmem:[%s21331_s10 + $0x70c] sm:$0xf]  ;;  %v13692_v37 = vor.u32 %v19480_v56, %v13689_v28  ;;  %v14204_v40 = vor.u32 %v19608_v30, %v14201_v31 }
 0x366   : > { %v19900_v39 = vld [vmem:[%s21331_s10 + $0xe24] sm:$0xf0]  ;;  %5813 = vmatmul.bf16.vlgmr.msrb.gmra.mxu0 %v21582_v62  ;;  %v14457_v35 = vld [vmem:[%s21331_s10 + $0x728] sm:$0xf0] }
 0x367   : > { %v15352_v0 = vor.u32 %v19900_v39, %v15351_v38  ;;  %5838 = vmatpush.bf16.msrb.mxu2 %v15096_v51  ;;  %5857 = vmatpush.bf16.msra.mxu0 %v13788_v58  ;;  %v5606_v38 = vpop.f32.mrf.mxu0  ;;  %v13948_v39 = vor.u32 %v19544_v26, %v13945_v29  ;;  %v14460_v47 = vor.u32 %v19672_v33, %v14457_v35  ;;  %v19600_v49 = vld [vmem:[%s21331_s10 + $0x4cc] sm:$0xf]  ;;  %v5634_v35 = vpop.f32.mrf.mxu2 }
 0x368   : > { %5826 = vmatmul.bf16.vlgmr.msrb.gmra.mxu1 %v21586_v5  ;;  %v5607_v36 = vadd.f32 %v5606_v38, %v21847_v25  ;;  %v14169_v50 = vld [vmem:[%s21331_s10 + $0x4e8] sm:$0xf0]  ;;  %v13916_v25 = vor.u32 %v19536_v45, %v13913_v48 }
 0x369   : > { %5851 = vmatpush.bf16.msrb.mxu3 %v15352_v0  ;;  %5870 = vmatpush.bf16.msra.mxu1 %v14044_v1  ;;  %v19664_v51 = vld [vmem:[%s21331_s10 + $0x6cc] sm:$0xf]  ;;  %v13660_v0 = vor.u32 %v19472_v41, %v13657_v44  ;;  %v14172_v58 = vor.u32 %v19600_v49, %v14169_v50  ;;  %v5647_v41 = vpop.f32.mrf.mxu3 }
 0x36a   : > { %5839 = vmatmul.bf16.vlgmr.msrb.gmra.mxu2 %v21578_v60  ;;  %v14425_v52 = vld [vmem:[%s21331_s10 + $0x6e8] sm:$0xf0]  ;;  %v5620_v53 = vadd.f32 %v5619_v46, %v5607_v36 }
 0x36b   : > { %5883 = vmatpush.bf16.msra.mxu2 %v14300_v59  ;;  %5858 = vmatpush.bf16.msra.mxu0 %v13756_v12  ;;  %v19464_v1 = vld [vmem:[%s21331_s10 + $0x8c] sm:$0xf]  ;;  %v14428_v61 = vor.u32 %v19664_v51, %v14425_v52  ;;  %v5621_v20 = vpop.f32.mrf.mxu1 }
 0x36c   : > { %5852 = vmatmul.bf16.vlgmr.msrb.gmra.mxu3 %v21584_v63  ;;  %v13625_v59 = vld [vmem:[%s21331_s10 + $0xa8] sm:$0xf0]  ;;  %v5633_v8 = vadd.f32 %v5632_v3, %v5620_v53 }
 0x36d   : > { %5896 = vmatpush.bf16.msra.mxu3 %v14556_v6  ;;  %5871 = vmatpush.bf16.msra.mxu1 %v14012_v13  ;;  %v19528_v2 = vld [vmem:[%s21331_s10 + $0x28c] sm:$0xf]  ;;  %v13628_v12 = vor.u32 %v19464_v1, %v13625_v59 }
 0x36e   : > { %v13881_v4 = vld [vmem:[%s21331_s10 + $0x2a8] sm:$0xf0]  ;;  %v21908_v13 = vadd.f32 %v5645_v9, %v5633_v8 }
 0x36f   : > { %5884 = vmatpush.bf16.msra.mxu2 %v14268_v14  ;;  %5859 = vmatpush.bf16.msra.mxu0 %v13724_v23  ;;  %v19592_v6 = vld [vmem:[%s21331_s10 + $0x48c] sm:$0xf]  ;;  %v5608_v14 = vpop.f32.mrf.mxu0  ;;  %v13884_v15 = vor.u32 %v19528_v2, %v13881_v4 }
 0x370   : > { %v14137_v7 = vld [vmem:[%s21331_s10 + $0x4a8] sm:$0xf0]  ;;  %vm6377_vm12 = vcmp.ge.f32.partialorder %v21908_v13, 0.0 }
 0x371   : > { %5897 = vmatpush.bf16.msra.mxu3 %v14524_v18  ;;  %5872 = vmatpush.bf16.msra.mxu1 %v13980_v55  ;;  %v19656_v10 = vld [vmem:[%s21331_s10 + $0x68c] sm:$0xf]  ;;  %v14140_v16 = vor.u32 %v19592_v6, %v14137_v7 }
 0x372   : > { %v14393_v11 = vld [vmem:[%s21331_s10 + $0x6a8] sm:$0xf0] }
 0x373   : > { %5885 = vmatpush.bf16.msra.mxu2 %v14236_v24  ;;  %5860 = vmatpush.bf16.msra.mxu0 %v13692_v37  ;;  %v19456_v17 = vld [vmem:[%s21331_s10 + $0x4c] sm:$0xf]  ;;  %v14396_v21 = vor.u32 %v19656_v10, %v14393_v11 }
 0x374   : > { %v13593_v18 = vld [vmem:[%s21331_s10 + $0x68] sm:$0xf0] }
 0x375   : > { %5898 = vmatpush.bf16.msra.mxu3 %v14492_v27  ;;  %5873 = vmatpush.bf16.msra.mxu1 %v13948_v39  ;;  %v19520_v19 = vld [vmem:[%s21331_s10 + $0x24c] sm:$0xf]  ;;  %v13596_v56 = vor.u32 %v19456_v17, %v13593_v18 }
 0x376   : > { %v13849_v22 = vld [vmem:[%s21331_s10 + $0x268] sm:$0xf0] }
 0x377   : > { %5886 = vmatpush.bf16.msra.mxu2 %v14204_v40  ;;  %5861 = vmatpush.bf16.msra.mxu0 %v13660_v0  ;;  %v19584_v54 = vld [vmem:[%s21331_s10 + $0x44c] sm:$0xf]  ;;  %v13852_v27 = vor.u32 %v19520_v19, %v13849_v22 }
 0x378   : > { %v14105_v23 = vld [vmem:[%s21331_s10 + $0x468] sm:$0xf0] }
 0x379   : > { %5899 = vmatpush.bf16.msra.mxu3 %v14460_v47  ;;  %5874 = vmatpush.bf16.msra.mxu1 %v13916_v25  ;;  %v19648_v55 = vld [vmem:[%s21331_s10 + $0x64c] sm:$0xf]  ;;  %v14108_v29 = vor.u32 %v19584_v54, %v14105_v23 }
 0x37a   : > { %v14361_v24 = vld [vmem:[%s21331_s10 + $0x668] sm:$0xf0] }
 0x37b   : > { %5887 = vmatpush.bf16.msra.mxu2 %v14172_v58  ;;  %5862 = vmatpush.bf16.msra.mxu0 %v13628_v12  ;;  %v19448_v28 = vld [vmem:[%s21331_s10 + $0xc] sm:$0xf]  ;;  %v14364_v37 = vor.u32 %v19648_v55, %v14361_v24 }
 0x37c   : > { %v13561_v26 = vld [vmem:[%s21331_s10 + $0x28] sm:$0xf0] }
 0x37d   : > { %5900 = vmatpush.bf16.msra.mxu3 %v14428_v61  ;;  %5875 = vmatpush.bf16.msra.mxu1 %v13884_v15  ;;  %v19512_v30 = vld [vmem:[%s21331_s10 + $0x20c] sm:$0xf]  ;;  %v13564_v46 = vor.u32 %v19448_v28, %v13561_v26  ;;  %v2970_v26 = vperm.slane %v21816_v32, 1 }
 0x37e   : > { %v13817_v31 = vld [vmem:[%s21331_s10 + $0x228] sm:$0xf0] }
 0x37f   : > { %5888 = vmatpush.bf16.msra.mxu2 %v14140_v16  ;;  %v19576_v33 = vld [vmem:[%s21331_s10 + $0x40c] sm:$0xf]  ;;  %5863 = vmatpush.bf16.msra.mxu0 %v13596_v56  ;;  %v13820_v50 = vor.u32 %v19512_v30, %v13817_v31 }
 0x380   : > { %v14073_v38 = vld [vmem:[%s21331_s10 + $0x428] sm:$0xf0] }
 0x381   : > { %5901 = vmatpush.bf16.msra.mxu3 %v14396_v21  ;;  %v19640_v39 = vld [vmem:[%s21331_s10 + $0x60c] sm:$0xf]  ;;  %5876 = vmatpush.bf16.msra.mxu1 %v13852_v27  ;;  %v14076_v51 = vor.u32 %v19576_v33, %v14073_v38  ;;  %v5658_v38 = vpop.f32.mrf.mxu0 }
 0x382   : > { %v14329_v40 = vld [vmem:[%s21331_s10 + $0x628] sm:$0xf0] }
 0x383   : > { %v19760_v44 = vld [vmem:[%s21331_s10 + $0x9cc] sm:$0xf]  ;;  %5889 = vmatpush.bf16.msra.mxu2 %v14108_v29  ;;  %v14332_v0 = vor.u32 %v19640_v39, %v14329_v40  ;;  %5864 = vmatpush.bf16.msra.mxu0 %v13564_v46 }
 0x384   : > { %v14809_v45 = vld [vmem:[%s21331_s10 + $0x9e8] sm:$0xf0] }
 0x385   : > { %v19824_v36 = vld [vmem:[%s21331_s10 + $0xbcc] sm:$0xf]  ;;  %5902 = vmatpush.bf16.msra.mxu3 %v14364_v37  ;;  %v14812_v25 = vor.u32 %v19760_v44, %v14809_v45  ;;  %5877 = vmatpush.bf16.msra.mxu1 %v13820_v50  ;;  %v5659_v45 = vadd.f32 %v5658_v38, %v2970_v26 }
 0x386   : > { %v15065_v47 = vld [vmem:[%s21331_s10 + $0xbe8] sm:$0xf0]  ;;  %5865 = vmatmul.bf16.vlgmr.msra.gmra.mxu0 %v21518_v34 }
 0x387   : > { %v19888_v48 = vld [vmem:[%s21331_s10 + $0xdcc] sm:$0xf]  ;;  %v15068_v58 = vor.u32 %v19824_v36, %v15065_v47  ;;  %5890 = vmatpush.bf16.msra.mxu2 %v14076_v51  ;;  %5909 = vmatpush.bf16.msrb.mxu0 %v14812_v25  ;;  %v5671_v36 = vpop.f32.mrf.mxu1 }
 0x388   : > { %v15321_v49 = vld [vmem:[%s21331_s10 + $0xde8] sm:$0xf0]  ;;  %5878 = vmatmul.bf16.vlgmr.msra.gmra.mxu1 %v21525_v43 }
 0x389   : > { %v19952_v52 = vld [vmem:[%s21331_s10 + $0xfcc] sm:$0xf]  ;;  %v15324_v1 = vor.u32 %v19888_v48, %v15321_v49  ;;  %5903 = vmatpush.bf16.msra.mxu3 %v14332_v0  ;;  %5922 = vmatpush.bf16.msrb.mxu1 %v15068_v58 }
 0x38a   : > { %v15577_v53 = vld [vmem:[%s21331_s10 + $0xfe8] sm:$0xf0]  ;;  %5891 = vmatmul.bf16.vlgmr.msra.gmra.mxu2 %v21510_v57 }
 0x38b   : > { %v19752_v59 = vld [vmem:[%s21331_s10 + $0x98c] sm:$0xf]  ;;  %v15580_v61 = vor.u32 %v19952_v52, %v15577_v53  ;;  %5935 = vmatpush.bf16.msrb.mxu2 %v15324_v1  ;;  %v5672_v52 = vadd.f32 %v5671_v36, %v5659_v45  ;;  %v14047_v45 = vld [vmem:[%s21331_s10 + $0x3d0] sm:$0xf] }
 0x38c   : > { %v14777_v2 = vld [vmem:[%s21331_s10 + $0x9a8] sm:$0xf0]  ;;  %5904 = vmatmul.bf16.vlgmr.msra.gmra.mxu3 %v21523_v42 }
 0x38d   : > { %v19816_v3 = vld [vmem:[%s21331_s10 + $0xb8c] sm:$0xf]  ;;  %v14780_v10 = vor.u32 %v19752_v59, %v14777_v2  ;;  %5948 = vmatpush.bf16.msrb.mxu3 %v15580_v61  ;;  %v5684_v2 = vpop.f32.mrf.mxu2 }
 0x38e   : > { %v15033_v4 = vld [vmem:[%s21331_s10 + $0xba8] sm:$0xf0] }
 0x38f   : > { %v19880_v6 = vld [vmem:[%s21331_s10 + $0xd8c] sm:$0xf]  ;;  %v15036_v11 = vor.u32 %v19816_v3, %v15033_v4  ;;  %5910 = vmatpush.bf16.msrb.mxu0 %v14780_v10 }
 0x390   : > { %v15289_v7 = vld [vmem:[%s21331_s10 + $0xda8] sm:$0xf0] }
 0x391   : > { %v19944_v8 = vld [vmem:[%s21331_s10 + $0xf8c] sm:$0xf]  ;;  %v15292_v12 = vor.u32 %v19880_v6, %v15289_v7  ;;  %5923 = vmatpush.bf16.msrb.mxu1 %v15036_v11  ;;  %v5685_v7 = vadd.f32 %v5684_v2, %v5672_v52  ;;  %v19701_v52 = vld [vmem:[%s21331_s10 + $0x7ec] sm:$0xf0] }
 0x392   : > { %v15545_v9 = vld [vmem:[%s21331_s10 + $0xfa8] sm:$0xf0]  ;;  %v14015_v2 = vld [vmem:[%s21331_s10 + $0x390] sm:$0xf] }
 0x393   : > { %v19744_v14 = vld [vmem:[%s21331_s10 + $0x94c] sm:$0xf]  ;;  %v15548_v17 = vor.u32 %v19944_v8, %v15545_v9  ;;  %5936 = vmatpush.bf16.msrb.mxu2 %v15292_v12  ;;  %v5697_v8 = vpop.f32.mrf.mxu3 }
 0x394   : > { %v14745_v15 = vld [vmem:[%s21331_s10 + $0x968] sm:$0xf0]  ;;  %v21979_v12 = vadd.f32 %v5697_v8, %v5685_v7  ;;  %v14527_v7 = vld [vmem:[%s21331_s10 + $0x790] sm:$0xf] }
 0x395   : > { %v19808_v16 = vld [vmem:[%s21331_s10 + $0xb4c] sm:$0xf]  ;;  %v14748_v54 = vor.u32 %v19744_v14, %v14745_v15  ;;  %5949 = vmatpush.bf16.msrb.mxu3 %v15548_v17  ;;  %v5660_v14 = vpop.f32.mrf.mxu0  ;;  %v19693_v8 = vld [vmem:[%s21331_s10 + $0x7ac] sm:$0xf0] }
 0x396   : > { %v15001_v18 = vld [vmem:[%s21331_s10 + $0xb68] sm:$0xf0]  ;;  %v13727_v14 = vld [vmem:[%s21331_s10 + $0x150] sm:$0xf] }
 0x397   : > { %v19872_v19 = vld [vmem:[%s21331_s10 + $0xd4c] sm:$0xf]  ;;  %v15004_v55 = vor.u32 %v19808_v16, %v15001_v18  ;;  %5911 = vmatpush.bf16.msrb.mxu0 %v14748_v54 }
 0x398   : > { %v15257_v20 = vld [vmem:[%s21331_s10 + $0xd68] sm:$0xf0] }
 0x399   : > { %v19936_v21 = vld [vmem:[%s21331_s10 + $0xf4c] sm:$0xf]  ;;  %v15260_v24 = vor.u32 %v19872_v19, %v15257_v20  ;;  %5924 = vmatpush.bf16.msrb.mxu1 %v15004_v55  ;;  %v5673_v20 = vpop.f32.mrf.mxu1 }
 0x39a   : > { %v15513_v22 = vld [vmem:[%s21331_s10 + $0xf68] sm:$0xf0]  ;;  %v19621_v20 = vld [vmem:[%s21331_s10 + $0x56c] sm:$0xf0] }
 0x39b   : > { %v19736_v23 = vld [vmem:[%s21331_s10 + $0x90c] sm:$0xf]  ;;  %v15516_v27 = vor.u32 %v19936_v21, %v15513_v22  ;;  %5937 = vmatpush.bf16.msrb.mxu2 %v15260_v24 }
 0x39c   : > { %v14713_v56 = vld [vmem:[%s21331_s10 + $0x928] sm:$0xf0] }
 0x39d   : > { %v19800_v28 = vld [vmem:[%s21331_s10 + $0xb0c] sm:$0xf]  ;;  %v14716_v37 = vor.u32 %v19736_v23, %v14713_v56  ;;  %5950 = vmatpush.bf16.msrb.mxu3 %v15516_v27 }
 0x39e   : > { %v14969_v29 = vld [vmem:[%s21331_s10 + $0xb28] sm:$0xf0] }
 0x39f   : > { %v19864_v30 = vld [vmem:[%s21331_s10 + $0xd0c] sm:$0xf]  ;;  %v14972_v32 = vor.u32 %v19800_v28, %v14969_v29  ;;  %5912 = vmatpush.bf16.msrb.mxu0 %v14716_v37 }
 0x3a0   : > { %v15225_v31 = vld [vmem:[%s21331_s10 + $0xd28] sm:$0xf0] }
 0x3a1   : > { %v19928_v33 = vld [vmem:[%s21331_s10 + $0xf0c] sm:$0xf]  ;;  %v15228_v39 = vor.u32 %v19864_v30, %v15225_v31  ;;  %5925 = vmatpush.bf16.msrb.mxu1 %v14972_v32 }
 0x3a2   : > { %v15481_v35 = vld [vmem:[%s21331_s10 + $0xf28] sm:$0xf0] }
 0x3a3   : > { %v19728_v40 = vld [vmem:[%s21331_s10 + $0x8cc] sm:$0xf]  ;;  %v15484_v46 = vor.u32 %v19928_v33, %v15481_v35  ;;  %5938 = vmatpush.bf16.msrb.mxu2 %v15228_v39  ;;  %v5686_v35 = vpop.f32.mrf.mxu2 }
 0x3a4   : > { %v14681_v41 = vld [vmem:[%s21331_s10 + $0x8e8] sm:$0xf0] }
 0x3a5   : > { %v19792_v44 = vld [vmem:[%s21331_s10 + $0xacc] sm:$0xf]  ;;  %v14684_v53 = vor.u32 %v19728_v40, %v14681_v41  ;;  %5951 = vmatpush.bf16.msrb.mxu3 %v15484_v46  ;;  %v5699_v40 = vpop.f32.mrf.mxu3  ;;  %v13791_v41 = vld [vmem:[%s21331_s10 + $0x1d0] sm:$0xf] }
 0x3a6   : > { %v14937_v47 = vld [vmem:[%s21331_s10 + $0xae8] sm:$0xf0]  ;;  %v19573_v46 = vld [vmem:[%s21331_s10 + $0x3ec] sm:$0xf0] }
 0x3a7   : > { %v19856_v48 = vld [vmem:[%s21331_s10 + $0xccc] sm:$0xf]  ;;  %v14940_v0 = vor.u32 %v19792_v44, %v14937_v47  ;;  %5913 = vmatpush.bf16.msrb.mxu0 %v14684_v53  ;;  %v19509_v44 = vld [vmem:[%s21331_s10 + $0x1ec] sm:$0xf0] }
 0x3a8   : > { %v15193_v49 = vld [vmem:[%s21331_s10 + $0xce8] sm:$0xf0]  ;;  %v14303_v47 = vld [vmem:[%s21331_s10 + $0x5d0] sm:$0xf] }
 0x3a9   : > { %v19920_v50 = vld [vmem:[%s21331_s10 + $0xecc] sm:$0xf]  ;;  %v15196_v25 = vor.u32 %v19856_v48, %v15193_v49  ;;  %5926 = vmatpush.bf16.msrb.mxu1 %v14940_v0  ;;  %v19637_v48 = vld [vmem:[%s21331_s10 + $0x5ec] sm:$0xf0]  ;;  %v13792_v0 = vor.u32 %v19509_v44, %v13791_v41 }
 0x3aa   : > { %v15449_v51 = vld [vmem:[%s21331_s10 + $0xee8] sm:$0xf0]  ;;  %v19477_v40 = vld [vmem:[%s21331_s10 + $0xec] sm:$0xf0] }
 0x3ab   : > { %v19720_v58 = vld [vmem:[%s21331_s10 + $0x88c] sm:$0xf]  ;;  %v15452_v3 = vor.u32 %v19920_v50, %v15449_v51  ;;  %5939 = vmatpush.bf16.msrb.mxu2 %v15196_v25  ;;  %v14559_v51 = vld [vmem:[%s21331_s10 + $0x7d0] sm:$0xf]  ;;  %v14048_v25 = vor.u32 %v19573_v46, %v14047_v45  ;;  %v5723_v45 = vpop.f32.mrf.mxu1 }
 0x3ac   : > { %v14649_v1 = vld [vmem:[%s21331_s10 + $0x8a8] sm:$0xf0]  ;;  %v13919_v41 = vld [vmem:[%s21331_s10 + $0x2d0] sm:$0xf] }
 0x3ad   : > { %v19784_v59 = vld [vmem:[%s21331_s10 + $0xa8c] sm:$0xf]  ;;  %v14652_v11 = vor.u32 %v19720_v58, %v14649_v1  ;;  %5952 = vmatpush.bf16.msrb.mxu3 %v15452_v3  ;;  %v14304_v58 = vor.u32 %v19637_v48, %v14303_v47  ;;  %v13759_v1 = vld [vmem:[%s21331_s10 + $0x190] sm:$0xf]  ;;  %v14560_v3 = vor.u32 %v19701_v52, %v14559_v51 }
 0x3ae   : > { %v14905_v61 = vld [vmem:[%s21331_s10 + $0xaa8] sm:$0xf0]  ;;  %v19541_v46 = vld [vmem:[%s21331_s10 + $0x2ec] sm:$0xf0] }
 0x3af   : > { %v19848_v4 = vld [vmem:[%s21331_s10 + $0xc8c] sm:$0xf]  ;;  %v14908_v15 = vor.u32 %v19784_v59, %v14905_v61  ;;  %5914 = vmatpush.bf16.msrb.mxu0 %v14652_v11  ;;  %v19501_v59 = vld [vmem:[%s21331_s10 + $0x1ac] sm:$0xf0] }
 0x3b0   : > { %v15161_v6 = vld [vmem:[%s21331_s10 + $0xca8] sm:$0xf0]  ;;  %v19565_v61 = vld [vmem:[%s21331_s10 + $0x3ac] sm:$0xf0] }
 0x3b1   : > { %v19912_v9 = vld [vmem:[%s21331_s10 + $0xe8c] sm:$0xf]  ;;  %v15164_v16 = vor.u32 %v19848_v4, %v15161_v6  ;;  %5927 = vmatpush.bf16.msrb.mxu1 %v14908_v15  ;;  %v14271_v4 = vld [vmem:[%s21331_s10 + $0x590] sm:$0xf] }
 0x3b2   : > { %v15417_v10 = vld [vmem:[%s21331_s10 + $0xea8] sm:$0xf0]  ;;  %v19629_v6 = vld [vmem:[%s21331_s10 + $0x5ac] sm:$0xf0] }
 0x3b3   : > { %v19712_v17 = vld [vmem:[%s21331_s10 + $0x84c] sm:$0xf]  ;;  %v15420_v21 = vor.u32 %v19912_v9, %v15417_v10  ;;  %5940 = vmatpush.bf16.msrb.mxu2 %v15164_v16  ;;  %v13760_v9 = vor.u32 %v19501_v59, %v13759_v1  ;;  %v14016_v10 = vor.u32 %v19565_v61, %v14015_v2  ;;  %v14272_v11 = vor.u32 %v19629_v6, %v14271_v4  ;;  %v19493_v15 = vld [vmem:[%s21331_s10 + $0x16c] sm:$0xf0]  ;;  %v5736_v1 = vpop.f32.mrf.mxu2  ;;  %v5749_v6 = vpop.f32.mrf.mxu3 }
 0x3b4   : > { %v14617_v18 = vld [vmem:[%s21331_s10 + $0x868] sm:$0xf0]  ;;  %v13983_v16 = vld [vmem:[%s21331_s10 + $0x350] sm:$0xf] }
 0x3b5   : > { %v19776_v19 = vld [vmem:[%s21331_s10 + $0xa4c] sm:$0xf]  ;;  %v14620_v56 = vor.u32 %v19712_v17, %v14617_v18  ;;  %5953 = vmatpush.bf16.msrb.mxu3 %v15420_v21  ;;  %v14528_v17 = vor.u32 %v19693_v8, %v14527_v7  ;;  %v19557_v18 = vld [vmem:[%s21331_s10 + $0x36c] sm:$0xf0] }
 0x3b6   : > { %v14873_v22 = vld [vmem:[%s21331_s10 + $0xa68] sm:$0xf0]  ;;  %v14495_v21 = vld [vmem:[%s21331_s10 + $0x750] sm:$0xf] }
 0x3b7   : > { %v19840_v54 = vld [vmem:[%s21331_s10 + $0xc4c] sm:$0xf]  ;;  %v14876_v27 = vor.u32 %v19776_v19, %v14873_v22  ;;  %5915 = vmatpush.bf16.msrb.mxu0 %v14620_v56  ;;  %v14239_v19 = vld [vmem:[%s21331_s10 + $0x550] sm:$0xf] }
 0x3b8   : > { %v15129_v23 = vld [vmem:[%s21331_s10 + $0xc68] sm:$0xf0]  ;;  %v19685_v22 = vld [vmem:[%s21331_s10 + $0x76c] sm:$0xf0] }
 0x3b9   : > { %v19904_v55 = vld [vmem:[%s21331_s10 + $0xe4c] sm:$0xf]  ;;  %v15132_v29 = vor.u32 %v19840_v54, %v15129_v23  ;;  %5928 = vmatpush.bf16.msrb.mxu1 %v14876_v27  ;;  %v13728_v54 = vor.u32 %v19493_v15, %v13727_v14  ;;  %v13984_v23 = vor.u32 %v19557_v18, %v13983_v16  ;;  %v19485_v56 = vld [vmem:[%s21331_s10 + $0x12c] sm:$0xf0] }
 0x3ba   : > { %v15385_v24 = vld [vmem:[%s21331_s10 + $0xe68] sm:$0xf0]  ;;  %v19549_v27 = vld [vmem:[%s21331_s10 + $0x32c] sm:$0xf0] }
 0x3bb   : > { %v19704_v28 = vld [vmem:[%s21331_s10 + $0x80c] sm:$0xf]  ;;  %v15388_v37 = vor.u32 %v19904_v55, %v15385_v24  ;;  %5941 = vmatpush.bf16.msrb.mxu2 %v15132_v29  ;;  %v14240_v55 = vor.u32 %v19621_v20, %v14239_v19  ;;  %v13695_v24 = vld [vmem:[%s21331_s10 + $0x110] sm:$0xf]  ;;  %v5725_v19 = vpop.f32.mrf.mxu1 }
 0x3bc   : > { %v14585_v26 = vld [vmem:[%s21331_s10 + $0x828] sm:$0xf0]  ;;  %v14207_v29 = vld [vmem:[%s21331_s10 + $0x510] sm:$0xf]  ;;  %v13696_v35 = vor.u32 %v19485_v56, %v13695_v24 }
 0x3bd   : > { %v19768_v30 = vld [vmem:[%s21331_s10 + $0xa0c] sm:$0xf]  ;;  %v14588_v36 = vor.u32 %v19704_v28, %v14585_v26  ;;  %5954 = vmatpush.bf16.msrb.mxu3 %v15388_v37  ;;  %v13951_v28 = vld [vmem:[%s21331_s10 + $0x310] sm:$0xf]  ;;  %v14496_v26 = vor.u32 %v19685_v22, %v14495_v21  ;;  %v5710_v37 = vpop.f32.mrf.mxu0 }
 0x3be   : > { %v14841_v31 = vld [vmem:[%s21331_s10 + $0xa28] sm:$0xf0]  ;;  %v5711_v44 = vadd.f32 %v5710_v37, %v21979_v12  ;;  %v14175_v47 = vld [vmem:[%s21331_s10 + $0x4d0] sm:$0xf]  ;;  %v13920_v12 = vor.u32 %v19541_v46, %v13919_v41 }
 0x3bf   : > { %v19832_v33 = vld [vmem:[%s21331_s10 + $0xc0c] sm:$0xf]  ;;  %v14844_v49 = vor.u32 %v19768_v30, %v14841_v31  ;;  %5916 = vmatpush.bf16.msrb.mxu0 %v14588_v36  ;;  %v19613_v30 = vld [vmem:[%s21331_s10 + $0x52c] sm:$0xf0] }
 0x3c0   : > { %v15097_v38 = vld [vmem:[%s21331_s10 + $0xc28] sm:$0xf0]  ;;  %v14463_v31 = vld [vmem:[%s21331_s10 + $0x710] sm:$0xf]  ;;  %v5724_v51 = vadd.f32 %v5723_v45, %v5711_v44 }
 0x3c1   : > { %v19896_v32 = vld [vmem:[%s21331_s10 + $0xe0c] sm:$0xf]  ;;  %v15100_v50 = vor.u32 %v19832_v33, %v15097_v38  ;;  %5929 = vmatpush.bf16.msrb.mxu1 %v14844_v49  ;;  %v19677_v33 = vld [vmem:[%s21331_s10 + $0x72c] sm:$0xf0]  ;;  %v13952_v38 = vor.u32 %v19549_v27, %v13951_v28 }
 0x3c2   : > { %v15353_v39 = vld [vmem:[%s21331_s10 + $0xe28] sm:$0xf0]  ;;  %5917 = vmatmul.bf16.vlgmr.msrb.gmra.mxu0 %v21582_v62  ;;  %v14464_v36 = vor.u32 %v19677_v33, %v14463_v31  ;;  %v19605_v48 = vld [vmem:[%s21331_s10 + $0x4ec] sm:$0xf0]  ;;  %v5737_v4 = vadd.f32 %v5736_v1, %v5724_v51  ;;  %v5738_v33 = vpop.f32.mrf.mxu2 }
 0x3c3   : > { %v15356_v53 = vor.u32 %v19896_v32, %v15353_v39  ;;  %5942 = vmatpush.bf16.msrb.mxu2 %v15100_v50  ;;  %5961 = vmatpush.bf16.msra.mxu0 %v13792_v0  ;;  %v14208_v32 = vor.u32 %v19613_v30, %v14207_v29  ;;  %v13663_v39 = vld [vmem:[%s21331_s10 + $0xd0] sm:$0xf] }
 0x3c4   : > { %5930 = vmatmul.bf16.vlgmr.msrb.gmra.mxu1 %v21586_v5  ;;  %v14431_v49 = vld [vmem:[%s21331_s10 + $0x6d0] sm:$0xf]  ;;  %v13664_v52 = vor.u32 %v19477_v40, %v13663_v39  ;;  %v5751_v39 = vpop.f32.mrf.mxu3 }
 0x3c5   : > { %5955 = vmatpush.bf16.msrb.mxu3 %v15356_v53  ;;  %5974 = vmatpush.bf16.msra.mxu1 %v14048_v25  ;;  %v19669_v50 = vld [vmem:[%s21331_s10 + $0x6ec] sm:$0xf0]  ;;  %v14176_v53 = vor.u32 %v19605_v48, %v14175_v47 }
 0x3c6   : > { %5943 = vmatmul.bf16.vlgmr.msrb.gmra.mxu2 %v21578_v60  ;;  %v13631_v0 = vld [vmem:[%s21331_s10 + $0x90] sm:$0xf]  ;;  %v14432_v59 = vor.u32 %v19669_v50, %v14431_v49 }
 0x3c7   : > { %5987 = vmatpush.bf16.msra.mxu2 %v14304_v58  ;;  %5962 = vmatpush.bf16.msra.mxu0 %v13760_v9  ;;  %v19469_v25 = vld [vmem:[%s21331_s10 + $0xac] sm:$0xf0] }
 0x3c8   : > { %5956 = vmatmul.bf16.vlgmr.msrb.gmra.mxu3 %v21584_v63  ;;  %v13887_v58 = vld [vmem:[%s21331_s10 + $0x290] sm:$0xf]  ;;  %v13632_v9 = vor.u32 %v19469_v25, %v13631_v0 }
 0x3c9   : > { %6000 = vmatpush.bf16.msra.mxu3 %v14560_v3  ;;  %5975 = vmatpush.bf16.msra.mxu1 %v14016_v10  ;;  %v19533_v2 = vld [vmem:[%s21331_s10 + $0x2ac] sm:$0xf0]  ;;  %v22050_v10 = vadd.f32 %v5749_v6, %v5737_v4 }
 0x3ca   : > { %v14143_v3 = vld [vmem:[%s21331_s10 + $0x490] sm:$0xf]  ;;  %v13888_v14 = vor.u32 %v19533_v2, %v13887_v58 }
 0x3cb   : > { %5988 = vmatpush.bf16.msra.mxu2 %v14272_v11  ;;  %5963 = vmatpush.bf16.msra.mxu0 %v13728_v54  ;;  %v19597_v61 = vld [vmem:[%s21331_s10 + $0x4ac] sm:$0xf0]  ;;  %v5712_v11 = vpop.f32.mrf.mxu0  ;;  %vm6378_vm13 = vcmp.ge.f32.partialorder %v22050_v10, 0.0 }
 0x3cc   : > { %v14399_v7 = vld [vmem:[%s21331_s10 + $0x690] sm:$0xf]  ;;  %v14144_v15 = vor.u32 %v19597_v61, %v14143_v3 }
 0x3cd   : > { %6001 = vmatpush.bf16.msra.mxu3 %v14528_v17  ;;  %5976 = vmatpush.bf16.msra.mxu1 %v13984_v23  ;;  %v19661_v8 = vld [vmem:[%s21331_s10 + $0x6ac] sm:$0xf0] }
 0x3ce   : > { %v13599_v16 = vld [vmem:[%s21331_s10 + $0x50] sm:$0xf]  ;;  %v14400_v20 = vor.u32 %v19661_v8, %v14399_v7 }
 0x3cf   : > { %5989 = vmatpush.bf16.msra.mxu2 %v14240_v55  ;;  %5964 = vmatpush.bf16.msra.mxu0 %v13696_v35  ;;  %v19461_v17 = vld [vmem:[%s21331_s10 + $0x6c] sm:$0xf0] }
 0x3d0   : > { %v13855_v18 = vld [vmem:[%s21331_s10 + $0x250] sm:$0xf]  ;;  %v13600_v24 = vor.u32 %v19461_v17, %v13599_v16 }
 0x3d1   : > { %6002 = vmatpush.bf16.msra.mxu3 %v14496_v26  ;;  %5977 = vmatpush.bf16.msra.mxu1 %v13952_v38  ;;  %v19525_v21 = vld [vmem:[%s21331_s10 + $0x26c] sm:$0xf0] }
 0x3d2   : > { %v14111_v22 = vld [vmem:[%s21331_s10 + $0x450] sm:$0xf]  ;;  %v13856_v26 = vor.u32 %v19525_v21, %v13855_v18 }
 0x3d3   : > { %5990 = vmatpush.bf16.msra.mxu2 %v14208_v32  ;;  %5965 = vmatpush.bf16.msra.mxu0 %v13664_v52  ;;  %v19589_v54 = vld [vmem:[%s21331_s10 + $0x46c] sm:$0xf0] }
 0x3d4   : > { %v14367_v23 = vld [vmem:[%s21331_s10 + $0x650] sm:$0xf]  ;;  %v14112_v27 = vor.u32 %v19589_v54, %v14111_v22 }
 0x3d5   : > { %6003 = vmatpush.bf16.msra.mxu3 %v14464_v36  ;;  %5978 = vmatpush.bf16.msra.mxu1 %v13920_v12  ;;  %v19653_v55 = vld [vmem:[%s21331_s10 + $0x66c] sm:$0xf0] }
 0x3d6   : > { %v13567_v56 = vld [vmem:[%s21331_s10 + $0x10] sm:$0xf]  ;;  %v14368_v35 = vor.u32 %v19653_v55, %v14367_v23 }
 0x3d7   : > { %5991 = vmatpush.bf16.msra.mxu2 %v14176_v53  ;;  %5966 = vmatpush.bf16.msra.mxu0 %v13632_v9  ;;  %v19453_v28 = vld [vmem:[%s21331_s10 + $0x2c] sm:$0xf0] }
 0x3d8   : > { %v13823_v29 = vld [vmem:[%s21331_s10 + $0x210] sm:$0xf]  ;;  %v13568_v45 = vor.u32 %v19453_v28, %v13567_v56  ;;  %v22100_v28 = vld [vmem:[%s21813_s12] sm:$0xff] }
 0x3d9   : > { %6004 = vmatpush.bf16.msra.mxu3 %v14432_v59  ;;  %5979 = vmatpush.bf16.msra.mxu1 %v13888_v14  ;;  %v19517_v30 = vld [vmem:[%s21331_s10 + $0x22c] sm:$0xf0] }
 0x3da   : > { %v14079_v31 = vld [vmem:[%s21331_s10 + $0x410] sm:$0xf]  ;;  %v13824_v48 = vor.u32 %v19517_v30, %v13823_v29 }
 0x3db   : > { %5992 = vmatpush.bf16.msra.mxu2 %v14144_v15  ;;  %v19581_v37 = vld [vmem:[%s21331_s10 + $0x42c] sm:$0xf0]  ;;  %5967 = vmatpush.bf16.msra.mxu0 %v13600_v24 }
 0x3dc   : > { %v14335_v38 = vld [vmem:[%s21331_s10 + $0x610] sm:$0xf]  ;;  %v14080_v49 = vor.u32 %v19581_v37, %v14079_v31 }
 0x3dd   : > { %6005 = vmatpush.bf16.msra.mxu3 %v14400_v20  ;;  %v19645_v32 = vld [vmem:[%s21331_s10 + $0x62c] sm:$0xf0]  ;;  %5980 = vmatpush.bf16.msra.mxu1 %v13856_v26  ;;  %v2971_v26 = vperm.slane %v22100_v28, 2 }
 0x3de   : > { %v14815_v40 = vld [vmem:[%s21331_s10 + $0x9d0] sm:$0xf]  ;;  %v14336_v52 = vor.u32 %v19645_v32, %v14335_v38  ;;  %v5762_v38 = vpop.f32.mrf.mxu0 }
 0x3df   : > { %v19765_v41 = vld [vmem:[%s21331_s10 + $0x9ec] sm:$0xf0]  ;;  %5993 = vmatpush.bf16.msra.mxu2 %v14112_v27  ;;  %5968 = vmatpush.bf16.msra.mxu0 %v13568_v45  ;;  %v5763_v45 = vadd.f32 %v5762_v38, %v2971_v26 }
 0x3e0   : > { %v15071_v44 = vld [vmem:[%s21331_s10 + $0xbd0] sm:$0xf]  ;;  %v14816_v12 = vor.u32 %v19765_v41, %v14815_v40 }
 0x3e1   : > { %v19829_v36 = vld [vmem:[%s21331_s10 + $0xbec] sm:$0xf0]  ;;  %6006 = vmatpush.bf16.msra.mxu3 %v14368_v35  ;;  %5981 = vmatpush.bf16.msra.mxu1 %v13824_v48 }
 0x3e2   : > { %v15327_v46 = vld [vmem:[%s21331_s10 + $0xdd0] sm:$0xf]  ;;  %v15072_v53 = vor.u32 %v19829_v36, %v15071_v44  ;;  %5969 = vmatmul.bf16.vlgmr.msra.gmra.mxu0 %v21518_v34  ;;  %v5775_v36 = vpop.f32.mrf.mxu1 }
 0x3e3   : > { %v19893_v47 = vld [vmem:[%s21331_s10 + $0xdec] sm:$0xf0]  ;;  %5994 = vmatpush.bf16.msra.mxu2 %v14080_v49  ;;  %6013 = vmatpush.bf16.msrb.mxu0 %v14816_v12 }
 0x3e4   : > { %v15583_v50 = vld [vmem:[%s21331_s10 + $0xfd0] sm:$0xf]  ;;  %v15328_v0 = vor.u32 %v19893_v47, %v15327_v46  ;;  %5982 = vmatmul.bf16.vlgmr.msra.gmra.mxu1 %v21525_v43 }
 0x3e5   : > { %v19957_v51 = vld [vmem:[%s21331_s10 + $0xfec] sm:$0xf0]  ;;  %6007 = vmatpush.bf16.msra.mxu3 %v14336_v52  ;;  %6026 = vmatpush.bf16.msrb.mxu1 %v15072_v53  ;;  %v5776_v52 = vadd.f32 %v5775_v36, %v5763_v45  ;;  %v19505_v45 = vld [vmem:[%s21331_s10 + $0x1d4] sm:$0xf] }
 0x3e6   : > { %v14783_v25 = vld [vmem:[%s21331_s10 + $0x990] sm:$0xf]  ;;  %v15584_v59 = vor.u32 %v19957_v51, %v15583_v50  ;;  %5995 = vmatmul.bf16.vlgmr.msra.gmra.mxu2 %v21510_v57  ;;  %v13793_v36 = vld [vmem:[%s21331_s10 + $0x1f0] sm:$0xf0] }
 0x3e7   : > { %v19757_v58 = vld [vmem:[%s21331_s10 + $0x9ac] sm:$0xf0]  ;;  %6039 = vmatpush.bf16.msrb.mxu2 %v15328_v0 }
 0x3e8   : > { %v15039_v1 = vld [vmem:[%s21331_s10 + $0xb90] sm:$0xf]  ;;  %v14784_v7 = vor.u32 %v19757_v58, %v14783_v25  ;;  %6008 = vmatmul.bf16.vlgmr.msra.gmra.mxu3 %v21523_v42 }
 0x3e9   : > { %v19821_v2 = vld [vmem:[%s21331_s10 + $0xbac] sm:$0xf0]  ;;  %6052 = vmatpush.bf16.msrb.mxu3 %v15584_v59  ;;  %v5788_v59 = vpop.f32.mrf.mxu2 }
 0x3ea   : > { %v15295_v3 = vld [vmem:[%s21331_s10 + $0xd90] sm:$0xf]  ;;  %v15040_v8 = vor.u32 %v19821_v2, %v15039_v1  ;;  %6014 = vmatpush.bf16.msrb.mxu0 %v14784_v7  ;;  %v5801_v7 = vpop.f32.mrf.mxu3 }
 0x3eb   : > { %v19885_v61 = vld [vmem:[%s21331_s10 + $0xdac] sm:$0xf0] }
 0x3ec   : > { %v15551_v4 = vld [vmem:[%s21331_s10 + $0xf90] sm:$0xf]  ;;  %v15296_v9 = vor.u32 %v19885_v61, %v15295_v3  ;;  %6027 = vmatpush.bf16.msrb.mxu1 %v15040_v8 }
 0x3ed   : > { %v19949_v6 = vld [vmem:[%s21331_s10 + $0xfac] sm:$0xf0] }
 0x3ee   : > { %v14751_v11 = vld [vmem:[%s21331_s10 + $0x950] sm:$0xf]  ;;  %v15552_v16 = vor.u32 %v19949_v6, %v15551_v4  ;;  %6040 = vmatpush.bf16.msrb.mxu2 %v15296_v9  ;;  %v5789_v6 = vadd.f32 %v5788_v59, %v5776_v52  ;;  %v19497_v59 = vld [vmem:[%s21331_s10 + $0x194] sm:$0xf] }
 0x3ef   : > { %v19749_v14 = vld [vmem:[%s21331_s10 + $0x96c] sm:$0xf0] }
 0x3f0   : > { %v15007_v15 = vld [vmem:[%s21331_s10 + $0xb50] sm:$0xf]  ;;  %v14752_v22 = vor.u32 %v19749_v14, %v14751_v11  ;;  %6053 = vmatpush.bf16.msrb.mxu3 %v15552_v16  ;;  %v22124_v14 = vadd.f32 %v5801_v7, %v5789_v6  ;;  %v19625_v6 = vld [vmem:[%s21331_s10 + $0x594] sm:$0xf] }
 0x3f1   : > { %v19813_v17 = vld [vmem:[%s21331_s10 + $0xb6c] sm:$0xf0]  ;;  %v5790_v38 = vpop.f32.mrf.mxu2  ;;  %v14273_v7 = vld [vmem:[%s21331_s10 + $0x5b0] sm:$0xf0] }
 0x3f2   : > { %v15263_v18 = vld [vmem:[%s21331_s10 + $0xd50] sm:$0xf]  ;;  %v15008_v23 = vor.u32 %v19813_v17, %v15007_v15  ;;  %6015 = vmatpush.bf16.msrb.mxu0 %v14752_v22  ;;  %v5764_v15 = vpop.f32.mrf.mxu0  ;;  %v19673_v38 = vld [vmem:[%s21331_s10 + $0x714] sm:$0xf] }
 0x3f3   : > { %v19877_v19 = vld [vmem:[%s21331_s10 + $0xd6c] sm:$0xf0] }
 0x3f4   : > { %v15519_v20 = vld [vmem:[%s21331_s10 + $0xf50] sm:$0xf]  ;;  %v15264_v55 = vor.u32 %v19877_v19, %v15263_v18  ;;  %6028 = vmatpush.bf16.msrb.mxu1 %v15008_v23 }
 0x3f5   : > { %v19941_v21 = vld [vmem:[%s21331_s10 + $0xf6c] sm:$0xf0] }
 0x3f6   : > { %v14719_v54 = vld [vmem:[%s21331_s10 + $0x910] sm:$0xf]  ;;  %v15520_v27 = vor.u32 %v19941_v21, %v15519_v20  ;;  %6041 = vmatpush.bf16.msrb.mxu2 %v15264_v55  ;;  %v5777_v21 = vpop.f32.mrf.mxu1 }
 0x3f7   : > { %v19741_v24 = vld [vmem:[%s21331_s10 + $0x92c] sm:$0xf0]  ;;  %v13985_v21 = vld [vmem:[%s21331_s10 + $0x370] sm:$0xf0] }
 0x3f8   : > { %v14975_v56 = vld [vmem:[%s21331_s10 + $0xb10] sm:$0xf]  ;;  %v14720_v37 = vor.u32 %v19741_v24, %v14719_v54  ;;  %6054 = vmatpush.bf16.msrb.mxu3 %v15520_v27 }
 0x3f9   : > { %v19805_v29 = vld [vmem:[%s21331_s10 + $0xb2c] sm:$0xf0] }
 0x3fa   : > { %v15231_v30 = vld [vmem:[%s21331_s10 + $0xd10] sm:$0xf]  ;;  %v14976_v32 = vor.u32 %v19805_v29, %v14975_v56  ;;  %6016 = vmatpush.bf16.msrb.mxu0 %v14720_v37 }
 0x3fb   : > { %v19869_v31 = vld [vmem:[%s21331_s10 + $0xd2c] sm:$0xf0] }
 0x3fc   : > { %v15487_v33 = vld [vmem:[%s21331_s10 + $0xf10] sm:$0xf]  ;;  %v15232_v39 = vor.u32 %v19869_v31, %v15231_v30  ;;  %6029 = vmatpush.bf16.msrb.mxu1 %v14976_v32 }
 0x3fd   : > { %v19933_v35 = vld [vmem:[%s21331_s10 + $0xf2c] sm:$0xf0] }
 0x3fe   : > { %v14687_v40 = vld [vmem:[%s21331_s10 + $0x8d0] sm:$0xf]  ;;  %v15488_v46 = vor.u32 %v19933_v35, %v15487_v33  ;;  %6042 = vmatpush.bf16.msrb.mxu2 %v15232_v39 }
 0x3ff   : > { %v19733_v41 = vld [vmem:[%s21331_s10 + $0x8ec] sm:$0xf0] }
 0x400   : > { %v14943_v44 = vld [vmem:[%s21331_s10 + $0xad0] sm:$0xf]  ;;  %v14688_v12 = vor.u32 %v19733_v41, %v14687_v40  ;;  %6055 = vmatpush.bf16.msrb.mxu3 %v15488_v46  ;;  %v19569_v46 = vld [vmem:[%s21331_s10 + $0x3d4] sm:$0xf] }
 0x401   : > { %v19797_v47 = vld [vmem:[%s21331_s10 + $0xaec] sm:$0xf0] }
 0x402   : > { %v15199_v48 = vld [vmem:[%s21331_s10 + $0xcd0] sm:$0xf]  ;;  %v14944_v53 = vor.u32 %v19797_v47, %v14943_v44  ;;  %6017 = vmatpush.bf16.msrb.mxu0 %v14688_v12  ;;  %v5803_v44 = vpop.f32.mrf.mxu3  ;;  %v19697_v12 = vld [vmem:[%s21331_s10 + $0x7d4] sm:$0xf] }
 0x403   : > { %v19861_v49 = vld [vmem:[%s21331_s10 + $0xcec] sm:$0xf0] }
 0x404   : > { %v15455_v50 = vld [vmem:[%s21331_s10 + $0xed0] sm:$0xf]  ;;  %v15200_v0 = vor.u32 %v19861_v49, %v15199_v48  ;;  %6030 = vmatpush.bf16.msrb.mxu1 %v14944_v53  ;;  %v14049_v48 = vld [vmem:[%s21331_s10 + $0x3f0] sm:$0xf0] }
 0x405   : > { %v19925_v51 = vld [vmem:[%s21331_s10 + $0xeec] sm:$0xf0]  ;;  %v19633_v49 = vld [vmem:[%s21331_s10 + $0x5d4] sm:$0xf] }
 0x406   : > { %v14655_v25 = vld [vmem:[%s21331_s10 + $0x890] sm:$0xf]  ;;  %v15456_v2 = vor.u32 %v19925_v51, %v15455_v50  ;;  %6043 = vmatpush.bf16.msrb.mxu2 %v15200_v0  ;;  %v14305_v50 = vld [vmem:[%s21331_s10 + $0x5f0] sm:$0xf0] }
 0x407   : > { %v19725_v58 = vld [vmem:[%s21331_s10 + $0x8ac] sm:$0xf0]  ;;  %v14561_v53 = vld [vmem:[%s21331_s10 + $0x7f0] sm:$0xf0] }
 0x408   : > { %v14911_v1 = vld [vmem:[%s21331_s10 + $0xa90] sm:$0xf]  ;;  %v14656_v11 = vor.u32 %v19725_v58, %v14655_v25  ;;  %6056 = vmatpush.bf16.msrb.mxu3 %v15456_v2  ;;  %v13796_v25 = vor.u32 %v19505_v45, %v13793_v36  ;;  %v14052_v58 = vor.u32 %v19569_v46, %v14049_v48  ;;  %v13761_v2 = vld [vmem:[%s21331_s10 + $0x1b0] sm:$0xf0]  ;;  %v5827_v48 = vpop.f32.mrf.mxu1 }
 0x409   : > { %v19789_v3 = vld [vmem:[%s21331_s10 + $0xaac] sm:$0xf0]  ;;  %v19473_v45 = vld [vmem:[%s21331_s10 + $0xd4] sm:$0xf] }
 0x40a   : > { %v15167_v61 = vld [vmem:[%s21331_s10 + $0xc90] sm:$0xf]  ;;  %v14912_v16 = vor.u32 %v19789_v3, %v14911_v1  ;;  %6018 = vmatpush.bf16.msrb.mxu0 %v14656_v11  ;;  %v14308_v1 = vor.u32 %v19633_v49, %v14305_v50  ;;  %v19561_v3 = vld [vmem:[%s21331_s10 + $0x394] sm:$0xf]  ;;  %v13764_v11 = vor.u32 %v19497_v59, %v13761_v2 }
 0x40b   : > { %v19853_v4 = vld [vmem:[%s21331_s10 + $0xcac] sm:$0xf0]  ;;  %v13665_v36 = vld [vmem:[%s21331_s10 + $0xf0] sm:$0xf0] }
 0x40c   : > { %v15423_v8 = vld [vmem:[%s21331_s10 + $0xe90] sm:$0xf]  ;;  %v15168_v17 = vor.u32 %v19853_v4, %v15167_v61  ;;  %6031 = vmatpush.bf16.msrb.mxu1 %v14912_v16  ;;  %v14564_v61 = vor.u32 %v19697_v12, %v14561_v53  ;;  %v14017_v4 = vld [vmem:[%s21331_s10 + $0x3b0] sm:$0xf0]  ;;  %v14276_v16 = vor.u32 %v19625_v6, %v14273_v7 }
 0x40d   : > { %v19917_v9 = vld [vmem:[%s21331_s10 + $0xeac] sm:$0xf0]  ;;  %v14020_v15 = vor.u32 %v19561_v3, %v14017_v4  ;;  %v19537_v46 = vld [vmem:[%s21331_s10 + $0x2d4] sm:$0xf]  ;;  %v5840_v3 = vpop.f32.mrf.mxu2 }
 0x40e   : > { %v14623_v18 = vld [vmem:[%s21331_s10 + $0x850] sm:$0xf]  ;;  %v15424_v22 = vor.u32 %v19917_v9, %v15423_v8  ;;  %6044 = vmatpush.bf16.msrb.mxu2 %v15168_v17  ;;  %v19689_v8 = vld [vmem:[%s21331_s10 + $0x794] sm:$0xf] }
 0x40f   : > { %v19717_v19 = vld [vmem:[%s21331_s10 + $0x86c] sm:$0xf0]  ;;  %v14529_v9 = vld [vmem:[%s21331_s10 + $0x7b0] sm:$0xf0] }
 0x410   : > { %v14879_v20 = vld [vmem:[%s21331_s10 + $0xa50] sm:$0xf]  ;;  %v14624_v26 = vor.u32 %v19717_v19, %v14623_v18  ;;  %6057 = vmatpush.bf16.msrb.mxu3 %v15424_v22  ;;  %v19489_v17 = vld [vmem:[%s21331_s10 + $0x154] sm:$0xf] }
 0x411   : > { %v19781_v54 = vld [vmem:[%s21331_s10 + $0xa6c] sm:$0xf0]  ;;  %v13729_v18 = vld [vmem:[%s21331_s10 + $0x170] sm:$0xf0] }
 0x412   : > { %v15135_v23 = vld [vmem:[%s21331_s10 + $0xc50] sm:$0xf]  ;;  %v14880_v30 = vor.u32 %v19781_v54, %v14879_v20  ;;  %6019 = vmatpush.bf16.msrb.mxu0 %v14624_v26  ;;  %v19553_v19 = vld [vmem:[%s21331_s10 + $0x354] sm:$0xf]  ;;  %v14532_v20 = vor.u32 %v19689_v8, %v14529_v9  ;;  %v5853_v9 = vpop.f32.mrf.mxu3 }
 0x413   : > { %v19845_v55 = vld [vmem:[%s21331_s10 + $0xc6c] sm:$0xf0]  ;;  %v19617_v22 = vld [vmem:[%s21331_s10 + $0x554] sm:$0xf] }
 0x414   : > { %v15391_v24 = vld [vmem:[%s21331_s10 + $0xe50] sm:$0xf]  ;;  %v15136_v31 = vor.u32 %v19845_v55, %v15135_v23  ;;  %6032 = vmatpush.bf16.msrb.mxu1 %v14880_v30  ;;  %v14241_v54 = vld [vmem:[%s21331_s10 + $0x570] sm:$0xf0] }
 0x415   : > { %v19909_v56 = vld [vmem:[%s21331_s10 + $0xe6c] sm:$0xf0]  ;;  %v19681_v23 = vld [vmem:[%s21331_s10 + $0x754] sm:$0xf]  ;;  %v14244_v26 = vor.u32 %v19617_v22, %v14241_v54 }
 0x416   : > { %v14591_v27 = vld [vmem:[%s21331_s10 + $0x810] sm:$0xf]  ;;  %v15392_v32 = vor.u32 %v19909_v56, %v15391_v24  ;;  %6045 = vmatpush.bf16.msrb.mxu2 %v15136_v31  ;;  %v14497_v55 = vld [vmem:[%s21331_s10 + $0x770] sm:$0xf0]  ;;  %v13732_v24 = vor.u32 %v19489_v17, %v13729_v18  ;;  %v13988_v56 = vor.u32 %v19553_v19, %v13985_v21 }
 0x417   : > { %v19709_v29 = vld [vmem:[%s21331_s10 + $0x82c] sm:$0xf0]  ;;  %v19545_v30 = vld [vmem:[%s21331_s10 + $0x314] sm:$0xf]  ;;  %v14500_v31 = vor.u32 %v19681_v23, %v14497_v55  ;;  %v5829_v23 = vpop.f32.mrf.mxu1 }
 0x418   : > { %v14847_v33 = vld [vmem:[%s21331_s10 + $0xa10] sm:$0xf]  ;;  %v14592_v47 = vor.u32 %v19709_v29, %v14591_v27  ;;  %6058 = vmatpush.bf16.msrb.mxu3 %v15392_v32  ;;  %v19481_v27 = vld [vmem:[%s21331_s10 + $0x114] sm:$0xf] }
 0x419   : > { %v19773_v35 = vld [vmem:[%s21331_s10 + $0xa2c] sm:$0xf0]  ;;  %v13697_v29 = vld [vmem:[%s21331_s10 + $0x130] sm:$0xf0] }
 0x41a   : > { %v15103_v37 = vld [vmem:[%s21331_s10 + $0xc10] sm:$0xf]  ;;  %v14848_v51 = vor.u32 %v19773_v35, %v14847_v33  ;;  %6020 = vmatpush.bf16.msrb.mxu0 %v14592_v47  ;;  %v13953_v33 = vld [vmem:[%s21331_s10 + $0x330] sm:$0xf0] }
 0x41b   : > { %v19837_v39 = vld [vmem:[%s21331_s10 + $0xc2c] sm:$0xf0]  ;;  %v19609_v35 = vld [vmem:[%s21331_s10 + $0x514] sm:$0xf] }
 0x41c   : > { %v15359_v40 = vld [vmem:[%s21331_s10 + $0xe10] sm:$0xf]  ;;  %v15104_v52 = vor.u32 %v19837_v39, %v15103_v37  ;;  %6033 = vmatpush.bf16.msrb.mxu1 %v14848_v51  ;;  %v14209_v37 = vld [vmem:[%s21331_s10 + $0x530] sm:$0xf0]  ;;  %v13700_v39 = vor.u32 %v19481_v27, %v13697_v29 }
 0x41d   : > { %v19901_v41 = vld [vmem:[%s21331_s10 + $0xe2c] sm:$0xf0]  ;;  %6021 = vmatmul.bf16.vlgmr.msrb.gmra.mxu0 %v21582_v62  ;;  %v14465_v32 = vld [vmem:[%s21331_s10 + $0x730] sm:$0xf0]  ;;  %v14212_v44 = vor.u32 %v19609_v35, %v14209_v37 }
 0x41e   : > { %v15360_v0 = vor.u32 %v19901_v41, %v15359_v40  ;;  %6046 = vmatpush.bf16.msrb.mxu2 %v15104_v52  ;;  %6065 = vmatpush.bf16.msra.mxu0 %v13796_v25  ;;  %v5814_v40 = vpop.f32.mrf.mxu0  ;;  %v13956_v41 = vor.u32 %v19545_v30, %v13953_v33  ;;  %v14468_v49 = vor.u32 %v19673_v38, %v14465_v32  ;;  %v13921_v50 = vld [vmem:[%s21331_s10 + $0x2f0] sm:$0xf0] }
 0x41f   : > { %6034 = vmatmul.bf16.vlgmr.msrb.gmra.mxu1 %v21586_v5  ;;  %v5815_v47 = vadd.f32 %v5814_v40, %v22124_v14  ;;  %v19601_v51 = vld [vmem:[%s21331_s10 + $0x4d4] sm:$0xf]  ;;  %v13668_v25 = vor.u32 %v19473_v45, %v13665_v36  ;;  %v13924_v14 = vor.u32 %v19537_v46, %v13921_v50  ;;  %v5842_v40 = vpop.f32.mrf.mxu2  ;;  %v5855_v46 = vpop.f32.mrf.mxu3 }
 0x420   : > { %6059 = vmatpush.bf16.msrb.mxu3 %v15360_v0  ;;  %6078 = vmatpush.bf16.msra.mxu1 %v14052_v58  ;;  %v14177_v52 = vld [vmem:[%s21331_s10 + $0x4f0] sm:$0xf0] }
 0x421   : > { %6047 = vmatmul.bf16.vlgmr.msrb.gmra.mxu2 %v21578_v60  ;;  %v19665_v12 = vld [vmem:[%s21331_s10 + $0x6d4] sm:$0xf]  ;;  %v5828_v0 = vadd.f32 %v5827_v48, %v5815_v47  ;;  %v14180_v58 = vor.u32 %v19601_v51, %v14177_v52 }
 0x422   : > { %6091 = vmatpush.bf16.msra.mxu2 %v14308_v1  ;;  %6066 = vmatpush.bf16.msra.mxu0 %v13764_v11  ;;  %v14433_v53 = vld [vmem:[%s21331_s10 + $0x6f0] sm:$0xf0] }
 0x423   : > { %6060 = vmatmul.bf16.vlgmr.msrb.gmra.mxu3 %v21584_v63  ;;  %v19465_v1 = vld [vmem:[%s21331_s10 + $0x94] sm:$0xf]  ;;  %v5841_v8 = vadd.f32 %v5840_v3, %v5828_v0 }
 0x424   : > { %6104 = vmatpush.bf16.msra.mxu3 %v14564_v61  ;;  %6079 = vmatpush.bf16.msra.mxu1 %v14020_v15  ;;  %v13633_v59 = vld [vmem:[%s21331_s10 + $0xb0] sm:$0xf0]  ;;  %v14436_v61 = vor.u32 %v19665_v12, %v14433_v53 }
 0x425   : > { %v19529_v2 = vld [vmem:[%s21331_s10 + $0x294] sm:$0xf]  ;;  %v22195_v17 = vadd.f32 %v5853_v9, %v5841_v8 }
 0x426   : > { %6092 = vmatpush.bf16.msra.mxu2 %v14276_v16  ;;  %6067 = vmatpush.bf16.msra.mxu0 %v13732_v24  ;;  %v13889_v4 = vld [vmem:[%s21331_s10 + $0x2b0] sm:$0xf0]  ;;  %v13636_v16 = vor.u32 %v19465_v1, %v13633_v59  ;;  %v5816_v18 = vpop.f32.mrf.mxu0 }
 0x427   : > { %v19593_v6 = vld [vmem:[%s21331_s10 + $0x494] sm:$0xf]  ;;  %v13892_v19 = vor.u32 %v19529_v2, %v13889_v4  ;;  %vm6379_vm14 = vcmp.ge.f32.partialorder %v22195_v17, 0.0 }
 0x428   : > { %6105 = vmatpush.bf16.msra.mxu3 %v14532_v20  ;;  %6080 = vmatpush.bf16.msra.mxu1 %v13988_v56  ;;  %v14145_v7 = vld [vmem:[%s21331_s10 + $0x4b0] sm:$0xf0] }
 0x429   : > { %v19657_v11 = vld [vmem:[%s21331_s10 + $0x694] sm:$0xf]  ;;  %v14148_v20 = vor.u32 %v19593_v6, %v14145_v7 }
 0x42a   : > { %6093 = vmatpush.bf16.msra.mxu2 %v14244_v26  ;;  %6068 = vmatpush.bf16.msra.mxu0 %v13700_v39  ;;  %v14401_v15 = vld [vmem:[%s21331_s10 + $0x6b0] sm:$0xf0] }
 0x42b   : > { %v19457_v21 = vld [vmem:[%s21331_s10 + $0x54] sm:$0xf]  ;;  %v14404_v55 = vor.u32 %v19657_v11, %v14401_v15 }
 0x42c   : > { %6106 = vmatpush.bf16.msra.mxu3 %v14500_v31  ;;  %6081 = vmatpush.bf16.msra.mxu1 %v13956_v41  ;;  %v13601_v22 = vld [vmem:[%s21331_s10 + $0x70] sm:$0xf0] }
 0x42d   : > { %v19521_v54 = vld [vmem:[%s21331_s10 + $0x254] sm:$0xf]  ;;  %v13604_v30 = vor.u32 %v19457_v21, %v13601_v22 }
 0x42e   : > { %6094 = vmatpush.bf16.msra.mxu2 %v14212_v44  ;;  %6069 = vmatpush.bf16.msra.mxu0 %v13668_v25  ;;  %v13857_v24 = vld [vmem:[%s21331_s10 + $0x270] sm:$0xf0] }
 0x42f   : > { %v19585_v56 = vld [vmem:[%s21331_s10 + $0x454] sm:$0xf]  ;;  %v13860_v35 = vor.u32 %v19521_v54, %v13857_v24 }
 0x430   : > { %6107 = vmatpush.bf16.msra.mxu3 %v14468_v49  ;;  %6082 = vmatpush.bf16.msra.mxu1 %v13924_v14  ;;  %v14113_v26 = vld [vmem:[%s21331_s10 + $0x470] sm:$0xf0] }
 0x431   : > { %v19649_v27 = vld [vmem:[%s21331_s10 + $0x654] sm:$0xf]  ;;  %v14116_v37 = vor.u32 %v19585_v56, %v14113_v26 }
 0x432   : > { %6095 = vmatpush.bf16.msra.mxu2 %v14180_v58  ;;  %v14369_v29 = vld [vmem:[%s21331_s10 + $0x670] sm:$0xf0]  ;;  %6070 = vmatpush.bf16.msra.mxu0 %v13636_v16 }
 0x433   : > { %v19449_v31 = vld [vmem:[%s21331_s10 + $0x14] sm:$0xf]  ;;  %v14372_v41 = vor.u32 %v19649_v27, %v14369_v29 }
 0x434   : > { %6108 = vmatpush.bf16.msra.mxu3 %v14436_v61  ;;  %v13569_v33 = vld [vmem:[%s21331_s10 + $0x30] sm:$0xf0]  ;;  %6083 = vmatpush.bf16.msra.mxu1 %v13892_v19 }
 0x435   : > { %v19513_v38 = vld [vmem:[%s21331_s10 + $0x214] sm:$0xf]  ;;  %v13572_v50 = vor.u32 %v19449_v31, %v13569_v33 }
 0x436   : > { %6096 = vmatpush.bf16.msra.mxu2 %v14148_v20  ;;  %v13825_v32 = vld [vmem:[%s21331_s10 + $0x230] sm:$0xf0]  ;;  %6071 = vmatpush.bf16.msra.mxu0 %v13604_v30 }
 0x437   : > { %v19577_v39 = vld [vmem:[%s21331_s10 + $0x414] sm:$0xf]  ;;  %v13828_v53 = vor.u32 %v19513_v38, %v13825_v32 }
 0x438   : > { %6109 = vmatpush.bf16.msra.mxu3 %v14404_v55  ;;  %v14081_v44 = vld [vmem:[%s21331_s10 + $0x430] sm:$0xf0]  ;;  %6084 = vmatpush.bf16.msra.mxu1 %v13860_v35 }
 0x439   : > { %v19641_v45 = vld [vmem:[%s21331_s10 + $0x614] sm:$0xf]  ;;  %v14084_v0 = vor.u32 %v19577_v39, %v14081_v44 }
 0x43a   : > { %v14337_v36 = vld [vmem:[%s21331_s10 + $0x630] sm:$0xf0]  ;;  %6097 = vmatpush.bf16.msra.mxu2 %v14116_v37  ;;  %6072 = vmatpush.bf16.msra.mxu0 %v13572_v50  ;;  %v2972_v37 = vperm.slane %v22100_v28, 3 }
 0x43b   : > { %v19761_v47 = vld [vmem:[%s21331_s10 + $0x9d4] sm:$0xf]  ;;  %v14340_v58 = vor.u32 %v19641_v45, %v14337_v36  ;;  %v5866_v36 = vpop.f32.mrf.mxu0 }
 0x43c   : > { %v14817_v48 = vld [vmem:[%s21331_s10 + $0x9f0] sm:$0xf0]  ;;  %6110 = vmatpush.bf16.msra.mxu3 %v14372_v41  ;;  %6085 = vmatpush.bf16.msra.mxu1 %v13828_v53  ;;  %v5867_v50 = vadd.f32 %v5866_v36, %v2972_v37 }
 0x43d   : > { %v19825_v49 = vld [vmem:[%s21331_s10 + $0xbd4] sm:$0xf]  ;;  %v14820_v1 = vor.u32 %v19761_v47, %v14817_v48  ;;  %6073 = vmatmul.bf16.vlgmr.msra.gmra.mxu0 %v21518_v34 }
 0x43e   : > { %v15073_v51 = vld [vmem:[%s21331_s10 + $0xbf0] sm:$0xf0]  ;;  %6098 = vmatpush.bf16.msra.mxu2 %v14084_v0 }
 0x43f   : > { %v19889_v52 = vld [vmem:[%s21331_s10 + $0xdd4] sm:$0xf]  ;;  %v15076_v59 = vor.u32 %v19825_v49, %v15073_v51  ;;  %6117 = vmatpush.bf16.msrb.mxu0 %v14820_v1  ;;  %6086 = vmatmul.bf16.vlgmr.msra.gmra.mxu1 %v21525_v43  ;;  %v5879_v51 = vpop.f32.mrf.mxu1 }
 0x440   : > { %v15329_v12 = vld [vmem:[%s21331_s10 + $0xdf0] sm:$0xf0]  ;;  %6111 = vmatpush.bf16.msra.mxu3 %v14340_v58  ;;  %v5880_v58 = vadd.f32 %v5879_v51, %v5867_v50  ;;  %v13799_v50 = vld [vmem:[%s21331_s10 + $0x1d8] sm:$0xf] }
 0x441   : > { %v19953_v25 = vld [vmem:[%s21331_s10 + $0xfd4] sm:$0xf]  ;;  %v15332_v2 = vor.u32 %v19889_v52, %v15329_v12  ;;  %6130 = vmatpush.bf16.msrb.mxu1 %v15076_v59  ;;  %6099 = vmatmul.bf16.vlgmr.msra.gmra.mxu2 %v21510_v57  ;;  %v19510_v51 = vld [vmem:[%s21331_s10 + $0x1f4] sm:$0xf0] }
 0x442   : > { %v15585_v14 = vld [vmem:[%s21331_s10 + $0xff0] sm:$0xf0] }
 0x443   : > { %v19753_v3 = vld [vmem:[%s21331_s10 + $0x994] sm:$0xf]  ;;  %v15588_v6 = vor.u32 %v19953_v25, %v15585_v14  ;;  %6143 = vmatpush.bf16.msrb.mxu2 %v15332_v2  ;;  %6112 = vmatmul.bf16.vlgmr.msra.gmra.mxu3 %v21523_v42 }
 0x444   : > { %v14785_v61 = vld [vmem:[%s21331_s10 + $0x9b0] sm:$0xf0] }
 0x445   : > { %v19817_v4 = vld [vmem:[%s21331_s10 + $0xb94] sm:$0xf]  ;;  %v14788_v16 = vor.u32 %v19753_v3, %v14785_v61  ;;  %6156 = vmatpush.bf16.msrb.mxu3 %v15588_v6  ;;  %v5892_v6 = vpop.f32.mrf.mxu2 }
 0x446   : > { %v15041_v7 = vld [vmem:[%s21331_s10 + $0xbb0] sm:$0xf0] }
 0x447   : > { %v19881_v8 = vld [vmem:[%s21331_s10 + $0xd94] sm:$0xf]  ;;  %v15044_v18 = vor.u32 %v19817_v4, %v15041_v7  ;;  %6118 = vmatpush.bf16.msrb.mxu0 %v14788_v16  ;;  %v5905_v16 = vpop.f32.mrf.mxu3 }
 0x448   : > { %v15297_v9 = vld [vmem:[%s21331_s10 + $0xdb0] sm:$0xf0] }
 0x449   : > { %v19945_v11 = vld [vmem:[%s21331_s10 + $0xf94] sm:$0xf]  ;;  %v15300_v19 = vor.u32 %v19881_v8, %v15297_v9  ;;  %6131 = vmatpush.bf16.msrb.mxu1 %v15044_v18 }
 0x44a   : > { %v15553_v15 = vld [vmem:[%s21331_s10 + $0xfb0] sm:$0xf0] }
 0x44b   : > { %v19745_v20 = vld [vmem:[%s21331_s10 + $0x954] sm:$0xf]  ;;  %v15556_v54 = vor.u32 %v19945_v11, %v15553_v15  ;;  %6144 = vmatpush.bf16.msrb.mxu2 %v15300_v19  ;;  %v5893_v15 = vadd.f32 %v5892_v6, %v5880_v58  ;;  %v13767_v6 = vld [vmem:[%s21331_s10 + $0x198] sm:$0xf] }
 0x44c   : > { %v14753_v21 = vld [vmem:[%s21331_s10 + $0x970] sm:$0xf0] }
 0x44d   : > { %v19809_v22 = vld [vmem:[%s21331_s10 + $0xb54] sm:$0xf]  ;;  %v14756_v27 = vor.u32 %v19745_v20, %v14753_v21  ;;  %6157 = vmatpush.bf16.msrb.mxu3 %v15556_v54  ;;  %v22266_v21 = vadd.f32 %v5905_v16, %v5893_v15  ;;  %v5894_v36 = vpop.f32.mrf.mxu2  ;;  %v14279_v15 = vld [vmem:[%s21331_s10 + $0x598] sm:$0xf] }
 0x44e   : > { %v15009_v23 = vld [vmem:[%s21331_s10 + $0xb70] sm:$0xf0]  ;;  %v19630_v16 = vld [vmem:[%s21331_s10 + $0x5b4] sm:$0xf0] }
 0x44f   : > { %v19873_v55 = vld [vmem:[%s21331_s10 + $0xd54] sm:$0xf]  ;;  %v15012_v30 = vor.u32 %v19809_v22, %v15009_v23  ;;  %6119 = vmatpush.bf16.msrb.mxu0 %v14756_v27  ;;  %v5868_v22 = vpop.f32.mrf.mxu0  ;;  %v14471_v36 = vld [vmem:[%s21331_s10 + $0x718] sm:$0xf] }
 0x450   : > { %v15265_v24 = vld [vmem:[%s21331_s10 + $0xd70] sm:$0xf0] }
 0x451   : > { %v19937_v56 = vld [vmem:[%s21331_s10 + $0xf54] sm:$0xf]  ;;  %v15268_v31 = vor.u32 %v19873_v55, %v15265_v24  ;;  %6132 = vmatpush.bf16.msrb.mxu1 %v15012_v30 }
 0x452   : > { %v15521_v26 = vld [vmem:[%s21331_s10 + $0xf70] sm:$0xf0] }
 0x453   : > { %v19737_v29 = vld [vmem:[%s21331_s10 + $0x914] sm:$0xf]  ;;  %v15524_v38 = vor.u32 %v19937_v56, %v15521_v26  ;;  %6145 = vmatpush.bf16.msrb.mxu2 %v15268_v31  ;;  %v5881_v26 = vpop.f32.mrf.mxu1 }
 0x454   : > { %v14721_v33 = vld [vmem:[%s21331_s10 + $0x930] sm:$0xf0]  ;;  %v19558_v26 = vld [vmem:[%s21331_s10 + $0x374] sm:$0xf0] }
 0x455   : > { %v19801_v35 = vld [vmem:[%s21331_s10 + $0xb14] sm:$0xf]  ;;  %v14724_v45 = vor.u32 %v19737_v29, %v14721_v33  ;;  %6158 = vmatpush.bf16.msrb.mxu3 %v15524_v38 }
 0x456   : > { %v14977_v32 = vld [vmem:[%s21331_s10 + $0xb30] sm:$0xf0] }
 0x457   : > { %v19865_v39 = vld [vmem:[%s21331_s10 + $0xd14] sm:$0xf]  ;;  %v14980_v28 = vor.u32 %v19801_v35, %v14977_v32  ;;  %6120 = vmatpush.bf16.msrb.mxu0 %v14724_v45 }
 0x458   : > { %v15233_v40 = vld [vmem:[%s21331_s10 + $0xd30] sm:$0xf0] }
 0x459   : > { %v19929_v41 = vld [vmem:[%s21331_s10 + $0xf14] sm:$0xf]  ;;  %v15236_v46 = vor.u32 %v19865_v39, %v15233_v40  ;;  %6133 = vmatpush.bf16.msrb.mxu1 %v14980_v28 }
 0x45a   : > { %v15489_v44 = vld [vmem:[%s21331_s10 + $0xf30] sm:$0xf0] }
 0x45b   : > { %v19729_v47 = vld [vmem:[%s21331_s10 + $0x8d4] sm:$0xf]  ;;  %v15492_v52 = vor.u32 %v19929_v41, %v15489_v44  ;;  %6146 = vmatpush.bf16.msrb.mxu2 %v15236_v46 }
 0x45c   : > { %v14689_v48 = vld [vmem:[%s21331_s10 + $0x8f0] sm:$0xf0] }
 0x45d   : > { %v19793_v49 = vld [vmem:[%s21331_s10 + $0xad4] sm:$0xf]  ;;  %v14692_v1 = vor.u32 %v19729_v47, %v14689_v48  ;;  %6159 = vmatpush.bf16.msrb.mxu3 %v15492_v52  ;;  %v14055_v52 = vld [vmem:[%s21331_s10 + $0x3d8] sm:$0xf] }
 0x45e   : > { %v14945_v12 = vld [vmem:[%s21331_s10 + $0xaf0] sm:$0xf0] }
 0x45f   : > { %v19857_v53 = vld [vmem:[%s21331_s10 + $0xcd4] sm:$0xf]  ;;  %v14948_v59 = vor.u32 %v19793_v49, %v14945_v12  ;;  %6121 = vmatpush.bf16.msrb.mxu0 %v14692_v1  ;;  %v5907_v49 = vpop.f32.mrf.mxu3  ;;  %v14567_v1 = vld [vmem:[%s21331_s10 + $0x7d8] sm:$0xf] }
 0x460   : > { %v15201_v0 = vld [vmem:[%s21331_s10 + $0xcf0] sm:$0xf0] }
 0x461   : > { %v19921_v25 = vld [vmem:[%s21331_s10 + $0xed4] sm:$0xf]  ;;  %v15204_v2 = vor.u32 %v19857_v53, %v15201_v0  ;;  %6134 = vmatpush.bf16.msrb.mxu1 %v14948_v59  ;;  %v19574_v53 = vld [vmem:[%s21331_s10 + $0x3f4] sm:$0xf0] }
 0x462   : > { %v15457_v14 = vld [vmem:[%s21331_s10 + $0xef0] sm:$0xf0]  ;;  %v14311_v0 = vld [vmem:[%s21331_s10 + $0x5d8] sm:$0xf] }
 0x463   : > { %v19721_v3 = vld [vmem:[%s21331_s10 + $0x894] sm:$0xf]  ;;  %v15460_v7 = vor.u32 %v19921_v25, %v15457_v14  ;;  %6147 = vmatpush.bf16.msrb.mxu2 %v15204_v2  ;;  %v19638_v25 = vld [vmem:[%s21331_s10 + $0x5f4] sm:$0xf0] }
 0x464   : > { %v14657_v61 = vld [vmem:[%s21331_s10 + $0x8b0] sm:$0xf0]  ;;  %v19702_v59 = vld [vmem:[%s21331_s10 + $0x7f4] sm:$0xf0] }
 0x465   : > { %v19785_v4 = vld [vmem:[%s21331_s10 + $0xa94] sm:$0xf]  ;;  %v14660_v20 = vor.u32 %v19721_v3, %v14657_v61  ;;  %6160 = vmatpush.bf16.msrb.mxu3 %v15460_v7  ;;  %v13800_v3 = vor.u32 %v19510_v51, %v13799_v50  ;;  %v14056_v61 = vor.u32 %v19574_v53, %v14055_v52  ;;  %v19502_v7 = vld [vmem:[%s21331_s10 + $0x1b4] sm:$0xf0]  ;;  %v5931_v53 = vpop.f32.mrf.mxu1 }
 0x466   : > { %v14913_v8 = vld [vmem:[%s21331_s10 + $0xab0] sm:$0xf0]  ;;  %v13671_v50 = vld [vmem:[%s21331_s10 + $0xd8] sm:$0xf] }
 0x467   : > { %v19849_v9 = vld [vmem:[%s21331_s10 + $0xc94] sm:$0xf]  ;;  %v14916_v54 = vor.u32 %v19785_v4, %v14913_v8  ;;  %6122 = vmatpush.bf16.msrb.mxu0 %v14660_v20  ;;  %v14312_v4 = vor.u32 %v19638_v25, %v14311_v0  ;;  %v14023_v8 = vld [vmem:[%s21331_s10 + $0x398] sm:$0xf]  ;;  %v13768_v20 = vor.u32 %v19502_v7, %v13767_v6 }
 0x468   : > { %v15169_v11 = vld [vmem:[%s21331_s10 + $0xcb0] sm:$0xf0]  ;;  %v19478_v51 = vld [vmem:[%s21331_s10 + $0xf4] sm:$0xf0] }
 0x469   : > { %v19913_v18 = vld [vmem:[%s21331_s10 + $0xe94] sm:$0xf]  ;;  %v15172_v23 = vor.u32 %v19849_v9, %v15169_v11  ;;  %6135 = vmatpush.bf16.msrb.mxu1 %v14916_v54  ;;  %v14568_v9 = vor.u32 %v19702_v59, %v14567_v1  ;;  %v19566_v11 = vld [vmem:[%s21331_s10 + $0x3b4] sm:$0xf0]  ;;  %v14280_v54 = vor.u32 %v19630_v16, %v14279_v15 }
 0x46a   : > { %v15425_v19 = vld [vmem:[%s21331_s10 + $0xeb0] sm:$0xf0]  ;;  %v14024_v22 = vor.u32 %v19566_v11, %v14023_v8  ;;  %v13927_v52 = vld [vmem:[%s21331_s10 + $0x2d8] sm:$0xf]  ;;  %v5944_v8 = vpop.f32.mrf.mxu2 }
 0x46b   : > { %v19713_v55 = vld [vmem:[%s21331_s10 + $0x854] sm:$0xf]  ;;  %v15428_v27 = vor.u32 %v19913_v18, %v15425_v19  ;;  %6148 = vmatpush.bf16.msrb.mxu2 %v15172_v23  ;;  %v14535_v18 = vld [vmem:[%s21331_s10 + $0x798] sm:$0xf] }
 0x46c   : > { %v14625_v24 = vld [vmem:[%s21331_s10 + $0x870] sm:$0xf0]  ;;  %v19694_v19 = vld [vmem:[%s21331_s10 + $0x7b4] sm:$0xf0] }
 0x46d   : > { %v19777_v56 = vld [vmem:[%s21331_s10 + $0xa54] sm:$0xf]  ;;  %v14628_v37 = vor.u32 %v19713_v55, %v14625_v24  ;;  %6161 = vmatpush.bf16.msrb.mxu3 %v15428_v27  ;;  %v13735_v23 = vld [vmem:[%s21331_s10 + $0x158] sm:$0xf] }
 0x46e   : > { %v14881_v29 = vld [vmem:[%s21331_s10 + $0xa70] sm:$0xf0]  ;;  %v19494_v55 = vld [vmem:[%s21331_s10 + $0x174] sm:$0xf0] }
 0x46f   : > { %v19841_v30 = vld [vmem:[%s21331_s10 + $0xc54] sm:$0xf]  ;;  %v14884_v39 = vor.u32 %v19777_v56, %v14881_v29  ;;  %6123 = vmatpush.bf16.msrb.mxu0 %v14628_v37  ;;  %v13991_v24 = vld [vmem:[%s21331_s10 + $0x358] sm:$0xf]  ;;  %v14536_v56 = vor.u32 %v19694_v19, %v14535_v18  ;;  %v5957_v19 = vpop.f32.mrf.mxu3 }
 0x470   : > { %v15137_v31 = vld [vmem:[%s21331_s10 + $0xc70] sm:$0xf0]  ;;  %v14247_v27 = vld [vmem:[%s21331_s10 + $0x558] sm:$0xf] }
 0x471   : > { %v19905_v33 = vld [vmem:[%s21331_s10 + $0xe54] sm:$0xf]  ;;  %v15140_v40 = vor.u32 %v19841_v30, %v15137_v31  ;;  %6136 = vmatpush.bf16.msrb.mxu1 %v14884_v39  ;;  %v19622_v29 = vld [vmem:[%s21331_s10 + $0x574] sm:$0xf0] }
 0x472   : > { %v15393_v35 = vld [vmem:[%s21331_s10 + $0xe70] sm:$0xf0]  ;;  %v14503_v30 = vld [vmem:[%s21331_s10 + $0x758] sm:$0xf]  ;;  %v14248_v37 = vor.u32 %v19622_v29, %v14247_v27 }
 0x473   : > { %v19705_v38 = vld [vmem:[%s21331_s10 + $0x814] sm:$0xf]  ;;  %v15396_v28 = vor.u32 %v19905_v33, %v15393_v35  ;;  %6149 = vmatpush.bf16.msrb.mxu2 %v15140_v40  ;;  %v19686_v31 = vld [vmem:[%s21331_s10 + $0x774] sm:$0xf0]  ;;  %v13736_v33 = vor.u32 %v19494_v55, %v13735_v23  ;;  %v13992_v35 = vor.u32 %v19558_v26, %v13991_v24 }
 0x474   : > { %v14593_v32 = vld [vmem:[%s21331_s10 + $0x830] sm:$0xf0]  ;;  %v13959_v39 = vld [vmem:[%s21331_s10 + $0x318] sm:$0xf]  ;;  %v14504_v40 = vor.u32 %v19686_v31, %v14503_v30  ;;  %v5933_v30 = vpop.f32.mrf.mxu1 }
 0x475   : > { %v19769_v41 = vld [vmem:[%s21331_s10 + $0xa14] sm:$0xf]  ;;  %v14596_v12 = vor.u32 %v19705_v38, %v14593_v32  ;;  %6162 = vmatpush.bf16.msrb.mxu3 %v15396_v28  ;;  %v13703_v38 = vld [vmem:[%s21331_s10 + $0x118] sm:$0xf] }
 0x476   : > { %v14849_v44 = vld [vmem:[%s21331_s10 + $0xa30] sm:$0xf0]  ;;  %v19486_v32 = vld [vmem:[%s21331_s10 + $0x134] sm:$0xf0] }
 0x477   : > { %v19833_v45 = vld [vmem:[%s21331_s10 + $0xc14] sm:$0xf]  ;;  %v14852_v14 = vor.u32 %v19769_v41, %v14849_v44  ;;  %6124 = vmatpush.bf16.msrb.mxu0 %v14596_v12  ;;  %v19550_v41 = vld [vmem:[%s21331_s10 + $0x334] sm:$0xf0] }
 0x478   : > { %v15105_v46 = vld [vmem:[%s21331_s10 + $0xc30] sm:$0xf0]  ;;  %v14215_v44 = vld [vmem:[%s21331_s10 + $0x518] sm:$0xf] }
 0x479   : > { %v19897_v47 = vld [vmem:[%s21331_s10 + $0xe14] sm:$0xf]  ;;  %v15108_v58 = vor.u32 %v19833_v45, %v15105_v46  ;;  %6137 = vmatpush.bf16.msrb.mxu1 %v14852_v14  ;;  %v19614_v45 = vld [vmem:[%s21331_s10 + $0x534] sm:$0xf0]  ;;  %v13704_v46 = vor.u32 %v19486_v32, %v13703_v38 }
 0x47a   : > { %v15361_v48 = vld [vmem:[%s21331_s10 + $0xe30] sm:$0xf0]  ;;  %6125 = vmatmul.bf16.vlgmr.msrb.gmra.mxu0 %v21582_v62  ;;  %v19678_v28 = vld [vmem:[%s21331_s10 + $0x734] sm:$0xf0]  ;;  %v14216_v49 = vor.u32 %v19614_v45, %v14215_v44 }
 0x47b   : > { %v15364_v2 = vor.u32 %v19897_v47, %v15361_v48  ;;  %6150 = vmatpush.bf16.msrb.mxu2 %v15108_v58  ;;  %6169 = vmatpush.bf16.msra.mxu0 %v13800_v3  ;;  %v5918_v47 = vpop.f32.mrf.mxu0  ;;  %v13960_v48 = vor.u32 %v19550_v41, %v13959_v39  ;;  %v14472_v0 = vor.u32 %v19678_v28, %v14471_v36  ;;  %v19542_v25 = vld [vmem:[%s21331_s10 + $0x2f4] sm:$0xf0] }
 0x47c   : > { %6138 = vmatmul.bf16.vlgmr.msrb.gmra.mxu1 %v21586_v5  ;;  %v5919_v12 = vadd.f32 %v5918_v47, %v22266_v21  ;;  %v14183_v14 = vld [vmem:[%s21331_s10 + $0x4d8] sm:$0xf]  ;;  %v13672_v3 = vor.u32 %v19478_v51, %v13671_v50  ;;  %v13928_v21 = vor.u32 %v19542_v25, %v13927_v52  ;;  %v5946_v47 = vpop.f32.mrf.mxu2  ;;  %v5959_v52 = vpop.f32.mrf.mxu3 }
 0x47d   : > { %6163 = vmatpush.bf16.msrb.mxu3 %v15364_v2  ;;  %6182 = vmatpush.bf16.msra.mxu1 %v14056_v61  ;;  %v19606_v58 = vld [vmem:[%s21331_s10 + $0x4f4] sm:$0xf0] }
 0x47e   : > { %6151 = vmatmul.bf16.vlgmr.msrb.gmra.mxu2 %v21578_v60  ;;  %v14439_v1 = vld [vmem:[%s21331_s10 + $0x6d8] sm:$0xf]  ;;  %v5932_v2 = vadd.f32 %v5931_v53, %v5919_v12  ;;  %v14184_v61 = vor.u32 %v19606_v58, %v14183_v14 }
 0x47f   : > { %6195 = vmatpush.bf16.msra.mxu2 %v14312_v4  ;;  %6170 = vmatpush.bf16.msra.mxu0 %v13768_v20  ;;  %v19670_v59 = vld [vmem:[%s21331_s10 + $0x6f4] sm:$0xf0] }
 0x480   : > { %6164 = vmatmul.bf16.vlgmr.msrb.gmra.mxu3 %v21584_v63  ;;  %v13639_v4 = vld [vmem:[%s21331_s10 + $0x98] sm:$0xf]  ;;  %v5945_v18 = vadd.f32 %v5944_v8, %v5932_v2 }
 0x481   : > { %6208 = vmatpush.bf16.msra.mxu3 %v14568_v9  ;;  %6183 = vmatpush.bf16.msra.mxu1 %v14024_v22  ;;  %v19470_v6 = vld [vmem:[%s21331_s10 + $0xb4] sm:$0xf0]  ;;  %v14440_v9 = vor.u32 %v19670_v59, %v14439_v1 }
 0x482   : > { %v13895_v7 = vld [vmem:[%s21331_s10 + $0x298] sm:$0xf]  ;;  %v22337_v23 = vadd.f32 %v5957_v19, %v5945_v18 }
 0x483   : > { %6196 = vmatpush.bf16.msra.mxu2 %v14280_v54  ;;  %6171 = vmatpush.bf16.msra.mxu0 %v13736_v33  ;;  %v19534_v11 = vld [vmem:[%s21331_s10 + $0x2b4] sm:$0xf0]  ;;  %v13640_v54 = vor.u32 %v19470_v6, %v13639_v4  ;;  %v5920_v55 = vpop.f32.mrf.mxu0 }
 0x484   : > { %v14151_v15 = vld [vmem:[%s21331_s10 + $0x498] sm:$0xf]  ;;  %v13896_v24 = vor.u32 %v19534_v11, %v13895_v7  ;;  %vm6380_vm15 = vcmp.ge.f32.partialorder %v22337_v23, 0.0 }
 0x485   : > { %6209 = vmatpush.bf16.msra.mxu3 %v14536_v56  ;;  %6184 = vmatpush.bf16.msra.mxu1 %v13992_v35  ;;  %v19598_v16 = vld [vmem:[%s21331_s10 + $0x4b4] sm:$0xf0] }
 0x486   : > { %v14407_v20 = vld [vmem:[%s21331_s10 + $0x698] sm:$0xf]  ;;  %v14152_v56 = vor.u32 %v19598_v16, %v14151_v15 }
 0x487   : > { %6197 = vmatpush.bf16.msra.mxu2 %v14248_v37  ;;  %6172 = vmatpush.bf16.msra.mxu0 %v13704_v46  ;;  %v19662_v22 = vld [vmem:[%s21331_s10 + $0x6b4] sm:$0xf0] }
 0x488   : > { %v13607_v26 = vld [vmem:[%s21331_s10 + $0x58] sm:$0xf]  ;;  %v14408_v31 = vor.u32 %v19662_v22, %v14407_v20 }
 0x489   : > { %6210 = vmatpush.bf16.msra.mxu3 %v14504_v40  ;;  %6185 = vmatpush.bf16.msra.mxu1 %v13960_v48  ;;  %v19462_v27 = vld [vmem:[%s21331_s10 + $0x74] sm:$0xf0] }
 0x48a   : > { %v13863_v29 = vld [vmem:[%s21331_s10 + $0x258] sm:$0xf]  ;;  %v13608_v39 = vor.u32 %v19462_v27, %v13607_v26 }
 0x48b   : > { %6198 = vmatpush.bf16.msra.mxu2 %v14216_v49  ;;  %6173 = vmatpush.bf16.msra.mxu0 %v13672_v3  ;;  %v19526_v33 = vld [vmem:[%s21331_s10 + $0x274] sm:$0xf0]  ;;  %v5970_v52 = vpop.f32.mrf.mxu0 }
 0x48c   : > { %v14119_v35 = vld [vmem:[%s21331_s10 + $0x458] sm:$0xf]  ;;  %v13864_v44 = vor.u32 %v19526_v33, %v13863_v29 }
 0x48d   : > { %6211 = vmatpush.bf16.msra.mxu3 %v14472_v0  ;;  %6186 = vmatpush.bf16.msra.mxu1 %v13928_v21  ;;  %v19590_v37 = vld [vmem:[%s21331_s10 + $0x474] sm:$0xf0] }
 0x48e   : > { %v14375_v38 = vld [vmem:[%s21331_s10 + $0x658] sm:$0xf]  ;;  %v14120_v45 = vor.u32 %v19590_v37, %v14119_v35 }
 0x48f   : > { %6199 = vmatpush.bf16.msra.mxu2 %v14184_v61  ;;  %v19654_v32 = vld [vmem:[%s21331_s10 + $0x674] sm:$0xf0]  ;;  %6174 = vmatpush.bf16.msra.mxu0 %v13640_v54 }
 0x490   : > { %v13575_v40 = vld [vmem:[%s21331_s10 + $0x18] sm:$0xf]  ;;  %v14376_v48 = vor.u32 %v19654_v32, %v14375_v38 }
 0x491   : > { %6212 = vmatpush.bf16.msra.mxu3 %v14440_v9  ;;  %v19454_v41 = vld [vmem:[%s21331_s10 + $0x34] sm:$0xf0]  ;;  %6187 = vmatpush.bf16.msra.mxu1 %v13896_v24 }
 0x492   : > { %v13831_v36 = vld [vmem:[%s21331_s10 + $0x218] sm:$0xf]  ;;  %v13576_v25 = vor.u32 %v19454_v41, %v13575_v40 }
 0x493   : > { %6200 = vmatpush.bf16.msra.mxu2 %v14152_v56  ;;  %v19518_v28 = vld [vmem:[%s21331_s10 + $0x234] sm:$0xf0]  ;;  %6175 = vmatpush.bf16.msra.mxu0 %v13608_v39 }
 0x494   : > { %v14087_v46 = vld [vmem:[%s21331_s10 + $0x418] sm:$0xf]  ;;  %v13832_v59 = vor.u32 %v19518_v28, %v13831_v36 }
 0x495   : > { %6213 = vmatpush.bf16.msra.mxu3 %v14408_v31  ;;  %v19582_v49 = vld [vmem:[%s21331_s10 + $0x434] sm:$0xf0]  ;;  %6188 = vmatpush.bf16.msra.mxu1 %v13864_v44 }
 0x496   : > { %v14343_v50 = vld [vmem:[%s21331_s10 + $0x618] sm:$0xf]  ;;  %v14088_v2 = vor.u32 %v19582_v49, %v14087_v46 }
 0x497   : > { %v19646_v51 = vld [vmem:[%s21331_s10 + $0x634] sm:$0xf0]  ;;  %6201 = vmatpush.bf16.msra.mxu2 %v14120_v45  ;;  %6176 = vmatpush.bf16.msra.mxu0 %v13576_v25 }
 0x498   : > { %v14823_v12 = vld [vmem:[%s21331_s10 + $0x9d8] sm:$0xf]  ;;  %v14344_v61 = vor.u32 %v19646_v51, %v14343_v50 }
 0x499   : > { %v19766_v53 = vld [vmem:[%s21331_s10 + $0x9f4] sm:$0xf0]  ;;  %6214 = vmatpush.bf16.msra.mxu3 %v14376_v48  ;;  %6189 = vmatpush.bf16.msra.mxu1 %v13832_v59 }
 0x49a   : > { %v15079_v0 = vld [vmem:[%s21331_s10 + $0xbd8] sm:$0xf]  ;;  %v14824_v4 = vor.u32 %v19766_v53, %v14823_v12  ;;  %6177 = vmatmul.bf16.vlgmr.msra.gmra.mxu0 %v21518_v34 }
 0x49b   : > { %v19830_v14 = vld [vmem:[%s21331_s10 + $0xbf4] sm:$0xf0]  ;;  %6202 = vmatpush.bf16.msra.mxu2 %v14088_v2 }
 0x49c   : > { %v15335_v58 = vld [vmem:[%s21331_s10 + $0xdd8] sm:$0xf]  ;;  %v15080_v6 = vor.u32 %v19830_v14, %v15079_v0  ;;  %6221 = vmatpush.bf16.msrb.mxu0 %v14824_v4  ;;  %6190 = vmatmul.bf16.vlgmr.msra.gmra.mxu1 %v21525_v43 }
 0x49d   : > { %v19894_v1 = vld [vmem:[%s21331_s10 + $0xdf4] sm:$0xf0]  ;;  %6215 = vmatpush.bf16.msra.mxu3 %v14344_v61 }
 0x49e   : > { %v15591_v3 = vld [vmem:[%s21331_s10 + $0xfd8] sm:$0xf]  ;;  %v15336_v7 = vor.u32 %v19894_v1, %v15335_v58  ;;  %6234 = vmatpush.bf16.msrb.mxu1 %v15080_v6  ;;  %6203 = vmatmul.bf16.vlgmr.msra.gmra.mxu2 %v21510_v57  ;;  %v5983_v1 = vpop.f32.mrf.mxu1 }
 0x49f   : > { %v19958_v21 = vld [vmem:[%s21331_s10 + $0xff4] sm:$0xf0] }
 0x4a0   : > { %v14791_v8 = vld [vmem:[%s21331_s10 + $0x998] sm:$0xf]  ;;  %v15592_v15 = vor.u32 %v19958_v21, %v15591_v3  ;;  %6247 = vmatpush.bf16.msrb.mxu2 %v15336_v7  ;;  %6216 = vmatmul.bf16.vlgmr.msra.gmra.mxu3 %v21523_v42 }
 0x4a1   : > { %v19758_v9 = vld [vmem:[%s21331_s10 + $0x9b4] sm:$0xf0] }
 0x4a2   : > { %v15047_v11 = vld [vmem:[%s21331_s10 + $0xb98] sm:$0xf]  ;;  %v14792_v54 = vor.u32 %v19758_v9, %v14791_v8  ;;  %6260 = vmatpush.bf16.msrb.mxu3 %v15592_v15 }
 0x4a3   : > { %v19822_v16 = vld [vmem:[%s21331_s10 + $0xbb4] sm:$0xf0] }
 0x4a4   : > { %v15303_v18 = vld [vmem:[%s21331_s10 + $0xd98] sm:$0xf]  ;;  %v15048_v55 = vor.u32 %v19822_v16, %v15047_v11  ;;  %6222 = vmatpush.bf16.msrb.mxu0 %v14792_v54 }
 0x4a5   : > { %v19886_v19 = vld [vmem:[%s21331_s10 + $0xdb4] sm:$0xf0] }
 0x4a6   : > { %v15559_v20 = vld [vmem:[%s21331_s10 + $0xf98] sm:$0xf]  ;;  %v15304_v24 = vor.u32 %v19886_v19, %v15303_v18  ;;  %6235 = vmatpush.bf16.msrb.mxu1 %v15048_v55  ;;  %v5996_v18 = vpop.f32.mrf.mxu2 }
 0x4a7   : > { %v19950_v22 = vld [vmem:[%s21331_s10 + $0xfb4] sm:$0xf0] }
 0x4a8   : > { %v14759_v56 = vld [vmem:[%s21331_s10 + $0x958] sm:$0xf]  ;;  %v15560_v29 = vor.u32 %v19950_v22, %v15559_v20  ;;  %6248 = vmatpush.bf16.msrb.mxu2 %v15304_v24  ;;  %v6009_v24 = vpop.f32.mrf.mxu3 }
 0x4a9   : > { %v19750_v26 = vld [vmem:[%s21331_s10 + $0x974] sm:$0xf0] }
 0x4aa   : > { %v15015_v27 = vld [vmem:[%s21331_s10 + $0xb58] sm:$0xf]  ;;  %v14760_v38 = vor.u32 %v19750_v26, %v14759_v56  ;;  %6261 = vmatpush.bf16.msrb.mxu3 %v15560_v29 }
 0x4ab   : > { %v19814_v30 = vld [vmem:[%s21331_s10 + $0xb74] sm:$0xf0] }
 0x4ac   : > { %v15271_v31 = vld [vmem:[%s21331_s10 + $0xd58] sm:$0xf]  ;;  %v15016_v39 = vor.u32 %v19814_v30, %v15015_v27  ;;  %6223 = vmatpush.bf16.msrb.mxu0 %v14760_v38  ;;  %v5972_v30 = vpop.f32.mrf.mxu0 }
 0x4ad   : > { %v19878_v33 = vld [vmem:[%s21331_s10 + $0xd74] sm:$0xf0]  ;;  %v14537_v30 = vld [vmem:[%s21331_s10 + $0x7b8] sm:$0xf0] }
 0x4ae   : > { %v15527_v35 = vld [vmem:[%s21331_s10 + $0xf58] sm:$0xf]  ;;  %v15272_v40 = vor.u32 %v19878_v33, %v15271_v31  ;;  %6236 = vmatpush.bf16.msrb.mxu1 %v15016_v39 }
 0x4af   : > { %v19942_v37 = vld [vmem:[%s21331_s10 + $0xf74] sm:$0xf0] }
 0x4b0   : > { %v14727_v32 = vld [vmem:[%s21331_s10 + $0x918] sm:$0xf]  ;;  %v15528_v28 = vor.u32 %v19942_v37, %v15527_v35  ;;  %6249 = vmatpush.bf16.msrb.mxu2 %v15272_v40 }
 0x4b1   : > { %v19742_v41 = vld [vmem:[%s21331_s10 + $0x934] sm:$0xf0] }
 0x4b2   : > { %v14983_v44 = vld [vmem:[%s21331_s10 + $0xb18] sm:$0xf]  ;;  %v14728_v51 = vor.u32 %v19742_v41, %v14727_v32  ;;  %6262 = vmatpush.bf16.msrb.mxu3 %v15528_v28  ;;  %v5985_v32 = vpop.f32.mrf.mxu1 }
 0x4b3   : > { %v22387_v45 = vld [vmem:[%s21813_s12] sm:$0xff] }
 0x4b4   : > { %v2973_v36 = vperm.slane %v22387_v45, 4  ;;  %v19806_v46 = vld [vmem:[%s21331_s10 + $0xb34] sm:$0xf0]  ;;  %6224 = vmatpush.bf16.msrb.mxu0 %v14728_v51  ;;  %v19554_v32 = vld [vmem:[%s21331_s10 + $0x35c] sm:$0xf] }
 0x4b5   : > { %v15239_v47 = vld [vmem:[%s21331_s10 + $0xd18] sm:$0xf]  ;;  %v14984_v12 = vor.u32 %v19806_v46, %v14983_v44 }
 0x4b6   : > { %v19870_v48 = vld [vmem:[%s21331_s10 + $0xd34] sm:$0xf0]  ;;  %v5971_v58 = vadd.f32 %v5970_v52, %v2973_v36 }
 0x4b7   : > { %v15495_v49 = vld [vmem:[%s21331_s10 + $0xf18] sm:$0xf]  ;;  %v15240_v53 = vor.u32 %v19870_v48, %v15239_v47  ;;  %6237 = vmatpush.bf16.msrb.mxu1 %v14984_v12 }
 0x4b8   : > { %v19934_v50 = vld [vmem:[%s21331_s10 + $0xf34] sm:$0xf0]  ;;  %v5984_v6 = vadd.f32 %v5983_v1, %v5971_v58  ;;  %v6011_v1 = vpop.f32.mrf.mxu3 }
 0x4b9   : > { %v14695_v0 = vld [vmem:[%s21331_s10 + $0x8d8] sm:$0xf]  ;;  %v15496_v59 = vor.u32 %v19934_v50, %v15495_v49  ;;  %6250 = vmatpush.bf16.msrb.mxu2 %v15240_v53  ;;  %v5998_v53 = vpop.f32.mrf.mxu2  ;;  %v6022_v1 = vpop.f32.mrf.mxu0 }
 0x4ba   : > { %v19734_v25 = vld [vmem:[%s21331_s10 + $0x8f4] sm:$0xf0]  ;;  %v5997_v55 = vadd.f32 %v5996_v18, %v5984_v6  ;;  %v14313_v6 = vld [vmem:[%s21331_s10 + $0x5f8] sm:$0xf0] }
 0x4bb   : > { %v14951_v14 = vld [vmem:[%s21331_s10 + $0xad8] sm:$0xf]  ;;  %v14696_v7 = vor.u32 %v19734_v25, %v14695_v0  ;;  %6263 = vmatpush.bf16.msrb.mxu3 %v15496_v59  ;;  %v19506_v59 = vld [vmem:[%s21331_s10 + $0x1dc] sm:$0xf] }
 0x4bc   : > { %v19798_v2 = vld [vmem:[%s21331_s10 + $0xaf4] sm:$0xf0]  ;;  %v22411_v29 = vadd.f32 %v6009_v24, %v5997_v55  ;;  %v14025_v24 = vld [vmem:[%s21331_s10 + $0x3b8] sm:$0xf0] }
 0x4bd   : > { %v15207_v3 = vld [vmem:[%s21331_s10 + $0xcd8] sm:$0xf]  ;;  %v14952_v8 = vor.u32 %v19798_v2, %v14951_v14  ;;  %6225 = vmatpush.bf16.msrb.mxu0 %v14696_v7  ;;  %v13801_v2 = vld [vmem:[%s21331_s10 + $0x1f8] sm:$0xf0] }
 0x4be   : > { %v19862_v21 = vld [vmem:[%s21331_s10 + $0xcf4] sm:$0xf0]  ;;  %v19610_v53 = vld [vmem:[%s21331_s10 + $0x51c] sm:$0xf] }
 0x4bf   : > { %v15463_v61 = vld [vmem:[%s21331_s10 + $0xed8] sm:$0xf]  ;;  %v15208_v9 = vor.u32 %v19862_v21, %v15207_v3  ;;  %6238 = vmatpush.bf16.msrb.mxu1 %v14952_v8  ;;  %v19570_v3 = vld [vmem:[%s21331_s10 + $0x3dc] sm:$0xf] }
 0x4c0   : > { %v19926_v4 = vld [vmem:[%s21331_s10 + $0xef4] sm:$0xf0] }
 0x4c1   : > { %v14663_v11 = vld [vmem:[%s21331_s10 + $0x898] sm:$0xf]  ;;  %v15464_v19 = vor.u32 %v19926_v4, %v15463_v61  ;;  %6251 = vmatpush.bf16.msrb.mxu2 %v15208_v9  ;;  %v14057_v61 = vld [vmem:[%s21331_s10 + $0x3f8] sm:$0xf0] }
 0x4c2   : > { %v19726_v15 = vld [vmem:[%s21331_s10 + $0x8b4] sm:$0xf0]  ;;  %v19634_v4 = vld [vmem:[%s21331_s10 + $0x5dc] sm:$0xf]  ;;  %v14060_v18 = vor.u32 %v19570_v3, %v14057_v61 }
 0x4c3   : > { %v14919_v16 = vld [vmem:[%s21331_s10 + $0xa98] sm:$0xf]  ;;  %v14664_v27 = vor.u32 %v19726_v15, %v14663_v11  ;;  %6264 = vmatpush.bf16.msrb.mxu3 %v15464_v19  ;;  %v19698_v9 = vld [vmem:[%s21331_s10 + $0x7dc] sm:$0xf]  ;;  %v14316_v19 = vor.u32 %v19634_v4, %v14313_v6  ;;  %v6023_v4 = vadd.f32 %v6022_v1, %v22411_v29  ;;  %v6035_v6 = vpop.f32.mrf.mxu1 }
 0x4c4   : > { %v19790_v20 = vld [vmem:[%s21331_s10 + $0xab4] sm:$0xf0]  ;;  %v14569_v11 = vld [vmem:[%s21331_s10 + $0x7f8] sm:$0xf0] }
 0x4c5   : > { %v15175_v22 = vld [vmem:[%s21331_s10 + $0xc98] sm:$0xf]  ;;  %v14920_v31 = vor.u32 %v19790_v20, %v14919_v16  ;;  %6226 = vmatpush.bf16.msrb.mxu0 %v14664_v27  ;;  %v13804_v16 = vor.u32 %v19506_v59, %v13801_v2  ;;  %v19498_v20 = vld [vmem:[%s21331_s10 + $0x19c] sm:$0xf]  ;;  %v14572_v55 = vor.u32 %v19698_v9, %v14569_v11 }
 0x4c6   : > { %v19854_v54 = vld [vmem:[%s21331_s10 + $0xcb4] sm:$0xf0]  ;;  %v19690_v27 = vld [vmem:[%s21331_s10 + $0x79c] sm:$0xf] }
 0x4c7   : > { %v15431_v56 = vld [vmem:[%s21331_s10 + $0xe98] sm:$0xf]  ;;  %v15176_v33 = vor.u32 %v19854_v54, %v15175_v22  ;;  %6239 = vmatpush.bf16.msrb.mxu1 %v14920_v31  ;;  %v13769_v22 = vld [vmem:[%s21331_s10 + $0x1b8] sm:$0xf0] }
 0x4c8   : > { %v19918_v26 = vld [vmem:[%s21331_s10 + $0xeb4] sm:$0xf0]  ;;  %v19562_v54 = vld [vmem:[%s21331_s10 + $0x39c] sm:$0xf]  ;;  %v13772_v31 = vor.u32 %v19498_v20, %v13769_v22 }
 0x4c9   : > { %v14631_v35 = vld [vmem:[%s21331_s10 + $0x858] sm:$0xf]  ;;  %v15432_v39 = vor.u32 %v19918_v26, %v15431_v56  ;;  %6252 = vmatpush.bf16.msrb.mxu2 %v15176_v33  ;;  %v19626_v56 = vld [vmem:[%s21331_s10 + $0x59c] sm:$0xf]  ;;  %v14028_v33 = vor.u32 %v19562_v54, %v14025_v24  ;;  %v6048_v24 = vpop.f32.mrf.mxu2 }
 0x4ca   : > { %v19718_v37 = vld [vmem:[%s21331_s10 + $0x874] sm:$0xf0]  ;;  %v14281_v26 = vld [vmem:[%s21331_s10 + $0x5b8] sm:$0xf0] }
 0x4cb   : > { %v14887_v38 = vld [vmem:[%s21331_s10 + $0xa58] sm:$0xf]  ;;  %v14632_v46 = vor.u32 %v19718_v37, %v14631_v35  ;;  %6265 = vmatpush.bf16.msrb.mxu3 %v15432_v39  ;;  %v14284_v35 = vor.u32 %v19626_v56, %v14281_v26  ;;  %v19490_v37 = vld [vmem:[%s21331_s10 + $0x15c] sm:$0xf]  ;;  %v14540_v39 = vor.u32 %v19690_v27, %v14537_v30 }
 0x4cc   : > { %v19782_v40 = vld [vmem:[%s21331_s10 + $0xa74] sm:$0xf0]  ;;  %v19474_v3 = vld [vmem:[%s21331_s10 + $0xdc] sm:$0xf] }
 0x4cd   : > { %v15143_v41 = vld [vmem:[%s21331_s10 + $0xc58] sm:$0xf]  ;;  %v14888_v49 = vor.u32 %v19782_v40, %v14887_v38  ;;  %6227 = vmatpush.bf16.msrb.mxu0 %v14632_v46  ;;  %v13737_v38 = vld [vmem:[%s21331_s10 + $0x178] sm:$0xf0] }
 0x4ce   : > { %v19846_v44 = vld [vmem:[%s21331_s10 + $0xc74] sm:$0xf0]  ;;  %v13993_v40 = vld [vmem:[%s21331_s10 + $0x378] sm:$0xf0]  ;;  %v13740_v46 = vor.u32 %v19490_v37, %v13737_v38 }
 0x4cf   : > { %v15399_v36 = vld [vmem:[%s21331_s10 + $0xe58] sm:$0xf]  ;;  %v15144_v50 = vor.u32 %v19846_v44, %v15143_v41  ;;  %6240 = vmatpush.bf16.msrb.mxu1 %v14888_v49  ;;  %v19618_v41 = vld [vmem:[%s21331_s10 + $0x55c] sm:$0xf] }
 0x4d0   : > { %v19910_v28 = vld [vmem:[%s21331_s10 + $0xe74] sm:$0xf0]  ;;  %v14249_v44 = vld [vmem:[%s21331_s10 + $0x578] sm:$0xf0] }
 0x4d1   : > { %v14599_v47 = vld [vmem:[%s21331_s10 + $0x818] sm:$0xf]  ;;  %v15400_v0 = vor.u32 %v19910_v28, %v15399_v36  ;;  %6253 = vmatpush.bf16.msrb.mxu2 %v15144_v50  ;;  %v19682_v36 = vld [vmem:[%s21331_s10 + $0x75c] sm:$0xf] }
 0x4d2   : > { %v19710_v48 = vld [vmem:[%s21331_s10 + $0x834] sm:$0xf0]  ;;  %v14505_v28 = vld [vmem:[%s21331_s10 + $0x778] sm:$0xf0] }
 0x4d3   : > { %v14855_v51 = vld [vmem:[%s21331_s10 + $0xa18] sm:$0xf]  ;;  %v14600_v21 = vor.u32 %v19710_v48, %v14599_v47  ;;  %6266 = vmatpush.bf16.msrb.mxu3 %v15400_v0  ;;  %v13996_v47 = vor.u32 %v19554_v32, %v13993_v40  ;;  %v14252_v48 = vor.u32 %v19618_v41, %v14249_v44  ;;  %v19482_v49 = vld [vmem:[%s21331_s10 + $0x11c] sm:$0xf] }
 0x4d4   : > { %v19774_v52 = vld [vmem:[%s21331_s10 + $0xa34] sm:$0xf0]  ;;  %v13705_v50 = vld [vmem:[%s21331_s10 + $0x138] sm:$0xf0] }
 0x4d5   : > { %v15111_v12 = vld [vmem:[%s21331_s10 + $0xc18] sm:$0xf]  ;;  %v14856_v7 = vor.u32 %v19774_v52, %v14855_v51  ;;  %6228 = vmatpush.bf16.msrb.mxu0 %v14600_v21  ;;  %v19546_v51 = vld [vmem:[%s21331_s10 + $0x31c] sm:$0xf]  ;;  %v14508_v52 = vor.u32 %v19682_v36, %v14505_v28 }
 0x4d6   : > { %v19838_v25 = vld [vmem:[%s21331_s10 + $0xc34] sm:$0xf0]  ;;  %v14217_v0 = vld [vmem:[%s21331_s10 + $0x538] sm:$0xf0] }
 0x4d7   : > { %v15367_v14 = vld [vmem:[%s21331_s10 + $0xe18] sm:$0xf]  ;;  %v15112_v8 = vor.u32 %v19838_v25, %v15111_v12  ;;  %6241 = vmatpush.bf16.msrb.mxu1 %v14856_v7  ;;  %v13961_v12 = vld [vmem:[%s21331_s10 + $0x338] sm:$0xf0]  ;;  %v14220_v2 = vor.u32 %v19610_v53, %v14217_v0 }
 0x4d8   : > { %v19902_v58 = vld [vmem:[%s21331_s10 + $0xe34] sm:$0xf0]  ;;  %6229 = vmatmul.bf16.vlgmr.msrb.gmra.mxu0 %v21582_v62  ;;  %v19674_v25 = vld [vmem:[%s21331_s10 + $0x71c] sm:$0xf]  ;;  %v13964_v59 = vor.u32 %v19546_v51, %v13961_v12 }
 0x4d9   : > { %v15368_v15 = vor.u32 %v19902_v58, %v15367_v14  ;;  %6254 = vmatpush.bf16.msrb.mxu2 %v15112_v8  ;;  %6273 = vmatpush.bf16.msra.mxu0 %v13804_v16  ;;  %v14473_v14 = vld [vmem:[%s21331_s10 + $0x738] sm:$0xf0]  ;;  %v13708_v58 = vor.u32 %v19482_v49, %v13705_v50 }
 0x4da   : > { %6242 = vmatmul.bf16.vlgmr.msrb.gmra.mxu1 %v21586_v5  ;;  %v13673_v21 = vld [vmem:[%s21331_s10 + $0xf8] sm:$0xf0]  ;;  %v14476_v7 = vor.u32 %v19674_v25, %v14473_v14 }
 0x4db   : > { %6267 = vmatpush.bf16.msrb.mxu3 %v15368_v15  ;;  %6286 = vmatpush.bf16.msra.mxu1 %v14060_v18  ;;  %v19538_v61 = vld [vmem:[%s21331_s10 + $0x2dc] sm:$0xf]  ;;  %v6036_v18 = vadd.f32 %v6035_v6, %v6023_v4 }
 0x4dc   : > { %6255 = vmatmul.bf16.vlgmr.msrb.gmra.mxu2 %v21578_v60  ;;  %v13929_v8 = vld [vmem:[%s21331_s10 + $0x2f8] sm:$0xf0] }
 0x4dd   : > { %6299 = vmatpush.bf16.msra.mxu2 %v14316_v19  ;;  %6274 = vmatpush.bf16.msra.mxu0 %v13772_v31  ;;  %v19602_v9 = vld [vmem:[%s21331_s10 + $0x4dc] sm:$0xf]  ;;  %v13676_v19 = vor.u32 %v19474_v3, %v13673_v21  ;;  %v13932_v29 = vor.u32 %v19538_v61, %v13929_v8  ;;  %v6049_v31 = vadd.f32 %v6048_v24, %v6036_v18 }
 0x4de   : > { %6268 = vmatmul.bf16.vlgmr.msrb.gmra.mxu3 %v21584_v63  ;;  %v14185_v11 = vld [vmem:[%s21331_s10 + $0x4f8] sm:$0xf0] }
 0x4df   : > { %6312 = vmatpush.bf16.msra.mxu3 %v14572_v55  ;;  %6287 = vmatpush.bf16.msra.mxu1 %v14028_v33  ;;  %v19666_v15 = vld [vmem:[%s21331_s10 + $0x6dc] sm:$0xf]  ;;  %v14188_v20 = vor.u32 %v19602_v9, %v14185_v11  ;;  %v6061_v33 = vpop.f32.mrf.mxu3 }
 0x4e0   : > { %v14441_v16 = vld [vmem:[%s21331_s10 + $0x6f8] sm:$0xf0]  ;;  %v22482_v32 = vadd.f32 %v6061_v33, %v6049_v31 }
 0x4e1   : > { %6300 = vmatpush.bf16.msra.mxu2 %v14284_v35  ;;  %6275 = vmatpush.bf16.msra.mxu0 %v13740_v46  ;;  %v19466_v22 = vld [vmem:[%s21331_s10 + $0x9c] sm:$0xf]  ;;  %v14444_v56 = vor.u32 %v19666_v15, %v14441_v16  ;;  %v6037_v46 = vpop.f32.mrf.mxu1 }
 0x4e2   : > { %v13641_v54 = vld [vmem:[%s21331_s10 + $0xb8] sm:$0xf0]  ;;  %vm6381_vm0 = vcmp.ge.f32.partialorder %v22482_v32, 0.0 }
 0x4e3   : > { %6313 = vmatpush.bf16.msra.mxu3 %v14540_v39  ;;  %6288 = vmatpush.bf16.msra.mxu1 %v13996_v47  ;;  %v19530_v55 = vld [vmem:[%s21331_s10 + $0x29c] sm:$0xf]  ;;  %v13644_v38 = vor.u32 %v19466_v22, %v13641_v54  ;;  %v6024_v39 = vpop.f32.mrf.mxu0 }
 0x4e4   : > { %v13897_v26 = vld [vmem:[%s21331_s10 + $0x2b8] sm:$0xf0] }
 0x4e5   : > { %6301 = vmatpush.bf16.msra.mxu2 %v14252_v48  ;;  %6276 = vmatpush.bf16.msra.mxu0 %v13708_v58  ;;  %v19594_v27 = vld [vmem:[%s21331_s10 + $0x49c] sm:$0xf]  ;;  %v13900_v40 = vor.u32 %v19530_v55, %v13897_v26 }
 0x4e6   : > { %v14153_v30 = vld [vmem:[%s21331_s10 + $0x4b8] sm:$0xf0] }
 0x4e7   : > { %6314 = vmatpush.bf16.msra.mxu3 %v14508_v52  ;;  %6289 = vmatpush.bf16.msra.mxu1 %v13964_v59  ;;  %v19658_v35 = vld [vmem:[%s21331_s10 + $0x69c] sm:$0xf]  ;;  %v14156_v41 = vor.u32 %v19594_v27, %v14153_v30  ;;  %v6063_v6 = vpop.f32.mrf.mxu3 }
 0x4e8   : > { %v14409_v37 = vld [vmem:[%s21331_s10 + $0x6b8] sm:$0xf0] }
 0x4e9   : > { %6302 = vmatpush.bf16.msra.mxu2 %v14220_v2  ;;  %6277 = vmatpush.bf16.msra.mxu0 %v13676_v19  ;;  %v19458_v44 = vld [vmem:[%s21331_s10 + $0x5c] sm:$0xf]  ;;  %v14412_v47 = vor.u32 %v19658_v35, %v14409_v37  ;;  %v6050_v2 = vpop.f32.mrf.mxu2 }
 0x4ea   : > { %v13609_v36 = vld [vmem:[%s21331_s10 + $0x78] sm:$0xf0] }
 0x4eb   : > { %6315 = vmatpush.bf16.msra.mxu3 %v14476_v7  ;;  %6290 = vmatpush.bf16.msra.mxu1 %v13932_v29  ;;  %v19522_v28 = vld [vmem:[%s21331_s10 + $0x25c] sm:$0xf]  ;;  %v13612_v12 = vor.u32 %v19458_v44, %v13609_v36 }
 0x4ec   : > { %v13865_v48 = vld [vmem:[%s21331_s10 + $0x278] sm:$0xf0] }
 0x4ed   : > { %6303 = vmatpush.bf16.msra.mxu2 %v14188_v20  ;;  %v19586_v49 = vld [vmem:[%s21331_s10 + $0x45c] sm:$0xf]  ;;  %6278 = vmatpush.bf16.msra.mxu0 %v13644_v38  ;;  %v13868_v25 = vor.u32 %v19522_v28, %v13865_v48 }
 0x4ee   : > { %v14121_v50 = vld [vmem:[%s21331_s10 + $0x478] sm:$0xf0] }
 0x4ef   : > { %6316 = vmatpush.bf16.msra.mxu3 %v14444_v56  ;;  %v19650_v51 = vld [vmem:[%s21331_s10 + $0x65c] sm:$0xf]  ;;  %6291 = vmatpush.bf16.msra.mxu1 %v13900_v40  ;;  %v14124_v14 = vor.u32 %v19586_v49, %v14121_v50 }
 0x4f0   : > { %v14377_v52 = vld [vmem:[%s21331_s10 + $0x678] sm:$0xf0] }
 0x4f1   : > { %v19450_v53 = vld [vmem:[%s21331_s10 + $0x1c] sm:$0xf]  ;;  %6304 = vmatpush.bf16.msra.mxu2 %v14156_v41  ;;  %v14380_v3 = vor.u32 %v19650_v51, %v14377_v52  ;;  %6279 = vmatpush.bf16.msra.mxu0 %v13612_v12 }
 0x4f2   : > { %v13577_v0 = vld [vmem:[%s21331_s10 + $0x38] sm:$0xf0] }
 0x4f3   : > { %v19514_v58 = vld [vmem:[%s21331_s10 + $0x21c] sm:$0xf]  ;;  %6317 = vmatpush.bf16.msra.mxu3 %v14412_v47  ;;  %v13580_v11 = vor.u32 %v19450_v53, %v13577_v0  ;;  %6292 = vmatpush.bf16.msra.mxu1 %v13868_v25 }
 0x4f4   : > { %v13833_v1 = vld [vmem:[%s21331_s10 + $0x238] sm:$0xf0] }
 0x4f5   : > { %v19578_v59 = vld [vmem:[%s21331_s10 + $0x41c] sm:$0xf]  ;;  %6305 = vmatpush.bf16.msra.mxu2 %v14124_v14  ;;  %v13836_v19 = vor.u32 %v19514_v58, %v13833_v1  ;;  %6280 = vmatpush.bf16.msra.mxu0 %v13580_v11 }
 0x4f6   : > { %v14089_v21 = vld [vmem:[%s21331_s10 + $0x438] sm:$0xf0] }
 0x4f7   : > { %v19642_v61 = vld [vmem:[%s21331_s10 + $0x61c] sm:$0xf]  ;;  %v14092_v29 = vor.u32 %v19578_v59, %v14089_v21  ;;  %6318 = vmatpush.bf16.msra.mxu3 %v14380_v3  ;;  %6293 = vmatpush.bf16.msra.mxu1 %v13836_v19  ;;  %v22536_v3 = vpop.f32.mrf.mxu0 }
 0x4f8   : > { %v14345_v4 = vld [vmem:[%s21331_s10 + $0x638] sm:$0xf0]  ;;  %6281 = vmatmul.bf16.vlgmr.msra.gmra.mxu0 %v21518_v34 }
 0x4f9   : > { %v19762_v7 = vld [vmem:[%s21331_s10 + $0x9dc] sm:$0xf]  ;;  %v14348_v54 = vor.u32 %v19642_v61, %v14345_v4  ;;  %6306 = vmatpush.bf16.msra.mxu2 %v14092_v29 }
 0x4fa   : > { %v14825_v8 = vld [vmem:[%s21331_s10 + $0x9f8] sm:$0xf0]  ;;  %6294 = vmatmul.bf16.vlgmr.msra.gmra.mxu1 %v21525_v43 }
 0x4fb   : > { %v19826_v9 = vld [vmem:[%s21331_s10 + $0xbdc] sm:$0xf]  ;;  %v14828_v55 = vor.u32 %v19762_v7, %v14825_v8  ;;  %6319 = vmatpush.bf16.msra.mxu3 %v14348_v54  ;;  %v22541_v8 = vpop.f32.mrf.mxu1 }
 0x4fc   : > { %v15081_v15 = vld [vmem:[%s21331_s10 + $0xbf8] sm:$0xf0]  ;;  %6307 = vmatmul.bf16.vlgmr.msra.gmra.mxu2 %v21510_v57 }
 0x4fd   : > { %v19890_v16 = vld [vmem:[%s21331_s10 + $0xddc] sm:$0xf]  ;;  %v15084_v24 = vor.u32 %v19826_v9, %v15081_v15  ;;  %6325 = vmatpush.bf16.msrb.mxu0 %v14828_v55 }
 0x4fe   : > { %v15337_v18 = vld [vmem:[%s21331_s10 + $0xdf8] sm:$0xf0]  ;;  %6320 = vmatmul.bf16.vlgmr.msra.gmra.mxu3 %v21523_v42 }
 0x4ff   : > { %v19954_v20 = vld [vmem:[%s21331_s10 + $0xfdc] sm:$0xf]  ;;  %v15340_v56 = vor.u32 %v19890_v16, %v15337_v18  ;;  %6338 = vmatpush.bf16.msrb.mxu1 %v15084_v24 }
 0x500   : > { %v15593_v22 = vld [vmem:[%s21331_s10 + $0xff8] sm:$0xf0] }
 0x501   : > { %v19754_v26 = vld [vmem:[%s21331_s10 + $0x99c] sm:$0xf]  ;;  %v15596_v31 = vor.u32 %v19954_v20, %v15593_v22  ;;  %6351 = vmatpush.bf16.msrb.mxu2 %v15340_v56  ;;  %v22551_v56 = vpop.f32.mrf.mxu2 }
 0x502   : > { %v14793_v27 = vld [vmem:[%s21331_s10 + $0x9b8] sm:$0xf0] }
 0x503   : > { %v19818_v30 = vld [vmem:[%s21331_s10 + $0xb9c] sm:$0xf]  ;;  %v14796_v40 = vor.u32 %v19754_v26, %v14793_v27  ;;  %6364 = vmatpush.bf16.msrb.mxu3 %v15596_v31 }
 0x504   : > { %v15049_v33 = vld [vmem:[%s21331_s10 + $0xbb8] sm:$0xf0] }
 0x505   : > { %v19882_v35 = vld [vmem:[%s21331_s10 + $0xd9c] sm:$0xf]  ;;  %v15052_v41 = vor.u32 %v19818_v30, %v15049_v33  ;;  %6326 = vmatpush.bf16.msrb.mxu0 %v14796_v40  ;;  %v22556_v33 = vpop.f32.mrf.mxu3 }
 0x506   : > { %v15305_v37 = vld [vmem:[%s21331_s10 + $0xdb8] sm:$0xf0] }
 0x507   : > { %v19946_v38 = vld [vmem:[%s21331_s10 + $0xf9c] sm:$0xf]  ;;  %v15308_v44 = vor.u32 %v19882_v35, %v15305_v37  ;;  %6339 = vmatpush.bf16.msrb.mxu1 %v15052_v41 }
 0x508   : > { %v15561_v39 = vld [vmem:[%s21331_s10 + $0xfb8] sm:$0xf0] }
 0x509   : > { %v19746_v36 = vld [vmem:[%s21331_s10 + $0x95c] sm:$0xf]  ;;  %v15564_v47 = vor.u32 %v19946_v38, %v15561_v39  ;;  %6352 = vmatpush.bf16.msrb.mxu2 %v15308_v44  ;;  %v6076_v39 = vpop.f32.mrf.mxu0 }
 0x50a   : > { %v14761_v28 = vld [vmem:[%s21331_s10 + $0x978] sm:$0xf0]  ;;  %v20204_v39 = vld [vmem:[%s21331_s10 + $0x179c] sm:$0xf0] }
 0x50b   : > { %v19810_v46 = vld [vmem:[%s21331_s10 + $0xb5c] sm:$0xf]  ;;  %v14764_v12 = vor.u32 %v19746_v36, %v14761_v28  ;;  %6365 = vmatpush.bf16.msrb.mxu3 %v15564_v47 }
 0x50c   : > { %v15017_v48 = vld [vmem:[%s21331_s10 + $0xb78] sm:$0xf0] }
 0x50d   : > { %v19874_v49 = vld [vmem:[%s21331_s10 + $0xd5c] sm:$0xf]  ;;  %v15020_v57 = vor.u32 %v19810_v46, %v15017_v48  ;;  %6327 = vmatpush.bf16.msrb.mxu0 %v14764_v12  ;;  %v6089_v46 = vpop.f32.mrf.mxu1 }
 0x50e   : > { %v15273_v50 = vld [vmem:[%s21331_s10 + $0xd78] sm:$0xf0]  ;;  %v16530_v46 = vld [vmem:[%s21331_s10 + $0x1340] sm:$0xf] }
 0x50f   : > { %v19938_v51 = vld [vmem:[%s21331_s10 + $0xf5c] sm:$0xf]  ;;  %v15276_v53 = vor.u32 %v19874_v49, %v15273_v50  ;;  %6340 = vmatpush.bf16.msrb.mxu1 %v15020_v57 }
 0x510   : > { %v15529_v52 = vld [vmem:[%s21331_s10 + $0xf78] sm:$0xf0] }
 0x511   : > { %v19738_v0 = vld [vmem:[%s21331_s10 + $0x91c] sm:$0xf]  ;;  %v15532_v34 = vor.u32 %v19938_v51, %v15529_v52  ;;  %6353 = vmatpush.bf16.msrb.mxu2 %v15276_v53 }
 0x512   : > { %v14729_v25 = vld [vmem:[%s21331_s10 + $0x938] sm:$0xf0] }
 0x513   : > { %v19802_v14 = vld [vmem:[%s21331_s10 + $0xb1c] sm:$0xf]  ;;  %v14732_v43 = vor.u32 %v19738_v0, %v14729_v25  ;;  %6366 = vmatpush.bf16.msrb.mxu3 %v15532_v34 }
 0x514   : > { %v14985_v58 = vld [vmem:[%s21331_s10 + $0xb38] sm:$0xf0] }
 0x515   : > { %v19866_v42 = vld [vmem:[%s21331_s10 + $0xd1c] sm:$0xf]  ;;  %v14988_v21 = vor.u32 %v19802_v14, %v14985_v58  ;;  %6328 = vmatpush.bf16.msrb.mxu0 %v14732_v43 }
 0x516   : > { %v15241_v1 = vld [vmem:[%s21331_s10 + $0xd38] sm:$0xf0] }
 0x517   : > { %v19930_v59 = vld [vmem:[%s21331_s10 + $0xf1c] sm:$0xf]  ;;  %v15244_v61 = vor.u32 %v19866_v42, %v15241_v1  ;;  %6341 = vmatpush.bf16.msrb.mxu1 %v14988_v21  ;;  %v6102_v42 = vpop.f32.mrf.mxu2  ;;  %v6115_v21 = vpop.f32.mrf.mxu3 }
 0x518   : > { %v15497_v2 = vld [vmem:[%s21331_s10 + $0xf38] sm:$0xf0]  ;;  %v17010_v42 = vld [vmem:[%s21331_s10 + $0x1700] sm:$0xf] }
 0x519   : > { %v19730_v4 = vld [vmem:[%s21331_s10 + $0x8dc] sm:$0xf]  ;;  %v15500_v9 = vor.u32 %v19930_v59, %v15497_v2  ;;  %6354 = vmatpush.bf16.msrb.mxu2 %v15244_v61  ;;  %v16338_v61 = vld [vmem:[%s21331_s10 + $0x11c0] sm:$0xf] }
 0x51a   : > { %v14697_v6 = vld [vmem:[%s21331_s10 + $0x8f8] sm:$0xf0] }
 0x51b   : > { %v19794_v7 = vld [vmem:[%s21331_s10 + $0xadc] sm:$0xf]  ;;  %v14700_v29 = vor.u32 %v19730_v4, %v14697_v6  ;;  %6367 = vmatpush.bf16.msrb.mxu3 %v15500_v9  ;;  %v20020_v4 = vld [vmem:[%s21331_s10 + $0x11dc] sm:$0xf0] }
 0x51c   : > { %v14953_v11 = vld [vmem:[%s21331_s10 + $0xaf8] sm:$0xf0]  ;;  %v16594_v6 = vld [vmem:[%s21331_s10 + $0x13c0] sm:$0xf] }
 0x51d   : > { %v19858_v15 = vld [vmem:[%s21331_s10 + $0xcdc] sm:$0xf]  ;;  %v14956_v20 = vor.u32 %v19794_v7, %v14953_v11  ;;  %6329 = vmatpush.bf16.msrb.mxu0 %v14700_v29  ;;  %v20084_v9 = vld [vmem:[%s21331_s10 + $0x13dc] sm:$0xf0] }
 0x51e   : > { %v15209_v16 = vld [vmem:[%s21331_s10 + $0xcf8] sm:$0xf0]  ;;  %v16850_v11 = vld [vmem:[%s21331_s10 + $0x15c0] sm:$0xf] }
 0x51f   : > { %v19922_v18 = vld [vmem:[%s21331_s10 + $0xedc] sm:$0xf]  ;;  %v15212_v22 = vor.u32 %v19858_v15, %v15209_v16  ;;  %6342 = vmatpush.bf16.msrb.mxu1 %v14956_v20  ;;  %v20148_v15 = vld [vmem:[%s21331_s10 + $0x15dc] sm:$0xf0] }
 0x520   : > { %v15465_v19 = vld [vmem:[%s21331_s10 + $0xef8] sm:$0xf0]  ;;  %v20212_v29 = vld [vmem:[%s21331_s10 + $0x17dc] sm:$0xf0] }
 0x521   : > { %v19722_v54 = vld [vmem:[%s21331_s10 + $0x89c] sm:$0xf]  ;;  %v15468_v26 = vor.u32 %v19922_v18, %v15465_v19  ;;  %6355 = vmatpush.bf16.msrb.mxu2 %v15212_v22  ;;  %v17106_v19 = vld [vmem:[%s21331_s10 + $0x17c0] sm:$0xf]  ;;  %v16339_v22 = vor.u32 %v20020_v4, %v16338_v61 }
 0x522   : > { %v14665_v55 = vld [vmem:[%s21331_s10 + $0x8b8] sm:$0xf0]  ;;  %v16210_v4 = vld [vmem:[%s21331_s10 + $0x10c0] sm:$0xf] }
 0x523   : > { %v19786_v24 = vld [vmem:[%s21331_s10 + $0xa9c] sm:$0xf]  ;;  %v14668_v38 = vor.u32 %v19722_v54, %v14665_v55  ;;  %6368 = vmatpush.bf16.msrb.mxu3 %v15468_v26  ;;  %v16595_v54 = vor.u32 %v20084_v9, %v16594_v6  ;;  %v16851_v55 = vor.u32 %v20148_v15, %v16850_v11  ;;  %v20012_v26 = vld [vmem:[%s21331_s10 + $0x119c] sm:$0xf0] }
 0x524   : > { %v14921_v27 = vld [vmem:[%s21331_s10 + $0xab8] sm:$0xf0]  ;;  %v19988_v6 = vld [vmem:[%s21331_s10 + $0x10dc] sm:$0xf0] }
 0x525   : > { %v19850_v30 = vld [vmem:[%s21331_s10 + $0xc9c] sm:$0xf]  ;;  %v14924_v40 = vor.u32 %v19786_v24, %v14921_v27  ;;  %6330 = vmatpush.bf16.msrb.mxu0 %v14668_v38  ;;  %v16306_v24 = vld [vmem:[%s21331_s10 + $0x1180] sm:$0xf] }
 0x526   : > { %v15177_v31 = vld [vmem:[%s21331_s10 + $0xcb8] sm:$0xf0]  ;;  %v16562_v27 = vld [vmem:[%s21331_s10 + $0x1380] sm:$0xf] }
 0x527   : > { %v19914_v35 = vld [vmem:[%s21331_s10 + $0xe9c] sm:$0xf]  ;;  %v15180_v41 = vor.u32 %v19850_v30, %v15177_v31  ;;  %6343 = vmatpush.bf16.msrb.mxu1 %v14924_v40  ;;  %v17107_v30 = vor.u32 %v20212_v29, %v17106_v19  ;;  %v20076_v31 = vld [vmem:[%s21331_s10 + $0x139c] sm:$0xf0]  ;;  %v16307_v40 = vor.u32 %v20012_v26, %v16306_v24  ;;  %v16211_v29 = vor.u32 %v19988_v6, %v16210_v4  ;;  %v22635_v26 = vpop.f32.mrf.mxu2 }
 0x528   : > { %v15433_v37 = vld [vmem:[%s21331_s10 + $0xeb8] sm:$0xf0]  ;;  %v17074_v38 = vld [vmem:[%s21331_s10 + $0x1780] sm:$0xf] }
 0x529   : > { %v19714_v44 = vld [vmem:[%s21331_s10 + $0x85c] sm:$0xf]  ;;  %v15436_v47 = vor.u32 %v19914_v35, %v15433_v37  ;;  %6356 = vmatpush.bf16.msrb.mxu2 %v15180_v41  ;;  %v16818_v35 = vld [vmem:[%s21331_s10 + $0x1580] sm:$0xf]  ;;  %v16563_v41 = vor.u32 %v20076_v31, %v16562_v27 }
 0x52a   : > { %v14633_v36 = vld [vmem:[%s21331_s10 + $0x878] sm:$0xf0]  ;;  %v20140_v37 = vld [vmem:[%s21331_s10 + $0x159c] sm:$0xf0] }
 0x52b   : > { %v19778_v28 = vld [vmem:[%s21331_s10 + $0xa5c] sm:$0xf]  ;;  %v14636_v12 = vor.u32 %v19714_v44, %v14633_v36  ;;  %6369 = vmatpush.bf16.msrb.mxu3 %v15436_v47  ;;  %v16819_v44 = vor.u32 %v20140_v37, %v16818_v35  ;;  %v16274_v36 = vld [vmem:[%s21331_s10 + $0x1140] sm:$0xf]  ;;  %v17075_v47 = vor.u32 %v20204_v39, %v17074_v38  ;;  %v22641_v38 = vpop.f32.mrf.mxu3 }
 0x52c   : > { %v14889_v48 = vld [vmem:[%s21331_s10 + $0xa78] sm:$0xf0]  ;;  %v20052_v11 = vld [vmem:[%s21331_s10 + $0x12dc] sm:$0xf0] }
 0x52d   : > { %v19842_v49 = vld [vmem:[%s21331_s10 + $0xc5c] sm:$0xf]  ;;  %v14892_v0 = vor.u32 %v19778_v28, %v14889_v48  ;;  %6331 = vmatpush.bf16.msrb.mxu0 %v14636_v12  ;;  %v20004_v28 = vld [vmem:[%s21331_s10 + $0x115c] sm:$0xf0] }
 0x52e   : > { %v15145_v50 = vld [vmem:[%s21331_s10 + $0xc78] sm:$0xf0]  ;;  %v20068_v48 = vld [vmem:[%s21331_s10 + $0x135c] sm:$0xf0]  ;;  %v16275_v12 = vor.u32 %v20004_v28, %v16274_v36 }
 0x52f   : > { %v19906_v51 = vld [vmem:[%s21331_s10 + $0xe5c] sm:$0xf]  ;;  %v15148_v25 = vor.u32 %v19842_v49, %v15145_v50  ;;  %6344 = vmatpush.bf16.msrb.mxu1 %v14892_v0  ;;  %v16786_v49 = vld [vmem:[%s21331_s10 + $0x1540] sm:$0xf] }
 0x530   : > { %v15401_v52 = vld [vmem:[%s21331_s10 + $0xe78] sm:$0xf0]  ;;  %v20132_v50 = vld [vmem:[%s21331_s10 + $0x155c] sm:$0xf0] }
 0x531   : > { %v19706_v57 = vld [vmem:[%s21331_s10 + $0x81c] sm:$0xf]  ;;  %v15404_v1 = vor.u32 %v19906_v51, %v15401_v52  ;;  %6357 = vmatpush.bf16.msrb.mxu2 %v15148_v25  ;;  %v17042_v51 = vld [vmem:[%s21331_s10 + $0x1740] sm:$0xf] }
 0x532   : > { %v14601_v53 = vld [vmem:[%s21331_s10 + $0x838] sm:$0xf0]  ;;  %v20196_v52 = vld [vmem:[%s21331_s10 + $0x175c] sm:$0xf0] }
 0x533   : > { %v19770_v14 = vld [vmem:[%s21331_s10 + $0xa1c] sm:$0xf]  ;;  %v14604_v7 = vor.u32 %v19706_v57, %v14601_v53  ;;  %6370 = vmatpush.bf16.msrb.mxu3 %v15404_v1  ;;  %v16787_v57 = vor.u32 %v20132_v50, %v16786_v49  ;;  %v19996_v53 = vld [vmem:[%s21331_s10 + $0x111c] sm:$0xf0]  ;;  %v17043_v25 = vor.u32 %v20196_v52, %v17042_v51  ;;  %v2974_v1 = vperm.slane %v22387_v45, 5  ;;  %v22623_v45 = vpop.f32.mrf.mxu1 }
 0x534   : > { %v14857_v34 = vld [vmem:[%s21331_s10 + $0xa38] sm:$0xf0]  ;;  %v16498_v0 = vld [vmem:[%s21331_s10 + $0x1300] sm:$0xf] }
 0x535   : > { %v19834_v58 = vld [vmem:[%s21331_s10 + $0xc1c] sm:$0xf]  ;;  %v14860_v16 = vor.u32 %v19770_v14, %v14857_v34  ;;  %6332 = vmatpush.bf16.msrb.mxu0 %v14604_v7  ;;  %v20060_v14 = vld [vmem:[%s21331_s10 + $0x131c] sm:$0xf0]  ;;  %v6075_v27 = vadd.f32 %v22536_v3, %v2974_v1  ;;  %v6387_v3 = vmul.f32 0.2, %v22195_v17  ;;  %v6154_v1 = vpop.f32.mrf.mxu2 }
 0x536   : > { %v15113_v59 = vld [vmem:[%s21331_s10 + $0xc38] sm:$0xf0]  ;;  %v16754_v34 = vld [vmem:[%s21331_s10 + $0x1500] sm:$0xf]  ;;  %v16499_v21 = vor.u32 %v20060_v14, %v16498_v0 }
 0x537   : > { %v19898_v2 = vld [vmem:[%s21331_s10 + $0xe1c] sm:$0xf]  ;;  %v15116_v18 = vor.u32 %v19834_v58, %v15113_v59  ;;  %6345 = vmatpush.bf16.msrb.mxu1 %v14860_v16  ;;  %v20124_v58 = vld [vmem:[%s21331_s10 + $0x151c] sm:$0xf0]  ;;  %v6088_v51 = vadd.f32 %v22541_v8, %v6075_v27 }
 0x538   : > { %v15369_v43 = vld [vmem:[%s21331_s10 + $0xe38] sm:$0xf0]  ;;  %6333 = vmatmul.bf16.vlgmr.msrb.gmra.mxu0 %v21582_v62  ;;  %v6385_v62 = vmul.f32 0.2, %v21908_v13  ;;  %v16755_v61 = vor.u32 %v20124_v58, %v16754_v34  ;;  %v16466_v7 = vld [vmem:[%s21331_s10 + $0x12c0] sm:$0xf] }
 0x539   : > { %v15372_v20 = vor.u32 %v19898_v2, %v15369_v43  ;;  %6358 = vmatpush.bf16.msrb.mxu2 %v15116_v18  ;;  %9511 = vmatpush.bf16.msra.mxu0 %v16339_v22  ;;  %v22615_v2 = vpop.f32.mrf.mxu0  ;;  %v16722_v15 = vld [vmem:[%s21331_s10 + $0x14c0] sm:$0xf] }
 0x53a   : > { %6346 = vmatmul.bf16.vlgmr.msrb.gmra.mxu1 %v21586_v5  ;;  %v16531_v5 = vor.u32 %v20068_v48, %v16530_v46  ;;  %v6393_v43 = vsel %vm6377_vm12, %v21908_v13, %v6385_v62  ;;  %v20116_v16 = vld [vmem:[%s21331_s10 + $0x14dc] sm:$0xf0] }
 0x53b   : > { %6371 = vmatpush.bf16.msrb.mxu3 %v15372_v20  ;;  %9524 = vmatpush.bf16.msra.mxu1 %v16595_v54  ;;  %v16978_v18 = vld [vmem:[%s21331_s10 + $0x16c0] sm:$0xf]  ;;  %v22630_v19 = vmul.f32 1.4142135, %v6393_v43  ;;  %v16467_v20 = vor.u32 %v20052_v11, %v16466_v7  ;;  %v16723_v22 = vor.u32 %v20116_v16, %v16722_v15  ;;  %v6141_v50 = vpop.f32.mrf.mxu1  ;;  %v6395_v43 = vsel %vm6379_vm14, %v22195_v17, %v6387_v3 }
 0x53c   : > { %6359 = vmatmul.bf16.vlgmr.msrb.gmra.mxu2 %v21578_v60  ;;  %v16242_v60 = vld [vmem:[%s21331_s10 + $0x1100] sm:$0xf] }
 0x53d   : > { %9537 = vmatpush.bf16.msra.mxu2 %v16851_v55  ;;  %9512 = vmatpush.bf16.msra.mxu0 %v16307_v40  ;;  %v16243_v59 = vor.u32 %v19996_v53, %v16242_v60  ;;  %v20180_v13 = vld [vmem:[%s21331_s10 + $0x16dc] sm:$0xf0] }
 0x53e   : > { %6372 = vmatmul.bf16.vlgmr.msrb.gmra.mxu3 %v21584_v63  ;;  %v20188_v63 = vld [vmem:[%s21331_s10 + $0x171c] sm:$0xf0] }
 0x53f   : > { %9550 = vmatpush.bf16.msra.mxu3 %v17107_v30  ;;  %9525 = vmatpush.bf16.msra.mxu1 %v16563_v41  ;;  %v17011_v9 = vor.u32 %v20188_v63, %v17010_v42  ;;  %v16178_v54 = vld [vmem:[%s21331_s10 + $0x1080] sm:$0xf]  ;;  %v16979_v30 = vor.u32 %v20180_v13, %v16978_v18  ;;  %v6386_v41 = vmul.f32 0.2, %v22050_v10 }
 0x540   : > { %v19980_v55 = vld [vmem:[%s21331_s10 + $0x109c] sm:$0xf0] }
 0x541   : > { %9538 = vmatpush.bf16.msra.mxu2 %v16819_v44  ;;  %9513 = vmatpush.bf16.msra.mxu0 %v16275_v12  ;;  %v16434_v24 = vld [vmem:[%s21331_s10 + $0x1280] sm:$0xf]  ;;  %v16179_v44 = vor.u32 %v19980_v55, %v16178_v54  ;;  %v6128_v36 = vpop.f32.mrf.mxu0 }
 0x542   : > { %v20044_v31 = vld [vmem:[%s21331_s10 + $0x129c] sm:$0xf0] }
 0x543   : > { %9551 = vmatpush.bf16.msra.mxu3 %v17075_v47  ;;  %9526 = vmatpush.bf16.msra.mxu1 %v16531_v5  ;;  %v16690_v35 = vld [vmem:[%s21331_s10 + $0x1480] sm:$0xf]  ;;  %v16435_v28 = vor.u32 %v20044_v31, %v16434_v24 }
 0x544   : > { %v20108_v37 = vld [vmem:[%s21331_s10 + $0x149c] sm:$0xf0] }
 0x545   : > { %9539 = vmatpush.bf16.msra.mxu2 %v16787_v57  ;;  %9514 = vmatpush.bf16.msra.mxu0 %v16243_v59  ;;  %v16946_v39 = vld [vmem:[%s21331_s10 + $0x1680] sm:$0xf]  ;;  %v16691_v46 = vor.u32 %v20108_v37, %v16690_v35  ;;  %v6388_v57 = vmul.f32 0.2, %v22337_v23  ;;  %v6394_v59 = vsel %vm6378_vm13, %v22050_v10, %v6386_v41 }
 0x546   : > { %v20172_v40 = vld [vmem:[%s21331_s10 + $0x169c] sm:$0xf0] }
 0x547   : > { %9552 = vmatpush.bf16.msra.mxu3 %v17043_v25  ;;  %9527 = vmatpush.bf16.msra.mxu1 %v16499_v21  ;;  %v16146_v47 = vld [vmem:[%s21331_s10 + $0x1040] sm:$0xf]  ;;  %v16947_v52 = vor.u32 %v20172_v40, %v16946_v39  ;;  %v6101_v21 = vadd.f32 %v22551_v56, %v6088_v51  ;;  %v6396_v11 = vsel %vm6380_vm15, %v22337_v23, %v6388_v57 }
 0x548   : > { %v19972_v48 = vld [vmem:[%s21331_s10 + $0x105c] sm:$0xf0]  ;;  %v6404_v54 = vmul.f32 1.4142135, %v6396_v11 }
 0x549   : > { %9540 = vmatpush.bf16.msra.mxu2 %v16755_v61  ;;  %9515 = vmatpush.bf16.msra.mxu0 %v16211_v29  ;;  %v16402_v49 = vld [vmem:[%s21331_s10 + $0x1240] sm:$0xf]  ;;  %v16147_v0 = vor.u32 %v19972_v48, %v16146_v47  ;;  %v6402_v29 = vmul.f32 1.4142135, %v6394_v59  ;;  %v6114_v55 = vadd.f32 %v22556_v33, %v6101_v21 }
 0x54a   : > { %v20036_v62 = vld [vmem:[%s21331_s10 + $0x125c] sm:$0xf0]  ;;  %v22700_v47 = vpack.c.bf16 %v6404_v54, %v6404_v54 }
 0x54b   : > { %9553 = vmatpush.bf16.msra.mxu3 %v17011_v9  ;;  %9528 = vmatpush.bf16.msra.mxu1 %v16467_v20  ;;  %v16658_v12 = vld [vmem:[%s21331_s10 + $0x1440] sm:$0xf]  ;;  %v16403_v14 = vor.u32 %v20036_v62, %v16402_v49  ;;  %v6167_v9 = vpop.f32.mrf.mxu3  ;;  %v6403_v20 = vmul.f32 1.4142135, %v6395_v43  ;;  %v22695_v33 = vpack.c.bf16 %v6402_v29, %v6402_v29 }
 0x54c   : > { %v20100_v5 = vld [vmem:[%s21331_s10 + $0x145c] sm:$0xf0] }
 0x54d   : > { %9541 = vmatpush.bf16.msra.mxu2 %v16723_v22  ;;  %v16914_v60 = vld [vmem:[%s21331_s10 + $0x1640] sm:$0xf]  ;;  %9516 = vmatpush.bf16.msra.mxu0 %v16179_v44  ;;  %v16659_v34 = vor.u32 %v20100_v5, %v16658_v12  ;;  %v22693_v44 = vpack.c.bf16 %v22630_v19, %v22630_v19  ;;  %v22697_v36 = vpack.c.bf16 %v6403_v20, %v6403_v20 }
 0x54e   : > { %v20164_v53 = vld [vmem:[%s21331_s10 + $0x165c] sm:$0xf0] }
 0x54f   : > { %9554 = vmatpush.bf16.msra.mxu3 %v16979_v30  ;;  %v16114_v25 = vld [vmem:[%s21331_s10 + $0x1000] sm:$0xf]  ;;  %9529 = vmatpush.bf16.msra.mxu1 %v16435_v28  ;;  %v16915_v61 = vor.u32 %v20164_v53, %v16914_v60  ;;  %v6127_v28 = vadd.f32 %v22615_v2, %v6114_v55 }
 0x550   : > { %v19964_v8 = vld [vmem:[%s21331_s10 + $0x101c] sm:$0xf0] }
 0x551   : > { %9542 = vmatpush.bf16.msra.mxu2 %v16691_v46  ;;  %v16370_v58 = vld [vmem:[%s21331_s10 + $0x1200] sm:$0xf]  ;;  %9517 = vmatpush.bf16.msra.mxu0 %v16147_v0  ;;  %v16115_v18 = vor.u32 %v19964_v8, %v16114_v25  ;;  %v6140_v12 = vadd.f32 %v22623_v45, %v6127_v28 }
 0x552   : > { %v20028_v42 = vld [vmem:[%s21331_s10 + $0x121c] sm:$0xf0] }
 0x553   : > { %v16626_v63 = vld [vmem:[%s21331_s10 + $0x1400] sm:$0xf]  ;;  %9555 = vmatpush.bf16.msra.mxu3 %v16947_v52  ;;  %9530 = vmatpush.bf16.msra.mxu1 %v16403_v14  ;;  %v16371_v22 = vor.u32 %v20028_v42, %v16370_v58  ;;  %v6153_v45 = vadd.f32 %v22635_v26, %v6140_v12  ;;  %v22720_v42 = vpop.f32.mrf.mxu0  ;;  %v22739_v20 = vpop.f32.mrf.mxu3 }
 0x554   : > { %v20092_v4 = vld [vmem:[%s21331_s10 + $0x141c] sm:$0xf0] }
 0x555   : > { %v16882_v6 = vld [vmem:[%s21331_s10 + $0x1600] sm:$0xf]  ;;  %9543 = vmatpush.bf16.msra.mxu2 %v16659_v34  ;;  %v16627_v23 = vor.u32 %v20092_v4, %v16626_v63  ;;  %9518 = vmatpush.bf16.msra.mxu0 %v16115_v18 }
 0x556   : > { %v20156_v7 = vld [vmem:[%s21331_s10 + $0x161c] sm:$0xf0] }
 0x557   : > { %v17362_v15 = vld [vmem:[%s21331_s10 + $0x19c0] sm:$0xf]  ;;  %9556 = vmatpush.bf16.msra.mxu3 %v16915_v61  ;;  %v16883_v24 = vor.u32 %v20156_v7, %v16882_v6  ;;  %9531 = vmatpush.bf16.msra.mxu1 %v16371_v22  ;;  %v22725_v61 = vpop.f32.mrf.mxu1  ;;  %v6166_v7 = vadd.f32 %v22641_v38, %v6153_v45  ;;  %v6389_v38 = vmul.f32 0.2, %v22482_v32  ;;  %v16852_v45 = vld [vmem:[%s21331_s10 + $0x15e0] sm:$0xf0] }
 0x558   : > { %v20276_v10 = vld [vmem:[%s21331_s10 + $0x19dc] sm:$0xf0]  ;;  %9519 = vmatmul.bf16.vlgmr.msra.gmra.mxu0 %v22693_v44 }
 0x559   : > { %v17618_v16 = vld [vmem:[%s21331_s10 + $0x1bc0] sm:$0xf]  ;;  %v17363_v27 = vor.u32 %v20276_v10, %v17362_v15  ;;  %9544 = vmatpush.bf16.msra.mxu2 %v16627_v23  ;;  %v6390_v22 = vmul.f32 0.2, %v6166_v7  ;;  %vm6382_vm1 = vcmp.ge.f32.partialorder %v6166_v7, 0.0 }
 0x55a   : > { %v20340_v13 = vld [vmem:[%s21331_s10 + $0x1bdc] sm:$0xf0]  ;;  %9532 = vmatmul.bf16.vlgmr.msra.gmra.mxu1 %v22695_v33 }
 0x55b   : > { %v17874_v17 = vld [vmem:[%s21331_s10 + $0x1dc0] sm:$0xf]  ;;  %v17619_v30 = vor.u32 %v20340_v13, %v17618_v16  ;;  %9557 = vmatpush.bf16.msra.mxu3 %v16883_v24  ;;  %9563 = vmatpush.bf16.msrb.mxu0 %v17363_v27  ;;  %v22734_v13 = vpop.f32.mrf.mxu2  ;;  %v6180_v54 = vpop.f32.mrf.mxu0 }
 0x55c   : > { %v20404_v56 = vld [vmem:[%s21331_s10 + $0x1ddc] sm:$0xf0]  ;;  %9545 = vmatmul.bf16.vlgmr.msra.gmra.mxu2 %v22697_v36 }
 0x55d   : > { %v17875_v31 = vor.u32 %v20404_v56, %v17874_v17  ;;  %v17330_v35 = vld [vmem:[%s21331_s10 + $0x1980] sm:$0xf]  ;;  %9576 = vmatpush.bf16.msrb.mxu1 %v17619_v30 }
 0x55e   : > { %v20268_v37 = vld [vmem:[%s21331_s10 + $0x199c] sm:$0xf0]  ;;  %9558 = vmatmul.bf16.vlgmr.msra.gmra.mxu3 %v22700_v47 }
 0x55f   : > { %v17586_v39 = vld [vmem:[%s21331_s10 + $0x1b80] sm:$0xf]  ;;  %v17331_v46 = vor.u32 %v20268_v37, %v17330_v35  ;;  %9589 = vmatpush.bf16.msrb.mxu2 %v17875_v31  ;;  %v6193_v35 = vpop.f32.mrf.mxu1 }
 0x560   : > { %v20332_v40 = vld [vmem:[%s21331_s10 + $0x1b9c] sm:$0xf0]  ;;  %v16788_v35 = vld [vmem:[%s21331_s10 + $0x1560] sm:$0xf0] }
 0x561   : > { %v17842_v41 = vld [vmem:[%s21331_s10 + $0x1d80] sm:$0xf]  ;;  %v17587_v19 = vor.u32 %v20332_v40, %v17586_v39  ;;  %9564 = vmatpush.bf16.msrb.mxu0 %v17331_v46 }
 0x562   : > { %v20396_v3 = vld [vmem:[%s21331_s10 + $0x1d9c] sm:$0xf0] }
 0x563   : > { %v17843_v48 = vor.u32 %v20396_v3, %v17842_v41  ;;  %v17298_v49 = vld [vmem:[%s21331_s10 + $0x1940] sm:$0xf]  ;;  %9577 = vmatpush.bf16.msrb.mxu1 %v17587_v19  ;;  %v22750_v41 = vld [vmem:[%s21813_s12] sm:$0xff]  ;;  %v6397_v19 = vsel %vm6381_vm0, %v22482_v32, %v6389_v38 }
 0x564   : > { %v20260_v50 = vld [vmem:[%s21331_s10 + $0x195c] sm:$0xf0]  ;;  %v2975_v3 = vperm.slane %v22750_v41, 6 }
 0x565   : > { %v17554_v51 = vld [vmem:[%s21331_s10 + $0x1b40] sm:$0xf]  ;;  %v17299_v5 = vor.u32 %v20260_v50, %v17298_v49  ;;  %9590 = vmatpush.bf16.msrb.mxu2 %v17843_v48 }
 0x566   : > { %v20324_v2 = vld [vmem:[%s21331_s10 + $0x1b5c] sm:$0xf0]  ;;  %v6179_v32 = vadd.f32 %v22720_v42, %v2975_v3 }
 0x567   : > { %v17810_v52 = vld [vmem:[%s21331_s10 + $0x1d40] sm:$0xf]  ;;  %v17555_v57 = vor.u32 %v20324_v2, %v17554_v51  ;;  %9565 = vmatpush.bf16.msrb.mxu0 %v17299_v5 }
 0x568   : > { %v20388_v62 = vld [vmem:[%s21331_s10 + $0x1d5c] sm:$0xf0] }
 0x569   : > { %v17811_v60 = vor.u32 %v20388_v62, %v17810_v52  ;;  %v17266_v53 = vld [vmem:[%s21331_s10 + $0x1900] sm:$0xf]  ;;  %9578 = vmatpush.bf16.msrb.mxu1 %v17555_v57  ;;  %v6206_v52 = vpop.f32.mrf.mxu2  ;;  %v6398_v62 = vsel %vm6382_vm1, %v6166_v7, %v6390_v22  ;;  %v20016_v57 = vld [vmem:[%s21331_s10 + $0x11c4] sm:$0xf] }
 0x56a   : > { %v20252_v0 = vld [vmem:[%s21331_s10 + $0x191c] sm:$0xf0]  ;;  %v20000_v22 = vld [vmem:[%s21331_s10 + $0x1144] sm:$0xf] }
 0x56b   : > { %v17522_v25 = vld [vmem:[%s21331_s10 + $0x1b00] sm:$0xf]  ;;  %v17267_v58 = vor.u32 %v20252_v0, %v17266_v53  ;;  %9591 = vmatpush.bf16.msrb.mxu2 %v17811_v60  ;;  %v6219_v60 = vpop.f32.mrf.mxu3  ;;  %v16340_v53 = vld [vmem:[%s21331_s10 + $0x11e0] sm:$0xf0] }
 0x56c   : > { %v20316_v8 = vld [vmem:[%s21331_s10 + $0x1b1c] sm:$0xf0]  ;;  %v20080_v0 = vld [vmem:[%s21331_s10 + $0x13c4] sm:$0xf] }
 0x56d   : > { %v17778_v14 = vld [vmem:[%s21331_s10 + $0x1d00] sm:$0xf]  ;;  %v17523_v63 = vor.u32 %v20316_v8, %v17522_v25  ;;  %9566 = vmatpush.bf16.msrb.mxu0 %v17267_v58  ;;  %v16596_v25 = vld [vmem:[%s21331_s10 + $0x13e0] sm:$0xf0]  ;;  %v6405_v8 = vmul.f32 1.4142135, %v6397_v19 }
 0x56e   : > { %v20380_v34 = vld [vmem:[%s21331_s10 + $0x1d1c] sm:$0xf0]  ;;  %v6406_v58 = vmul.f32 1.4142135, %v6398_v62  ;;  %v19984_v60 = vld [vmem:[%s21331_s10 + $0x10c4] sm:$0xf] }
 0x56f   : > { %v17779_v1 = vor.u32 %v20380_v34, %v17778_v14  ;;  %v17234_v59 = vld [vmem:[%s21331_s10 + $0x18c0] sm:$0xf]  ;;  %9579 = vmatpush.bf16.msrb.mxu1 %v17523_v63  ;;  %v20144_v34 = vld [vmem:[%s21331_s10 + $0x15c4] sm:$0xf] }
 0x570   : > { %v20244_v43 = vld [vmem:[%s21331_s10 + $0x18dc] sm:$0xf0]  ;;  %v16855_v7 = vor.u32 %v20144_v34, %v16852_v45  ;;  %v20112_v34 = vld [vmem:[%s21331_s10 + $0x14c4] sm:$0xf] }
 0x571   : > { %v17490_v21 = vld [vmem:[%s21331_s10 + $0x1ac0] sm:$0xf]  ;;  %v17235_v9 = vor.u32 %v20244_v43, %v17234_v59  ;;  %9592 = vmatpush.bf16.msrb.mxu2 %v17779_v1  ;;  %v16343_v43 = vor.u32 %v20016_v57, %v16340_v53  ;;  %v6230_v57 = vpop.f32.mrf.mxu0  ;;  %v16724_v45 = vld [vmem:[%s21331_s10 + $0x14e0] sm:$0xf0] }
 0x572   : > { %v20308_v4 = vld [vmem:[%s21331_s10 + $0x1adc] sm:$0xf0] }
 0x573   : > { %v17746_v26 = vld [vmem:[%s21331_s10 + $0x1cc0] sm:$0xf]  ;;  %v17491_v11 = vor.u32 %v20308_v4, %v17490_v21  ;;  %9567 = vmatpush.bf16.msrb.mxu0 %v17235_v9  ;;  %v16599_v21 = vor.u32 %v20080_v0, %v16596_v25  ;;  %v20008_v4 = vld [vmem:[%s21331_s10 + $0x1184] sm:$0xf]  ;;  %v6243_v25 = vpop.f32.mrf.mxu1 }
 0x574   : > { %v20372_v6 = vld [vmem:[%s21331_s10 + $0x1cdc] sm:$0xf0]  ;;  %v16308_v9 = vld [vmem:[%s21331_s10 + $0x11a0] sm:$0xf0] }
 0x575   : > { %v17747_v15 = vor.u32 %v20372_v6, %v17746_v26  ;;  %v17202_v10 = vld [vmem:[%s21331_s10 + $0x1880] sm:$0xf]  ;;  %9580 = vmatpush.bf16.msrb.mxu1 %v17491_v11  ;;  %v6192_v6 = vadd.f32 %v22725_v61, %v6179_v32  ;;  %v20072_v11 = vld [vmem:[%s21331_s10 + $0x1384] sm:$0xf] }
 0x576   : > { %v20236_v16 = vld [vmem:[%s21331_s10 + $0x189c] sm:$0xf0]  ;;  %v16212_v32 = vld [vmem:[%s21331_s10 + $0x10e0] sm:$0xf0] }
 0x577   : > { %v17458_v18 = vld [vmem:[%s21331_s10 + $0x1a80] sm:$0xf]  ;;  %v17203_v23 = vor.u32 %v20236_v16, %v17202_v10  ;;  %9593 = vmatpush.bf16.msrb.mxu2 %v17747_v15  ;;  %v16564_v15 = vld [vmem:[%s21331_s10 + $0x13a0] sm:$0xf0] }
 0x578   : > { %v20300_v17 = vld [vmem:[%s21331_s10 + $0x1a9c] sm:$0xf0]  ;;  %v20136_v10 = vld [vmem:[%s21331_s10 + $0x1584] sm:$0xf]  ;;  %v16567_v38 = vor.u32 %v20072_v11, %v16564_v15 }
 0x579   : > { %v17714_v56 = vld [vmem:[%s21331_s10 + $0x1c80] sm:$0xf]  ;;  %v17459_v55 = vor.u32 %v20300_v17, %v17458_v18  ;;  %9568 = vmatpush.bf16.msrb.mxu0 %v17203_v23  ;;  %v16820_v16 = vld [vmem:[%s21331_s10 + $0x15a0] sm:$0xf0]  ;;  %v22778_v18 = vpack.c.bf16 %v6405_v8, %v6405_v8  ;;  %v22780_v17 = vpack.c.bf16 %v6406_v58, %v6406_v58 }
 0x57a   : > { %v20364_v29 = vld [vmem:[%s21331_s10 + $0x1c9c] sm:$0xf0]  ;;  %v16276_v23 = vld [vmem:[%s21331_s10 + $0x1160] sm:$0xf0] }
 0x57b   : > { %v17715_v24 = vor.u32 %v20364_v29, %v17714_v56  ;;  %v17170_v27 = vld [vmem:[%s21331_s10 + $0x1840] sm:$0xf]  ;;  %9581 = vmatpush.bf16.msrb.mxu1 %v17459_v55  ;;  %v16311_v29 = vor.u32 %v20008_v4, %v16308_v9  ;;  %v6205_v55 = vadd.f32 %v22734_v13, %v6192_v6  ;;  %v20048_v8 = vld [vmem:[%s21331_s10 + $0x12c4] sm:$0xf]  ;;  %v6256_v6 = vpop.f32.mrf.mxu2 }
 0x57c   : > { %v20228_v30 = vld [vmem:[%s21331_s10 + $0x185c] sm:$0xf0]  ;;  %v16180_v4 = vld [vmem:[%s21331_s10 + $0x10a0] sm:$0xf0] }
 0x57d   : > { %v17426_v31 = vld [vmem:[%s21331_s10 + $0x1a40] sm:$0xf]  ;;  %v17171_v28 = vor.u32 %v20228_v30, %v17170_v27  ;;  %9594 = vmatpush.bf16.msrb.mxu2 %v17715_v24  ;;  %v16823_v24 = vor.u32 %v20136_v10, %v16820_v16  ;;  %v20064_v27 = vld [vmem:[%s21331_s10 + $0x1344] sm:$0xf]  ;;  %v6218_v19 = vadd.f32 %v22739_v20, %v6205_v55  ;;  %v6269_v10 = vpop.f32.mrf.mxu3 }
 0x57e   : > { %v20292_v37 = vld [vmem:[%s21331_s10 + $0x1a5c] sm:$0xf0]  ;;  %v16532_v30 = vld [vmem:[%s21331_s10 + $0x1360] sm:$0xf0] }
 0x57f   : > { %v17682_v39 = vld [vmem:[%s21331_s10 + $0x1c40] sm:$0xf]  ;;  %v17427_v48 = vor.u32 %v20292_v37, %v17426_v31  ;;  %9569 = vmatpush.bf16.msrb.mxu0 %v17171_v28  ;;  %v20128_v31 = vld [vmem:[%s21331_s10 + $0x1544] sm:$0xf]  ;;  %v16535_v3 = vor.u32 %v20064_v27, %v16532_v30  ;;  %v6231_v0 = vadd.f32 %v6230_v57, %v6218_v19  ;;  %v6232_v27 = vpop.f32.mrf.mxu0 }
 0x580   : > { %v20356_v40 = vld [vmem:[%s21331_s10 + $0x1c5c] sm:$0xf0]  ;;  %v19992_v28 = vld [vmem:[%s21331_s10 + $0x1104] sm:$0xf] }
 0x581   : > { %v17138_v46 = vld [vmem:[%s21331_s10 + $0x1800] sm:$0xf]  ;;  %v17683_v49 = vor.u32 %v20356_v40, %v17682_v39  ;;  %9582 = vmatpush.bf16.msrb.mxu1 %v17427_v48  ;;  %v16279_v40 = vor.u32 %v20000_v22, %v16276_v23  ;;  %v16791_v48 = vor.u32 %v20128_v31, %v16788_v35  ;;  %v16436_v9 = vld [vmem:[%s21331_s10 + $0x12a0] sm:$0xf0] }
 0x582   : > { %v20220_v50 = vld [vmem:[%s21331_s10 + $0x181c] sm:$0xf0]  ;;  %v20104_v11 = vld [vmem:[%s21331_s10 + $0x1484] sm:$0xf] }
 0x583   : > { %v17394_v51 = vld [vmem:[%s21331_s10 + $0x1a00] sm:$0xf]  ;;  %v17139_v14 = vor.u32 %v20220_v50, %v17138_v46  ;;  %9595 = vmatpush.bf16.msrb.mxu2 %v17683_v49  ;;  %v16244_v46 = vld [vmem:[%s21331_s10 + $0x1120] sm:$0xf0] }
 0x584   : > { %v20284_v2 = vld [vmem:[%s21331_s10 + $0x1a1c] sm:$0xf0]  ;;  %v20056_v49 = vld [vmem:[%s21331_s10 + $0x1304] sm:$0xf]  ;;  %v16247_v20 = vor.u32 %v19992_v28, %v16244_v46 }
 0x585   : > { %v17650_v12 = vld [vmem:[%s21331_s10 + $0x1c00] sm:$0xf]  ;;  %v17395_v63 = vor.u32 %v20284_v2, %v17394_v51  ;;  %9570 = vmatpush.bf16.msrb.mxu0 %v17139_v14  ;;  %v16500_v50 = vld [vmem:[%s21331_s10 + $0x1320] sm:$0xf0] }
 0x586   : > { %v20348_v5 = vld [vmem:[%s21331_s10 + $0x1c1c] sm:$0xf0]  ;;  %v20120_v51 = vld [vmem:[%s21331_s10 + $0x1504] sm:$0xf] }
 0x587   : > { %v17651_v1 = vor.u32 %v20348_v5, %v17650_v12  ;;  %v18130_v42 = vld [vmem:[%s21331_s10 + $0x1fc0] sm:$0xf]  ;;  %9583 = vmatpush.bf16.msrb.mxu1 %v17395_v63  ;;  %v16756_v2 = vld [vmem:[%s21331_s10 + $0x1520] sm:$0xf0]  ;;  %v16503_v5 = vor.u32 %v20056_v49, %v16500_v50 }
 0x588   : > { %v20468_v59 = vld [vmem:[%s21331_s10 + $0x1fdc] sm:$0xf0]  ;;  %9571 = vmatmul.bf16.vlgmr.msrb.gmra.mxu0 %v22778_v18  ;;  %v16759_v53 = vor.u32 %v20120_v51, %v16756_v2  ;;  %v16468_v14 = vld [vmem:[%s21331_s10 + $0x12e0] sm:$0xf0] }
 0x589   : > { %v18131_v26 = vor.u32 %v20468_v59, %v18130_v42  ;;  %9596 = vmatpush.bf16.msrb.mxu2 %v17651_v1  ;;  %v18098_v61 = vld [vmem:[%s21331_s10 + $0x1f80] sm:$0xf]  ;;  %9615 = vmatpush.bf16.msra.mxu0 %v16343_v43  ;;  %v6244_v1 = vadd.f32 %v6243_v25, %v6231_v0  ;;  %v16215_v59 = vor.u32 %v19984_v60, %v16212_v32  ;;  %v16692_v16 = vld [vmem:[%s21331_s10 + $0x14a0] sm:$0xf0]  ;;  %v6258_v60 = vpop.f32.mrf.mxu2 }
 0x58a   : > { %v20460_v56 = vld [vmem:[%s21331_s10 + $0x1f9c] sm:$0xf0]  ;;  %9584 = vmatmul.bf16.vlgmr.msrb.gmra.mxu1 %v22780_v17  ;;  %v16471_v43 = vor.u32 %v20048_v8, %v16468_v14  ;;  %v16148_v55 = vld [vmem:[%s21331_s10 + $0x1060] sm:$0xf0]  ;;  %v16695_v30 = vor.u32 %v20104_v11, %v16692_v16  ;;  %v22876_v60 = vpop.f32.mrf.mxu0 }
 0x58b   : > { %9602 = vmatpush.bf16.msrb.mxu3 %v18131_v26  ;;  %9628 = vmatpush.bf16.msra.mxu1 %v16599_v21  ;;  %v18099_v54 = vor.u32 %v20460_v56, %v18098_v61  ;;  %v18066_v37 = vld [vmem:[%s21331_s10 + $0x1f40] sm:$0xf]  ;;  %v19976_v21 = vld [vmem:[%s21331_s10 + $0x1084] sm:$0xf]  ;;  %v16727_v26 = vor.u32 %v20112_v34, %v16724_v45  ;;  %v6257_v15 = vadd.f32 %v6256_v6, %v6244_v1 }
 0x58c   : > { %v20452_v39 = vld [vmem:[%s21331_s10 + $0x1f5c] sm:$0xf0]  ;;  %v16183_v22 = vor.u32 %v19976_v21, %v16180_v4  ;;  %v16404_v31 = vld [vmem:[%s21331_s10 + $0x1260] sm:$0xf0] }
 0x58d   : > { %9641 = vmatpush.bf16.msra.mxu2 %v16855_v7  ;;  %v18067_v13 = vor.u32 %v20452_v39, %v18066_v37  ;;  %9616 = vmatpush.bf16.msra.mxu0 %v16311_v29  ;;  %v18034_v52 = vld [vmem:[%s21331_s10 + $0x1f00] sm:$0xf]  ;;  %v20040_v7 = vld [vmem:[%s21331_s10 + $0x1284] sm:$0xf]  ;;  %v6245_v39 = vpop.f32.mrf.mxu1 }
 0x58e   : > { %v20444_v62 = vld [vmem:[%s21331_s10 + $0x1f1c] sm:$0xf0]  ;;  %v16439_v23 = vor.u32 %v20040_v7, %v16436_v9  ;;  %v20096_v35 = vld [vmem:[%s21331_s10 + $0x1444] sm:$0xf] }
 0x58f   : > { %9603 = vmatpush.bf16.msrb.mxu3 %v18099_v54  ;;  %9629 = vmatpush.bf16.msra.mxu1 %v16567_v38  ;;  %v18035_v12 = vor.u32 %v20444_v62, %v18034_v52  ;;  %v18002_v58 = vld [vmem:[%s21331_s10 + $0x1ec0] sm:$0xf]  ;;  %v6270_v38 = vadd.f32 %v6269_v10, %v6257_v15  ;;  %v19968_v54 = vld [vmem:[%s21331_s10 + $0x1044] sm:$0xf] }
 0x590   : > { %v20436_v63 = vld [vmem:[%s21331_s10 + $0x1edc] sm:$0xf0]  ;;  %v16660_v37 = vld [vmem:[%s21331_s10 + $0x1460] sm:$0xf0] }
 0x591   : > { %9642 = vmatpush.bf16.msra.mxu2 %v16823_v24  ;;  %9617 = vmatpush.bf16.msra.mxu0 %v16279_v40  ;;  %v18003_v42 = vor.u32 %v20436_v63, %v18002_v58  ;;  %v17970_v61 = vld [vmem:[%s21331_s10 + $0x1e80] sm:$0xf]  ;;  %v20032_v24 = vld [vmem:[%s21331_s10 + $0x1244] sm:$0xf]  ;;  %vm6383_vm2 = vcmp.ge.f32.partialorder %v6270_v38, 0.0 }
 0x592   : > { %v20428_v56 = vld [vmem:[%s21331_s10 + $0x1e9c] sm:$0xf0]  ;;  %v19960_v28 = vld [vmem:[%s21331_s10 + $0x1004] sm:$0xf]  ;;  %v16407_v50 = vor.u32 %v20032_v24, %v16404_v31 }
 0x593   : > { %9604 = vmatpush.bf16.msrb.mxu3 %v18067_v13  ;;  %9630 = vmatpush.bf16.msra.mxu1 %v16535_v3  ;;  %v17971_v29 = vor.u32 %v20428_v56, %v17970_v61  ;;  %v6391_v13 = vmul.f32 0.2, %v6270_v38  ;;  %v17938_v40 = vld [vmem:[%s21331_s10 + $0x1e40] sm:$0xf]  ;;  %v16151_v3 = vor.u32 %v19968_v54, %v16148_v55  ;;  %v16116_v46 = vld [vmem:[%s21331_s10 + $0x1020] sm:$0xf0] }
 0x594   : > { %v20024_v19 = vld [vmem:[%s21331_s10 + $0x1204] sm:$0xf]  ;;  %v17906_v0 = vld [vmem:[%s21331_s10 + $0x1e00] sm:$0xf]  ;;  %v16119_v63 = vor.u32 %v19960_v28, %v16116_v46 }
 0x595   : > { %9643 = vmatpush.bf16.msra.mxu2 %v16791_v48  ;;  %9618 = vmatpush.bf16.msra.mxu0 %v16247_v20  ;;  %v20420_v48 = vld [vmem:[%s21331_s10 + $0x1e5c] sm:$0xf0]  ;;  %v6399_v49 = vsel %vm6383_vm2, %v6270_v38, %v6391_v13  ;;  %v16372_v51 = vld [vmem:[%s21331_s10 + $0x1220] sm:$0xf0]  ;;  %v16663_v20 = vor.u32 %v20096_v35, %v16660_v37 }
 0x596   : > { %v20088_v2 = vld [vmem:[%s21331_s10 + $0x1404] sm:$0xf]  ;;  %v17939_v62 = vor.u32 %v20420_v48, %v17938_v40  ;;  %v20412_v25 = vld [vmem:[%s21331_s10 + $0x1e1c] sm:$0xf0]  ;;  %v16375_v1 = vor.u32 %v20024_v19, %v16372_v51 }
 0x597   : > { %9605 = vmatpush.bf16.msrb.mxu3 %v18035_v12  ;;  %9631 = vmatpush.bf16.msra.mxu1 %v16503_v5  ;;  %v16628_v52 = vld [vmem:[%s21331_s10 + $0x1420] sm:$0xf0]  ;;  %v6407_v12 = vmul.f32 1.4142135, %v6399_v49  ;;  %v17907_v58 = vor.u32 %v20412_v25, %v17906_v0  ;;  %v22881_v25 = vpop.f32.mrf.mxu1 }
 0x598   : > { %v20272_v5 = vld [vmem:[%s21331_s10 + $0x19c4] sm:$0xf] }
 0x599   : > { %9644 = vmatpush.bf16.msra.mxu2 %v16759_v53  ;;  %9619 = vmatpush.bf16.msra.mxu0 %v16215_v59  ;;  %v17364_v57 = vld [vmem:[%s21331_s10 + $0x19e0] sm:$0xf0]  ;;  %v6271_v53 = vpop.f32.mrf.mxu3  ;;  %v22839_v8 = vpack.c.bf16 %v6407_v12, %v6407_v12 }
 0x59a   : > { %v20336_v32 = vld [vmem:[%s21331_s10 + $0x1bc4] sm:$0xf]  ;;  %v17367_v59 = vor.u32 %v20272_v5, %v17364_v57 }
 0x59b   : > { %9606 = vmatpush.bf16.msrb.mxu3 %v18003_v42  ;;  %9632 = vmatpush.bf16.msra.mxu1 %v16471_v43  ;;  %v17620_v14 = vld [vmem:[%s21331_s10 + $0x1be0] sm:$0xf0]  ;;  %v16631_v42 = vor.u32 %v20088_v2, %v16628_v52 }
 0x59c   : > { %v20400_v34 = vld [vmem:[%s21331_s10 + $0x1dc4] sm:$0xf]  ;;  %9597 = vmatmul.bf16.vlgmr.msrb.gmra.mxu2 %v22839_v8  ;;  %v17623_v4 = vor.u32 %v20336_v32, %v17620_v14 }
 0x59d   : > { %9645 = vmatpush.bf16.msra.mxu2 %v16727_v26  ;;  %9620 = vmatpush.bf16.msra.mxu0 %v16183_v22  ;;  %v17876_v45 = vld [vmem:[%s21331_s10 + $0x1de0] sm:$0xf0] }
 0x59e   : > { %v20208_v43 = vld [vmem:[%s21331_s10 + $0x17c4] sm:$0xf]  ;;  %v17879_v26 = vor.u32 %v20400_v34, %v17876_v45 }
 0x59f   : > { %9607 = vmatpush.bf16.msrb.mxu3 %v17971_v29  ;;  %9633 = vmatpush.bf16.msra.mxu1 %v16439_v23  ;;  %v17108_v21 = vld [vmem:[%s21331_s10 + $0x17e0] sm:$0xf0] }
 0x5a0   : > { %v20264_v6 = vld [vmem:[%s21331_s10 + $0x1984] sm:$0xf]  ;;  %v17111_v16 = vor.u32 %v20208_v43, %v17108_v21 }
 0x5a1   : > { %9646 = vmatpush.bf16.msra.mxu2 %v16695_v30  ;;  %9621 = vmatpush.bf16.msra.mxu0 %v16151_v3  ;;  %v17332_v7 = vld [vmem:[%s21331_s10 + $0x19a0] sm:$0xf0] }
 0x5a2   : > { %v20328_v9 = vld [vmem:[%s21331_s10 + $0x1b84] sm:$0xf]  ;;  %v17335_v61 = vor.u32 %v20264_v6, %v17332_v7  ;;  %v22892_v6 = vpop.f32.mrf.mxu2  ;;  %v22894_v7 = vpop.f32.mrf.mxu3 }
 0x5a3   : > { %9608 = vmatpush.bf16.msrb.mxu3 %v17939_v62  ;;  %9634 = vmatpush.bf16.msra.mxu1 %v16407_v50  ;;  %v17588_v11 = vld [vmem:[%s21331_s10 + $0x1ba0] sm:$0xf0] }
 0x5a4   : > { %v20392_v15 = vld [vmem:[%s21331_s10 + $0x1d84] sm:$0xf]  ;;  %v17591_v38 = vor.u32 %v20328_v9, %v17588_v11 }
 0x5a5   : > { %9647 = vmatpush.bf16.msra.mxu2 %v16663_v20  ;;  %v17844_v10 = vld [vmem:[%s21331_s10 + $0x1da0] sm:$0xf0]  ;;  %9622 = vmatpush.bf16.msra.mxu0 %v16119_v63 }
 0x5a6   : > { %v20200_v56 = vld [vmem:[%s21331_s10 + $0x1784] sm:$0xf]  ;;  %v17847_v22 = vor.u32 %v20392_v15, %v17844_v10 }
 0x5a7   : > { %9609 = vmatpush.bf16.msrb.mxu3 %v17907_v58  ;;  %9635 = vmatpush.bf16.msra.mxu1 %v16375_v1  ;;  %v17076_v29 = vld [vmem:[%s21331_s10 + $0x17a0] sm:$0xf0] }
 0x5a8   : > { %v20256_v23 = vld [vmem:[%s21331_s10 + $0x1944] sm:$0xf]  ;;  %9623 = vmatmul.bf16.vlgmr.msra.gmra.mxu0 %v22693_v44  ;;  %v17079_v31 = vor.u32 %v20200_v56, %v17076_v29 }
 0x5a9   : > { %9648 = vmatpush.bf16.msra.mxu2 %v16631_v42  ;;  %9667 = vmatpush.bf16.msrb.mxu0 %v17367_v59  ;;  %v17300_v54 = vld [vmem:[%s21331_s10 + $0x1960] sm:$0xf0] }
 0x5aa   : > { %v20320_v55 = vld [vmem:[%s21331_s10 + $0x1b44] sm:$0xf]  ;;  %9636 = vmatmul.bf16.vlgmr.msra.gmra.mxu1 %v22695_v33  ;;  %v17303_v35 = vor.u32 %v20256_v23, %v17300_v54 }
 0x5ab   : > { %9680 = vmatpush.bf16.msrb.mxu1 %v17623_v4  ;;  %v17556_v24 = vld [vmem:[%s21331_s10 + $0x1b60] sm:$0xf0]  ;;  %9654 = vmatpush.bf16.msra.mxu3 %v17111_v16 }
 0x5ac   : > { %v20384_v27 = vld [vmem:[%s21331_s10 + $0x1d44] sm:$0xf]  ;;  %v17559_v13 = vor.u32 %v20320_v55, %v17556_v24  ;;  %9649 = vmatmul.bf16.vlgmr.msra.gmra.mxu2 %v22697_v36  ;;  %v6297_v24 = vpop.f32.mrf.mxu1 }
 0x5ad   : > { %9693 = vmatpush.bf16.msrb.mxu2 %v17879_v26  ;;  %v17812_v30 = vld [vmem:[%s21331_s10 + $0x1d60] sm:$0xf0]  ;;  %9668 = vmatpush.bf16.msrb.mxu0 %v17335_v61  ;;  %v16506_v24 = vld [vmem:[%s21331_s10 + $0x1308] sm:$0xf] }
 0x5ae   : > { %v20192_v37 = vld [vmem:[%s21331_s10 + $0x1744] sm:$0xf]  ;;  %v17815_v40 = vor.u32 %v20384_v27, %v17812_v30  ;;  %v2976_v27 = vperm.slane %v22750_v41, 7 }
 0x5af   : > { %v17044_v39 = vld [vmem:[%s21331_s10 + $0x1760] sm:$0xf0]  ;;  %9681 = vmatpush.bf16.msrb.mxu1 %v17591_v38  ;;  %9655 = vmatpush.bf16.msra.mxu3 %v17079_v31 }
 0x5b0   : > { %v20248_v3 = vld [vmem:[%s21331_s10 + $0x1904] sm:$0xf]  ;;  %v17047_v50 = vor.u32 %v20192_v37, %v17044_v39 }
 0x5b1   : > { %9694 = vmatpush.bf16.msrb.mxu2 %v17847_v22  ;;  %v17268_v28 = vld [vmem:[%s21331_s10 + $0x1920] sm:$0xf0]  ;;  %9669 = vmatpush.bf16.msrb.mxu0 %v17303_v35  ;;  %v6284_v22 = vpop.f32.mrf.mxu0 }
 0x5b2   : > { %v20312_v46 = vld [vmem:[%s21331_s10 + $0x1b04] sm:$0xf]  ;;  %v17271_v51 = vor.u32 %v20248_v3, %v17268_v28 }
 0x5b3   : > { %v17524_v19 = vld [vmem:[%s21331_s10 + $0x1b20] sm:$0xf0]  ;;  %9682 = vmatpush.bf16.msrb.mxu1 %v17559_v13  ;;  %9656 = vmatpush.bf16.msra.mxu3 %v17047_v50  ;;  %v20021_v50 = vld [vmem:[%s21331_s10 + $0x11e4] sm:$0xf0] }
 0x5b4   : > { %v20376_v48 = vld [vmem:[%s21331_s10 + $0x1d04] sm:$0xf]  ;;  %v17527_v62 = vor.u32 %v20312_v46, %v17524_v19 }
 0x5b5   : > { %v17780_v49 = vld [vmem:[%s21331_s10 + $0x1d20] sm:$0xf0]  ;;  %9695 = vmatpush.bf16.msrb.mxu2 %v17815_v40  ;;  %9670 = vmatpush.bf16.msrb.mxu0 %v17271_v51  ;;  %v16602_v51 = vld [vmem:[%s21331_s10 + $0x13c8] sm:$0xf] }
 0x5b6   : > { %v20184_v2 = vld [vmem:[%s21331_s10 + $0x1704] sm:$0xf]  ;;  %v17783_v12 = vor.u32 %v20376_v48, %v17780_v49  ;;  %v16346_v48 = vld [vmem:[%s21331_s10 + $0x11c8] sm:$0xf]  ;;  %v6310_v49 = vpop.f32.mrf.mxu2 }
 0x5b7   : > { %v17012_v52 = vld [vmem:[%s21331_s10 + $0x1720] sm:$0xf0]  ;;  %9683 = vmatpush.bf16.msrb.mxu1 %v17527_v62 }
 0x5b8   : > { %v20240_v20 = vld [vmem:[%s21331_s10 + $0x18c4] sm:$0xf]  ;;  %v17015_v14 = vor.u32 %v20184_v2, %v17012_v52  ;;  %v20085_v2 = vld [vmem:[%s21331_s10 + $0x13e4] sm:$0xf0]  ;;  %v6323_v52 = vpop.f32.mrf.mxu3 }
 0x5b9   : > { %v17236_v5 = vld [vmem:[%s21331_s10 + $0x18e0] sm:$0xf0]  ;;  %9696 = vmatpush.bf16.msrb.mxu2 %v17783_v12  ;;  %v19981_v52 = vld [vmem:[%s21331_s10 + $0x10a4] sm:$0xf0] }
 0x5ba   : > { %v20304_v57 = vld [vmem:[%s21331_s10 + $0x1ac4] sm:$0xf]  ;;  %v17239_v34 = vor.u32 %v20240_v20, %v17236_v5  ;;  %9657 = vmatpush.bf16.msra.mxu3 %v17015_v14  ;;  %v16858_v20 = vld [vmem:[%s21331_s10 + $0x15c8] sm:$0xf]  ;;  %v16603_v14 = vor.u32 %v20085_v2, %v16602_v51 }
 0x5bb   : > { %v17492_v32 = vld [vmem:[%s21331_s10 + $0x1ae0] sm:$0xf0]  ;;  %v20149_v5 = vld [vmem:[%s21331_s10 + $0x15e4] sm:$0xf0] }
 0x5bc   : > { %v20368_v53 = vld [vmem:[%s21331_s10 + $0x1cc4] sm:$0xf]  ;;  %v17495_v63 = vor.u32 %v20304_v57, %v17492_v32  ;;  %9671 = vmatpush.bf16.msrb.mxu0 %v17239_v34  ;;  %v16314_v34 = vld [vmem:[%s21331_s10 + $0x1188] sm:$0xf] }
 0x5bd   : > { %v17748_v0 = vld [vmem:[%s21331_s10 + $0x1ce0] sm:$0xf0]  ;;  %v16186_v51 = vld [vmem:[%s21331_s10 + $0x1088] sm:$0xf] }
 0x5be   : > { %v20176_v45 = vld [vmem:[%s21331_s10 + $0x16c4] sm:$0xf]  ;;  %v17751_v1 = vor.u32 %v20368_v53, %v17748_v0  ;;  %9684 = vmatpush.bf16.msrb.mxu1 %v17495_v63  ;;  %v6283_v53 = vadd.f32 %v22876_v60, %v2976_v27  ;;  %v16347_v0 = vor.u32 %v20021_v50, %v16346_v48  ;;  %v16859_v63 = vor.u32 %v20149_v5, %v16858_v20  ;;  %v20061_v27 = vld [vmem:[%s21331_s10 + $0x1324] sm:$0xf0] }
 0x5bf   : > { %v16980_v58 = vld [vmem:[%s21331_s10 + $0x16e0] sm:$0xf0]  ;;  %v20117_v48 = vld [vmem:[%s21331_s10 + $0x14e4] sm:$0xf0] }
 0x5c0   : > { %v20232_v42 = vld [vmem:[%s21331_s10 + $0x1884] sm:$0xf]  ;;  %v16983_v9 = vor.u32 %v20176_v45, %v16980_v58  ;;  %9697 = vmatpush.bf16.msrb.mxu2 %v17751_v1  ;;  %v20013_v1 = vld [vmem:[%s21331_s10 + $0x11a4] sm:$0xf0] }
 0x5c1   : > { %v17204_v59 = vld [vmem:[%s21331_s10 + $0x18a0] sm:$0xf0]  ;;  %v16698_v5 = vld [vmem:[%s21331_s10 + $0x1488] sm:$0xf] }
 0x5c2   : > { %v20296_v43 = vld [vmem:[%s21331_s10 + $0x1a84] sm:$0xf]  ;;  %v17207_v11 = vor.u32 %v20232_v42, %v17204_v59  ;;  %9658 = vmatpush.bf16.msra.mxu3 %v16983_v9  ;;  %v16570_v42 = vld [vmem:[%s21331_s10 + $0x1388] sm:$0xf] }
 0x5c3   : > { %v17460_v21 = vld [vmem:[%s21331_s10 + $0x1aa0] sm:$0xf0]  ;;  %v20077_v59 = vld [vmem:[%s21331_s10 + $0x13a4] sm:$0xf0] }
 0x5c4   : > { %v20360_v4 = vld [vmem:[%s21331_s10 + $0x1c84] sm:$0xf]  ;;  %v17463_v16 = vor.u32 %v20296_v43, %v17460_v21  ;;  %9672 = vmatpush.bf16.msrb.mxu0 %v17207_v11  ;;  %v16826_v43 = vld [vmem:[%s21331_s10 + $0x1588] sm:$0xf]  ;;  %v16571_v9 = vor.u32 %v20077_v59, %v16570_v42 }
 0x5c5   : > { %v17716_v26 = vld [vmem:[%s21331_s10 + $0x1ca0] sm:$0xf0]  ;;  %v20141_v21 = vld [vmem:[%s21331_s10 + $0x15a4] sm:$0xf0] }
 0x5c6   : > { %v20168_v15 = vld [vmem:[%s21331_s10 + $0x1684] sm:$0xf]  ;;  %v17719_v61 = vor.u32 %v20360_v4, %v17716_v26  ;;  %9685 = vmatpush.bf16.msrb.mxu1 %v17463_v16  ;;  %v6296_v4 = vadd.f32 %v22881_v25, %v6283_v53  ;;  %v16315_v26 = vor.u32 %v20013_v1, %v16314_v34  ;;  %v16282_v11 = vld [vmem:[%s21331_s10 + $0x1148] sm:$0xf]  ;;  %v16187_v34 = vor.u32 %v19981_v52, %v16186_v51 }
 0x5c7   : > { %v16948_v10 = vld [vmem:[%s21331_s10 + $0x16a0] sm:$0xf0]  ;;  %v16538_v16 = vld [vmem:[%s21331_s10 + $0x1348] sm:$0xf] }
 0x5c8   : > { %v20224_v56 = vld [vmem:[%s21331_s10 + $0x1844] sm:$0xf]  ;;  %v16951_v30 = vor.u32 %v20168_v15, %v16948_v10  ;;  %9698 = vmatpush.bf16.msrb.mxu2 %v17719_v61  ;;  %v16827_v15 = vor.u32 %v20141_v21, %v16826_v43  ;;  %v20005_v10 = vld [vmem:[%s21331_s10 + $0x1164] sm:$0xf0] }
 0x5c9   : > { %v17172_v29 = vld [vmem:[%s21331_s10 + $0x1860] sm:$0xf0]  ;;  %v20069_v61 = vld [vmem:[%s21331_s10 + $0x1364] sm:$0xf0] }
 0x5ca   : > { %v20288_v38 = vld [vmem:[%s21331_s10 + $0x1a44] sm:$0xf]  ;;  %v17175_v31 = vor.u32 %v20224_v56, %v17172_v29  ;;  %9659 = vmatpush.bf16.msra.mxu3 %v16951_v30  ;;  %v16794_v25 = vld [vmem:[%s21331_s10 + $0x1548] sm:$0xf]  ;;  %v6309_v29 = vadd.f32 %v22892_v6, %v6296_v4  ;;  %v16539_v22 = vor.u32 %v20069_v61, %v16538_v16 }
 0x5cb   : > { %v17428_v23 = vld [vmem:[%s21331_s10 + $0x1a60] sm:$0xf0]  ;;  %v20133_v56 = vld [vmem:[%s21331_s10 + $0x1564] sm:$0xf0] }
 0x5cc   : > { %v20352_v54 = vld [vmem:[%s21331_s10 + $0x1c44] sm:$0xf]  ;;  %v17431_v13 = vor.u32 %v20288_v38, %v17428_v23  ;;  %9673 = vmatpush.bf16.msrb.mxu0 %v17175_v31  ;;  %v16283_v38 = vor.u32 %v20005_v10, %v16282_v11  ;;  %v16250_v23 = vld [vmem:[%s21331_s10 + $0x1108] sm:$0xf]  ;;  %v6322_v6 = vadd.f32 %v22894_v7, %v6309_v29 }
 0x5cd   : > { %v17684_v55 = vld [vmem:[%s21331_s10 + $0x1c60] sm:$0xf0]  ;;  %v16762_v30 = vld [vmem:[%s21331_s10 + $0x1508] sm:$0xf] }
 0x5ce   : > { %v20216_v35 = vld [vmem:[%s21331_s10 + $0x1804] sm:$0xf]  ;;  %v17687_v40 = vor.u32 %v20352_v54, %v17684_v55  ;;  %9686 = vmatpush.bf16.msrb.mxu1 %v17431_v13  ;;  %v16795_v54 = vor.u32 %v20133_v56, %v16794_v25  ;;  %v19997_v55 = vld [vmem:[%s21331_s10 + $0x1124] sm:$0xf0] }
 0x5cf   : > { %v20160_v37 = vld [vmem:[%s21331_s10 + $0x1644] sm:$0xf]  ;;  %v20125_v31 = vld [vmem:[%s21331_s10 + $0x1524] sm:$0xf0] }
 0x5d0   : > { %v16916_v39 = vld [vmem:[%s21331_s10 + $0x1660] sm:$0xf0]  ;;  %9699 = vmatpush.bf16.msrb.mxu2 %v17687_v40  ;;  %v16218_v13 = vld [vmem:[%s21331_s10 + $0x10c8] sm:$0xf]  ;;  %v6347_v40 = vpop.f32.mrf.mxu1 }
 0x5d1   : > { %v17140_v3 = vld [vmem:[%s21331_s10 + $0x1820] sm:$0xf0]  ;;  %v16919_v62 = vor.u32 %v20160_v37, %v16916_v39  ;;  %v16251_v37 = vor.u32 %v19997_v55, %v16250_v23  ;;  %v16507_v39 = vor.u32 %v20061_v27, %v16506_v24  ;;  %v16730_v7 = vld [vmem:[%s21331_s10 + $0x14c8] sm:$0xf] }
 0x5d2   : > { %v20280_v41 = vld [vmem:[%s21331_s10 + $0x1a04] sm:$0xf]  ;;  %v17143_v12 = vor.u32 %v20216_v35, %v17140_v3  ;;  %v6334_v35 = vpop.f32.mrf.mxu0  ;;  %v16763_v3 = vor.u32 %v20125_v31, %v16762_v30  ;;  %v16731_v2 = vor.u32 %v20117_v48, %v16730_v7  ;;  %v19973_v42 = vld [vmem:[%s21331_s10 + $0x1064] sm:$0xf0] }
 0x5d3   : > { %v17396_v28 = vld [vmem:[%s21331_s10 + $0x1a20] sm:$0xf0]  ;;  %9660 = vmatpush.bf16.msra.mxu3 %v16919_v62  ;;  %v16442_v62 = vld [vmem:[%s21331_s10 + $0x1288] sm:$0xf] }
 0x5d4   : > { %v20344_v46 = vld [vmem:[%s21331_s10 + $0x1c04] sm:$0xf]  ;;  %v17399_v57 = vor.u32 %v20280_v41, %v17396_v28  ;;  %9674 = vmatpush.bf16.msrb.mxu0 %v17143_v12  ;;  %v19989_v41 = vld [vmem:[%s21331_s10 + $0x10e4] sm:$0xf0] }
 0x5d5   : > { %v17652_v19 = vld [vmem:[%s21331_s10 + $0x1c20] sm:$0xf0]  ;;  %v16474_v28 = vld [vmem:[%s21331_s10 + $0x12c8] sm:$0xf]  ;;  %v16219_v49 = vor.u32 %v19989_v41, %v16218_v13 }
 0x5d6   : > { %v17655_v32 = vor.u32 %v20344_v46, %v17652_v19  ;;  %v20152_v45 = vld [vmem:[%s21331_s10 + $0x1604] sm:$0xf]  ;;  %9687 = vmatpush.bf16.msrb.mxu1 %v17399_v57  ;;  %v20053_v46 = vld [vmem:[%s21331_s10 + $0x12e4] sm:$0xf0]  ;;  %v6335_v19 = vadd.f32 %v6334_v35, %v6322_v6 }
 0x5d7   : > { %v16884_v58 = vld [vmem:[%s21331_s10 + $0x1620] sm:$0xf0]  ;;  %9675 = vmatmul.bf16.vlgmr.msrb.gmra.mxu0 %v22778_v18  ;;  %v16475_v50 = vor.u32 %v20053_v46, %v16474_v28  ;;  %v20045_v12 = vld [vmem:[%s21331_s10 + $0x12a4] sm:$0xf0] }
 0x5d8   : > { %9700 = vmatpush.bf16.msrb.mxu2 %v17655_v32  ;;  %v16887_v60 = vor.u32 %v20152_v45, %v16884_v58  ;;  %9719 = vmatpush.bf16.msra.mxu0 %v16347_v0  ;;  %v6348_v20 = vadd.f32 %v6347_v40, %v6335_v19  ;;  %v20109_v57 = vld [vmem:[%s21331_s10 + $0x14a4] sm:$0xf0]  ;;  %v6360_v32 = vpop.f32.mrf.mxu2  ;;  %v6373_v0 = vpop.f32.mrf.mxu3  ;;  %v16443_v45 = vor.u32 %v20045_v12, %v16442_v62  ;;  %v18132_v23 = vld [vmem:[%s21331_s10 + $0x1fe0] sm:$0xf0] }
 0x5d9   : > { %9688 = vmatmul.bf16.vlgmr.msrb.gmra.mxu1 %v22780_v17  ;;  %v16154_v58 = vld [vmem:[%s21331_s10 + $0x1048] sm:$0xf]  ;;  %v16699_v1 = vor.u32 %v20109_v57, %v16698_v5  ;;  %v20456_v19 = vld [vmem:[%s21331_s10 + $0x1f84] sm:$0xf] }
 0x5da   : > { %9732 = vmatpush.bf16.msra.mxu1 %v16603_v14  ;;  %9661 = vmatpush.bf16.msra.mxu3 %v16887_v60  ;;  %v6361_v53 = vadd.f32 %v6360_v32, %v6348_v20  ;;  %v6336_v14 = vpop.f32.mrf.mxu0  ;;  %v16410_v59 = vld [vmem:[%s21331_s10 + $0x1248] sm:$0xf]  ;;  %v16155_v10 = vor.u32 %v19973_v42, %v16154_v58  ;;  %v18100_v7 = vld [vmem:[%s21331_s10 + $0x1fa0] sm:$0xf0] }
 0x5db   : > { %9701 = vmatmul.bf16.vlgmr.msrb.gmra.mxu2 %v22839_v8  ;;  %v20037_v43 = vld [vmem:[%s21331_s10 + $0x1264] sm:$0xf0]  ;;  %v18103_v12 = vor.u32 %v20456_v19, %v18100_v7  ;;  %v20448_v20 = vld [vmem:[%s21331_s10 + $0x1f44] sm:$0xf] }
 0x5dc   : > { %9745 = vmatpush.bf16.msra.mxu2 %v16859_v63  ;;  %9720 = vmatpush.bf16.msra.mxu0 %v16315_v26  ;;  %v6349_v63 = vpop.f32.mrf.mxu1  ;;  %v6374_v21 = vadd.f32 %v6373_v0, %v6361_v53  ;;  %v16666_v60 = vld [vmem:[%s21331_s10 + $0x1448] sm:$0xf]  ;;  %v16411_v16 = vor.u32 %v20037_v43, %v16410_v59  ;;  %v18068_v32 = vld [vmem:[%s21331_s10 + $0x1f60] sm:$0xf0] }
 0x5dd   : > { %v20101_v4 = vld [vmem:[%s21331_s10 + $0x1464] sm:$0xf0]  ;;  %v22993_v0 = vld [vmem:[%s21813_s12 + $0x8] sm:$0xff]  ;;  %v18071_v42 = vor.u32 %v20448_v20, %v18068_v32 }
 0x5de   : > { %9733 = vmatpush.bf16.msra.mxu1 %v16571_v9  ;;  %v16122_v26 = vld [vmem:[%s21331_s10 + $0x1008] sm:$0xf]  ;;  %vm6384_vm3 = vcmp.ge.f32.partialorder %v6374_v21, 0.0  ;;  %v16667_v25 = vor.u32 %v20101_v4, %v16666_v60  ;;  %v6935_v59 = vperm.slane %v22993_v0, 0  ;;  %v20440_v60 = vld [vmem:[%s21331_s10 + $0x1f04] sm:$0xf] }
 0x5df   : > { %v19965_v9 = vld [vmem:[%s21331_s10 + $0x1024] sm:$0xf0]  ;;  %v18036_v4 = vld [vmem:[%s21331_s10 + $0x1f20] sm:$0xf0] }
 0x5e0   : > { %9746 = vmatpush.bf16.msra.mxu2 %v16827_v15  ;;  %9721 = vmatpush.bf16.msra.mxu0 %v16283_v38  ;;  %v16378_v11 = vld [vmem:[%s21331_s10 + $0x1208] sm:$0xf]  ;;  %v6392_v15 = vmul.f32 0.2, %v6374_v21  ;;  %v20464_v38 = vld [vmem:[%s21331_s10 + $0x1fc4] sm:$0xf]  ;;  %v6362_v27 = vpop.f32.mrf.mxu2  ;;  %v6375_v6 = vpop.f32.mrf.mxu3  ;;  %v16123_v35 = vor.u32 %v19965_v9, %v16122_v26 }
 0x5e1   : > { %v20029_v61 = vld [vmem:[%s21331_s10 + $0x1224] sm:$0xf0]  ;;  %v18135_v41 = vor.u32 %v20464_v38, %v18132_v23  ;;  %v20432_v23 = vld [vmem:[%s21331_s10 + $0x1ec4] sm:$0xf] }
 0x5e2   : > { %9734 = vmatpush.bf16.msra.mxu1 %v16539_v22  ;;  %v16634_v56 = vld [vmem:[%s21331_s10 + $0x1408] sm:$0xf]  ;;  %v6400_v22 = vsel %vm6384_vm3, %v6374_v21, %v6392_v15 }
 0x5e3   : > { %v20093_v29 = vld [vmem:[%s21331_s10 + $0x1424] sm:$0xf0]  ;;  %v6408_v24 = vmul.f32 1.4142135, %v6400_v22 }
 0x5e4   : > { %9747 = vmatpush.bf16.msra.mxu2 %v16795_v54  ;;  %9722 = vmatpush.bf16.msra.mxu0 %v16251_v37  ;;  %v17370_v54 = vld [vmem:[%s21331_s10 + $0x19c8] sm:$0xf]  ;;  %v16379_v37 = vor.u32 %v20029_v61, %v16378_v11 }
 0x5e5   : > { %v20277_v55 = vld [vmem:[%s21331_s10 + $0x19e4] sm:$0xf0]  ;;  %v22978_v40 = vpack.c.bf16 %v6408_v24, %v6408_v24 }
 0x5e6   : > { %9735 = vmatpush.bf16.msra.mxu1 %v16507_v39  ;;  %v17626_v30 = vld [vmem:[%s21331_s10 + $0x1bc8] sm:$0xf]  ;;  %v17371_v28 = vor.u32 %v20277_v55, %v17370_v54  ;;  %v18004_v54 = vld [vmem:[%s21331_s10 + $0x1ee0] sm:$0xf0] }
 0x5e7   : > { %v20341_v31 = vld [vmem:[%s21331_s10 + $0x1be4] sm:$0xf0]  ;;  %9610 = vmatmul.bf16.vlgmr.msrb.gmra.mxu3 %v22978_v40 }
 0x5e8   : > { %9748 = vmatpush.bf16.msra.mxu2 %v16763_v3  ;;  %9723 = vmatpush.bf16.msra.mxu0 %v16219_v49  ;;  %v17882_v39 = vld [vmem:[%s21331_s10 + $0x1dc8] sm:$0xf]  ;;  %v16635_v3 = vor.u32 %v20093_v29, %v16634_v56  ;;  %v17627_v46 = vor.u32 %v20341_v31, %v17626_v30  ;;  %v9520_v56 = vpop.f32.mrf.mxu0  ;;  %v9533_v29 = vpop.f32.mrf.mxu1 }
 0x5e9   : > { %v20405_v13 = vld [vmem:[%s21331_s10 + $0x1de4] sm:$0xf0]  ;;  %9706 = vmatpush.bf16.msrb.mxu3 %v18135_v41  ;;  %v9521_v24 = vadd.f32 %v9520_v56, %v6935_v59 }
 0x5ea   : > { %9736 = vmatpush.bf16.msra.mxu1 %v16475_v50  ;;  %v17338_v48 = vld [vmem:[%s21331_s10 + $0x1988] sm:$0xf]  ;;  %v17883_v49 = vor.u32 %v20405_v13, %v17882_v39  ;;  %v18007_v13 = vor.u32 %v20432_v23, %v18004_v54  ;;  %v20017_v23 = vld [vmem:[%s21331_s10 + $0x11cc] sm:$0xf] }
 0x5eb   : > { %v20269_v50 = vld [vmem:[%s21331_s10 + $0x19a4] sm:$0xf0]  ;;  %v9534_v39 = vadd.f32 %v9533_v29, %v9521_v24 }
 0x5ec   : > { %9749 = vmatpush.bf16.msra.mxu2 %v16731_v2  ;;  %9724 = vmatpush.bf16.msra.mxu0 %v16187_v34  ;;  %v17594_v51 = vld [vmem:[%s21331_s10 + $0x1b88] sm:$0xf]  ;;  %v17339_v5 = vor.u32 %v20269_v50, %v17338_v48 }
 0x5ed   : > { %v20333_v2 = vld [vmem:[%s21331_s10 + $0x1ba4] sm:$0xf0]  ;;  %9707 = vmatpush.bf16.msrb.mxu3 %v18103_v12 }
 0x5ee   : > { %9737 = vmatpush.bf16.msra.mxu1 %v16443_v45  ;;  %v17850_v52 = vld [vmem:[%s21331_s10 + $0x1d88] sm:$0xf]  ;;  %v17595_v57 = vor.u32 %v20333_v2, %v17594_v51 }
 0x5ef   : > { %v20397_v62 = vld [vmem:[%s21331_s10 + $0x1da4] sm:$0xf0] }
 0x5f0   : > { %9750 = vmatpush.bf16.msra.mxu2 %v16699_v1  ;;  %9725 = vmatpush.bf16.msra.mxu0 %v16155_v10  ;;  %v17306_v53 = vld [vmem:[%s21331_s10 + $0x1948] sm:$0xf]  ;;  %v17851_v14 = vor.u32 %v20397_v62, %v17850_v52  ;;  %v9546_v52 = vpop.f32.mrf.mxu2  ;;  %v9559_v62 = vpop.f32.mrf.mxu3 }
 0x5f1   : > { %v20261_v34 = vld [vmem:[%s21331_s10 + $0x1964] sm:$0xf0]  ;;  %9708 = vmatpush.bf16.msrb.mxu3 %v18071_v42  ;;  %v9547_v20 = vadd.f32 %v9546_v52, %v9534_v39  ;;  %v16860_v39 = vld [vmem:[%s21331_s10 + $0x15e8] sm:$0xf0] }
 0x5f2   : > { %9738 = vmatpush.bf16.msra.mxu1 %v16411_v16  ;;  %v17562_v45 = vld [vmem:[%s21331_s10 + $0x1b48] sm:$0xf]  ;;  %v17307_v43 = vor.u32 %v20261_v34, %v17306_v53  ;;  %v17940_v34 = vld [vmem:[%s21331_s10 + $0x1e60] sm:$0xf0]  ;;  %v16828_v52 = vld [vmem:[%s21331_s10 + $0x15a8] sm:$0xf0] }
 0x5f3   : > { %v20325_v58 = vld [vmem:[%s21331_s10 + $0x1b64] sm:$0xf0]  ;;  %v23035_v59 = vadd.f32 %v9559_v62, %v9547_v20 }
 0x5f4   : > { %9751 = vmatpush.bf16.msra.mxu2 %v16667_v25  ;;  %9726 = vmatpush.bf16.msra.mxu0 %v16123_v35  ;;  %v17818_v63 = vld [vmem:[%s21331_s10 + $0x1d48] sm:$0xf]  ;;  %v17563_v21 = vor.u32 %v20325_v58, %v17562_v45  ;;  %v18039_v25 = vor.u32 %v20440_v60, %v18036_v4  ;;  %v20408_v4 = vld [vmem:[%s21331_s10 + $0x1e04] sm:$0xf] }
 0x5f5   : > { %v20389_v1 = vld [vmem:[%s21331_s10 + $0x1d64] sm:$0xf0] }
 0x5f6   : > { %9739 = vmatpush.bf16.msra.mxu1 %v16379_v37  ;;  %v17274_v26 = vld [vmem:[%s21331_s10 + $0x1908] sm:$0xf]  ;;  %v17819_v9 = vor.u32 %v20389_v1, %v17818_v63  ;;  %9709 = vmatpush.bf16.msrb.mxu3 %v18039_v25 }
 0x5f7   : > { %9727 = vmatmul.bf16.vlgmr.msra.gmra.mxu0 %v22693_v44  ;;  %v20253_v11 = vld [vmem:[%s21331_s10 + $0x1924] sm:$0xf0]  ;;  %9662 = vmatmul.bf16.vlgmr.msra.gmra.mxu3 %v22700_v47 }
 0x5f8   : > { %9752 = vmatpush.bf16.msra.mxu2 %v16635_v3  ;;  %9771 = vmatpush.bf16.msrb.mxu0 %v17371_v28  ;;  %v17530_v15 = vld [vmem:[%s21331_s10 + $0x1b08] sm:$0xf]  ;;  %v17275_v38 = vor.u32 %v20253_v11, %v17274_v26  ;;  %v20424_v28 = vld [vmem:[%s21331_s10 + $0x1e84] sm:$0xf]  ;;  %v9548_v54 = vpop.f32.mrf.mxu2 }
 0x5f9   : > { %9740 = vmatmul.bf16.vlgmr.msra.gmra.mxu1 %v22695_v33  ;;  %v20317_v10 = vld [vmem:[%s21331_s10 + $0x1b24] sm:$0xf0]  ;;  %v17908_v26 = vld [vmem:[%s21331_s10 + $0x1e20] sm:$0xf0] }
 0x5fa   : > { %9784 = vmatpush.bf16.msrb.mxu1 %v17627_v46  ;;  %v17786_v16 = vld [vmem:[%s21331_s10 + $0x1d08] sm:$0xf]  ;;  %v17531_v22 = vor.u32 %v20317_v10, %v17530_v15  ;;  %v17972_v46 = vld [vmem:[%s21331_s10 + $0x1ea0] sm:$0xf0]  ;;  %9710 = vmatpush.bf16.msrb.mxu3 %v18007_v13  ;;  %v17911_v24 = vor.u32 %v20408_v4, %v17908_v26  ;;  %v19993_v26 = vld [vmem:[%s21331_s10 + $0x110c] sm:$0xf] }
 0x5fb   : > { %9753 = vmatmul.bf16.vlgmr.msra.gmra.mxu2 %v22697_v36  ;;  %v20381_v61 = vld [vmem:[%s21331_s10 + $0x1d24] sm:$0xf0]  ;;  %v17975_v12 = vor.u32 %v20424_v28, %v17972_v46 }
 0x5fc   : > { %9797 = vmatpush.bf16.msrb.mxu2 %v17883_v49  ;;  %9772 = vmatpush.bf16.msrb.mxu0 %v17339_v5  ;;  %v17242_v55 = vld [vmem:[%s21331_s10 + $0x18c8] sm:$0xf]  ;;  %v17787_v27 = vor.u32 %v20381_v61, %v17786_v16  ;;  %v9522_v5 = vpop.f32.mrf.mxu0 }
 0x5fd   : > { %v20245_v30 = vld [vmem:[%s21331_s10 + $0x18e4] sm:$0xf0] }
 0x5fe   : > { %9785 = vmatpush.bf16.msrb.mxu1 %v17595_v57  ;;  %v17498_v31 = vld [vmem:[%s21331_s10 + $0x1ac8] sm:$0xf]  ;;  %v17243_v3 = vor.u32 %v20245_v30, %v17242_v55  ;;  %v9535_v57 = vpop.f32.mrf.mxu1  ;;  %9711 = vmatpush.bf16.msrb.mxu3 %v17975_v12  ;;  %v9561_v55 = vpop.f32.mrf.mxu3  ;;  %v20081_v30 = vld [vmem:[%s21331_s10 + $0x13cc] sm:$0xf] }
 0x5ff   : > { %v20309_v6 = vld [vmem:[%s21331_s10 + $0x1ae4] sm:$0xf0] }
 0x600   : > { %9798 = vmatpush.bf16.msrb.mxu2 %v17851_v14  ;;  %9773 = vmatpush.bf16.msrb.mxu0 %v17307_v43  ;;  %v17754_v35 = vld [vmem:[%s21331_s10 + $0x1cc8] sm:$0xf]  ;;  %v17499_v41 = vor.u32 %v20309_v6, %v17498_v31  ;;  %v20416_v14 = vld [vmem:[%s21331_s10 + $0x1e44] sm:$0xf]  ;;  %v16604_v31 = vld [vmem:[%s21331_s10 + $0x13e8] sm:$0xf0] }
 0x601   : > { %v20373_v37 = vld [vmem:[%s21331_s10 + $0x1ce4] sm:$0xf0]  ;;  %v17943_v60 = vor.u32 %v20416_v14, %v17940_v34  ;;  %v16607_v28 = vor.u32 %v20081_v30, %v16604_v31  ;;  %v16284_v14 = vld [vmem:[%s21331_s10 + $0x1168] sm:$0xf0] }
 0x602   : > { %9786 = vmatpush.bf16.msrb.mxu1 %v17563_v21  ;;  %v17210_v19 = vld [vmem:[%s21331_s10 + $0x1888] sm:$0xf]  ;;  %v17755_v7 = vor.u32 %v20373_v37, %v17754_v35  ;;  %v20145_v37 = vld [vmem:[%s21331_s10 + $0x15cc] sm:$0xf] }
 0x603   : > { %v20237_v48 = vld [vmem:[%s21331_s10 + $0x18a4] sm:$0xf0]  ;;  %9712 = vmatpush.bf16.msrb.mxu3 %v17943_v60  ;;  %v20065_v34 = vld [vmem:[%s21331_s10 + $0x134c] sm:$0xf] }
 0x604   : > { %9799 = vmatpush.bf16.msrb.mxu2 %v17819_v9  ;;  %9774 = vmatpush.bf16.msrb.mxu0 %v17275_v38  ;;  %v17466_v49 = vld [vmem:[%s21331_s10 + $0x1a88] sm:$0xf]  ;;  %v17211_v32 = vor.u32 %v20237_v48, %v17210_v19  ;;  %v20009_v48 = vld [vmem:[%s21331_s10 + $0x118c] sm:$0xf] }
 0x605   : > { %v20301_v50 = vld [vmem:[%s21331_s10 + $0x1aa4] sm:$0xf0]  ;;  %v20049_v30 = vld [vmem:[%s21331_s10 + $0x12cc] sm:$0xf] }
 0x606   : > { %9787 = vmatpush.bf16.msrb.mxu1 %v17531_v22  ;;  %v17722_v51 = vld [vmem:[%s21331_s10 + $0x1c88] sm:$0xf]  ;;  %v17467_v53 = vor.u32 %v20301_v50, %v17466_v49  ;;  %v16316_v49 = vld [vmem:[%s21331_s10 + $0x11a8] sm:$0xf0] }
 0x607   : > { %v20365_v2 = vld [vmem:[%s21331_s10 + $0x1ca4] sm:$0xf0]  ;;  %9713 = vmatpush.bf16.msrb.mxu3 %v17911_v24  ;;  %v20073_v50 = vld [vmem:[%s21331_s10 + $0x138c] sm:$0xf]  ;;  %v16319_v12 = vor.u32 %v20009_v48, %v16316_v49 }
 0x608   : > { %9800 = vmatpush.bf16.msrb.mxu2 %v17787_v27  ;;  %9775 = vmatpush.bf16.msrb.mxu0 %v17243_v3  ;;  %v17178_v45 = vld [vmem:[%s21331_s10 + $0x1848] sm:$0xf]  ;;  %v17723_v58 = vor.u32 %v20365_v2, %v17722_v51  ;;  %v16348_v27 = vld [vmem:[%s21331_s10 + $0x11e8] sm:$0xf0] }
 0x609   : > { %v20229_v63 = vld [vmem:[%s21331_s10 + $0x1864] sm:$0xf0]  ;;  %v16572_v51 = vld [vmem:[%s21331_s10 + $0x13a8] sm:$0xf0] }
 0x60a   : > { %9788 = vmatpush.bf16.msrb.mxu1 %v17499_v41  ;;  %v17434_v1 = vld [vmem:[%s21331_s10 + $0x1a48] sm:$0xf]  ;;  %v17179_v9 = vor.u32 %v20229_v63, %v17178_v45  ;;  %v16351_v41 = vor.u32 %v20017_v23, %v16348_v27  ;;  %v20137_v2 = vld [vmem:[%s21331_s10 + $0x158c] sm:$0xf]  ;;  %v16575_v57 = vor.u32 %v20073_v50, %v16572_v51  ;;  %9714 = vmatmul.bf16.vlgmr.msrb.gmra.mxu3 %v22978_v40 }
 0x60b   : > { %v20293_v42 = vld [vmem:[%s21331_s10 + $0x1a64] sm:$0xf0]  ;;  %v16540_v45 = vld [vmem:[%s21331_s10 + $0x1368] sm:$0xf0] }
 0x60c   : > { %9801 = vmatpush.bf16.msrb.mxu2 %v17755_v7  ;;  %v17690_v43 = vld [vmem:[%s21331_s10 + $0x1c48] sm:$0xf]  ;;  %9776 = vmatpush.bf16.msrb.mxu0 %v17211_v32  ;;  %v17435_v11 = vor.u32 %v20293_v42, %v17434_v1  ;;  %v16863_v7 = vor.u32 %v20145_v37, %v16860_v39  ;;  %v16831_v32 = vor.u32 %v20137_v2, %v16828_v52  ;;  %v16796_v63 = vld [vmem:[%s21331_s10 + $0x1568] sm:$0xf0] }
 0x60d   : > { %v20357_v21 = vld [vmem:[%s21331_s10 + $0x1c64] sm:$0xf0]  ;;  %v16543_v60 = vor.u32 %v20065_v34, %v16540_v45  ;;  %v19985_v24 = vld [vmem:[%s21331_s10 + $0x10cc] sm:$0xf] }
 0x60e   : > { %9789 = vmatpush.bf16.msrb.mxu1 %v17467_v53  ;;  %v17146_v15 = vld [vmem:[%s21331_s10 + $0x1808] sm:$0xf]  ;;  %v17691_v61 = vor.u32 %v20357_v21, %v17690_v43  ;;  %v20001_v53 = vld [vmem:[%s21331_s10 + $0x114c] sm:$0xf] }
 0x60f   : > { %v20221_v10 = vld [vmem:[%s21331_s10 + $0x1824] sm:$0xf0]  ;;  %v16287_v42 = vor.u32 %v20001_v53, %v16284_v14  ;;  %v16220_v27 = vld [vmem:[%s21331_s10 + $0x10e8] sm:$0xf0] }
 0x610   : > { %v17402_v16 = vld [vmem:[%s21331_s10 + $0x1a08] sm:$0xf]  ;;  %9802 = vmatpush.bf16.msrb.mxu2 %v17723_v58  ;;  %9777 = vmatpush.bf16.msrb.mxu0 %v17179_v9  ;;  %v17147_v6 = vor.u32 %v20221_v10, %v17146_v15  ;;  %v20129_v58 = vld [vmem:[%s21331_s10 + $0x154c] sm:$0xf]  ;;  %v16223_v39 = vor.u32 %v19985_v24, %v16220_v27 }
 0x611   : > { %v20285_v25 = vld [vmem:[%s21331_s10 + $0x1a24] sm:$0xf0]  ;;  %v16799_v4 = vor.u32 %v20129_v58, %v16796_v63  ;;  %v16252_v9 = vld [vmem:[%s21331_s10 + $0x1128] sm:$0xf0] }
 0x612   : > { %v17658_v56 = vld [vmem:[%s21331_s10 + $0x1c08] sm:$0xf]  ;;  %9790 = vmatpush.bf16.msrb.mxu1 %v17435_v11  ;;  %v17403_v35 = vor.u32 %v20285_v25, %v17402_v16  ;;  %v20057_v11 = vld [vmem:[%s21331_s10 + $0x130c] sm:$0xf] }
 0x613   : > { %v20349_v29 = vld [vmem:[%s21331_s10 + $0x1c24] sm:$0xf0]  ;;  %v16508_v15 = vld [vmem:[%s21331_s10 + $0x1328] sm:$0xf0] }
 0x614   : > { %v17114_v38 = vld [vmem:[%s21331_s10 + $0x17c8] sm:$0xf]  ;;  %9803 = vmatpush.bf16.msrb.mxu2 %v17691_v61  ;;  %v17659_v13 = vor.u32 %v20349_v29, %v17658_v56  ;;  %9778 = vmatpush.bf16.msrb.mxu0 %v17147_v6  ;;  %v20121_v10 = vld [vmem:[%s21331_s10 + $0x150c] sm:$0xf]  ;;  %v9572_v61 = vpop.f32.mrf.mxu0  ;;  %v9585_v56 = vpop.f32.mrf.mxu1  ;;  %v16511_v54 = vor.u32 %v20057_v11, %v16508_v15 }
 0x615   : > { %v20213_v22 = vld [vmem:[%s21331_s10 + $0x17e4] sm:$0xf0]  ;;  %v16764_v16 = vld [vmem:[%s21331_s10 + $0x1528] sm:$0xf0]  ;;  %v9573_v25 = vadd.f32 %v9572_v61, %v23035_v59 }
 0x616   : > { %v17115_v3 = vor.u32 %v20213_v22, %v17114_v38  ;;  %v17082_v46 = vld [vmem:[%s21331_s10 + $0x1788] sm:$0xf]  ;;  %9791 = vmatpush.bf16.msrb.mxu1 %v17403_v35  ;;  %v16255_v38 = vor.u32 %v19993_v26, %v16252_v9  ;;  %v16767_v55 = vor.u32 %v20121_v10, %v16764_v16  ;;  %v16476_v59 = vld [vmem:[%s21331_s10 + $0x12e8] sm:$0xf0] }
 0x617   : > { %v20205_v19 = vld [vmem:[%s21331_s10 + $0x17a4] sm:$0xf0]  ;;  %9779 = vmatmul.bf16.vlgmr.msrb.gmra.mxu0 %v22778_v18  ;;  %v23089_v31 = vadd.f32 %v9585_v56, %v9573_v25  ;;  %v20113_v6 = vld [vmem:[%s21331_s10 + $0x14cc] sm:$0xf] }
 0x618   : > { %9804 = vmatpush.bf16.msrb.mxu2 %v17659_v13  ;;  %9758 = vmatpush.bf16.msra.mxu3 %v17115_v3  ;;  %v17083_v62 = vor.u32 %v20205_v19, %v17082_v46  ;;  %v17050_v20 = vld [vmem:[%s21331_s10 + $0x1748] sm:$0xf]  ;;  %v16732_v35 = vld [vmem:[%s21331_s10 + $0x14e8] sm:$0xf0] }
 0x619   : > { %9823 = vmatpush.bf16.msra.mxu0 %v16351_v41  ;;  %v20197_v5 = vld [vmem:[%s21331_s10 + $0x1764] sm:$0xf0]  ;;  %9792 = vmatmul.bf16.vlgmr.msrb.gmra.mxu1 %v22780_v17  ;;  %v16479_v41 = vor.u32 %v20049_v30, %v16476_v59  ;;  %v19977_v46 = vld [vmem:[%s21331_s10 + $0x108c] sm:$0xf] }
 0x61a   : > { %9836 = vmatpush.bf16.msra.mxu1 %v16607_v28  ;;  %v17051_v1 = vor.u32 %v20197_v5, %v17050_v20  ;;  %v17018_v43 = vld [vmem:[%s21331_s10 + $0x1708] sm:$0xf]  ;;  %v16735_v28 = vor.u32 %v20113_v6, %v16732_v35  ;;  %v16188_v19 = vld [vmem:[%s21331_s10 + $0x10a8] sm:$0xf0] }
 0x61b   : > { %9805 = vmatmul.bf16.vlgmr.msrb.gmra.mxu2 %v22839_v8  ;;  %v20189_v21 = vld [vmem:[%s21331_s10 + $0x1724] sm:$0xf0]  ;;  %v16444_v48 = vld [vmem:[%s21331_s10 + $0x12a8] sm:$0xf0] }
 0x61c   : > { %9849 = vmatpush.bf16.msra.mxu2 %v16863_v7  ;;  %9759 = vmatpush.bf16.msra.mxu3 %v17083_v62  ;;  %v17019_v29 = vor.u32 %v20189_v21, %v17018_v43  ;;  %v16986_v22 = vld [vmem:[%s21331_s10 + $0x16c8] sm:$0xf]  ;;  %v20041_v7 = vld [vmem:[%s21331_s10 + $0x128c] sm:$0xf]  ;;  %v9574_v51 = vpop.f32.mrf.mxu0  ;;  %v9587_v2 = vpop.f32.mrf.mxu1  ;;  %v16191_v62 = vor.u32 %v19977_v46, %v16188_v19 }
 0x61d   : > { %9824 = vmatpush.bf16.msra.mxu0 %v16319_v12  ;;  %v20181_v23 = vld [vmem:[%s21331_s10 + $0x16e4] sm:$0xf0]  ;;  %v20105_v49 = vld [vmem:[%s21331_s10 + $0x148c] sm:$0xf]  ;;  %v16447_v5 = vor.u32 %v20041_v7, %v16444_v48 }
 0x61e   : > { %9837 = vmatpush.bf16.msra.mxu1 %v16575_v57  ;;  %v16987_v37 = vor.u32 %v20181_v23, %v16986_v22  ;;  %v16954_v13 = vld [vmem:[%s21331_s10 + $0x1688] sm:$0xf]  ;;  %v16700_v50 = vld [vmem:[%s21331_s10 + $0x14a8] sm:$0xf0] }
 0x61f   : > { %v20173_v3 = vld [vmem:[%s21331_s10 + $0x16a4] sm:$0xf0]  ;;  %v16703_v57 = vor.u32 %v20105_v49, %v16700_v50  ;;  %v16156_v53 = vld [vmem:[%s21331_s10 + $0x1068] sm:$0xf0] }
 0x620   : > { %9850 = vmatpush.bf16.msra.mxu2 %v16831_v32  ;;  %9760 = vmatpush.bf16.msra.mxu3 %v17051_v1  ;;  %v16955_v52 = vor.u32 %v20173_v3, %v16954_v13  ;;  %v16922_v12 = vld [vmem:[%s21331_s10 + $0x1648] sm:$0xf]  ;;  %v19969_v32 = vld [vmem:[%s21331_s10 + $0x104c] sm:$0xf] }
 0x621   : > { %9825 = vmatpush.bf16.msra.mxu0 %v16287_v42  ;;  %v20165_v20 = vld [vmem:[%s21331_s10 + $0x1664] sm:$0xf0]  ;;  %v20033_v14 = vld [vmem:[%s21331_s10 + $0x124c] sm:$0xf]  ;;  %v16159_v42 = vor.u32 %v19969_v32, %v16156_v53 }
 0x622   : > { %9838 = vmatpush.bf16.msra.mxu1 %v16543_v60  ;;  %v16412_v34 = vld [vmem:[%s21331_s10 + $0x1268] sm:$0xf0]  ;;  %v16890_v63 = vld [vmem:[%s21331_s10 + $0x1608] sm:$0xf]  ;;  %v16923_v1 = vor.u32 %v20165_v20, %v16922_v12 }
 0x623   : > { %v20097_v45 = vld [vmem:[%s21331_s10 + $0x144c] sm:$0xf]  ;;  %v20157_v43 = vld [vmem:[%s21331_s10 + $0x1624] sm:$0xf0] }
 0x624   : > { %9851 = vmatpush.bf16.msra.mxu2 %v16799_v4  ;;  %9761 = vmatpush.bf16.msra.mxu3 %v17019_v29  ;;  %v16668_v58 = vld [vmem:[%s21331_s10 + $0x1468] sm:$0xf0]  ;;  %v16415_v4 = vor.u32 %v20033_v14, %v16412_v34  ;;  %v18138_v16 = vld [vmem:[%s21331_s10 + $0x1fc8] sm:$0xf]  ;;  %v6936_v14 = vperm.slane %v22993_v0, 1 }
 0x625   : > { %9826 = vmatpush.bf16.msra.mxu0 %v16255_v38  ;;  %v19961_v21 = vld [vmem:[%s21331_s10 + $0x100c] sm:$0xf]  ;;  %v16671_v26 = vor.u32 %v20097_v45, %v16668_v58  ;;  %v20469_v61 = vld [vmem:[%s21331_s10 + $0x1fe4] sm:$0xf0]  ;;  %v16891_v38 = vor.u32 %v20157_v43, %v16890_v63 }
 0x626   : > { %9839 = vmatpush.bf16.msra.mxu1 %v16511_v54  ;;  %v16124_v60 = vld [vmem:[%s21331_s10 + $0x1028] sm:$0xf0]  ;;  %v18139_v30 = vor.u32 %v20469_v61, %v18138_v16  ;;  %v18106_v6 = vld [vmem:[%s21331_s10 + $0x1f88] sm:$0xf] }
 0x627   : > { %v20025_v9 = vld [vmem:[%s21331_s10 + $0x120c] sm:$0xf]  ;;  %v16127_v22 = vor.u32 %v19961_v21, %v16124_v60  ;;  %v20461_v35 = vld [vmem:[%s21331_s10 + $0x1fa4] sm:$0xf0] }
 0x628   : > { %9852 = vmatpush.bf16.msra.mxu2 %v16767_v55  ;;  %9762 = vmatpush.bf16.msra.mxu3 %v16987_v37  ;;  %v16380_v11 = vld [vmem:[%s21331_s10 + $0x1228] sm:$0xf0]  ;;  %v18107_v7 = vor.u32 %v20461_v35, %v18106_v6  ;;  %v18074_v49 = vld [vmem:[%s21331_s10 + $0x1f48] sm:$0xf] }
 0x629   : > { %9827 = vmatpush.bf16.msra.mxu0 %v16223_v39  ;;  %v20089_v15 = vld [vmem:[%s21331_s10 + $0x140c] sm:$0xf]  ;;  %v16383_v24 = vor.u32 %v20025_v9, %v16380_v11  ;;  %v20453_v50 = vld [vmem:[%s21331_s10 + $0x1f64] sm:$0xf0]  ;;  %v9637_v9 = vpop.f32.mrf.mxu1 }
 0x62a   : > { %9840 = vmatpush.bf16.msra.mxu1 %v16479_v41  ;;  %v16636_v10 = vld [vmem:[%s21331_s10 + $0x1428] sm:$0xf0]  ;;  %v18075_v32 = vor.u32 %v20453_v50, %v18074_v49  ;;  %v18042_v34 = vld [vmem:[%s21331_s10 + $0x1f08] sm:$0xf] }
 0x62b   : > { %v20273_v25 = vld [vmem:[%s21331_s10 + $0x19cc] sm:$0xf]  ;;  %v16639_v27 = vor.u32 %v20089_v15, %v16636_v10  ;;  %v20445_v45 = vld [vmem:[%s21331_s10 + $0x1f24] sm:$0xf0]  ;;  %v23155_v10 = vpop.f32.mrf.mxu2 }
 0x62c   : > { %9853 = vmatpush.bf16.msra.mxu2 %v16735_v28  ;;  %9763 = vmatpush.bf16.msra.mxu3 %v16955_v52  ;;  %v17372_v56 = vld [vmem:[%s21331_s10 + $0x19e8] sm:$0xf0]  ;;  %v18043_v11 = vor.u32 %v20445_v45, %v18042_v34  ;;  %v18010_v16 = vld [vmem:[%s21331_s10 + $0x1ec8] sm:$0xf] }
 0x62d   : > { %9828 = vmatpush.bf16.msra.mxu0 %v16191_v62  ;;  %v20337_v29 = vld [vmem:[%s21331_s10 + $0x1bcc] sm:$0xf]  ;;  %v17375_v59 = vor.u32 %v20273_v25, %v17372_v56  ;;  %v20437_v61 = vld [vmem:[%s21331_s10 + $0x1ee4] sm:$0xf0] }
 0x62e   : > { %9841 = vmatpush.bf16.msra.mxu1 %v16447_v5  ;;  %v17628_v23 = vld [vmem:[%s21331_s10 + $0x1be8] sm:$0xf0]  ;;  %v20429_v6 = vld [vmem:[%s21331_s10 + $0x1ea4] sm:$0xf0] }
 0x62f   : > { %v20401_v54 = vld [vmem:[%s21331_s10 + $0x1dcc] sm:$0xf]  ;;  %v17631_v37 = vor.u32 %v20337_v29, %v17628_v23 }
 0x630   : > { %9854 = vmatpush.bf16.msra.mxu2 %v16703_v57  ;;  %9764 = vmatpush.bf16.msra.mxu3 %v16923_v1  ;;  %v17884_v55 = vld [vmem:[%s21331_s10 + $0x1de8] sm:$0xf0] }
 0x631   : > { %9829 = vmatpush.bf16.msra.mxu0 %v16159_v42  ;;  %v17887_v39 = vor.u32 %v20401_v54, %v17884_v55  ;;  %v20265_v13 = vld [vmem:[%s21331_s10 + $0x198c] sm:$0xf] }
 0x632   : > { %9842 = vmatpush.bf16.msra.mxu1 %v16415_v4  ;;  %v17340_v3 = vld [vmem:[%s21331_s10 + $0x19a8] sm:$0xf0] }
 0x633   : > { %v20329_v41 = vld [vmem:[%s21331_s10 + $0x1b8c] sm:$0xf]  ;;  %v17343_v48 = vor.u32 %v20265_v13, %v17340_v3  ;;  %v9600_v50 = vpop.f32.mrf.mxu2 }
 0x634   : > { %9855 = vmatpush.bf16.msra.mxu2 %v16671_v26  ;;  %9765 = vmatpush.bf16.msra.mxu3 %v16891_v38  ;;  %v17596_v28 = vld [vmem:[%s21331_s10 + $0x1ba8] sm:$0xf0]  ;;  %v9624_v26 = vpop.f32.mrf.mxu0 }
 0x635   : > { %9830 = vmatpush.bf16.msra.mxu0 %v16127_v22  ;;  %v20393_v46 = vld [vmem:[%s21331_s10 + $0x1d8c] sm:$0xf]  ;;  %v17599_v51 = vor.u32 %v20329_v41, %v17596_v28  ;;  %v9625_v0 = vadd.f32 %v9624_v26, %v6936_v14  ;;  %v17914_v14 = vld [vmem:[%s21331_s10 + $0x1e08] sm:$0xf] }
 0x636   : > { %v17852_v19 = vld [vmem:[%s21331_s10 + $0x1da8] sm:$0xf0]  ;;  %9843 = vmatpush.bf16.msra.mxu1 %v16383_v24 }
 0x637   : > { %v17855_v2 = vor.u32 %v20393_v46, %v17852_v19  ;;  %v20257_v52 = vld [vmem:[%s21331_s10 + $0x194c] sm:$0xf]  ;;  %9766 = vmatmul.bf16.vlgmr.msra.gmra.mxu3 %v22700_v47  ;;  %v23162_v23 = vadd.f32 %v9637_v9, %v9625_v0 }
 0x638   : > { %9856 = vmatpush.bf16.msra.mxu2 %v16639_v27  ;;  %9810 = vmatpush.bf16.msrb.mxu3 %v18139_v30  ;;  %v17308_v62 = vld [vmem:[%s21331_s10 + $0x1968] sm:$0xf0]  ;;  %v18011_v27 = vor.u32 %v20437_v61, %v18010_v16  ;;  %v16610_v16 = vld [vmem:[%s21331_s10 + $0x13d0] sm:$0xf] }
 0x639   : > { %9875 = vmatpush.bf16.msrb.mxu0 %v17375_v59  ;;  %v20321_v12 = vld [vmem:[%s21331_s10 + $0x1b4c] sm:$0xf]  ;;  %9844 = vmatmul.bf16.vlgmr.msra.gmra.mxu1 %v22695_v33  ;;  %v17311_v53 = vor.u32 %v20257_v52, %v17308_v62  ;;  %v17978_v59 = vld [vmem:[%s21331_s10 + $0x1e88] sm:$0xf] }
 0x63a   : > { %9888 = vmatpush.bf16.msrb.mxu1 %v17631_v37  ;;  %9831 = vmatmul.bf16.vlgmr.msra.gmra.mxu0 %v22693_v44  ;;  %v17564_v20 = vld [vmem:[%s21331_s10 + $0x1b68] sm:$0xf0] }
 0x63b   : > { %v20385_v5 = vld [vmem:[%s21331_s10 + $0x1d4c] sm:$0xf]  ;;  %9857 = vmatmul.bf16.vlgmr.msra.gmra.mxu2 %v22697_v36  ;;  %v17567_v58 = vor.u32 %v20321_v12, %v17564_v20 }
 0x63c   : > { %9901 = vmatpush.bf16.msrb.mxu2 %v17887_v39  ;;  %v17820_v57 = vld [vmem:[%s21331_s10 + $0x1d68] sm:$0xf0]  ;;  %9811 = vmatpush.bf16.msrb.mxu3 %v18107_v7  ;;  %v9626_v19 = vpop.f32.mrf.mxu0  ;;  %v9639_v7 = vpop.f32.mrf.mxu1 }
 0x63d   : > { %9876 = vmatpush.bf16.msrb.mxu0 %v17343_v48  ;;  %v17823_v63 = vor.u32 %v20385_v5, %v17820_v57  ;;  %v20249_v1 = vld [vmem:[%s21331_s10 + $0x190c] sm:$0xf]  ;;  %v17979_v48 = vor.u32 %v20429_v6, %v17978_v59 }
 0x63e   : > { %9889 = vmatpush.bf16.msrb.mxu1 %v17599_v51  ;;  %v17276_v42 = vld [vmem:[%s21331_s10 + $0x1928] sm:$0xf0]  ;;  %v17946_v51 = vld [vmem:[%s21331_s10 + $0x1e48] sm:$0xf] }
 0x63f   : > { %v20313_v43 = vld [vmem:[%s21331_s10 + $0x1b0c] sm:$0xf]  ;;  %v17279_v15 = vor.u32 %v20249_v1, %v17276_v42 }
 0x640   : > { %9902 = vmatpush.bf16.msrb.mxu2 %v17855_v2  ;;  %v17532_v21 = vld [vmem:[%s21331_s10 + $0x1b28] sm:$0xf0]  ;;  %9812 = vmatpush.bf16.msrb.mxu3 %v18075_v32  ;;  %v20421_v2 = vld [vmem:[%s21331_s10 + $0x1e64] sm:$0xf0] }
 0x641   : > { %v20377_v60 = vld [vmem:[%s21331_s10 + $0x1d0c] sm:$0xf]  ;;  %9877 = vmatpush.bf16.msrb.mxu0 %v17311_v53  ;;  %v17535_v25 = vor.u32 %v20313_v43, %v17532_v21  ;;  %v17947_v34 = vor.u32 %v20421_v2, %v17946_v51  ;;  %v16290_v51 = vld [vmem:[%s21331_s10 + $0x1150] sm:$0xf] }
 0x642   : > { %v17788_v4 = vld [vmem:[%s21331_s10 + $0x1d28] sm:$0xf0]  ;;  %9890 = vmatpush.bf16.msrb.mxu1 %v17567_v58  ;;  %v20413_v58 = vld [vmem:[%s21331_s10 + $0x1e24] sm:$0xf0]  ;;  %v20006_v2 = vld [vmem:[%s21331_s10 + $0x116c] sm:$0xf0] }
 0x643   : > { %v17791_v56 = vor.u32 %v20377_v60, %v17788_v4  ;;  %v20241_v29 = vld [vmem:[%s21331_s10 + $0x18cc] sm:$0xf]  ;;  %v17915_v61 = vor.u32 %v20413_v58, %v17914_v14  ;;  %v16258_v58 = vld [vmem:[%s21331_s10 + $0x1110] sm:$0xf] }
 0x644   : > { %9903 = vmatpush.bf16.msrb.mxu2 %v17823_v63  ;;  %v17244_v38 = vld [vmem:[%s21331_s10 + $0x18e8] sm:$0xf0]  ;;  %9813 = vmatpush.bf16.msrb.mxu3 %v18043_v11  ;;  %v16354_v11 = vld [vmem:[%s21331_s10 + $0x11d0] sm:$0xf] }
 0x645   : > { %v20305_v22 = vld [vmem:[%s21331_s10 + $0x1acc] sm:$0xf]  ;;  %9878 = vmatpush.bf16.msrb.mxu0 %v17279_v15  ;;  %v17247_v30 = vor.u32 %v20241_v29, %v17244_v38  ;;  %v20022_v15 = vld [vmem:[%s21331_s10 + $0x11ec] sm:$0xf0] }
 0x646   : > { %v17500_v54 = vld [vmem:[%s21331_s10 + $0x1ae8] sm:$0xf0]  ;;  %9891 = vmatpush.bf16.msrb.mxu1 %v17535_v25  ;;  %v16866_v29 = vld [vmem:[%s21331_s10 + $0x15d0] sm:$0xf] }
 0x647   : > { %v20369_v55 = vld [vmem:[%s21331_s10 + $0x1ccc] sm:$0xf]  ;;  %v17503_v35 = vor.u32 %v20305_v22, %v17500_v54  ;;  %v20150_v38 = vld [vmem:[%s21331_s10 + $0x15ec] sm:$0xf0] }
 0x648   : > { %v17756_v24 = vld [vmem:[%s21331_s10 + $0x1ce8] sm:$0xf0]  ;;  %9904 = vmatpush.bf16.msrb.mxu2 %v17791_v56  ;;  %9814 = vmatpush.bf16.msrb.mxu3 %v18011_v27  ;;  %v20086_v56 = vld [vmem:[%s21331_s10 + $0x13ec] sm:$0xf0]  ;;  %v16355_v27 = vor.u32 %v20022_v15, %v16354_v11 }
 0x649   : > { %v17759_v37 = vor.u32 %v20369_v55, %v17756_v24  ;;  %v20233_v39 = vld [vmem:[%s21331_s10 + $0x188c] sm:$0xf]  ;;  %9879 = vmatpush.bf16.msrb.mxu0 %v17247_v30  ;;  %v9650_v55 = vpop.f32.mrf.mxu2 }
 0x64a   : > { %v17212_v13 = vld [vmem:[%s21331_s10 + $0x18a8] sm:$0xf0]  ;;  %9892 = vmatpush.bf16.msrb.mxu1 %v17503_v35  ;;  %v23200_v30 = vadd.f32 %v9650_v55, %v23162_v23  ;;  %v16611_v35 = vor.u32 %v20086_v56, %v16610_v16  ;;  %v16482_v56 = vld [vmem:[%s21331_s10 + $0x12d0] sm:$0xf] }
 0x64b   : > { %v20297_v3 = vld [vmem:[%s21331_s10 + $0x1a8c] sm:$0xf]  ;;  %v17215_v49 = vor.u32 %v20233_v39, %v17212_v13  ;;  %v16322_v39 = vld [vmem:[%s21331_s10 + $0x1190] sm:$0xf] }
 0x64c   : > { %v17468_v41 = vld [vmem:[%s21331_s10 + $0x1aa8] sm:$0xf0]  ;;  %9905 = vmatpush.bf16.msrb.mxu2 %v17759_v37  ;;  %9815 = vmatpush.bf16.msrb.mxu3 %v17979_v48  ;;  %v16867_v37 = vor.u32 %v20150_v38, %v16866_v29  ;;  %v20014_v13 = vld [vmem:[%s21331_s10 + $0x11ac] sm:$0xf0] }
 0x64d   : > { %v20361_v28 = vld [vmem:[%s21331_s10 + $0x1c8c] sm:$0xf]  ;;  %v17471_v52 = vor.u32 %v20297_v3, %v17468_v41  ;;  %9880 = vmatpush.bf16.msrb.mxu0 %v17215_v49  ;;  %v16578_v3 = vld [vmem:[%s21331_s10 + $0x1390] sm:$0xf]  ;;  %v16323_v19 = vor.u32 %v20014_v13, %v16322_v39 }
 0x64e   : > { %v17724_v46 = vld [vmem:[%s21331_s10 + $0x1ca8] sm:$0xf0]  ;;  %v20078_v41 = vld [vmem:[%s21331_s10 + $0x13ac] sm:$0xf0] }
 0x64f   : > { %v17727_v62 = vor.u32 %v20361_v28, %v17724_v46  ;;  %v20225_v12 = vld [vmem:[%s21331_s10 + $0x184c] sm:$0xf]  ;;  %9893 = vmatpush.bf16.msrb.mxu1 %v17471_v52  ;;  %v16834_v28 = vld [vmem:[%s21331_s10 + $0x1590] sm:$0xf]  ;;  %v16579_v49 = vor.u32 %v20078_v41, %v16578_v3 }
 0x650   : > { %v17180_v20 = vld [vmem:[%s21331_s10 + $0x1868] sm:$0xf0]  ;;  %9816 = vmatpush.bf16.msrb.mxu3 %v17947_v34  ;;  %v20142_v46 = vld [vmem:[%s21331_s10 + $0x15ac] sm:$0xf0] }
 0x651   : > { %v20289_v5 = vld [vmem:[%s21331_s10 + $0x1a4c] sm:$0xf]  ;;  %v17183_v45 = vor.u32 %v20225_v12, %v17180_v20  ;;  %9906 = vmatpush.bf16.msrb.mxu2 %v17727_v62  ;;  %v16835_v50 = vor.u32 %v20142_v46, %v16834_v28  ;;  %v16546_v52 = vld [vmem:[%s21331_s10 + $0x1350] sm:$0xf] }
 0x652   : > { %v17436_v57 = vld [vmem:[%s21331_s10 + $0x1a68] sm:$0xf0]  ;;  %v20070_v62 = vld [vmem:[%s21331_s10 + $0x136c] sm:$0xf0] }
 0x653   : > { %v20353_v32 = vld [vmem:[%s21331_s10 + $0x1c4c] sm:$0xf]  ;;  %v17439_v42 = vor.u32 %v20289_v5, %v17436_v57  ;;  %9881 = vmatpush.bf16.msrb.mxu0 %v17183_v45  ;;  %v16802_v12 = vld [vmem:[%s21331_s10 + $0x1550] sm:$0xf]  ;;  %v9652_v5 = vpop.f32.mrf.mxu2  ;;  %v16547_v34 = vor.u32 %v20070_v62, %v16546_v52 }
 0x654   : > { %v17692_v53 = vld [vmem:[%s21331_s10 + $0x1c68] sm:$0xf0]  ;;  %9817 = vmatpush.bf16.msrb.mxu3 %v17915_v61  ;;  %v20134_v20 = vld [vmem:[%s21331_s10 + $0x156c] sm:$0xf0] }
 0x655   : > { %v20217_v63 = vld [vmem:[%s21331_s10 + $0x180c] sm:$0xf]  ;;  %v17695_v43 = vor.u32 %v20353_v32, %v17692_v53  ;;  %9894 = vmatpush.bf16.msrb.mxu1 %v17439_v42  ;;  %v16291_v32 = vor.u32 %v20006_v2, %v16290_v51  ;;  %v16803_v45 = vor.u32 %v20134_v20, %v16802_v12  ;;  %v23227_v42 = vpop.f32.mrf.mxu0  ;;  %v16226_v61 = vld [vmem:[%s21331_s10 + $0x10d0] sm:$0xf] }
 0x656   : > { %v17148_v1 = vld [vmem:[%s21331_s10 + $0x1828] sm:$0xf0]  ;;  %v20054_v29 = vld [vmem:[%s21331_s10 + $0x12ec] sm:$0xf0] }
 0x657   : > { %v20281_v21 = vld [vmem:[%s21331_s10 + $0x1a0c] sm:$0xf]  ;;  %v17151_v25 = vor.u32 %v20217_v63, %v17148_v1  ;;  %9907 = vmatpush.bf16.msrb.mxu2 %v17695_v43  ;;  %9818 = vmatmul.bf16.vlgmr.msrb.gmra.mxu3 %v22978_v40  ;;  %v19998_v63 = vld [vmem:[%s21331_s10 + $0x112c] sm:$0xf0] }
 0x658   : > { %v17404_v60 = vld [vmem:[%s21331_s10 + $0x1a28] sm:$0xf0]  ;;  %v16514_v1 = vld [vmem:[%s21331_s10 + $0x1310] sm:$0xf] }
 0x659   : > { %v20345_v4 = vld [vmem:[%s21331_s10 + $0x1c0c] sm:$0xf]  ;;  %v17407_v22 = vor.u32 %v20281_v21, %v17404_v60  ;;  %9882 = vmatpush.bf16.msrb.mxu0 %v17151_v25  ;;  %v20062_v43 = vld [vmem:[%s21331_s10 + $0x132c] sm:$0xf0] }
 0x65a   : > { %v17660_v26 = vld [vmem:[%s21331_s10 + $0x1c28] sm:$0xf0]  ;;  %v16770_v21 = vld [vmem:[%s21331_s10 + $0x1510] sm:$0xf]  ;;  %v16515_v15 = vor.u32 %v20062_v43, %v16514_v1 }
 0x65b   : > { %v20209_v9 = vld [vmem:[%s21331_s10 + $0x17cc] sm:$0xf]  ;;  %v17663_v54 = vor.u32 %v20345_v4, %v17660_v26  ;;  %9895 = vmatpush.bf16.msrb.mxu1 %v17407_v22  ;;  %v20126_v60 = vld [vmem:[%s21331_s10 + $0x152c] sm:$0xf0]  ;;  %v23232_v4 = vpop.f32.mrf.mxu1 }
 0x65c   : > { %v17116_v0 = vld [vmem:[%s21331_s10 + $0x17e8] sm:$0xf0]  ;;  %9883 = vmatmul.bf16.vlgmr.msrb.gmra.mxu0 %v22778_v18  ;;  %v16771_v16 = vor.u32 %v20126_v60, %v16770_v21  ;;  %v19990_v25 = vld [vmem:[%s21331_s10 + $0x10ec] sm:$0xf0] }
 0x65d   : > { %v17119_v24 = vor.u32 %v20209_v9, %v17116_v0  ;;  %v20201_v59 = vld [vmem:[%s21331_s10 + $0x178c] sm:$0xf]  ;;  %9908 = vmatpush.bf16.msrb.mxu2 %v17663_v54  ;;  %9927 = vmatpush.bf16.msra.mxu0 %v16355_v27  ;;  %v16259_v9 = vor.u32 %v19998_v63, %v16258_v58  ;;  %v16738_v38 = vld [vmem:[%s21331_s10 + $0x14d0] sm:$0xf]  ;;  %v16227_v55 = vor.u32 %v19990_v25, %v16226_v61  ;;  %v9678_v3 = vpop.f32.mrf.mxu0 }
 0x65e   : > { %v17084_v6 = vld [vmem:[%s21331_s10 + $0x17a8] sm:$0xf0]  ;;  %9896 = vmatmul.bf16.vlgmr.msrb.gmra.mxu1 %v22780_v17  ;;  %v20118_v22 = vld [vmem:[%s21331_s10 + $0x14ec] sm:$0xf0] }
 0x65f   : > { %9862 = vmatpush.bf16.msra.mxu3 %v17119_v24  ;;  %v17087_v23 = vor.u32 %v20201_v59, %v17084_v6  ;;  %v20193_v7 = vld [vmem:[%s21331_s10 + $0x174c] sm:$0xf]  ;;  %9940 = vmatpush.bf16.msra.mxu1 %v16611_v35  ;;  %v16483_v59 = vor.u32 %v20054_v29, %v16482_v56  ;;  %v16739_v6 = vor.u32 %v20118_v22, %v16738_v38  ;;  %v23244_v35 = vpop.f32.mrf.mxu2  ;;  %v19982_v39 = vld [vmem:[%s21331_s10 + $0x10ac] sm:$0xf0] }
 0x660   : > { %v17052_v48 = vld [vmem:[%s21331_s10 + $0x1768] sm:$0xf0]  ;;  %9909 = vmatmul.bf16.vlgmr.msrb.gmra.mxu2 %v22839_v8  ;;  %v16450_v13 = vld [vmem:[%s21331_s10 + $0x1290] sm:$0xf] }
 0x661   : > { %9953 = vmatpush.bf16.msra.mxu2 %v16867_v37  ;;  %9928 = vmatpush.bf16.msra.mxu0 %v16323_v19  ;;  %v17055_v57 = vor.u32 %v20193_v7, %v17052_v48  ;;  %v20185_v53 = vld [vmem:[%s21331_s10 + $0x170c] sm:$0xf]  ;;  %v16194_v37 = vld [vmem:[%s21331_s10 + $0x1090] sm:$0xf] }
 0x662   : > { %v17020_v14 = vld [vmem:[%s21331_s10 + $0x1728] sm:$0xf0]  ;;  %v20046_v41 = vld [vmem:[%s21331_s10 + $0x12ac] sm:$0xf0]  ;;  %v16195_v7 = vor.u32 %v19982_v39, %v16194_v37 }
 0x663   : > { %9863 = vmatpush.bf16.msra.mxu3 %v17087_v23  ;;  %9941 = vmatpush.bf16.msra.mxu1 %v16579_v49  ;;  %v17023_v26 = vor.u32 %v20185_v53, %v17020_v14  ;;  %v20177_v0 = vld [vmem:[%s21331_s10 + $0x16cc] sm:$0xf]  ;;  %v16706_v28 = vld [vmem:[%s21331_s10 + $0x1490] sm:$0xf]  ;;  %v9691_v23 = vpop.f32.mrf.mxu1 }
 0x664   : > { %v16988_v11 = vld [vmem:[%s21331_s10 + $0x16e8] sm:$0xf0]  ;;  %v20110_v46 = vld [vmem:[%s21331_s10 + $0x14ac] sm:$0xf0] }
 0x665   : > { %9954 = vmatpush.bf16.msra.mxu2 %v16835_v50  ;;  %9929 = vmatpush.bf16.msra.mxu0 %v16291_v32  ;;  %v16991_v54 = vor.u32 %v20177_v0, %v16988_v11  ;;  %v20169_v24 = vld [vmem:[%s21331_s10 + $0x168c] sm:$0xf]  ;;  %v16451_v50 = vor.u32 %v20046_v41, %v16450_v13  ;;  %v16707_v51 = vor.u32 %v20110_v46, %v16706_v28  ;;  %v16162_v2 = vld [vmem:[%s21331_s10 + $0x1050] sm:$0xf] }
 0x666   : > { %v16956_v27 = vld [vmem:[%s21331_s10 + $0x16a8] sm:$0xf0]  ;;  %v19974_v52 = vld [vmem:[%s21331_s10 + $0x106c] sm:$0xf0] }
 0x667   : > { %9864 = vmatpush.bf16.msra.mxu3 %v17055_v57  ;;  %9942 = vmatpush.bf16.msra.mxu1 %v16547_v34  ;;  %v16959_v19 = vor.u32 %v20169_v24, %v16956_v27  ;;  %v20161_v48 = vld [vmem:[%s21331_s10 + $0x164c] sm:$0xf]  ;;  %v16418_v62 = vld [vmem:[%s21331_s10 + $0x1250] sm:$0xf]  ;;  %v16163_v53 = vor.u32 %v19974_v52, %v16162_v2  ;;  %v9704_v1 = vpop.f32.mrf.mxu2 }
 0x668   : > { %v16924_v49 = vld [vmem:[%s21331_s10 + $0x1668] sm:$0xf0]  ;;  %v20038_v12 = vld [vmem:[%s21331_s10 + $0x126c] sm:$0xf0] }
 0x669   : > { %9955 = vmatpush.bf16.msra.mxu2 %v16803_v45  ;;  %9930 = vmatpush.bf16.msra.mxu0 %v16259_v9  ;;  %v16674_v20 = vld [vmem:[%s21331_s10 + $0x1450] sm:$0xf]  ;;  %v20153_v57 = vld [vmem:[%s21331_s10 + $0x160c] sm:$0xf]  ;;  %v16927_v32 = vor.u32 %v20161_v48, %v16924_v49  ;;  %v16419_v58 = vor.u32 %v20038_v12, %v16418_v62 }
 0x66a   : > { %v20102_v5 = vld [vmem:[%s21331_s10 + $0x146c] sm:$0xf0]  ;;  %v16892_v14 = vld [vmem:[%s21331_s10 + $0x1628] sm:$0xf0] }
 0x66b   : > { %9865 = vmatpush.bf16.msra.mxu3 %v17023_v26  ;;  %9943 = vmatpush.bf16.msra.mxu1 %v16515_v15  ;;  %v16130_v34 = vld [vmem:[%s21331_s10 + $0x1010] sm:$0xf]  ;;  %v16675_v63 = vor.u32 %v20102_v5, %v16674_v20  ;;  %v20465_v9 = vld [vmem:[%s21331_s10 + $0x1fcc] sm:$0xf]  ;;  %v16895_v61 = vor.u32 %v20153_v57, %v16892_v14  ;;  %v23297_v5 = vld [vmem:[%s21813_s12 + $0x8] sm:$0xff] }
 0x66c   : > { %v19966_v45 = vld [vmem:[%s21331_s10 + $0x102c] sm:$0xf0]  ;;  %v18140_v0 = vld [vmem:[%s21331_s10 + $0x1fe8] sm:$0xf0]  ;;  %v6937_v57 = vperm.slane %v23297_v5, 2 }
 0x66d   : > { %9956 = vmatpush.bf16.msra.mxu2 %v16771_v16  ;;  %9931 = vmatpush.bf16.msra.mxu0 %v16227_v55  ;;  %v16386_v43 = vld [vmem:[%s21331_s10 + $0x1210] sm:$0xf]  ;;  %v16131_v25 = vor.u32 %v19966_v45, %v16130_v34  ;;  %v18143_v55 = vor.u32 %v20465_v9, %v18140_v0  ;;  %v20457_v27 = vld [vmem:[%s21331_s10 + $0x1f8c] sm:$0xf]  ;;  %v9599_v0 = vadd.f32 %v23155_v10, %v23089_v31 }
 0x66e   : > { %v20030_v21 = vld [vmem:[%s21331_s10 + $0x122c] sm:$0xf0]  ;;  %v18076_v48 = vld [vmem:[%s21331_s10 + $0x1f68] sm:$0xf0] }
 0x66f   : > { %9866 = vmatpush.bf16.msra.mxu3 %v16991_v54  ;;  %9944 = vmatpush.bf16.msra.mxu1 %v16483_v59  ;;  %v16642_v60 = vld [vmem:[%s21331_s10 + $0x1410] sm:$0xf]  ;;  %v16387_v22 = vor.u32 %v20030_v21, %v16386_v43  ;;  %v18108_v59 = vld [vmem:[%s21331_s10 + $0x1fa8] sm:$0xf0] }
 0x670   : > { %v20094_v26 = vld [vmem:[%s21331_s10 + $0x142c] sm:$0xf0]  ;;  %v18111_v23 = vor.u32 %v20457_v27, %v18108_v59  ;;  %v20441_v14 = vld [vmem:[%s21331_s10 + $0x1f0c] sm:$0xf] }
 0x671   : > { %9957 = vmatpush.bf16.msra.mxu2 %v16739_v6  ;;  %9932 = vmatpush.bf16.msra.mxu0 %v16195_v7  ;;  %v17378_v11 = vld [vmem:[%s21331_s10 + $0x19d0] sm:$0xf]  ;;  %v16643_v54 = vor.u32 %v20094_v26, %v16642_v60  ;;  %v20449_v7 = vld [vmem:[%s21331_s10 + $0x1f4c] sm:$0xf] }
 0x672   : > { %v20278_v15 = vld [vmem:[%s21331_s10 + $0x19ec] sm:$0xf0]  ;;  %v18044_v34 = vld [vmem:[%s21331_s10 + $0x1f28] sm:$0xf0] }
 0x673   : > { %9867 = vmatpush.bf16.msra.mxu3 %v16959_v19  ;;  %9945 = vmatpush.bf16.msra.mxu1 %v16451_v50  ;;  %v17634_v16 = vld [vmem:[%s21331_s10 + $0x1bd0] sm:$0xf]  ;;  %v17379_v24 = vor.u32 %v20278_v15, %v17378_v11 }
 0x674   : > { %v20342_v56 = vld [vmem:[%s21331_s10 + $0x1bec] sm:$0xf0]  ;;  %v9728_v60 = vpop.f32.mrf.mxu0 }
 0x675   : > { %9958 = vmatpush.bf16.msra.mxu2 %v16707_v51  ;;  %9933 = vmatpush.bf16.msra.mxu0 %v16163_v53  ;;  %v17890_v29 = vld [vmem:[%s21331_s10 + $0x1dd0] sm:$0xf]  ;;  %v17635_v6 = vor.u32 %v20342_v56, %v17634_v16  ;;  %v9729_v11 = vadd.f32 %v9728_v60, %v6937_v57  ;;  %v18047_v16 = vor.u32 %v20441_v14, %v18044_v34  ;;  %v9611_v56 = vpop.f32.mrf.mxu3  ;;  %v20417_v14 = vld [vmem:[%s21331_s10 + $0x1e4c] sm:$0xf] }
 0x676   : > { %v20406_v38 = vld [vmem:[%s21331_s10 + $0x1dec] sm:$0xf0]  ;;  %v9741_v15 = vpop.f32.mrf.mxu1  ;;  %v17948_v34 = vld [vmem:[%s21331_s10 + $0x1e68] sm:$0xf0] }
 0x677   : > { %9868 = vmatpush.bf16.msra.mxu3 %v16927_v32  ;;  %9946 = vmatpush.bf16.msra.mxu1 %v16419_v58  ;;  %v17891_v37 = vor.u32 %v20406_v38, %v17890_v29  ;;  %v17346_v39 = vld [vmem:[%s21331_s10 + $0x1990] sm:$0xf]  ;;  %v18079_v32 = vor.u32 %v20449_v7, %v18076_v48  ;;  %v20433_v29 = vld [vmem:[%s21331_s10 + $0x1ecc] sm:$0xf]  ;;  %v9742_v31 = vadd.f32 %v9741_v15, %v9729_v11 }
 0x678   : > { %v20270_v13 = vld [vmem:[%s21331_s10 + $0x19ac] sm:$0xf0]  ;;  %v18012_v38 = vld [vmem:[%s21331_s10 + $0x1ee8] sm:$0xf0] }
 0x679   : > { %9959 = vmatpush.bf16.msra.mxu2 %v16675_v63  ;;  %v17602_v3 = vld [vmem:[%s21331_s10 + $0x1b90] sm:$0xf]  ;;  %9934 = vmatpush.bf16.msra.mxu0 %v16131_v25  ;;  %v17347_v19 = vor.u32 %v20270_v13, %v17346_v39  ;;  %v18015_v39 = vor.u32 %v20433_v29, %v18012_v38  ;;  %v17916_v15 = vld [vmem:[%s21331_s10 + $0x1e28] sm:$0xf0] }
 0x67a   : > { %v20334_v41 = vld [vmem:[%s21331_s10 + $0x1bac] sm:$0xf0] }
 0x67b   : > { %9869 = vmatpush.bf16.msra.mxu3 %v16895_v61  ;;  %v17858_v28 = vld [vmem:[%s21331_s10 + $0x1d90] sm:$0xf]  ;;  %9947 = vmatpush.bf16.msra.mxu1 %v16387_v22  ;;  %v17603_v49 = vor.u32 %v20334_v41, %v17602_v3  ;;  %v9612_v22 = vadd.f32 %v9611_v56, %v9599_v0  ;;  %v20425_v3 = vld [vmem:[%s21331_s10 + $0x1e8c] sm:$0xf]  ;;  %v17951_v0 = vor.u32 %v20417_v14, %v17948_v34 }
 0x67c   : > { %v20398_v46 = vld [vmem:[%s21331_s10 + $0x1dac] sm:$0xf0]  ;;  %9935 = vmatmul.bf16.vlgmr.msra.gmra.mxu0 %v22693_v44  ;;  %v17980_v41 = vld [vmem:[%s21331_s10 + $0x1ea8] sm:$0xf0] }
 0x67d   : > { %9960 = vmatpush.bf16.msra.mxu2 %v16643_v54  ;;  %9979 = vmatpush.bf16.msrb.mxu0 %v17379_v24  ;;  %v17859_v50 = vor.u32 %v20398_v46, %v17858_v28  ;;  %v17314_v51 = vld [vmem:[%s21331_s10 + $0x1950] sm:$0xf]  ;;  %vm10343_vm4 = vcmp.ge.f32.partialorder %v9612_v22, 0.0  ;;  %v17983_v57 = vor.u32 %v20425_v3, %v17980_v41  ;;  %v16868_v3 = vld [vmem:[%s21331_s10 + $0x15f0] sm:$0xf0] }
 0x67e   : > { %v20262_v2 = vld [vmem:[%s21331_s10 + $0x196c] sm:$0xf0]  ;;  %9870 = vmatmul.bf16.vlgmr.msra.gmra.mxu3 %v22700_v47  ;;  %9948 = vmatmul.bf16.vlgmr.msra.gmra.mxu1 %v22695_v33  ;;  %v9754_v7 = vpop.f32.mrf.mxu2 }
 0x67f   : > { %9914 = vmatpush.bf16.msrb.mxu3 %v18143_v55  ;;  %9992 = vmatpush.bf16.msrb.mxu1 %v17635_v6  ;;  %v17570_v52 = vld [vmem:[%s21331_s10 + $0x1b50] sm:$0xf]  ;;  %v17315_v53 = vor.u32 %v20262_v2, %v17314_v51  ;;  %v23326_v2 = vadd.f32 %v9754_v7, %v9742_v31 }
 0x680   : > { %v20326_v62 = vld [vmem:[%s21331_s10 + $0x1b6c] sm:$0xf0]  ;;  %9961 = vmatmul.bf16.vlgmr.msra.gmra.mxu2 %v22697_v36 }
 0x681   : > { %10005 = vmatpush.bf16.msrb.mxu2 %v17891_v37  ;;  %v17826_v12 = vld [vmem:[%s21331_s10 + $0x1d50] sm:$0xf]  ;;  %9980 = vmatpush.bf16.msrb.mxu0 %v17347_v19  ;;  %v17571_v58 = vor.u32 %v20326_v62, %v17570_v52  ;;  %v10351_v37 = vmul.f32 0.2, %v9612_v22  ;;  %v9730_v52 = vpop.f32.mrf.mxu0 }
 0x682   : > { %v20390_v20 = vld [vmem:[%s21331_s10 + $0x1d6c] sm:$0xf0]  ;;  %v20010_v52 = vld [vmem:[%s21331_s10 + $0x1194] sm:$0xf] }
 0x683   : > { %9915 = vmatpush.bf16.msrb.mxu3 %v18111_v23  ;;  %v17282_v45 = vld [vmem:[%s21331_s10 + $0x1910] sm:$0xf]  ;;  %9993 = vmatpush.bf16.msrb.mxu1 %v17603_v49  ;;  %v17827_v63 = vor.u32 %v20390_v20, %v17826_v12  ;;  %v10359_v46 = vsel %vm10343_vm4, %v9612_v22, %v10351_v37  ;;  %v9743_v20 = vpop.f32.mrf.mxu1 }
 0x684   : > { %v20254_v1 = vld [vmem:[%s21331_s10 + $0x192c] sm:$0xf0]  ;;  %v23324_v51 = vmul.f32 1.4142135, %v10359_v46  ;;  %v16580_v20 = vld [vmem:[%s21331_s10 + $0x13b0] sm:$0xf0] }
 0x685   : > { %10006 = vmatpush.bf16.msrb.mxu2 %v17859_v50  ;;  %v17538_v43 = vld [vmem:[%s21331_s10 + $0x1b10] sm:$0xf]  ;;  %9981 = vmatpush.bf16.msrb.mxu0 %v17315_v53  ;;  %v17283_v61 = vor.u32 %v20254_v1, %v17282_v45  ;;  %v9613_v53 = vpop.f32.mrf.mxu3 }
 0x686   : > { %v20318_v21 = vld [vmem:[%s21331_s10 + $0x1b2c] sm:$0xf0]  ;;  %10375 = vst [vmem:[#allocation2 + $0x30] sm:$0xff] %v23324_v51  ;;  %v9756_v29 = vpop.f32.mrf.mxu2 }
 0x687   : > { %v17794_v26 = vld [vmem:[%s21331_s10 + $0x1d10] sm:$0xf]  ;;  %9916 = vmatpush.bf16.msrb.mxu3 %v18079_v32  ;;  %v17539_v25 = vor.u32 %v20318_v21, %v17538_v43  ;;  %9994 = vmatpush.bf16.msrb.mxu1 %v17571_v58 }
 0x688   : > { %v20382_v9 = vld [vmem:[%s21331_s10 + $0x1d2c] sm:$0xf0] }
 0x689   : > { %10007 = vmatpush.bf16.msrb.mxu2 %v17827_v63  ;;  %v17795_v10 = vor.u32 %v20382_v9, %v17794_v26  ;;  %v17250_v54 = vld [vmem:[%s21331_s10 + $0x18d0] sm:$0xf]  ;;  %9982 = vmatpush.bf16.msrb.mxu0 %v17283_v61  ;;  %v20409_v9 = vld [vmem:[%s21331_s10 + $0x1e0c] sm:$0xf] }
 0x68a   : > { %v20246_v55 = vld [vmem:[%s21331_s10 + $0x18ec] sm:$0xf0] }
 0x68b   : > { %v17506_v24 = vld [vmem:[%s21331_s10 + $0x1ad0] sm:$0xf]  ;;  %9917 = vmatpush.bf16.msrb.mxu3 %v18047_v16  ;;  %v17251_v13 = vor.u32 %v20246_v55, %v17250_v54  ;;  %9995 = vmatpush.bf16.msrb.mxu1 %v17539_v25 }
 0x68c   : > { %v20310_v27 = vld [vmem:[%s21331_s10 + $0x1aec] sm:$0xf0] }
 0x68d   : > { %v17762_v59 = vld [vmem:[%s21331_s10 + $0x1cd0] sm:$0xf]  ;;  %10008 = vmatpush.bf16.msrb.mxu2 %v17795_v10  ;;  %v17507_v23 = vor.u32 %v20310_v27, %v17506_v24  ;;  %9983 = vmatpush.bf16.msrb.mxu0 %v17251_v13  ;;  %v20018_v24 = vld [vmem:[%s21331_s10 + $0x11d4] sm:$0xf]  ;;  %v9663_v41 = vpop.f32.mrf.mxu3 }
 0x68e   : > { %v20374_v6 = vld [vmem:[%s21331_s10 + $0x1cec] sm:$0xf0]  ;;  %v16356_v27 = vld [vmem:[%s21331_s10 + $0x11f0] sm:$0xf0] }
 0x68f   : > { %v17218_v28 = vld [vmem:[%s21331_s10 + $0x1890] sm:$0xf]  ;;  %v17763_v19 = vor.u32 %v20374_v6, %v17762_v59  ;;  %9918 = vmatpush.bf16.msrb.mxu3 %v18015_v39  ;;  %9996 = vmatpush.bf16.msrb.mxu1 %v17507_v23  ;;  %v20082_v59 = vld [vmem:[%s21331_s10 + $0x13d4] sm:$0xf]  ;;  %v17919_v6 = vor.u32 %v20409_v9, %v17916_v15 }
 0x690   : > { %v20238_v48 = vld [vmem:[%s21331_s10 + $0x18ac] sm:$0xf0]  ;;  %v16612_v39 = vld [vmem:[%s21331_s10 + $0x13f0] sm:$0xf0] }
 0x691   : > { %v17474_v49 = vld [vmem:[%s21331_s10 + $0x1a90] sm:$0xf]  ;;  %v17219_v32 = vor.u32 %v20238_v48, %v17218_v28  ;;  %10009 = vmatpush.bf16.msrb.mxu2 %v17763_v19  ;;  %v20146_v13 = vld [vmem:[%s21331_s10 + $0x15d4] sm:$0xf]  ;;  %v16359_v19 = vor.u32 %v20018_v24, %v16356_v27 }
 0x692   : > { %v20302_v50 = vld [vmem:[%s21331_s10 + $0x1aac] sm:$0xf0]  ;;  %v20130_v9 = vld [vmem:[%s21331_s10 + $0x1554] sm:$0xf] }
 0x693   : > { %v17730_v62 = vld [vmem:[%s21331_s10 + $0x1c90] sm:$0xf]  ;;  %v17475_v45 = vor.u32 %v20302_v50, %v17474_v49  ;;  %9919 = vmatpush.bf16.msrb.mxu3 %v17983_v57  ;;  %9984 = vmatpush.bf16.msrb.mxu0 %v17219_v32  ;;  %v16615_v49 = vor.u32 %v20082_v59, %v16612_v39  ;;  %v16871_v50 = vor.u32 %v20146_v13, %v16868_v3  ;;  %v20138_v57 = vld [vmem:[%s21331_s10 + $0x1594] sm:$0xf] }
 0x694   : > { %v20366_v12 = vld [vmem:[%s21331_s10 + $0x1cac] sm:$0xf0]  ;;  %v16836_v32 = vld [vmem:[%s21331_s10 + $0x15b0] sm:$0xf0] }
 0x695   : > { %v17731_v58 = vor.u32 %v20366_v12, %v17730_v62  ;;  %v17186_v63 = vld [vmem:[%s21331_s10 + $0x1850] sm:$0xf]  ;;  %9997 = vmatpush.bf16.msrb.mxu1 %v17475_v45  ;;  %v16324_v62 = vld [vmem:[%s21331_s10 + $0x11b0] sm:$0xf0] }
 0x696   : > { %v20230_v1 = vld [vmem:[%s21331_s10 + $0x186c] sm:$0xf0]  ;;  %v20074_v12 = vld [vmem:[%s21331_s10 + $0x1394] sm:$0xf]  ;;  %v16327_v14 = vor.u32 %v20010_v52, %v16324_v62  ;;  %v23387_v27 = vpop.f32.mrf.mxu1 }
 0x697   : > { %v17442_v43 = vld [vmem:[%s21331_s10 + $0x1a50] sm:$0xf]  ;;  %v17187_v11 = vor.u32 %v20230_v1, %v17186_v63  ;;  %10010 = vmatpush.bf16.msrb.mxu2 %v17731_v58  ;;  %9920 = vmatpush.bf16.msrb.mxu3 %v17951_v0  ;;  %v9664_v58 = vadd.f32 %v9663_v41, %v23200_v30  ;;  %v16583_v63 = vor.u32 %v20074_v12, %v16580_v20  ;;  %v16804_v0 = vld [vmem:[%s21331_s10 + $0x1570] sm:$0xf0] }
 0x698   : > { %v20294_v21 = vld [vmem:[%s21331_s10 + $0x1a6c] sm:$0xf0]  ;;  %v16839_v1 = vor.u32 %v20138_v57, %v16836_v32  ;;  %v16807_v29 = vor.u32 %v20130_v9, %v16804_v0  ;;  %v16772_v24 = vld [vmem:[%s21331_s10 + $0x1530] sm:$0xf0] }
 0x699   : > { %v17698_v60 = vld [vmem:[%s21331_s10 + $0x1c50] sm:$0xf]  ;;  %v17443_v25 = vor.u32 %v20294_v21, %v17442_v43  ;;  %9985 = vmatpush.bf16.msrb.mxu0 %v17187_v11  ;;  %v20002_v43 = vld [vmem:[%s21331_s10 + $0x1154] sm:$0xf]  ;;  %v9665_v11 = vpop.f32.mrf.mxu3 }
 0x69a   : > { %v20358_v26 = vld [vmem:[%s21331_s10 + $0x1c6c] sm:$0xf0]  ;;  %v16292_v21 = vld [vmem:[%s21331_s10 + $0x1170] sm:$0xf0] }
 0x69b   : > { %v17154_v16 = vld [vmem:[%s21331_s10 + $0x1810] sm:$0xf]  ;;  %v17699_v56 = vor.u32 %v20358_v26, %v17698_v60  ;;  %9998 = vmatpush.bf16.msrb.mxu1 %v17443_v25  ;;  %9921 = vmatpush.bf16.msrb.mxu3 %v17919_v6  ;;  %v20066_v60 = vld [vmem:[%s21331_s10 + $0x1354] sm:$0xf]  ;;  %v16295_v15 = vor.u32 %v20002_v43, %v16292_v21  ;;  %v9677_v25 = vadd.f32 %v23227_v42, %v9664_v58 }
 0x69c   : > { %v20222_v61 = vld [vmem:[%s21331_s10 + $0x182c] sm:$0xf0]  ;;  %v16548_v26 = vld [vmem:[%s21331_s10 + $0x1370] sm:$0xf0] }
 0x69d   : > { %v17410_v38 = vld [vmem:[%s21331_s10 + $0x1a10] sm:$0xf]  ;;  %v17155_v37 = vor.u32 %v20222_v61, %v17154_v16  ;;  %10011 = vmatpush.bf16.msrb.mxu2 %v17699_v56  ;;  %v16551_v56 = vor.u32 %v20066_v60, %v16548_v26  ;;  %v19986_v3 = vld [vmem:[%s21331_s10 + $0x10d4] sm:$0xf] }
 0x69e   : > { %v20286_v31 = vld [vmem:[%s21331_s10 + $0x1a2c] sm:$0xf0]  ;;  %9922 = vmatmul.bf16.vlgmr.msrb.gmra.mxu3 %v22978_v40  ;;  %v16228_v41 = vld [vmem:[%s21331_s10 + $0x10f0] sm:$0xf0]  ;;  %v23400_v12 = vpop.f32.mrf.mxu2  ;;  %v9795_v43 = vpop.f32.mrf.mxu1 }
 0x69f   : > { %v17666_v10 = vld [vmem:[%s21331_s10 + $0x1c10] sm:$0xf]  ;;  %v17411_v28 = vor.u32 %v20286_v31, %v17410_v38  ;;  %9986 = vmatpush.bf16.msrb.mxu0 %v17155_v37  ;;  %v19994_v38 = vld [vmem:[%s21331_s10 + $0x1114] sm:$0xf] }
 0x6a0   : > { %v20350_v22 = vld [vmem:[%s21331_s10 + $0x1c2c] sm:$0xf0]  ;;  %v16260_v31 = vld [vmem:[%s21331_s10 + $0x1130] sm:$0xf0] }
 0x6a1   : > { %v17122_v54 = vld [vmem:[%s21331_s10 + $0x17d0] sm:$0xf]  ;;  %v17667_v46 = vor.u32 %v20350_v22, %v17666_v10  ;;  %9999 = vmatpush.bf16.msrb.mxu1 %v17411_v28  ;;  %v20058_v10 = vld [vmem:[%s21331_s10 + $0x1314] sm:$0xf]  ;;  %v23382_v22 = vpop.f32.mrf.mxu0  ;;  %v16263_v59 = vor.u32 %v19994_v38, %v16260_v31 }
 0x6a2   : > { %v20214_v55 = vld [vmem:[%s21331_s10 + $0x17ec] sm:$0xf0]  ;;  %9987 = vmatmul.bf16.vlgmr.msrb.gmra.mxu0 %v22778_v18  ;;  %v20050_v28 = vld [vmem:[%s21331_s10 + $0x12d4] sm:$0xf] }
 0x6a3   : > { %v17123_v23 = vor.u32 %v20214_v55, %v17122_v54  ;;  %v17090_v7 = vld [vmem:[%s21331_s10 + $0x1790] sm:$0xf]  ;;  %10012 = vmatpush.bf16.msrb.mxu2 %v17667_v46  ;;  %10031 = vmatpush.bf16.msra.mxu0 %v16359_v19  ;;  %v16516_v54 = vld [vmem:[%s21331_s10 + $0x1330] sm:$0xf0]  ;;  %v9690_v46 = vadd.f32 %v23232_v4, %v9677_v25 }
 0x6a4   : > { %v20206_v48 = vld [vmem:[%s21331_s10 + $0x17ac] sm:$0xf0]  ;;  %10000 = vmatmul.bf16.vlgmr.msrb.gmra.mxu1 %v22780_v17  ;;  %v20122_v55 = vld [vmem:[%s21331_s10 + $0x1514] sm:$0xf]  ;;  %v16519_v39 = vor.u32 %v20058_v10, %v16516_v54 }
 0x6a5   : > { %9966 = vmatpush.bf16.msra.mxu3 %v17123_v23  ;;  %v17091_v53 = vor.u32 %v20206_v48, %v17090_v7  ;;  %v17058_v34 = vld [vmem:[%s21331_s10 + $0x1750] sm:$0xf]  ;;  %10044 = vmatpush.bf16.msra.mxu1 %v16615_v49  ;;  %v16775_v13 = vor.u32 %v20122_v55, %v16772_v24  ;;  %v16484_v23 = vld [vmem:[%s21331_s10 + $0x12f0] sm:$0xf0]  ;;  %v16231_v49 = vor.u32 %v19986_v3, %v16228_v41 }
 0x6a6   : > { %v20198_v45 = vld [vmem:[%s21331_s10 + $0x176c] sm:$0xf0]  ;;  %10013 = vmatmul.bf16.vlgmr.msrb.gmra.mxu2 %v22839_v8  ;;  %v20114_v19 = vld [vmem:[%s21331_s10 + $0x14d4] sm:$0xf]  ;;  %v16487_v62 = vor.u32 %v20050_v28, %v16484_v23  ;;  %v9703_v20 = vadd.f32 %v23244_v35, %v9690_v46 }
 0x6a7   : > { %10057 = vmatpush.bf16.msra.mxu2 %v16871_v50  ;;  %10032 = vmatpush.bf16.msra.mxu0 %v16327_v14  ;;  %v17059_v30 = vor.u32 %v20198_v45, %v17058_v34  ;;  %v17026_v16 = vld [vmem:[%s21331_s10 + $0x1710] sm:$0xf]  ;;  %v16740_v7 = vld [vmem:[%s21331_s10 + $0x14f0] sm:$0xf0]  ;;  %v9715_v14 = vpop.f32.mrf.mxu3 }
 0x6a8   : > { %v20190_v61 = vld [vmem:[%s21331_s10 + $0x172c] sm:$0xf0]  ;;  %v16743_v4 = vor.u32 %v20114_v19, %v16740_v7  ;;  %v19978_v57 = vld [vmem:[%s21331_s10 + $0x1094] sm:$0xf] }
 0x6a9   : > { %9967 = vmatpush.bf16.msra.mxu3 %v17091_v53  ;;  %10045 = vmatpush.bf16.msra.mxu1 %v16583_v63  ;;  %v17027_v42 = vor.u32 %v20190_v61, %v17026_v16  ;;  %v16994_v6 = vld [vmem:[%s21331_s10 + $0x16d0] sm:$0xf]  ;;  %v16196_v32 = vld [vmem:[%s21331_s10 + $0x10b0] sm:$0xf0]  ;;  %v9782_v34 = vpop.f32.mrf.mxu0 }
 0x6aa   : > { %v20182_v37 = vld [vmem:[%s21331_s10 + $0x16ec] sm:$0xf0]  ;;  %v20042_v53 = vld [vmem:[%s21331_s10 + $0x1294] sm:$0xf]  ;;  %v16199_v60 = vor.u32 %v19978_v57, %v16196_v32 }
 0x6ab   : > { %10058 = vmatpush.bf16.msra.mxu2 %v16839_v1  ;;  %10033 = vmatpush.bf16.msra.mxu0 %v16295_v15  ;;  %v16995_v48 = vor.u32 %v20182_v37, %v16994_v6  ;;  %v16962_v50 = vld [vmem:[%s21331_s10 + $0x1690] sm:$0xf]  ;;  %v16452_v45 = vld [vmem:[%s21331_s10 + $0x12b0] sm:$0xf0]  ;;  %v9716_v1 = vadd.f32 %v9715_v14, %v9703_v20 }
 0x6ac   : > { %v20174_v52 = vld [vmem:[%s21331_s10 + $0x16ac] sm:$0xf0]  ;;  %v20106_v58 = vld [vmem:[%s21331_s10 + $0x1494] sm:$0xf] }
 0x6ad   : > { %9968 = vmatpush.bf16.msra.mxu3 %v17059_v30  ;;  %10046 = vmatpush.bf16.msra.mxu1 %v16551_v56  ;;  %v16708_v63 = vld [vmem:[%s21331_s10 + $0x14b0] sm:$0xf0]  ;;  %v16930_v21 = vld [vmem:[%s21331_s10 + $0x1650] sm:$0xf]  ;;  %v16963_v35 = vor.u32 %v20174_v52, %v16962_v50  ;;  %vm10344_vm5 = vcmp.ge.f32.partialorder %v9716_v1, 0.0  ;;  %v16455_v30 = vor.u32 %v20042_v53, %v16452_v45 }
 0x6ae   : > { %v20166_v26 = vld [vmem:[%s21331_s10 + $0x166c] sm:$0xf0]  ;;  %v19970_v9 = vld [vmem:[%s21331_s10 + $0x1054] sm:$0xf]  ;;  %v10352_v11 = vmul.f32 0.2, %v9716_v1  ;;  %v16711_v15 = vor.u32 %v20106_v58, %v16708_v63 }
 0x6af   : > { %10059 = vmatpush.bf16.msra.mxu2 %v16807_v29  ;;  %10034 = vmatpush.bf16.msra.mxu0 %v16263_v59  ;;  %v16164_v0 = vld [vmem:[%s21331_s10 + $0x1070] sm:$0xf0]  ;;  %v16898_v38 = vld [vmem:[%s21331_s10 + $0x1610] sm:$0xf]  ;;  %v16931_v55 = vor.u32 %v20166_v26, %v16930_v21  ;;  %v9717_v28 = vpop.f32.mrf.mxu3 }
 0x6b0   : > { %v20034_v16 = vld [vmem:[%s21331_s10 + $0x1254] sm:$0xf]  ;;  %v10360_v29 = vsel %vm10344_vm5, %v9716_v1, %v10352_v11  ;;  %v20158_v31 = vld [vmem:[%s21331_s10 + $0x162c] sm:$0xf0]  ;;  %v16167_v24 = vor.u32 %v19970_v9, %v16164_v0 }
 0x6b1   : > { %9969 = vmatpush.bf16.msra.mxu3 %v17027_v42  ;;  %10047 = vmatpush.bf16.msra.mxu1 %v16519_v39  ;;  %v16420_v61 = vld [vmem:[%s21331_s10 + $0x1270] sm:$0xf0]  ;;  %v23420_v54 = vmul.f32 1.4142135, %v10360_v29  ;;  %v9808_v39 = vpop.f32.mrf.mxu2  ;;  %v18146_v46 = vld [vmem:[%s21331_s10 + $0x1fd0] sm:$0xf] }
 0x6b2   : > { %v20098_v25 = vld [vmem:[%s21331_s10 + $0x1454] sm:$0xf]  ;;  %v16423_v6 = vor.u32 %v20034_v16, %v16420_v61  ;;  %v20470_v23 = vld [vmem:[%s21331_s10 + $0x1fec] sm:$0xf0] }
 0x6b3   : > { %10060 = vmatpush.bf16.msra.mxu2 %v16775_v13  ;;  %10035 = vmatpush.bf16.msra.mxu0 %v16231_v49  ;;  %v16676_v56 = vld [vmem:[%s21331_s10 + $0x1470] sm:$0xf0]  ;;  %10376 = vst [vmem:[#allocation2] sm:$0xff] %v23420_v54  ;;  %v16899_v49 = vor.u32 %v20158_v31, %v16898_v38  ;;  %v18147_v32 = vor.u32 %v20470_v23, %v18146_v46  ;;  %v18114_v14 = vld [vmem:[%s21331_s10 + $0x1f90] sm:$0xf] }
 0x6b4   : > { %v19962_v10 = vld [vmem:[%s21331_s10 + $0x1014] sm:$0xf]  ;;  %v16679_v37 = vor.u32 %v20098_v25, %v16676_v56  ;;  %v20462_v34 = vld [vmem:[%s21331_s10 + $0x1fac] sm:$0xf0] }
 0x6b5   : > { %9970 = vmatpush.bf16.msra.mxu3 %v16995_v48  ;;  %10048 = vmatpush.bf16.msra.mxu1 %v16487_v62  ;;  %v16132_v42 = vld [vmem:[%s21331_s10 + $0x1030] sm:$0xf0]  ;;  %v18115_v26 = vor.u32 %v20462_v34, %v18114_v14  ;;  %v18082_v0 = vld [vmem:[%s21331_s10 + $0x1f50] sm:$0xf] }
 0x6b6   : > { %v20026_v59 = vld [vmem:[%s21331_s10 + $0x1214] sm:$0xf]  ;;  %v16135_v50 = vor.u32 %v19962_v10, %v16132_v42  ;;  %v20454_v11 = vld [vmem:[%s21331_s10 + $0x1f6c] sm:$0xf0]  ;;  %v9845_v23 = vpop.f32.mrf.mxu1 }
 0x6b7   : > { %10061 = vmatpush.bf16.msra.mxu2 %v16743_v4  ;;  %10036 = vmatpush.bf16.msra.mxu0 %v16199_v60  ;;  %v16388_v13 = vld [vmem:[%s21331_s10 + $0x1230] sm:$0xf0]  ;;  %v18083_v31 = vor.u32 %v20454_v11, %v18082_v0  ;;  %v20446_v42 = vld [vmem:[%s21331_s10 + $0x1f2c] sm:$0xf0]  ;;  %v9832_v46 = vpop.f32.mrf.mxu0 }
 0x6b8   : > { %v20090_v3 = vld [vmem:[%s21331_s10 + $0x1414] sm:$0xf]  ;;  %v16391_v20 = vor.u32 %v20026_v59, %v16388_v13 }
 0x6b9   : > { %9971 = vmatpush.bf16.msra.mxu3 %v16963_v35  ;;  %10049 = vmatpush.bf16.msra.mxu1 %v16455_v30  ;;  %v16644_v41 = vld [vmem:[%s21331_s10 + $0x1430] sm:$0xf0] }
 0x6ba   : > { %v20274_v19 = vld [vmem:[%s21331_s10 + $0x19d4] sm:$0xf]  ;;  %v16647_v57 = vor.u32 %v20090_v3, %v16644_v41 }
 0x6bb   : > { %10062 = vmatpush.bf16.msra.mxu2 %v16711_v15  ;;  %v17380_v7 = vld [vmem:[%s21331_s10 + $0x19f0] sm:$0xf0]  ;;  %10037 = vmatpush.bf16.msra.mxu0 %v16167_v24  ;;  %v18050_v24 = vld [vmem:[%s21331_s10 + $0x1f10] sm:$0xf] }
 0x6bc   : > { %v20338_v48 = vld [vmem:[%s21331_s10 + $0x1bd4] sm:$0xf]  ;;  %v17383_v53 = vor.u32 %v20274_v19, %v17380_v7  ;;  %v18051_v19 = vor.u32 %v20446_v42, %v18050_v24 }
 0x6bd   : > { %9972 = vmatpush.bf16.msra.mxu3 %v16931_v55  ;;  %v17636_v52 = vld [vmem:[%s21331_s10 + $0x1bf0] sm:$0xf0]  ;;  %10050 = vmatpush.bf16.msra.mxu1 %v16423_v6  ;;  %v6938_v55 = vperm.slane %v23297_v5, 3 }
 0x6be   : > { %v20402_v62 = vld [vmem:[%s21331_s10 + $0x1dd4] sm:$0xf]  ;;  %v17639_v45 = vor.u32 %v20338_v48, %v17636_v52  ;;  %v18018_v48 = vld [vmem:[%s21331_s10 + $0x1ed0] sm:$0xf] }
 0x6bf   : > { %v17892_v4 = vld [vmem:[%s21331_s10 + $0x1df0] sm:$0xf0]  ;;  %10063 = vmatpush.bf16.msra.mxu2 %v16679_v37  ;;  %10038 = vmatpush.bf16.msra.mxu0 %v16135_v50  ;;  %v9833_v5 = vadd.f32 %v9832_v46, %v6938_v55 }
 0x6c0   : > { %v17895_v58 = vor.u32 %v20402_v62, %v17892_v4  ;;  %v20266_v63 = vld [vmem:[%s21331_s10 + $0x1994] sm:$0xf] }
 0x6c1   : > { %v17348_v1 = vld [vmem:[%s21331_s10 + $0x19b0] sm:$0xf0]  ;;  %9973 = vmatpush.bf16.msra.mxu3 %v16899_v49  ;;  %10051 = vmatpush.bf16.msra.mxu1 %v16391_v20  ;;  %v20438_v49 = vld [vmem:[%s21331_s10 + $0x1eec] sm:$0xf0] }
 0x6c2   : > { %v20330_v43 = vld [vmem:[%s21331_s10 + $0x1b94] sm:$0xf]  ;;  %v17351_v9 = vor.u32 %v20266_v63, %v17348_v1  ;;  %10039 = vmatmul.bf16.vlgmr.msra.gmra.mxu0 %v22693_v44  ;;  %v18019_v34 = vor.u32 %v20438_v49, %v18018_v48  ;;  %v20430_v63 = vld [vmem:[%s21331_s10 + $0x1eac] sm:$0xf0] }
 0x6c3   : > { %v17604_v21 = vld [vmem:[%s21331_s10 + $0x1bb0] sm:$0xf0]  ;;  %10064 = vmatpush.bf16.msra.mxu2 %v16647_v57  ;;  %10083 = vmatpush.bf16.msrb.mxu0 %v17383_v53  ;;  %v9846_v57 = vadd.f32 %v9845_v23, %v9833_v5 }
 0x6c4   : > { %v20394_v35 = vld [vmem:[%s21331_s10 + $0x1d94] sm:$0xf]  ;;  %v17607_v30 = vor.u32 %v20330_v43, %v17604_v21  ;;  %9974 = vmatmul.bf16.vlgmr.msra.gmra.mxu3 %v22700_v47  ;;  %10052 = vmatmul.bf16.vlgmr.msra.gmra.mxu1 %v22695_v33  ;;  %v23475_v21 = vpop.f32.mrf.mxu3 }
 0x6c5   : > { %v17860_v60 = vld [vmem:[%s21331_s10 + $0x1db0] sm:$0xf0]  ;;  %10018 = vmatpush.bf16.msrb.mxu3 %v18147_v32  ;;  %10096 = vmatpush.bf16.msrb.mxu1 %v17639_v45 }
 0x6c6   : > { %v17863_v15 = vor.u32 %v20394_v35, %v17860_v60  ;;  %v20258_v16 = vld [vmem:[%s21331_s10 + $0x1954] sm:$0xf]  ;;  %10065 = vmatmul.bf16.vlgmr.msra.gmra.mxu2 %v22697_v36 }
 0x6c7   : > { %10109 = vmatpush.bf16.msrb.mxu2 %v17895_v58  ;;  %v17316_v61 = vld [vmem:[%s21331_s10 + $0x1970] sm:$0xf0]  ;;  %10084 = vmatpush.bf16.msrb.mxu0 %v17351_v9  ;;  %v17986_v58 = vld [vmem:[%s21331_s10 + $0x1e90] sm:$0xf]  ;;  %v9858_v9 = vpop.f32.mrf.mxu2 }
 0x6c8   : > { %v20322_v25 = vld [vmem:[%s21331_s10 + $0x1b54] sm:$0xf]  ;;  %v17319_v10 = vor.u32 %v20258_v16, %v17316_v61  ;;  %v9834_v16 = vpop.f32.mrf.mxu0  ;;  %v9847_v61 = vpop.f32.mrf.mxu1 }
 0x6c9   : > { %v17572_v56 = vld [vmem:[%s21331_s10 + $0x1b70] sm:$0xf0]  ;;  %10019 = vmatpush.bf16.msrb.mxu3 %v18115_v26  ;;  %10097 = vmatpush.bf16.msrb.mxu1 %v17607_v30  ;;  %v16586_v16 = vld [vmem:[%s21331_s10 + $0x1398] sm:$0xf] }
 0x6ca   : > { %v20386_v29 = vld [vmem:[%s21331_s10 + $0x1d54] sm:$0xf]  ;;  %v17575_v59 = vor.u32 %v20322_v25, %v17572_v56  ;;  %v17987_v25 = vor.u32 %v20430_v63, %v17986_v58  ;;  %v20151_v58 = vld [vmem:[%s21331_s10 + $0x15f4] sm:$0xf0] }
 0x6cb   : > { %v17828_v38 = vld [vmem:[%s21331_s10 + $0x1d70] sm:$0xf0]  ;;  %10110 = vmatpush.bf16.msrb.mxu2 %v17863_v15  ;;  %10085 = vmatpush.bf16.msrb.mxu0 %v17319_v10  ;;  %v23483_v15 = vadd.f32 %v9858_v9, %v9846_v57  ;;  %v20023_v57 = vld [vmem:[%s21331_s10 + $0x11f4] sm:$0xf0] }
 0x6cc   : > { %v17831_v6 = vor.u32 %v20386_v29, %v17828_v38  ;;  %v20250_v37 = vld [vmem:[%s21331_s10 + $0x1914] sm:$0xf]  ;;  %v17954_v29 = vld [vmem:[%s21331_s10 + $0x1e50] sm:$0xf]  ;;  %v20079_v61 = vld [vmem:[%s21331_s10 + $0x13b4] sm:$0xf0] }
 0x6cd   : > { %v17284_v39 = vld [vmem:[%s21331_s10 + $0x1930] sm:$0xf0]  ;;  %10020 = vmatpush.bf16.msrb.mxu3 %v18083_v31  ;;  %10098 = vmatpush.bf16.msrb.mxu1 %v17575_v59  ;;  %v20422_v38 = vld [vmem:[%s21331_s10 + $0x1e6c] sm:$0xf0] }
 0x6ce   : > { %v20314_v13 = vld [vmem:[%s21331_s10 + $0x1b14] sm:$0xf]  ;;  %v17287_v7 = vor.u32 %v20250_v37, %v17284_v39  ;;  %v17922_v39 = vld [vmem:[%s21331_s10 + $0x1e10] sm:$0xf] }
 0x6cf   : > { %v17540_v3 = vld [vmem:[%s21331_s10 + $0x1b30] sm:$0xf0]  ;;  %10111 = vmatpush.bf16.msrb.mxu2 %v17831_v6 }
 0x6d0   : > { %v20378_v41 = vld [vmem:[%s21331_s10 + $0x1d14] sm:$0xf]  ;;  %v17543_v50 = vor.u32 %v20314_v13, %v17540_v3  ;;  %10086 = vmatpush.bf16.msrb.mxu0 %v17287_v7  ;;  %v17955_v13 = vor.u32 %v20422_v38, %v17954_v29  ;;  %v9768_v29 = vadd.f32 %v23475_v21, %v23326_v2  ;;  %v20071_v2 = vld [vmem:[%s21331_s10 + $0x1374] sm:$0xf0] }
 0x6d1   : > { %v17796_v28 = vld [vmem:[%s21331_s10 + $0x1d30] sm:$0xf0]  ;;  %10021 = vmatpush.bf16.msrb.mxu3 %v18051_v19  ;;  %v9769_v19 = vpop.f32.mrf.mxu3  ;;  %v16810_v21 = vld [vmem:[%s21331_s10 + $0x1558] sm:$0xf] }
 0x6d2   : > { %v17799_v52 = vor.u32 %v20378_v41, %v17796_v28  ;;  %v20242_v62 = vld [vmem:[%s21331_s10 + $0x18d4] sm:$0xf]  ;;  %10099 = vmatpush.bf16.msrb.mxu1 %v17543_v50  ;;  %v20414_v41 = vld [vmem:[%s21331_s10 + $0x1e2c] sm:$0xf0]  ;;  %v9860_v50 = vpop.f32.mrf.mxu2  ;;  %v16266_v19 = vld [vmem:[%s21331_s10 + $0x1118] sm:$0xf] }
 0x6d3   : > { %v17252_v4 = vld [vmem:[%s21331_s10 + $0x18f0] sm:$0xf0]  ;;  %v16778_v50 = vld [vmem:[%s21331_s10 + $0x1518] sm:$0xf] }
 0x6d4   : > { %v20306_v20 = vld [vmem:[%s21331_s10 + $0x1ad4] sm:$0xf]  ;;  %v17255_v45 = vor.u32 %v20242_v62, %v17252_v4  ;;  %10112 = vmatpush.bf16.msrb.mxu2 %v17799_v52 }
 0x6d5   : > { %v17508_v32 = vld [vmem:[%s21331_s10 + $0x1af0] sm:$0xf0]  ;;  %10022 = vmatpush.bf16.msrb.mxu3 %v18019_v34  ;;  %v20087_v34 = vld [vmem:[%s21331_s10 + $0x13f4] sm:$0xf0] }
 0x6d6   : > { %v20370_v53 = vld [vmem:[%s21331_s10 + $0x1cd4] sm:$0xf]  ;;  %v17511_v1 = vor.u32 %v20306_v20, %v17508_v32  ;;  %10087 = vmatpush.bf16.msrb.mxu0 %v17255_v45  ;;  %v16362_v20 = vld [vmem:[%s21331_s10 + $0x11d8] sm:$0xf] }
 0x6d7   : > { %v17764_v14 = vld [vmem:[%s21331_s10 + $0x1cf0] sm:$0xf0]  ;;  %v16618_v32 = vld [vmem:[%s21331_s10 + $0x13d8] sm:$0xf] }
 0x6d8   : > { %v17767_v43 = vor.u32 %v20370_v53, %v17764_v14  ;;  %v20234_v35 = vld [vmem:[%s21331_s10 + $0x1894] sm:$0xf]  ;;  %10100 = vmatpush.bf16.msrb.mxu1 %v17511_v1  ;;  %v17923_v53 = vor.u32 %v20414_v41, %v17922_v39  ;;  %v16874_v45 = vld [vmem:[%s21331_s10 + $0x15d8] sm:$0xf]  ;;  %v16619_v9 = vor.u32 %v20087_v34, %v16618_v32 }
 0x6d9   : > { %v17220_v60 = vld [vmem:[%s21331_s10 + $0x18b0] sm:$0xf0]  ;;  %10023 = vmatpush.bf16.msrb.mxu3 %v17987_v25  ;;  %v16842_v25 = vld [vmem:[%s21331_s10 + $0x1598] sm:$0xf] }
 0x6da   : > { %v20298_v26 = vld [vmem:[%s21331_s10 + $0x1a94] sm:$0xf]  ;;  %v17223_v56 = vor.u32 %v20234_v35, %v17220_v60  ;;  %10113 = vmatpush.bf16.msrb.mxu2 %v17767_v43  ;;  %v16363_v35 = vor.u32 %v20023_v57, %v16362_v20  ;;  %v20135_v39 = vld [vmem:[%s21331_s10 + $0x1574] sm:$0xf0] }
 0x6db   : > { %v17476_v0 = vld [vmem:[%s21331_s10 + $0x1ab0] sm:$0xf0] }
 0x6dc   : > { %v20362_v11 = vld [vmem:[%s21331_s10 + $0x1c94] sm:$0xf]  ;;  %v17479_v31 = vor.u32 %v20298_v26, %v17476_v0  ;;  %10088 = vmatpush.bf16.msrb.mxu0 %v17223_v56  ;;  %v16875_v0 = vor.u32 %v20151_v58, %v16874_v45  ;;  %v20143_v56 = vld [vmem:[%s21331_s10 + $0x15b4] sm:$0xf0] }
 0x6dd   : > { %v17732_v30 = vld [vmem:[%s21331_s10 + $0x1cb0] sm:$0xf0]  ;;  %10024 = vmatpush.bf16.msrb.mxu3 %v17955_v13  ;;  %v9781_v13 = vadd.f32 %v23382_v22, %v9768_v29  ;;  %v20127_v22 = vld [vmem:[%s21331_s10 + $0x1534] sm:$0xf0] }
 0x6de   : > { %v17735_v10 = vor.u32 %v20362_v11, %v17732_v30  ;;  %v20226_v55 = vld [vmem:[%s21331_s10 + $0x1854] sm:$0xf]  ;;  %10101 = vmatpush.bf16.msrb.mxu1 %v17479_v31  ;;  %v16330_v11 = vld [vmem:[%s21331_s10 + $0x1198] sm:$0xf]  ;;  %v16779_v34 = vor.u32 %v20127_v22, %v16778_v50 }
 0x6df   : > { %v17188_v24 = vld [vmem:[%s21331_s10 + $0x1870] sm:$0xf0]  ;;  %v20015_v30 = vld [vmem:[%s21331_s10 + $0x11b4] sm:$0xf0] }
 0x6e0   : > { %v20290_v42 = vld [vmem:[%s21331_s10 + $0x1a54] sm:$0xf]  ;;  %v17191_v3 = vor.u32 %v20226_v55, %v17188_v24  ;;  %10114 = vmatpush.bf16.msrb.mxu2 %v17735_v10  ;;  %v16331_v31 = vor.u32 %v20015_v30, %v16330_v11  ;;  %v16587_v24 = vor.u32 %v20079_v61, %v16586_v16  ;;  %v16234_v45 = vld [vmem:[%s21331_s10 + $0x10d8] sm:$0xf]  ;;  %v9819_v16 = vpop.f32.mrf.mxu3 }
 0x6e1   : > { %v17444_v59 = vld [vmem:[%s21331_s10 + $0x1a70] sm:$0xf0]  ;;  %10025 = vmatpush.bf16.msrb.mxu3 %v17923_v53  ;;  %v9794_v53 = vadd.f32 %v23387_v27, %v9781_v13  ;;  %v19991_v58 = vld [vmem:[%s21331_s10 + $0x10f4] sm:$0xf0] }
 0x6e2   : > { %v20354_v6 = vld [vmem:[%s21331_s10 + $0x1c54] sm:$0xf]  ;;  %v17447_v5 = vor.u32 %v20290_v42, %v17444_v59  ;;  %10089 = vmatpush.bf16.msrb.mxu0 %v17191_v3  ;;  %v16843_v42 = vor.u32 %v20143_v56, %v16842_v25  ;;  %v16298_v59 = vld [vmem:[%s21331_s10 + $0x1158] sm:$0xf]  ;;  %v16235_v27 = vor.u32 %v19991_v58, %v16234_v45 }
 0x6e3   : > { %v17700_v37 = vld [vmem:[%s21331_s10 + $0x1c70] sm:$0xf0]  ;;  %v16202_v61 = vld [vmem:[%s21331_s10 + $0x1098] sm:$0xf] }
 0x6e4   : > { %v20218_v28 = vld [vmem:[%s21331_s10 + $0x1814] sm:$0xf]  ;;  %v17703_v23 = vor.u32 %v20354_v6, %v17700_v37  ;;  %10102 = vmatpush.bf16.msrb.mxu1 %v17447_v5  ;;  %v20007_v6 = vld [vmem:[%s21331_s10 + $0x1174] sm:$0xf0]  ;;  %10026 = vmatmul.bf16.vlgmr.msrb.gmra.mxu3 %v22978_v40 }
 0x6e5   : > { %v17156_v46 = vld [vmem:[%s21331_s10 + $0x1830] sm:$0xf0]  ;;  %v16554_v37 = vld [vmem:[%s21331_s10 + $0x1358] sm:$0xf]  ;;  %v16299_v41 = vor.u32 %v20007_v6, %v16298_v59 }
 0x6e6   : > { %v20282_v7 = vld [vmem:[%s21331_s10 + $0x1a14] sm:$0xf]  ;;  %v17159_v14 = vor.u32 %v20218_v28, %v17156_v46  ;;  %10115 = vmatpush.bf16.msrb.mxu2 %v17703_v23  ;;  %v16555_v5 = vor.u32 %v20071_v2, %v16554_v37  ;;  %v16811_v23 = vor.u32 %v20135_v39, %v16810_v21  ;;  %v19983_v25 = vld [vmem:[%s21331_s10 + $0x10b4] sm:$0xf0] }
 0x6e7   : > { %v17412_v48 = vld [vmem:[%s21331_s10 + $0x1a30] sm:$0xf0]  ;;  %v16458_v56 = vld [vmem:[%s21331_s10 + $0x1298] sm:$0xf]  ;;  %v16203_v37 = vor.u32 %v19983_v25, %v16202_v61 }
 0x6e8   : > { %v20346_v49 = vld [vmem:[%s21331_s10 + $0x1c14] sm:$0xf]  ;;  %v17415_v63 = vor.u32 %v20282_v7, %v17412_v48  ;;  %10090 = vmatpush.bf16.msrb.mxu0 %v17159_v14  ;;  %v19999_v7 = vld [vmem:[%s21331_s10 + $0x1134] sm:$0xf0] }
 0x6e9   : > { %v17668_v52 = vld [vmem:[%s21331_s10 + $0x1c30] sm:$0xf0]  ;;  %v16522_v48 = vld [vmem:[%s21331_s10 + $0x1318] sm:$0xf]  ;;  %v16267_v20 = vor.u32 %v19999_v7, %v16266_v19 }
 0x6ea   : > { %v20210_v62 = vld [vmem:[%s21331_s10 + $0x17d4] sm:$0xf]  ;;  %v17671_v1 = vor.u32 %v20346_v49, %v17668_v52  ;;  %10103 = vmatpush.bf16.msrb.mxu1 %v17415_v63  ;;  %v20063_v49 = vld [vmem:[%s21331_s10 + $0x1334] sm:$0xf0]  ;;  %v23540_v52 = vpop.f32.mrf.mxu0 }
 0x6eb   : > { %v17124_v4 = vld [vmem:[%s21331_s10 + $0x17f0] sm:$0xf0]  ;;  %10091 = vmatmul.bf16.vlgmr.msrb.gmra.mxu0 %v22778_v18  ;;  %v16523_v14 = vor.u32 %v20063_v49, %v16522_v48  ;;  %v16490_v63 = vld [vmem:[%s21331_s10 + $0x12d8] sm:$0xf] }
 0x6ec   : > { %v17127_v43 = vor.u32 %v20210_v62, %v17124_v4  ;;  %v20202_v60 = vld [vmem:[%s21331_s10 + $0x1794] sm:$0xf]  ;;  %10116 = vmatpush.bf16.msrb.mxu2 %v17671_v1  ;;  %10135 = vmatpush.bf16.msra.mxu0 %v16363_v35  ;;  %v23542_v62 = vpop.f32.mrf.mxu1  ;;  %v20055_v1 = vld [vmem:[%s21331_s10 + $0x12f4] sm:$0xf0] }
 0x6ed   : > { %v17092_v26 = vld [vmem:[%s21331_s10 + $0x17b0] sm:$0xf0]  ;;  %10104 = vmatmul.bf16.vlgmr.msrb.gmra.mxu1 %v22780_v17  ;;  %v20119_v35 = vld [vmem:[%s21331_s10 + $0x14f4] sm:$0xf0]  ;;  %v16491_v11 = vor.u32 %v20055_v1, %v16490_v63 }
 0x6ee   : > { %10070 = vmatpush.bf16.msra.mxu3 %v17127_v43  ;;  %v17095_v38 = vor.u32 %v20202_v60, %v17092_v26  ;;  %v20194_v10 = vld [vmem:[%s21331_s10 + $0x1754] sm:$0xf]  ;;  %10148 = vmatpush.bf16.msra.mxu1 %v16619_v9  ;;  %v16746_v43 = vld [vmem:[%s21331_s10 + $0x14d8] sm:$0xf]  ;;  %v9807_v26 = vadd.f32 %v23400_v12, %v9794_v53  ;;  %v9821_v53 = vpop.f32.mrf.mxu3 }
 0x6ef   : > { %v17060_v55 = vld [vmem:[%s21331_s10 + $0x1770] sm:$0xf0]  ;;  %10117 = vmatmul.bf16.vlgmr.msrb.gmra.mxu2 %v22839_v8  ;;  %v16747_v30 = vor.u32 %v20119_v35, %v16746_v43  ;;  %v16170_v13 = vld [vmem:[%s21331_s10 + $0x1058] sm:$0xf] }
 0x6f0   : > { %10161 = vmatpush.bf16.msra.mxu2 %v16875_v0  ;;  %10136 = vmatpush.bf16.msra.mxu0 %v16331_v31  ;;  %v17063_v3 = vor.u32 %v20194_v10, %v17060_v55  ;;  %v20186_v28 = vld [vmem:[%s21331_s10 + $0x1714] sm:$0xf]  ;;  %v9820_v29 = vadd.f32 %v9819_v16, %v9807_v26  ;;  %v20047_v31 = vld [vmem:[%s21331_s10 + $0x12b4] sm:$0xf0] }
 0x6f1   : > { %v17028_v46 = vld [vmem:[%s21331_s10 + $0x1730] sm:$0xf0]  ;;  %v16714_v10 = vld [vmem:[%s21331_s10 + $0x1498] sm:$0xf]  ;;  %v16459_v21 = vor.u32 %v20047_v31, %v16458_v56 }
 0x6f2   : > { %10071 = vmatpush.bf16.msra.mxu3 %v17095_v38  ;;  %10149 = vmatpush.bf16.msra.mxu1 %v16587_v24  ;;  %v17031_v4 = vor.u32 %v20186_v28, %v17028_v46  ;;  %v20178_v57 = vld [vmem:[%s21331_s10 + $0x16d4] sm:$0xf]  ;;  %v23559_v38 = vpop.f32.mrf.mxu2  ;;  %v20111_v55 = vld [vmem:[%s21331_s10 + $0x14b4] sm:$0xf0]  ;;  %v9886_v12 = vpop.f32.mrf.mxu0  ;;  %vm10345_vm6 = vcmp.ge.f32.partialorder %v9820_v29, 0.0 }
 0x6f3   : > { %v16996_v32 = vld [vmem:[%s21331_s10 + $0x16f0] sm:$0xf0]  ;;  %v16715_v39 = vor.u32 %v20111_v55, %v16714_v10  ;;  %v20039_v46 = vld [vmem:[%s21331_s10 + $0x1274] sm:$0xf0] }
 0x6f4   : > { %10162 = vmatpush.bf16.msra.mxu2 %v16843_v42  ;;  %10137 = vmatpush.bf16.msra.mxu0 %v16299_v41  ;;  %v16999_v60 = vor.u32 %v20178_v57, %v16996_v32  ;;  %v20170_v9 = vld [vmem:[%s21331_s10 + $0x1694] sm:$0xf]  ;;  %v10353_v42 = vmul.f32 0.2, %v9820_v29  ;;  %v9899_v59 = vpop.f32.mrf.mxu1  ;;  %v16426_v41 = vld [vmem:[%s21331_s10 + $0x1258] sm:$0xf] }
 0x6f5   : > { %v16964_v0 = vld [vmem:[%s21331_s10 + $0x16b0] sm:$0xf0]  ;;  %v16138_v22 = vld [vmem:[%s21331_s10 + $0x1018] sm:$0xf]  ;;  %v16427_v57 = vor.u32 %v20039_v46, %v16426_v41 }
 0x6f6   : > { %10072 = vmatpush.bf16.msra.mxu3 %v17063_v3  ;;  %10150 = vmatpush.bf16.msra.mxu1 %v16555_v5  ;;  %v20162_v24 = vld [vmem:[%s21331_s10 + $0x1654] sm:$0xf]  ;;  %v16967_v6 = vor.u32 %v20170_v9, %v16964_v0  ;;  %v19975_v3 = vld [vmem:[%s21331_s10 + $0x1074] sm:$0xf0]  ;;  %v10361_v28 = vsel %vm10345_vm6, %v9820_v29, %v10353_v42 }
 0x6f7   : > { %v16932_v2 = vld [vmem:[%s21331_s10 + $0x1670] sm:$0xf0]  ;;  %v16682_v5 = vld [vmem:[%s21331_s10 + $0x1458] sm:$0xf]  ;;  %v23572_v19 = vmul.f32 1.4142135, %v10361_v28  ;;  %v16171_v50 = vor.u32 %v19975_v3, %v16170_v13 }
 0x6f8   : > { %10163 = vmatpush.bf16.msra.mxu2 %v16811_v23  ;;  %10138 = vmatpush.bf16.msra.mxu0 %v16267_v20  ;;  %v20103_v23 = vld [vmem:[%s21331_s10 + $0x1474] sm:$0xf0]  ;;  %v20154_v7 = vld [vmem:[%s21331_s10 + $0x1614] sm:$0xf]  ;;  %v16935_v49 = vor.u32 %v20162_v24, %v16932_v2 }
 0x6f9   : > { %v16900_v48 = vld [vmem:[%s21331_s10 + $0x1630] sm:$0xf0]  ;;  %v16394_v20 = vld [vmem:[%s21331_s10 + $0x1218] sm:$0xf]  ;;  %10377 = vst [vmem:[#allocation2 + $0x18] sm:$0xff] %v23572_v19  ;;  %v16683_v32 = vor.u32 %v20103_v23, %v16682_v5 }
 0x6fa   : > { %10073 = vmatpush.bf16.msra.mxu3 %v17031_v4  ;;  %10151 = vmatpush.bf16.msra.mxu1 %v16523_v14  ;;  %v19967_v4 = vld [vmem:[%s21331_s10 + $0x1034] sm:$0xf0]  ;;  %v9912_v45 = vpop.f32.mrf.mxu2  ;;  %v20466_v63 = vld [vmem:[%s21331_s10 + $0x1fd4] sm:$0xf] }
 0x6fb   : > { %v20031_v14 = vld [vmem:[%s21331_s10 + $0x1234] sm:$0xf0]  ;;  %v18148_v1 = vld [vmem:[%s21331_s10 + $0x1ff0] sm:$0xf0]  ;;  %v16139_v26 = vor.u32 %v19967_v4, %v16138_v22 }
 0x6fc   : > { %10164 = vmatpush.bf16.msra.mxu2 %v16779_v34  ;;  %10139 = vmatpush.bf16.msra.mxu0 %v16235_v27  ;;  %v16650_v34 = vld [vmem:[%s21331_s10 + $0x1418] sm:$0xf]  ;;  %v16903_v27 = vor.u32 %v20154_v7, %v16900_v48  ;;  %v18151_v61 = vor.u32 %v20466_v63, %v18148_v1  ;;  %v20458_v56 = vld [vmem:[%s21331_s10 + $0x1f94] sm:$0xf]  ;;  %v9936_v1 = vpop.f32.mrf.mxu0 }
 0x6fd   : > { %v20095_v58 = vld [vmem:[%s21331_s10 + $0x1434] sm:$0xf0]  ;;  %v18116_v29 = vld [vmem:[%s21331_s10 + $0x1fb0] sm:$0xf0] }
 0x6fe   : > { %10074 = vmatpush.bf16.msra.mxu3 %v16999_v60  ;;  %10152 = vmatpush.bf16.msra.mxu1 %v16491_v11  ;;  %v17386_v43 = vld [vmem:[%s21331_s10 + $0x19d8] sm:$0xf]  ;;  %v16651_v16 = vor.u32 %v20095_v58, %v16650_v34  ;;  %v20442_v4 = vld [vmem:[%s21331_s10 + $0x1f14] sm:$0xf] }
 0x6ff   : > { %v20279_v35 = vld [vmem:[%s21331_s10 + $0x19f4] sm:$0xf0] }
 0x700   : > { %10165 = vmatpush.bf16.msra.mxu2 %v16747_v30  ;;  %10140 = vmatpush.bf16.msra.mxu0 %v16203_v37  ;;  %v17642_v60 = vld [vmem:[%s21331_s10 + $0x1bd8] sm:$0xf]  ;;  %v16395_v30 = vor.u32 %v20031_v14, %v16394_v20  ;;  %v17387_v25 = vor.u32 %v20279_v35, %v17386_v43  ;;  %v18119_v37 = vor.u32 %v20458_v56, %v18116_v29  ;;  %v18052_v20 = vld [vmem:[%s21331_s10 + $0x1f30] sm:$0xf0]  ;;  %v9949_v35 = vpop.f32.mrf.mxu1 }
 0x701   : > { %v20343_v9 = vld [vmem:[%s21331_s10 + $0x1bf4] sm:$0xf0] }
 0x702   : > { %10075 = vmatpush.bf16.msra.mxu3 %v16967_v6  ;;  %10153 = vmatpush.bf16.msra.mxu1 %v16459_v21  ;;  %v17898_v0 = vld [vmem:[%s21331_s10 + $0x1dd8] sm:$0xf]  ;;  %v17643_v31 = vor.u32 %v20343_v9, %v17642_v60  ;;  %v20450_v21 = vld [vmem:[%s21331_s10 + $0x1f54] sm:$0xf]  ;;  %v18055_v60 = vor.u32 %v20442_v4, %v18052_v20 }
 0x703   : > { %v20407_v11 = vld [vmem:[%s21331_s10 + $0x1df4] sm:$0xf0]  ;;  %v18020_v9 = vld [vmem:[%s21331_s10 + $0x1ef0] sm:$0xf0] }
 0x704   : > { %10166 = vmatpush.bf16.msra.mxu2 %v16715_v39  ;;  %10141 = vmatpush.bf16.msra.mxu0 %v16171_v50  ;;  %v17899_v10 = vor.u32 %v20407_v11, %v17898_v0  ;;  %v17354_v55 = vld [vmem:[%s21331_s10 + $0x1998] sm:$0xf]  ;;  %v18084_v39 = vld [vmem:[%s21331_s10 + $0x1f70] sm:$0xf0]  ;;  %v23612_v50 = vld [vmem:[%s21813_s12 + $0x8] sm:$0xff] }
 0x705   : > { %v20271_v12 = vld [vmem:[%s21331_s10 + $0x19b4] sm:$0xf0]  ;;  %v18087_v48 = vor.u32 %v20450_v21, %v18084_v39  ;;  %v6939_v22 = vperm.slane %v23612_v50, 4  ;;  %v9962_v39 = vpop.f32.mrf.mxu2 }
 0x706   : > { %10076 = vmatpush.bf16.msra.mxu3 %v16935_v49  ;;  %10154 = vmatpush.bf16.msra.mxu1 %v16427_v57  ;;  %v17610_v24 = vld [vmem:[%s21331_s10 + $0x1b98] sm:$0xf]  ;;  %v17355_v2 = vor.u32 %v20271_v12, %v17354_v55  ;;  %v20426_v12 = vld [vmem:[%s21331_s10 + $0x1e94] sm:$0xf] }
 0x707   : > { %v20335_v42 = vld [vmem:[%s21331_s10 + $0x1bb4] sm:$0xf0]  ;;  %v9937_v43 = vadd.f32 %v9936_v1, %v6939_v22  ;;  %v17924_v1 = vld [vmem:[%s21331_s10 + $0x1e30] sm:$0xf0] }
 0x708   : > { %10167 = vmatpush.bf16.msra.mxu2 %v16683_v32  ;;  %10142 = vmatpush.bf16.msra.mxu0 %v16139_v26  ;;  %v17866_v59 = vld [vmem:[%s21331_s10 + $0x1d98] sm:$0xf]  ;;  %v17611_v13 = vor.u32 %v20335_v42, %v17610_v24  ;;  %v20434_v26 = vld [vmem:[%s21331_s10 + $0x1ed4] sm:$0xf] }
 0x709   : > { %v20399_v6 = vld [vmem:[%s21331_s10 + $0x1db4] sm:$0xf0]  ;;  %v17988_v24 = vld [vmem:[%s21331_s10 + $0x1eb0] sm:$0xf0] }
 0x70a   : > { %10077 = vmatpush.bf16.msra.mxu3 %v16903_v27  ;;  %10155 = vmatpush.bf16.msra.mxu1 %v16395_v30  ;;  %v17867_v3 = vor.u32 %v20399_v6, %v17866_v59  ;;  %v17322_v41 = vld [vmem:[%s21331_s10 + $0x1958] sm:$0xf]  ;;  %v23633_v6 = vpop.f32.mrf.mxu3 }
 0x70b   : > { %v20263_v28 = vld [vmem:[%s21331_s10 + $0x1974] sm:$0xf0]  ;;  %10143 = vmatmul.bf16.vlgmr.msra.gmra.mxu0 %v22693_v44 }
 0x70c   : > { %10168 = vmatpush.bf16.msra.mxu2 %v16651_v16  ;;  %10187 = vmatpush.bf16.msrb.mxu0 %v17387_v25  ;;  %v17578_v46 = vld [vmem:[%s21331_s10 + $0x1b58] sm:$0xf]  ;;  %v17323_v49 = vor.u32 %v20263_v28, %v17322_v41  ;;  %v9950_v25 = vadd.f32 %v9949_v35, %v9937_v43 }
 0x70d   : > { %10078 = vmatmul.bf16.vlgmr.msra.gmra.mxu3 %v22700_v47  ;;  %v20327_v5 = vld [vmem:[%s21331_s10 + $0x1b74] sm:$0xf0]  ;;  %10156 = vmatmul.bf16.vlgmr.msra.gmra.mxu1 %v22695_v33 }
 0x70e   : > { %10122 = vmatpush.bf16.msrb.mxu3 %v18151_v61  ;;  %10200 = vmatpush.bf16.msrb.mxu1 %v17643_v31  ;;  %v17834_v23 = vld [vmem:[%s21331_s10 + $0x1d58] sm:$0xf]  ;;  %v17579_v57 = vor.u32 %v20327_v5, %v17578_v46  ;;  %v23641_v28 = vadd.f32 %v9962_v39, %v9950_v25  ;;  %v9938_v46 = vpop.f32.mrf.mxu0  ;;  %v9951_v5 = vpop.f32.mrf.mxu1 }
 0x70f   : > { %v20391_v7 = vld [vmem:[%s21331_s10 + $0x1d74] sm:$0xf0]  ;;  %10169 = vmatmul.bf16.vlgmr.msra.gmra.mxu2 %v22697_v36  ;;  %v20011_v46 = vld [vmem:[%s21331_s10 + $0x119c] sm:$0xf] }
 0x710   : > { %10213 = vmatpush.bf16.msrb.mxu2 %v17899_v10  ;;  %10188 = vmatpush.bf16.msrb.mxu0 %v17355_v2  ;;  %v17835_v32 = vor.u32 %v20391_v7, %v17834_v23  ;;  %v17290_v53 = vld [vmem:[%s21331_s10 + $0x1918] sm:$0xf]  ;;  %v18023_v10 = vor.u32 %v20434_v26, %v18020_v9  ;;  %v17991_v23 = vor.u32 %v20426_v12, %v17988_v24  ;;  %v16620_v12 = vld [vmem:[%s21331_s10 + $0x13f8] sm:$0xf0] }
 0x711   : > { %v20255_v14 = vld [vmem:[%s21331_s10 + $0x1934] sm:$0xf0]  ;;  %v20147_v24 = vld [vmem:[%s21331_s10 + $0x15dc] sm:$0xf] }
 0x712   : > { %10123 = vmatpush.bf16.msrb.mxu3 %v18119_v37  ;;  %10201 = vmatpush.bf16.msrb.mxu1 %v17611_v13  ;;  %v17546_v34 = vld [vmem:[%s21331_s10 + $0x1b18] sm:$0xf]  ;;  %v17291_v27 = vor.u32 %v20255_v14, %v17290_v53  ;;  %v9873_v26 = vpop.f32.mrf.mxu3  ;;  %v16332_v5 = vld [vmem:[%s21331_s10 + $0x11b8] sm:$0xf0] }
 0x713   : > { %v20319_v45 = vld [vmem:[%s21331_s10 + $0x1b34] sm:$0xf0] }
 0x714   : > { %10214 = vmatpush.bf16.msrb.mxu2 %v17867_v3  ;;  %v17802_v58 = vld [vmem:[%s21331_s10 + $0x1d18] sm:$0xf]  ;;  %10189 = vmatpush.bf16.msrb.mxu0 %v17323_v49  ;;  %v17547_v0 = vor.u32 %v20319_v45, %v17546_v34  ;;  %v17956_v49 = vld [vmem:[%s21331_s10 + $0x1e70] sm:$0xf0] }
 0x715   : > { %v20383_v63 = vld [vmem:[%s21331_s10 + $0x1d34] sm:$0xf0]  ;;  %v20410_v45 = vld [vmem:[%s21331_s10 + $0x1e14] sm:$0xf] }
 0x716   : > { %10124 = vmatpush.bf16.msrb.mxu3 %v18087_v48  ;;  %10202 = vmatpush.bf16.msrb.mxu1 %v17579_v57  ;;  %v17803_v11 = vor.u32 %v20383_v63, %v17802_v58  ;;  %v17258_v30 = vld [vmem:[%s21331_s10 + $0x18d8] sm:$0xf]  ;;  %v20418_v48 = vld [vmem:[%s21331_s10 + $0x1e54] sm:$0xf] }
 0x717   : > { %v20247_v16 = vld [vmem:[%s21331_s10 + $0x18f4] sm:$0xf0]  ;;  %v17959_v58 = vor.u32 %v20418_v48, %v17956_v49  ;;  %v20139_v48 = vld [vmem:[%s21331_s10 + $0x159c] sm:$0xf] }
 0x718   : > { %10215 = vmatpush.bf16.msrb.mxu2 %v17835_v32  ;;  %v17514_v61 = vld [vmem:[%s21331_s10 + $0x1ad8] sm:$0xf]  ;;  %10190 = vmatpush.bf16.msrb.mxu0 %v17291_v27  ;;  %v17259_v55 = vor.u32 %v20247_v16, %v17258_v30  ;;  %v9964_v30 = vpop.f32.mrf.mxu2  ;;  %v16844_v49 = vld [vmem:[%s21331_s10 + $0x15b8] sm:$0xf0] }
 0x719   : > { %v20311_v56 = vld [vmem:[%s21331_s10 + $0x1af4] sm:$0xf0]  ;;  %v20059_v30 = vld [vmem:[%s21331_s10 + $0x131c] sm:$0xf] }
 0x71a   : > { %v17770_v29 = vld [vmem:[%s21331_s10 + $0x1cd8] sm:$0xf]  ;;  %10125 = vmatpush.bf16.msrb.mxu3 %v18055_v60  ;;  %10203 = vmatpush.bf16.msrb.mxu1 %v17547_v0  ;;  %v17515_v42 = vor.u32 %v20311_v56, %v17514_v61  ;;  %v20019_v56 = vld [vmem:[%s21331_s10 + $0x11dc] sm:$0xf] }
 0x71b   : > { %v20375_v31 = vld [vmem:[%s21331_s10 + $0x1cf4] sm:$0xf0] }
 0x71c   : > { %10216 = vmatpush.bf16.msrb.mxu2 %v17803_v11  ;;  %v17771_v59 = vor.u32 %v20375_v31, %v17770_v29  ;;  %v17226_v37 = vld [vmem:[%s21331_s10 + $0x1898] sm:$0xf]  ;;  %10191 = vmatpush.bf16.msrb.mxu0 %v17259_v55  ;;  %v16364_v29 = vld [vmem:[%s21331_s10 + $0x11f8] sm:$0xf0] }
 0x71d   : > { %v20239_v2 = vld [vmem:[%s21331_s10 + $0x18b4] sm:$0xf0]  ;;  %v20083_v31 = vld [vmem:[%s21331_s10 + $0x13dc] sm:$0xf] }
 0x71e   : > { %v17482_v21 = vld [vmem:[%s21331_s10 + $0x1a98] sm:$0xf]  ;;  %10126 = vmatpush.bf16.msrb.mxu3 %v18023_v10  ;;  %v17227_v7 = vor.u32 %v20239_v2, %v17226_v37  ;;  %10204 = vmatpush.bf16.msrb.mxu1 %v17515_v42  ;;  %v17927_v10 = vor.u32 %v20410_v45, %v17924_v1  ;;  %v16876_v42 = vld [vmem:[%s21331_s10 + $0x15f8] sm:$0xf0] }
 0x71f   : > { %v20303_v13 = vld [vmem:[%s21331_s10 + $0x1ab4] sm:$0xf0]  ;;  %v16300_v45 = vld [vmem:[%s21331_s10 + $0x1178] sm:$0xf0] }
 0x720   : > { %v17738_v3 = vld [vmem:[%s21331_s10 + $0x1c98] sm:$0xf]  ;;  %10217 = vmatpush.bf16.msrb.mxu2 %v17771_v59  ;;  %v17483_v22 = vor.u32 %v20303_v13, %v17482_v21  ;;  %10192 = vmatpush.bf16.msrb.mxu0 %v17227_v7  ;;  %v16367_v21 = vor.u32 %v20019_v56, %v16364_v29  ;;  %v16588_v7 = vld [vmem:[%s21331_s10 + $0x13b8] sm:$0xf0] }
 0x721   : > { %v20367_v41 = vld [vmem:[%s21331_s10 + $0x1cb4] sm:$0xf0]  ;;  %v23700_v56 = vpop.f32.mrf.mxu1 }
 0x722   : > { %v17739_v4 = vor.u32 %v20367_v41, %v17738_v3  ;;  %v17194_v20 = vld [vmem:[%s21331_s10 + $0x1858] sm:$0xf]  ;;  %10127 = vmatpush.bf16.msrb.mxu3 %v17991_v23  ;;  %10205 = vmatpush.bf16.msrb.mxu1 %v17483_v22  ;;  %v16623_v3 = vor.u32 %v20083_v31, %v16620_v12  ;;  %v16879_v41 = vor.u32 %v20147_v24, %v16876_v42  ;;  %v20075_v23 = vld [vmem:[%s21331_s10 + $0x139c] sm:$0xf] }
 0x723   : > { %v20231_v57 = vld [vmem:[%s21331_s10 + $0x1874] sm:$0xf0]  ;;  %v9872_v22 = vadd.f32 %v23633_v6, %v23483_v15  ;;  %v16556_v15 = vld [vmem:[%s21331_s10 + $0x1378] sm:$0xf0] }
 0x724   : > { %v17450_v32 = vld [vmem:[%s21331_s10 + $0x1a58] sm:$0xf]  ;;  %v17195_v63 = vor.u32 %v20231_v57, %v17194_v20  ;;  %10218 = vmatpush.bf16.msrb.mxu2 %v17739_v4  ;;  %v16335_v20 = vor.u32 %v20011_v46, %v16332_v5  ;;  %v20131_v6 = vld [vmem:[%s21331_s10 + $0x155c] sm:$0xf] }
 0x725   : > { %v20295_v53 = vld [vmem:[%s21331_s10 + $0x1a74] sm:$0xf0]  ;;  %v9885_v1 = vadd.f32 %v23540_v52, %v9872_v22  ;;  %v16780_v52 = vld [vmem:[%s21331_s10 + $0x1538] sm:$0xf0] }
 0x726   : > { %v17706_v14 = vld [vmem:[%s21331_s10 + $0x1c58] sm:$0xf]  ;;  %v17451_v60 = vor.u32 %v20295_v53, %v17450_v32  ;;  %10128 = vmatpush.bf16.msrb.mxu3 %v17959_v58  ;;  %10193 = vmatpush.bf16.msrb.mxu0 %v17195_v63  ;;  %v16591_v53 = vor.u32 %v20075_v23, %v16588_v7  ;;  %v20067_v58 = vld [vmem:[%s21331_s10 + $0x135c] sm:$0xf] }
 0x727   : > { %v20359_v34 = vld [vmem:[%s21331_s10 + $0x1c74] sm:$0xf0]  ;;  %v16812_v63 = vld [vmem:[%s21331_s10 + $0x1578] sm:$0xf0]  ;;  %v16559_v26 = vor.u32 %v20067_v58, %v16556_v15  ;;  %v9898_v12 = vadd.f32 %v23542_v62, %v9885_v1 }
 0x728   : > { %v17162_v43 = vld [vmem:[%s21331_s10 + $0x1818] sm:$0xf]  ;;  %v17707_v27 = vor.u32 %v20359_v34, %v17706_v14  ;;  %10206 = vmatpush.bf16.msrb.mxu1 %v17451_v60  ;;  %v16847_v14 = vor.u32 %v20139_v48, %v16844_v49  ;;  %v20003_v34 = vld [vmem:[%s21331_s10 + $0x115c] sm:$0xf]  ;;  %v9923_v48 = vpop.f32.mrf.mxu3 }
 0x729   : > { %v20223_v35 = vld [vmem:[%s21331_s10 + $0x1834] sm:$0xf0]  ;;  %v19979_v49 = vld [vmem:[%s21331_s10 + $0x109c] sm:$0xf]  ;;  %v10003_v58 = vpop.f32.mrf.mxu1 }
 0x72a   : > { %v17418_v9 = vld [vmem:[%s21331_s10 + $0x1a18] sm:$0xf]  ;;  %v17163_v55 = vor.u32 %v20223_v35, %v17162_v43  ;;  %10219 = vmatpush.bf16.msrb.mxu2 %v17707_v27  ;;  %10129 = vmatpush.bf16.msrb.mxu3 %v17927_v10  ;;  %v16303_v35 = vor.u32 %v20003_v34, %v16300_v45  ;;  %v16204_v22 = vld [vmem:[%s21331_s10 + $0x10b8] sm:$0xf0] }
 0x72b   : > { %v20287_v0 = vld [vmem:[%s21331_s10 + $0x1a34] sm:$0xf0]  ;;  %v20331_v58 = vld [vmem:[%s21331_s10 + $0x1b9c] sm:$0xf] }
 0x72c   : > { %v17674_v11 = vld [vmem:[%s21331_s10 + $0x1c18] sm:$0xf]  ;;  %v17419_v59 = vor.u32 %v20287_v0, %v17418_v9  ;;  %10194 = vmatpush.bf16.msrb.mxu0 %v17163_v55  ;;  %v16815_v9 = vor.u32 %v20131_v6, %v16812_v63  ;;  %v19995_v0 = vld [vmem:[%s21331_s10 + $0x111c] sm:$0xf]  ;;  %v16207_v6 = vor.u32 %v19979_v49, %v16204_v22 }
 0x72d   : > { %v20351_v16 = vld [vmem:[%s21331_s10 + $0x1c34] sm:$0xf0]  ;;  %10130 = vmatmul.bf16.vlgmr.msrb.gmra.mxu3 %v22978_v40 }
 0x72e   : > { %v17130_v61 = vld [vmem:[%s21331_s10 + $0x17d8] sm:$0xf]  ;;  %v17675_v37 = vor.u32 %v20351_v16, %v17674_v11  ;;  %10207 = vmatpush.bf16.msrb.mxu1 %v17419_v59  ;;  %v16268_v11 = vld [vmem:[%s21331_s10 + $0x1138] sm:$0xf0] }
 0x72f   : > { %v20215_v25 = vld [vmem:[%s21331_s10 + $0x17f4] sm:$0xf0]  ;;  %10195 = vmatmul.bf16.vlgmr.msrb.gmra.mxu0 %v22778_v18  ;;  %v16524_v16 = vld [vmem:[%s21331_s10 + $0x1338] sm:$0xf0]  ;;  %v16271_v31 = vor.u32 %v19995_v0, %v16268_v11 }
 0x730   : > { %v17131_v2 = vor.u32 %v20215_v25, %v17130_v61  ;;  %v17098_v39 = vld [vmem:[%s21331_s10 + $0x1798] sm:$0xf]  ;;  %10220 = vmatpush.bf16.msrb.mxu2 %v17675_v37  ;;  %10239 = vmatpush.bf16.msra.mxu0 %v16367_v21  ;;  %v20123_v61 = vld [vmem:[%s21331_s10 + $0x151c] sm:$0xf]  ;;  %v23698_v25 = vpop.f32.mrf.mxu0  ;;  %v16527_v24 = vor.u32 %v20059_v30, %v16524_v16 }
 0x731   : > { %v20207_v13 = vld [vmem:[%s21331_s10 + $0x17b4] sm:$0xf0]  ;;  %10208 = vmatmul.bf16.vlgmr.msrb.gmra.mxu1 %v22780_v17  ;;  %v16783_v42 = vor.u32 %v20123_v61, %v16780_v52  ;;  %v19987_v59 = vld [vmem:[%s21331_s10 + $0x10dc] sm:$0xf] }
 0x732   : > { %10174 = vmatpush.bf16.msra.mxu3 %v17131_v2  ;;  %v17099_v4 = vor.u32 %v20207_v13, %v17098_v39  ;;  %v17066_v57 = vld [vmem:[%s21331_s10 + $0x1758] sm:$0xf]  ;;  %10252 = vmatpush.bf16.msra.mxu1 %v16623_v3  ;;  %v16236_v37 = vld [vmem:[%s21331_s10 + $0x10f8] sm:$0xf0] }
 0x733   : > { %v20199_v32 = vld [vmem:[%s21331_s10 + $0x1774] sm:$0xf0]  ;;  %10221 = vmatmul.bf16.vlgmr.msrb.gmra.mxu2 %v22839_v8  ;;  %v20051_v2 = vld [vmem:[%s21331_s10 + $0x12dc] sm:$0xf]  ;;  %v16239_v62 = vor.u32 %v19987_v59, %v16236_v37 }
 0x734   : > { %10265 = vmatpush.bf16.msra.mxu2 %v16879_v41  ;;  %10240 = vmatpush.bf16.msra.mxu0 %v16335_v20  ;;  %v17067_v43 = vor.u32 %v20199_v32, %v17066_v57  ;;  %v17034_v60 = vld [vmem:[%s21331_s10 + $0x1718] sm:$0xf]  ;;  %v16492_v21 = vld [vmem:[%s21331_s10 + $0x12f8] sm:$0xf0]  ;;  %v9911_v41 = vadd.f32 %v23559_v38, %v9898_v12  ;;  %v23717_v57 = vpop.f32.mrf.mxu2 }
 0x735   : > { %v20191_v27 = vld [vmem:[%s21331_s10 + $0x1734] sm:$0xf0]  ;;  %v20115_v39 = vld [vmem:[%s21331_s10 + $0x14dc] sm:$0xf]  ;;  %v16495_v23 = vor.u32 %v20051_v2, %v16492_v21 }
 0x736   : > { %10175 = vmatpush.bf16.msra.mxu3 %v17099_v4  ;;  %10253 = vmatpush.bf16.msra.mxu1 %v16591_v53  ;;  %v17035_v29 = vor.u32 %v20191_v27, %v17034_v60  ;;  %v17002_v10 = vld [vmem:[%s21331_s10 + $0x16d8] sm:$0xf]  ;;  %v16748_v13 = vld [vmem:[%s21331_s10 + $0x14f8] sm:$0xf0]  ;;  %v9924_v20 = vadd.f32 %v9923_v48, %v9911_v41 }
 0x737   : > { %v20183_v55 = vld [vmem:[%s21331_s10 + $0x16f4] sm:$0xf0]  ;;  %v16751_v7 = vor.u32 %v20115_v39, %v16748_v13  ;;  %v20043_v4 = vld [vmem:[%s21331_s10 + $0x129c] sm:$0xf] }
 0x738   : > { %10266 = vmatpush.bf16.msra.mxu2 %v16847_v14  ;;  %10241 = vmatpush.bf16.msra.mxu0 %v16303_v35  ;;  %v17003_v3 = vor.u32 %v20183_v55, %v17002_v10  ;;  %v16970_v46 = vld [vmem:[%s21331_s10 + $0x1698] sm:$0xf]  ;;  %v16460_v32 = vld [vmem:[%s21331_s10 + $0x12b8] sm:$0xf0]  ;;  %v9990_v38 = vpop.f32.mrf.mxu0  ;;  %vm10346_vm7 = vcmp.ge.f32.partialorder %v9924_v20, 0.0 }
 0x739   : > { %v20175_v5 = vld [vmem:[%s21331_s10 + $0x16b4] sm:$0xf0]  ;;  %v20107_v53 = vld [vmem:[%s21331_s10 + $0x149c] sm:$0xf]  ;;  %v10354_v45 = vmul.f32 0.2, %v9924_v20  ;;  %v16463_v1 = vor.u32 %v20043_v4, %v16460_v32 }
 0x73a   : > { %10176 = vmatpush.bf16.msra.mxu3 %v17067_v43  ;;  %10254 = vmatpush.bf16.msra.mxu1 %v16559_v26  ;;  %v16716_v14 = vld [vmem:[%s21331_s10 + $0x14b8] sm:$0xf0]  ;;  %v16938_v34 = vld [vmem:[%s21331_s10 + $0x1658] sm:$0xf]  ;;  %v16971_v15 = vor.u32 %v20175_v5, %v16970_v46 }
 0x73b   : > { %v20167_v63 = vld [vmem:[%s21331_s10 + $0x1674] sm:$0xf0]  ;;  %v16719_v43 = vor.u32 %v20107_v53, %v16716_v14  ;;  %v19971_v35 = vld [vmem:[%s21331_s10 + $0x105c] sm:$0xf]  ;;  %v10362_v26 = vsel %vm10346_vm7, %v9924_v20, %v10354_v45 }
 0x73c   : > { %10267 = vmatpush.bf16.msra.mxu2 %v16815_v9  ;;  %10242 = vmatpush.bf16.msra.mxu0 %v16271_v31  ;;  %v16172_v60 = vld [vmem:[%s21331_s10 + $0x1078] sm:$0xf0]  ;;  %v23730_v30 = vmul.f32 1.4142135, %v10362_v26  ;;  %v16906_v16 = vld [vmem:[%s21331_s10 + $0x1618] sm:$0xf]  ;;  %v16939_v52 = vor.u32 %v20167_v63, %v16938_v34  ;;  %v10016_v2 = vpop.f32.mrf.mxu2 }
 0x73d   : > { %v20035_v27 = vld [vmem:[%s21331_s10 + $0x125c] sm:$0xf]  ;;  %v20159_v61 = vld [vmem:[%s21331_s10 + $0x1634] sm:$0xf0] }
 0x73e   : > { %10177 = vmatpush.bf16.msra.mxu3 %v17035_v29  ;;  %10255 = vmatpush.bf16.msra.mxu1 %v16527_v24  ;;  %v16428_v9 = vld [vmem:[%s21331_s10 + $0x1278] sm:$0xf0]  ;;  %v16175_v29 = vor.u32 %v19971_v35, %v16172_v60  ;;  %10378 = vst [vmem:[#allocation2 + $0x10] sm:$0xff] %v23730_v30  ;;  %v18154_v39 = vld [vmem:[%s21331_s10 + $0x1fd8] sm:$0xf]  ;;  %v16907_v46 = vor.u32 %v20159_v61, %v16906_v16 }
 0x73f   : > { %v20099_v0 = vld [vmem:[%s21331_s10 + $0x145c] sm:$0xf]  ;;  %v16431_v12 = vor.u32 %v20035_v27, %v16428_v9  ;;  %v20471_v13 = vld [vmem:[%s21331_s10 + $0x1ff4] sm:$0xf0] }
 0x740   : > { %10268 = vmatpush.bf16.msra.mxu2 %v16783_v42  ;;  %10243 = vmatpush.bf16.msra.mxu0 %v16239_v62  ;;  %v16684_v11 = vld [vmem:[%s21331_s10 + $0x1478] sm:$0xf0]  ;;  %v9925_v42 = vpop.f32.mrf.mxu3  ;;  %v18155_v4 = vor.u32 %v20471_v13, %v18154_v39  ;;  %v18122_v32 = vld [vmem:[%s21331_s10 + $0x1f98] sm:$0xf] }
 0x741   : > { %v19963_v31 = vld [vmem:[%s21331_s10 + $0x101c] sm:$0xf]  ;;  %v16687_v24 = vor.u32 %v20099_v0, %v16684_v11  ;;  %v20463_v53 = vld [vmem:[%s21331_s10 + $0x1fb4] sm:$0xf0]  ;;  %v10053_v13 = vpop.f32.mrf.mxu1 }
 0x742   : > { %10178 = vmatpush.bf16.msra.mxu3 %v17003_v3  ;;  %10256 = vmatpush.bf16.msra.mxu1 %v16495_v23  ;;  %v16140_v10 = vld [vmem:[%s21331_s10 + $0x1038] sm:$0xf0]  ;;  %v18090_v35 = vld [vmem:[%s21331_s10 + $0x1f58] sm:$0xf] }
 0x743   : > { %v20027_v55 = vld [vmem:[%s21331_s10 + $0x121c] sm:$0xf]  ;;  %v16143_v5 = vor.u32 %v19963_v31, %v16140_v10  ;;  %v20455_v60 = vld [vmem:[%s21331_s10 + $0x1f74] sm:$0xf0]  ;;  %v6940_v10 = vperm.slane %v23612_v50, 5 }
 0x744   : > { %10269 = vmatpush.bf16.msra.mxu2 %v16751_v7  ;;  %10244 = vmatpush.bf16.msra.mxu0 %v16207_v6  ;;  %v16396_v59 = vld [vmem:[%s21331_s10 + $0x1238] sm:$0xf0] }
 0x745   : > { %v20091_v37 = vld [vmem:[%s21331_s10 + $0x141c] sm:$0xf]  ;;  %v16399_v49 = vor.u32 %v20027_v55, %v16396_v59  ;;  %v20447_v55 = vld [vmem:[%s21331_s10 + $0x1f34] sm:$0xf0] }
 0x746   : > { %10179 = vmatpush.bf16.msra.mxu3 %v16971_v15  ;;  %10257 = vmatpush.bf16.msra.mxu1 %v16463_v1  ;;  %v16652_v21 = vld [vmem:[%s21331_s10 + $0x1438] sm:$0xf0]  ;;  %v18123_v1 = vor.u32 %v20463_v53, %v18122_v32 }
 0x747   : > { %v20275_v3 = vld [vmem:[%s21331_s10 + $0x19dc] sm:$0xf]  ;;  %v16655_v22 = vor.u32 %v20091_v37, %v16652_v21  ;;  %v10040_v21 = vpop.f32.mrf.mxu0 }
 0x748   : > { %10270 = vmatpush.bf16.msra.mxu2 %v16719_v43  ;;  %v17388_v62 = vld [vmem:[%s21331_s10 + $0x19f8] sm:$0xf0]  ;;  %10245 = vmatpush.bf16.msra.mxu0 %v16175_v29  ;;  %v18091_v29 = vor.u32 %v20455_v60, %v18090_v35  ;;  %v10041_v39 = vadd.f32 %v10040_v21, %v6940_v10 }
 0x749   : > { %v20339_v41 = vld [vmem:[%s21331_s10 + $0x1bdc] sm:$0xf]  ;;  %v17391_v20 = vor.u32 %v20275_v3, %v17388_v62 }
 0x74a   : > { %10180 = vmatpush.bf16.msra.mxu3 %v16939_v52  ;;  %v17644_v23 = vld [vmem:[%s21331_s10 + $0x1bf8] sm:$0xf0]  ;;  %10258 = vmatpush.bf16.msra.mxu1 %v16431_v12 }
 0x74b   : > { %v20403_v7 = vld [vmem:[%s21331_s10 + $0x1ddc] sm:$0xf]  ;;  %v17647_v14 = vor.u32 %v20339_v41, %v17644_v23  ;;  %v18026_v41 = vld [vmem:[%s21331_s10 + $0x1ed8] sm:$0xf] }
 0x74c   : > { %v17900_v48 = vld [vmem:[%s21331_s10 + $0x1df8] sm:$0xf0]  ;;  %10271 = vmatpush.bf16.msra.mxu2 %v16687_v24  ;;  %10246 = vmatpush.bf16.msra.mxu0 %v16143_v5 }
 0x74d   : > { %v17903_v38 = vor.u32 %v20403_v7, %v17900_v48  ;;  %v20267_v34 = vld [vmem:[%s21331_s10 + $0x199c] sm:$0xf] }
 0x74e   : > { %v17356_v45 = vld [vmem:[%s21331_s10 + $0x19b8] sm:$0xf0]  ;;  %10181 = vmatpush.bf16.msra.mxu3 %v16907_v46  ;;  %10259 = vmatpush.bf16.msra.mxu1 %v16399_v49  ;;  %v20439_v46 = vld [vmem:[%s21331_s10 + $0x1ef4] sm:$0xf0] }
 0x74f   : > { %v17612_v15 = vld [vmem:[%s21331_s10 + $0x1bb8] sm:$0xf0]  ;;  %v17359_v43 = vor.u32 %v20267_v34, %v17356_v45  ;;  %10247 = vmatmul.bf16.vlgmr.msra.gmra.mxu0 %v22693_v44  ;;  %v18058_v44 = vld [vmem:[%s21331_s10 + $0x1f18] sm:$0xf]  ;;  %v18027_v53 = vor.u32 %v20439_v46, %v18026_v41 }
 0x750   : > { %v20395_v6 = vld [vmem:[%s21331_s10 + $0x1d9c] sm:$0xf]  ;;  %10272 = vmatpush.bf16.msra.mxu2 %v16655_v22  ;;  %10291 = vmatpush.bf16.msrb.mxu0 %v17391_v20  ;;  %v17615_v27 = vor.u32 %v20331_v58, %v17612_v15  ;;  %v18059_v3 = vor.u32 %v20447_v55, %v18058_v44  ;;  %v10054_v22 = vadd.f32 %v10053_v13, %v10041_v39  ;;  %v20431_v34 = vld [vmem:[%s21331_s10 + $0x1eb4] sm:$0xf0]  ;;  %v9975_v15 = vpop.f32.mrf.mxu3 }
 0x751   : > { %v17868_v63 = vld [vmem:[%s21331_s10 + $0x1db8] sm:$0xf0]  ;;  %10182 = vmatmul.bf16.vlgmr.msra.gmra.mxu3 %v22700_v47  ;;  %10260 = vmatmul.bf16.vlgmr.msra.gmra.mxu1 %v22695_v33 }
 0x752   : > { %10226 = vmatpush.bf16.msrb.mxu3 %v18155_v4  ;;  %10304 = vmatpush.bf16.msrb.mxu1 %v17647_v14  ;;  %v17871_v26 = vor.u32 %v20395_v6, %v17868_v63  ;;  %v20259_v9 = vld [vmem:[%s21331_s10 + $0x195c] sm:$0xf] }
 0x753   : > { %v17324_v0 = vld [vmem:[%s21331_s10 + $0x1978] sm:$0xf0]  ;;  %10273 = vmatmul.bf16.vlgmr.msra.gmra.mxu2 %v22697_v36 }
 0x754   : > { %10317 = vmatpush.bf16.msrb.mxu2 %v17903_v38  ;;  %v20323_v11 = vld [vmem:[%s21331_s10 + $0x1b5c] sm:$0xf]  ;;  %10292 = vmatpush.bf16.msrb.mxu0 %v17359_v43  ;;  %v17327_v31 = vor.u32 %v20259_v9, %v17324_v0  ;;  %v17994_v38 = vld [vmem:[%s21331_s10 + $0x1e98] sm:$0xf]  ;;  %v10066_v43 = vpop.f32.mrf.mxu2  ;;  %v10042_v9 = vpop.f32.mrf.mxu0 }
 0x755   : > { %v17580_v16 = vld [vmem:[%s21331_s10 + $0x1b78] sm:$0xf0]  ;;  %v10055_v0 = vpop.f32.mrf.mxu1 }
 0x756   : > { %v20387_v61 = vld [vmem:[%s21331_s10 + $0x1d5c] sm:$0xf]  ;;  %10227 = vmatpush.bf16.msrb.mxu3 %v18123_v1  ;;  %10305 = vmatpush.bf16.msrb.mxu1 %v17615_v27  ;;  %v17583_v12 = vor.u32 %v20323_v11, %v17580_v16  ;;  %v17995_v11 = vor.u32 %v20431_v34, %v17994_v38  ;;  %v9976_v38 = vadd.f32 %v9975_v15, %v23641_v28 }
 0x757   : > { %v17836_v52 = vld [vmem:[%s21331_s10 + $0x1d78] sm:$0xf0] }
 0x758   : > { %10318 = vmatpush.bf16.msrb.mxu2 %v17871_v26  ;;  %v17839_v24 = vor.u32 %v20387_v61, %v17836_v52  ;;  %v20251_v33 = vld [vmem:[%s21331_s10 + $0x191c] sm:$0xf]  ;;  %10293 = vmatpush.bf16.msrb.mxu0 %v17327_v31  ;;  %v23794_v26 = vadd.f32 %v10066_v43, %v10054_v22  ;;  %v17962_v61 = vld [vmem:[%s21331_s10 + $0x1e58] sm:$0xf]  ;;  %v9977_v39 = vpop.f32.mrf.mxu3 }
 0x759   : > { %v17292_v42 = vld [vmem:[%s21331_s10 + $0x1938] sm:$0xf0]  ;;  %v20423_v52 = vld [vmem:[%s21331_s10 + $0x1e74] sm:$0xf0] }
 0x75a   : > { %v20315_v59 = vld [vmem:[%s21331_s10 + $0x1b1c] sm:$0xf]  ;;  %10228 = vmatpush.bf16.msrb.mxu3 %v18091_v29  ;;  %v17295_v62 = vor.u32 %v20251_v33, %v17292_v42  ;;  %10306 = vmatpush.bf16.msrb.mxu1 %v17583_v12  ;;  %v17963_v42 = vor.u32 %v20423_v52, %v17962_v61 }
 0x75b   : > { %v17548_v36 = vld [vmem:[%s21331_s10 + $0x1b38] sm:$0xf0] }
 0x75c   : > { %v20379_v37 = vld [vmem:[%s21331_s10 + $0x1d1c] sm:$0xf]  ;;  %10319 = vmatpush.bf16.msrb.mxu2 %v17839_v24  ;;  %v17551_v5 = vor.u32 %v20315_v59, %v17548_v36  ;;  %10294 = vmatpush.bf16.msrb.mxu0 %v17295_v62  ;;  %v17930_v36 = vld [vmem:[%s21331_s10 + $0x1e18] sm:$0xf]  ;;  %v10068_v41 = vpop.f32.mrf.mxu2 }
 0x75d   : > { %v17804_v2 = vld [vmem:[%s21331_s10 + $0x1d38] sm:$0xf0] }
 0x75e   : > { %v17807_v23 = vor.u32 %v20379_v37, %v17804_v2  ;;  %v20243_v7 = vld [vmem:[%s21331_s10 + $0x18dc] sm:$0xf]  ;;  %10229 = vmatpush.bf16.msrb.mxu3 %v18059_v3  ;;  %10307 = vmatpush.bf16.msrb.mxu1 %v17551_v5  ;;  %v20415_v37 = vld [vmem:[%s21331_s10 + $0x1e34] sm:$0xf0] }
 0x75f   : > { %v17260_v48 = vld [vmem:[%s21331_s10 + $0x18f8] sm:$0xf0] }
 0x760   : > { %v20307_v49 = vld [vmem:[%s21331_s10 + $0x1adc] sm:$0xf]  ;;  %v17263_v14 = vor.u32 %v20243_v7, %v17260_v48  ;;  %10320 = vmatpush.bf16.msrb.mxu2 %v17807_v23 }
 0x761   : > { %v17516_v4 = vld [vmem:[%s21331_s10 + $0x1af8] sm:$0xf0] }
 0x762   : > { %v20371_v20 = vld [vmem:[%s21331_s10 + $0x1cdc] sm:$0xf]  ;;  %v17519_v45 = vor.u32 %v20307_v49, %v17516_v4  ;;  %10230 = vmatpush.bf16.msrb.mxu3 %v18027_v53  ;;  %10295 = vmatpush.bf16.msrb.mxu0 %v17263_v14  ;;  %v17931_v49 = vor.u32 %v20415_v37, %v17930_v36 }
 0x763   : > { %v17772_v32 = vld [vmem:[%s21331_s10 + $0x1cf8] sm:$0xf0] }
 0x764   : > { %v17775_v58 = vor.u32 %v20371_v20, %v17772_v32  ;;  %v20235_v6 = vld [vmem:[%s21331_s10 + $0x189c] sm:$0xf]  ;;  %10308 = vmatpush.bf16.msrb.mxu1 %v17519_v45 }
 0x765   : > { %v17228_v63 = vld [vmem:[%s21331_s10 + $0x18b8] sm:$0xf0] }
 0x766   : > { %v20299_v1 = vld [vmem:[%s21331_s10 + $0x1a9c] sm:$0xf]  ;;  %v17231_v16 = vor.u32 %v20235_v6, %v17228_v63  ;;  %10321 = vmatpush.bf16.msrb.mxu2 %v17775_v58  ;;  %10231 = vmatpush.bf16.msrb.mxu3 %v17995_v11  ;;  %v9989_v6 = vadd.f32 %v23698_v25, %v9976_v38 }
 0x767   : > { %v17484_v35 = vld [vmem:[%s21331_s10 + $0x1ab8] sm:$0xf0] }
 0x768   : > { %v20363_v60 = vld [vmem:[%s21331_s10 + $0x1c9c] sm:$0xf]  ;;  %v17487_v29 = vor.u32 %v20299_v1, %v17484_v35  ;;  %10296 = vmatpush.bf16.msrb.mxu0 %v17231_v16  ;;  %v23826_v1 = vpop.f32.mrf.mxu0  ;;  %v10002_v35 = vadd.f32 %v23700_v56, %v9989_v6 }
 0x769   : > { %v17740_v27 = vld [vmem:[%s21331_s10 + $0x1cb8] sm:$0xf0] }
 0x76a   : > { %v17743_v31 = vor.u32 %v20363_v60, %v17740_v27  ;;  %v20227_v10 = vld [vmem:[%s21331_s10 + $0x185c] sm:$0xf]  ;;  %10309 = vmatpush.bf16.msrb.mxu1 %v17487_v29  ;;  %10232 = vmatpush.bf16.msrb.mxu3 %v17963_v42  ;;  %v23828_v43 = vpop.f32.mrf.mxu1  ;;  %v10015_v25 = vadd.f32 %v23717_v57, %v10002_v35  ;;  %v10027_v27 = vpop.f32.mrf.mxu3 }
 0x76b   : > { %v17196_v44 = vld [vmem:[%s21331_s10 + $0x1878] sm:$0xf0] }
 0x76c   : > { %v20291_v55 = vld [vmem:[%s21331_s10 + $0x1a5c] sm:$0xf]  ;;  %v17199_v59 = vor.u32 %v20227_v10, %v17196_v44  ;;  %10322 = vmatpush.bf16.msrb.mxu2 %v17743_v31  ;;  %v10028_v11 = vadd.f32 %v10027_v27, %v10015_v25 }
 0x76d   : > { %v17452_v12 = vld [vmem:[%s21331_s10 + $0x1a78] sm:$0xf0] }
 0x76e   : > { %v20355_v24 = vld [vmem:[%s21331_s10 + $0x1c5c] sm:$0xf]  ;;  %v17455_v2 = vor.u32 %v20291_v55, %v17452_v12  ;;  %10297 = vmatpush.bf16.msrb.mxu0 %v17199_v59  ;;  %10233 = vmatpush.bf16.msrb.mxu3 %v17931_v49  ;;  %vm10347_vm8 = vcmp.ge.f32.partialorder %v10028_v11, 0.0  ;;  %v10355_v56 = vmul.f32 0.2, %v10028_v11 }
 0x76f   : > { %v17708_v33 = vld [vmem:[%s21331_s10 + $0x1c78] sm:$0xf0] }
 0x770   : > { %v17711_v21 = vor.u32 %v20355_v24, %v17708_v33  ;;  %v20219_v13 = vld [vmem:[%s21331_s10 + $0x181c] sm:$0xf]  ;;  %10310 = vmatpush.bf16.msrb.mxu1 %v17455_v2  ;;  %v10094_v61 = vpop.f32.mrf.mxu0  ;;  %v10363_v57 = vsel %vm10347_vm8, %v10028_v11, %v10355_v56 }
 0x771   : > { %v17164_v3 = vld [vmem:[%s21331_s10 + $0x1838] sm:$0xf0]  ;;  %10234 = vmatmul.bf16.vlgmr.msrb.gmra.mxu3 %v22978_v40  ;;  %v23840_v44 = vmul.f32 1.4142135, %v10363_v57 }
 0x772   : > { %v20283_v62 = vld [vmem:[%s21331_s10 + $0x1a1c] sm:$0xf]  ;;  %v17167_v22 = vor.u32 %v20219_v13, %v17164_v3  ;;  %10323 = vmatpush.bf16.msrb.mxu2 %v17711_v21  ;;  %v23836_v16 = vpop.f32.mrf.mxu2  ;;  %v10107_v52 = vpop.f32.mrf.mxu1 }
 0x773   : > { %v17420_v46 = vld [vmem:[%s21331_s10 + $0x1a38] sm:$0xf0]  ;;  %10379 = vst [vmem:[#allocation2 + $0x8] sm:$0xff] %v23840_v44  ;;  %v10029_v12 = vpop.f32.mrf.mxu3 }
 0x774   : > { %v20347_v5 = vld [vmem:[%s21331_s10 + $0x1c1c] sm:$0xf]  ;;  %v17423_v4 = vor.u32 %v20283_v62, %v17420_v46  ;;  %10298 = vmatpush.bf16.msrb.mxu0 %v17167_v22  ;;  %v6941_v46 = vperm.slane %v23612_v50, 6  ;;  %v20852_v12 = vld [vmem:[%s21813_s12 + $0x8] sm:$0xff] }
 0x775   : > { %v17676_v23 = vld [vmem:[%s21331_s10 + $0x1c38] sm:$0xf0] }
 0x776   : > { %v20211_v7 = vld [vmem:[%s21331_s10 + $0x17dc] sm:$0xf]  ;;  %v17679_v20 = vor.u32 %v20347_v5, %v17676_v23  ;;  %10311 = vmatpush.bf16.msrb.mxu1 %v17423_v4 }
 0x777   : > { %v17132_v48 = vld [vmem:[%s21331_s10 + $0x17f8] sm:$0xf0]  ;;  %10299 = vmatmul.bf16.vlgmr.msrb.gmra.mxu0 %v22778_v18 }
 0x778   : > { %v17135_v32 = vor.u32 %v20211_v7, %v17132_v48  ;;  %v20203_v53 = vld [vmem:[%s21331_s10 + $0x179c] sm:$0xf]  ;;  %10324 = vmatpush.bf16.msrb.mxu2 %v17679_v20 }
 0x779   : > { %v17100_v14 = vld [vmem:[%s21331_s10 + $0x17b8] sm:$0xf0]  ;;  %10312 = vmatmul.bf16.vlgmr.msrb.gmra.mxu1 %v22780_v17 }
 0x77a   : > { %10278 = vmatpush.bf16.msra.mxu3 %v17135_v32  ;;  %v17103_v34 = vor.u32 %v20203_v53, %v17100_v14  ;;  %v20195_v45 = vld [vmem:[%s21331_s10 + $0x175c] sm:$0xf]  ;;  %v10120_v42 = vpop.f32.mrf.mxu2 }
 0x77b   : > { %v17068_v58 = vld [vmem:[%s21331_s10 + $0x1778] sm:$0xf0]  ;;  %10325 = vmatmul.bf16.vlgmr.msrb.gmra.mxu2 %v22839_v8 }
 0x77c   : > { %v17071_v28 = vor.u32 %v20195_v45, %v17068_v58  ;;  %v20187_v15 = vld [vmem:[%s21331_s10 + $0x171c] sm:$0xf] }
 0x77d   : > { %v17036_v63 = vld [vmem:[%s21331_s10 + $0x1738] sm:$0xf0] }
 0x77e   : > { %10279 = vmatpush.bf16.msra.mxu3 %v17103_v34  ;;  %v17039_v18 = vor.u32 %v20187_v15, %v17036_v63  ;;  %v20179_v60 = vld [vmem:[%s21331_s10 + $0x16dc] sm:$0xf] }
 0x77f   : > { %v17004_v17 = vld [vmem:[%s21331_s10 + $0x16f8] sm:$0xf0] }
 0x780   : > { %v17007_v8 = vor.u32 %v20179_v60, %v17004_v17  ;;  %v20171_v9 = vld [vmem:[%s21331_s10 + $0x169c] sm:$0xf] }
 0x781   : > { %v16972_v0 = vld [vmem:[%s21331_s10 + $0x16b8] sm:$0xf0] }
 0x782   : > { %10280 = vmatpush.bf16.msra.mxu3 %v17071_v28  ;;  %v16975_v29 = vor.u32 %v20171_v9, %v16972_v0  ;;  %v20163_v31 = vld [vmem:[%s21331_s10 + $0x165c] sm:$0xf] }
 0x783   : > { %v16940_v10 = vld [vmem:[%s21331_s10 + $0x1678] sm:$0xf0] }
 0x784   : > { %v16943_v55 = vor.u32 %v20163_v31, %v16940_v10  ;;  %v20155_v24 = vld [vmem:[%s21331_s10 + $0x161c] sm:$0xf] }
 0x785   : > { %v16908_v33 = vld [vmem:[%s21331_s10 + $0x1638] sm:$0xf0] }
 0x786   : > { %10281 = vmatpush.bf16.msra.mxu3 %v17039_v18  ;;  %v20467_v59 = vld [vmem:[%s21331_s10 + $0x1fdc] sm:$0xf]  ;;  %v16911_v37 = vor.u32 %v20155_v24, %v16908_v33  ;;  %v6942_v24 = vperm.slane %v20852_v12, 7 }
 0x787   : > { %v18156_v36 = vld [vmem:[%s21331_s10 + $0x1ff8] sm:$0xf0] }
 0x788   : > { %v18159_v2 = vor.u32 %v20467_v59, %v18156_v36  ;;  %v20459_v21 = vld [vmem:[%s21331_s10 + $0x1f9c] sm:$0xf]  ;;  %v10144_v7 = vpop.f32.mrf.mxu0 }
 0x789   : > { %v18124_v39 = vld [vmem:[%s21331_s10 + $0x1fb8] sm:$0xf0]  ;;  %v10145_v49 = vadd.f32 %v10144_v7, %v6941_v46 }
 0x78a   : > { %10282 = vmatpush.bf16.msra.mxu3 %v17007_v8  ;;  %v18127_v13 = vor.u32 %v20459_v21, %v18124_v39  ;;  %v20451_v3 = vld [vmem:[%s21331_s10 + $0x1f5c] sm:$0xf]  ;;  %v10157_v22 = vpop.f32.mrf.mxu1 }
 0x78b   : > { %v18092_v62 = vld [vmem:[%s21331_s10 + $0x1f78] sm:$0xf0]  ;;  %v10158_v32 = vadd.f32 %v10157_v22, %v10145_v49 }
 0x78c   : > { %v18095_v41 = vor.u32 %v20451_v3, %v18092_v62  ;;  %v20443_v5 = vld [vmem:[%s21331_s10 + $0x1f1c] sm:$0xf] }
 0x78d   : > { %v18060_v23 = vld [vmem:[%s21331_s10 + $0x1f38] sm:$0xf0] }
 0x78e   : > { %10283 = vmatpush.bf16.msra.mxu3 %v16975_v29  ;;  %v18063_v48 = vor.u32 %v20443_v5, %v18060_v23  ;;  %v20435_v4 = vld [vmem:[%s21331_s10 + $0x1edc] sm:$0xf] }
 0x78f   : > { %v18028_v20 = vld [vmem:[%s21331_s10 + $0x1ef8] sm:$0xf0] }
 0x790   : > { %v20427_v53 = vld [vmem:[%s21331_s10 + $0x1e9c] sm:$0xf]  ;;  %v10079_v38 = vpop.f32.mrf.mxu3  ;;  %v10146_v45 = vpop.f32.mrf.mxu0 }
 0x791   : > { %v17996_v14 = vld [vmem:[%s21331_s10 + $0x1eb8] sm:$0xf0]  ;;  %v10080_v25 = vadd.f32 %v10079_v38, %v23794_v26 }
 0x792   : > { %10284 = vmatpush.bf16.msra.mxu3 %v16943_v55  ;;  %v10170_v50 = vpop.f32.mrf.mxu2  ;;  %v17999_v58 = vor.u32 %v20427_v53, %v17996_v14  ;;  %v10159_v6 = vpop.f32.mrf.mxu1  ;;  %v20419_v28 = vld [vmem:[%s21331_s10 + $0x1e5c] sm:$0xf] }
 0x793   : > { %v10171_v34 = vadd.f32 %v10170_v50, %v10158_v32  ;;  %v17964_v15 = vld [vmem:[%s21331_s10 + $0x1e78] sm:$0xf0]  ;;  %v10093_v27 = vadd.f32 %v23826_v1, %v10080_v25 }
 0x794   : > { %v17967_v63 = vor.u32 %v20419_v28, %v17964_v15  ;;  %v20411_v18 = vld [vmem:[%s21331_s10 + $0x1e1c] sm:$0xf] }
 0x795   : > { %v17932_v35 = vld [vmem:[%s21331_s10 + $0x1e38] sm:$0xf0]  ;;  %v10106_v11 = vadd.f32 %v23828_v43, %v10093_v27 }
 0x796   : > { %10285 = vmatpush.bf16.msra.mxu3 %v16911_v37  ;;  %v17935_v8 = vor.u32 %v20411_v18, %v17932_v35 }
 0x797   : > { %v10119_v61 = vadd.f32 %v23836_v16, %v10106_v11 }
 0x798   : > { %v10081_v60 = vpop.f32.mrf.mxu3 }
 0x799   : > { %10286 = vmatmul.bf16.vlgmr.msra.gmra.mxu3 %v22700_v47  ;;  %v18031_v47 = vor.u32 %v20435_v4, %v18028_v20 }
 0x79a   : > { %10330 = vmatpush.bf16.msrb.mxu3 %v18159_v2  ;;  %v10172_v17 = vpop.f32.mrf.mxu2 }
 0x79e   : > { %10331 = vmatpush.bf16.msrb.mxu3 %v18127_v13 }
 0x7a2   : > { %10332 = vmatpush.bf16.msrb.mxu3 %v18095_v41 }
 0x7a6   : > { %10333 = vmatpush.bf16.msrb.mxu3 %v18063_v48 }
 0x7aa   : > { %10334 = vmatpush.bf16.msrb.mxu3 %v18031_v47 }
 0x7ac   : > { %v10196_v9 = vpop.f32.mrf.mxu0 }
 0x7ae   : > { %10335 = vmatpush.bf16.msrb.mxu3 %v17999_v58  ;;  %v10209_v0 = vpop.f32.mrf.mxu1 }
 0x7b0   : > { %v10131_v56 = vpop.f32.mrf.mxu3 }
 0x7b1   : > { %v10132_v52 = vadd.f32 %v10131_v56, %v10119_v61 }
 0x7b2   : > { %10336 = vmatpush.bf16.msrb.mxu3 %v17967_v63 }
 0x7b3   : > { %vm10348_vm9 = vcmp.ge.f32.partialorder %v10132_v52, 0.0  ;;  %v10356_v10 = vmul.f32 0.2, %v10132_v52 }
 0x7b4   : > { %v10198_v31 = vpop.f32.mrf.mxu0 }
 0x7b5   : > { %v10364_v55 = vsel %vm10348_vm9, %v10132_v52, %v10356_v10 }
 0x7b6   : > { %10337 = vmatpush.bf16.msrb.mxu3 %v17935_v8  ;;  %v10222_v29 = vpop.f32.mrf.mxu2  ;;  %v10211_v57 = vpop.f32.mrf.mxu1  ;;  %v23868_v26 = vmul.f32 1.4142135, %v10364_v55 }
 0x7b8   : > { %10380 = vst [vmem:[#allocation2 + $0x20] sm:$0xff] %v23868_v26 }
 0x7b9   : > { %10338 = vmatmul.bf16.vlgmr.msrb.gmra.mxu3 %v22978_v40  ;;  %v10133_v40 = vpop.f32.mrf.mxu3 }
 0x7be   : > { %v10224_v1 = vpop.f32.mrf.mxu2 }
 0x7cc   : > { %v10248_v33 = vpop.f32.mrf.mxu0 }
 0x7cd   : > { %v10249_v43 = vadd.f32 %v10248_v33, %v6942_v24 }
 0x7ce   : > { %v10261_v42 = vpop.f32.mrf.mxu1 }
 0x7cf   : > { %v10262_v16 = vadd.f32 %v10261_v42, %v10249_v43 }
 0x7d4   : > { %v10183_v59 = vpop.f32.mrf.mxu3  ;;  %v10250_v2 = vpop.f32.mrf.mxu0 }
 0x7d5   : > { %v10184_v3 = vadd.f32 %v10183_v59, %v10171_v34 }
 0x7d6   : > { %v10274_v36 = vpop.f32.mrf.mxu2  ;;  %v10263_v21 = vpop.f32.mrf.mxu1 }
 0x7d7   : > { %v10275_v37 = vadd.f32 %v10274_v36, %v10262_v16  ;;  %v10197_v62 = vadd.f32 %v10196_v9, %v10184_v3 }
 0x7d9   : > { %v10210_v5 = vadd.f32 %v10209_v0, %v10197_v62 }
 0x7db   : > { %v10223_v23 = vadd.f32 %v10222_v29, %v10210_v5 }
 0x7dc   : > { %v10185_v39 = vpop.f32.mrf.mxu3 }
 0x7de   : > { %v10276_v13 = vpop.f32.mrf.mxu2 }
 0x7f4   : > { %v10300_v41 = vpop.f32.mrf.mxu0  ;;  %v10235_v7 = vpop.f32.mrf.mxu3 }
 0x7f5   : > { %v10236_v48 = vadd.f32 %v10235_v7, %v10223_v23 }
 0x7f6   : > { %v10313_v46 = vpop.f32.mrf.mxu1 }
 0x7f7   : > { %vm10349_vm10 = vcmp.ge.f32.partialorder %v10236_v48, 0.0  ;;  %v10357_v4 = vmul.f32 0.2, %v10236_v48 }
 0x7f9   : > { %v10365_v32 = vsel %vm10349_vm10, %v10236_v48, %v10357_v4 }
 0x7fa   : > { %v23872_v47 = vmul.f32 1.4142135, %v10365_v32 }
 0x7fc   : > { %v10302_v22 = vpop.f32.mrf.mxu0  ;;  %10381 = vst [vmem:[#allocation2 + $0x28] sm:$0xff] %v23872_v47  ;;  %v10237_v53 = vpop.f32.mrf.mxu3 }
 0x7fe   : > { %v10326_v49 = vpop.f32.mrf.mxu2  ;;  %v10315_v20 = vpop.f32.mrf.mxu1 }
 0x806   : > { %v10328_v14 = vpop.f32.mrf.mxu2 }
 0x81c   : > { %v10287_v38 = vpop.f32.mrf.mxu3 }
 0x81d   : > { %v10288_v34 = vadd.f32 %v10287_v38, %v10275_v37 }
 0x81f   : > { %v10301_v45 = vadd.f32 %v10300_v41, %v10288_v34 }
 0x821   : > { %v10314_v58 = vadd.f32 %v10313_v46, %v10301_v45 }
 0x823   : > { %v10327_v6 = vadd.f32 %v10326_v49, %v10314_v58 }
 0x824   : > { %v10289_v50 = vpop.f32.mrf.mxu3 }
 0x83c   : > { %v10339_v28 = vpop.f32.mrf.mxu3 }
 0x83d   : > { %v10340_v15 = vadd.f32 %v10339_v28, %v10327_v6 }
 0x83f   : > { %vm10350_vm11 = vcmp.ge.f32.partialorder %v10340_v15, 0.0  ;;  %v10358_v63 = vmul.f32 0.2, %v10340_v15 }
 0x840   : > { %10386 = sbr.rel (%p18160_p1) target bundleno = 2519 (0x9d7), region = 84 }
 0x841   : > { %v10366_v18 = vsel %vm10350_vm11, %v10340_v15, %v10358_v63 }
 0x842   : > { %v23875_v35 = vmul.f32 1.4142135, %v10366_v18 }
 0x844   : > { %10382 = vst [vmem:[#allocation2 + $0x38] sm:$0xff] %v23875_v35  ;;  %v10341_v60 = vpop.f32.mrf.mxu3 }
 0x845   : > { %v18275_v17 = vld [vmem:[#allocation12 + $0xe0] sm:$0xf]  ;;  %v20503_v8 = vld [vmem:[#allocation12 + $0xec] sm:$0xf0] }
 0x846   : > { %v18403_v25 = vld [vmem:[#allocation12 + $0x1e0] sm:$0xf]  ;;  %v18276_v27 = vor.u32 %v20503_v8, %v18275_v17  ;;  %v20535_v9 = vld [vmem:[#allocation12 + $0x1ec] sm:$0xf0] }
 0x847   : > { %v18531_v0 = vld [vmem:[#allocation12 + $0x2e0] sm:$0xf]  ;;  %v20567_v11 = vld [vmem:[#allocation12 + $0x2ec] sm:$0xf0]  ;;  %v18404_v61 = vor.u32 %v20535_v9, %v18403_v25 }
 0x848   : > { %v18532_v56 = vor.u32 %v20567_v11, %v18531_v0  ;;  %v18659_v52 = vld [vmem:[#allocation12 + $0x3e0] sm:$0xf]  ;;  %v20599_v29 = vld [vmem:[#allocation12 + $0x3ec] sm:$0xf0]  ;;  %11941 = vmatpush.bf16.msra.mxu0 %v18276_v27 }
 0x849   : > { %v18259_v31 = vld [vmem:[#allocation12 + $0xc0] sm:$0xf]  ;;  %v18660_v10 = vor.u32 %v20599_v29, %v18659_v52  ;;  %v20499_v57 = vld [vmem:[#allocation12 + $0xcc] sm:$0xf0]  ;;  %11954 = vmatpush.bf16.msra.mxu1 %v18404_v61 }
 0x84a   : > { %v18387_v55 = vld [vmem:[#allocation12 + $0x1c0] sm:$0xf]  ;;  %v20531_v40 = vld [vmem:[#allocation12 + $0x1cc] sm:$0xf0]  ;;  %11967 = vmatpush.bf16.msra.mxu2 %v18532_v56  ;;  %v18260_v1 = vor.u32 %v20499_v57, %v18259_v31 }
 0x84b   : > { %v18388_v12 = vor.u32 %v20531_v40, %v18387_v55  ;;  %v18515_v24 = vld [vmem:[#allocation12 + $0x2c0] sm:$0xf]  ;;  %v20563_v33 = vld [vmem:[#allocation12 + $0x2cc] sm:$0xf0]  ;;  %11980 = vmatpush.bf16.msra.mxu3 %v18660_v10 }
 0x84c   : > { %v18643_v43 = vld [vmem:[#allocation12 + $0x3c0] sm:$0xf]  ;;  %v18516_v42 = vor.u32 %v20563_v33, %v18515_v24  ;;  %v20595_v16 = vld [vmem:[#allocation12 + $0x3cc] sm:$0xf0]  ;;  %11942 = vmatpush.bf16.msra.mxu0 %v18260_v1 }
 0x84d   : > { %v18243_v59 = vld [vmem:[#allocation12 + $0xa0] sm:$0xf]  ;;  %v20495_v36 = vld [vmem:[#allocation12 + $0xac] sm:$0xf0]  ;;  %v18644_v37 = vor.u32 %v20595_v16, %v18643_v43  ;;  %11955 = vmatpush.bf16.msra.mxu1 %v18388_v12 }
 0x84e   : > { %v18371_v2 = vld [vmem:[#allocation12 + $0x1a0] sm:$0xf]  ;;  %v20527_v21 = vld [vmem:[#allocation12 + $0x1ac] sm:$0xf0]  ;;  %v18244_v13 = vor.u32 %v20495_v36, %v18243_v59  ;;  %11968 = vmatpush.bf16.msra.mxu2 %v18516_v42 }
 0x84f   : > { %v18499_v39 = vld [vmem:[#allocation12 + $0x2a0] sm:$0xf]  ;;  %v20559_v3 = vld [vmem:[#allocation12 + $0x2ac] sm:$0xf0]  ;;  %v18372_v46 = vor.u32 %v20527_v21, %v18371_v2  ;;  %11981 = vmatpush.bf16.msra.mxu3 %v18644_v37 }
 0x850   : > { %v18627_v62 = vld [vmem:[#allocation12 + $0x3a0] sm:$0xf]  ;;  %v20591_v41 = vld [vmem:[#allocation12 + $0x3ac] sm:$0xf0]  ;;  %v18500_v5 = vor.u32 %v20559_v3, %v18499_v39  ;;  %11943 = vmatpush.bf16.msra.mxu0 %v18244_v13 }
 0x851   : > { %v18227_v23 = vld [vmem:[#allocation12 + $0x80] sm:$0xf]  ;;  %v20491_v7 = vld [vmem:[#allocation12 + $0x8c] sm:$0xf0]  ;;  %v18628_v49 = vor.u32 %v20591_v41, %v18627_v62  ;;  %11956 = vmatpush.bf16.msra.mxu1 %v18372_v46 }
 0x852   : > { %v18355_v48 = vld [vmem:[#allocation12 + $0x180] sm:$0xf]  ;;  %v20523_v22 = vld [vmem:[#allocation12 + $0x18c] sm:$0xf0]  ;;  %v18228_v14 = vor.u32 %v20491_v7, %v18227_v23  ;;  %11969 = vmatpush.bf16.msra.mxu2 %v18500_v5 }
 0x853   : > { %v18483_v4 = vld [vmem:[#allocation12 + $0x280] sm:$0xf]  ;;  %v20555_v20 = vld [vmem:[#allocation12 + $0x28c] sm:$0xf0]  ;;  %v18356_v38 = vor.u32 %v20523_v22, %v18355_v48  ;;  %11982 = vmatpush.bf16.msra.mxu3 %v18628_v49 }
 0x854   : > { %v18611_v32 = vld [vmem:[#allocation12 + $0x380] sm:$0xf]  ;;  %v20587_v53 = vld [vmem:[#allocation12 + $0x38c] sm:$0xf0]  ;;  %v18484_v50 = vor.u32 %v20555_v20, %v18483_v4  ;;  %11944 = vmatpush.bf16.msra.mxu0 %v18228_v14 }
 0x855   : > { %v18211_v34 = vld [vmem:[#allocation12 + $0x60] sm:$0xf]  ;;  %v20487_v45 = vld [vmem:[#allocation12 + $0x6c] sm:$0xf0]  ;;  %v18612_v6 = vor.u32 %v20587_v53, %v18611_v32  ;;  %11957 = vmatpush.bf16.msra.mxu1 %v18356_v38 }
 0x856   : > { %v18339_v58 = vld [vmem:[#allocation12 + $0x160] sm:$0xf]  ;;  %v20519_v28 = vld [vmem:[#allocation12 + $0x16c] sm:$0xf0]  ;;  %v18212_v17 = vor.u32 %v20487_v45, %v18211_v34  ;;  %11970 = vmatpush.bf16.msra.mxu2 %v18484_v50 }
 0x857   : > { %v18467_v15 = vld [vmem:[#allocation12 + $0x260] sm:$0xf]  ;;  %v20551_v63 = vld [vmem:[#allocation12 + $0x26c] sm:$0xf0]  ;;  %v18340_v8 = vor.u32 %v20519_v28, %v18339_v58  ;;  %11983 = vmatpush.bf16.msra.mxu3 %v18612_v6 }
 0x858   : > { %v18595_v18 = vld [vmem:[#allocation12 + $0x360] sm:$0xf]  ;;  %v20583_v60 = vld [vmem:[#allocation12 + $0x36c] sm:$0xf0]  ;;  %v18468_v25 = vor.u32 %v20551_v63, %v18467_v15  ;;  %11945 = vmatpush.bf16.msra.mxu0 %v18212_v17 }
 0x859   : > { %v18195_v27 = vld [vmem:[#allocation12 + $0x40] sm:$0xf]  ;;  %v20483_v9 = vld [vmem:[#allocation12 + $0x4c] sm:$0xf0]  ;;  %v18596_v11 = vor.u32 %v20583_v60, %v18595_v18  ;;  %11958 = vmatpush.bf16.msra.mxu1 %v18340_v8 }
 0x85a   : > { %v18323_v0 = vld [vmem:[#allocation12 + $0x140] sm:$0xf]  ;;  %v20515_v61 = vld [vmem:[#allocation12 + $0x14c] sm:$0xf0]  ;;  %v18196_v10 = vor.u32 %v20483_v9, %v18195_v27  ;;  %11971 = vmatpush.bf16.msra.mxu2 %v18468_v25  ;;  %v23881_v25 = vpack.c.bf16 %v23572_v19, %v23572_v19 }
 0x85b   : > { %v18451_v56 = vld [vmem:[#allocation12 + $0x240] sm:$0xf]  ;;  %v20547_v52 = vld [vmem:[#allocation12 + $0x24c] sm:$0xf0]  ;;  %v18324_v57 = vor.u32 %v20515_v61, %v18323_v0  ;;  %11984 = vmatpush.bf16.msra.mxu3 %v18596_v11  ;;  %v23885_v0 = vpack.c.bf16 %v23324_v51, %v23324_v51  ;;  %v23889_v11 = vpack.c.bf16 %v23730_v30, %v23730_v30 }
 0x85c   : > { %v18579_v29 = vld [vmem:[#allocation12 + $0x340] sm:$0xf]  ;;  %v20579_v31 = vld [vmem:[#allocation12 + $0x34c] sm:$0xf0]  ;;  %v18452_v55 = vor.u32 %v20547_v52, %v18451_v56  ;;  %11946 = vmatpush.bf16.msra.mxu0 %v18196_v10  ;;  %v23893_v56 = vpack.c.bf16 %v23420_v54, %v23420_v54 }
 0x85d   : > { %v18179_v40 = vld [vmem:[#allocation12 + $0x20] sm:$0xf]  ;;  %v20479_v1 = vld [vmem:[#allocation12 + $0x2c] sm:$0xf0]  ;;  %v18580_v24 = vor.u32 %v20579_v31, %v18579_v29  ;;  %11959 = vmatpush.bf16.msra.mxu1 %v18324_v57 }
 0x85e   : > { %v18307_v12 = vld [vmem:[#allocation12 + $0x120] sm:$0xf]  ;;  %v20511_v33 = vld [vmem:[#allocation12 + $0x12c] sm:$0xf0]  ;;  %v18180_v36 = vor.u32 %v20479_v1, %v18179_v40  ;;  %11972 = vmatpush.bf16.msra.mxu2 %v18452_v55 }
 0x85f   : > { %v18435_v43 = vld [vmem:[#allocation12 + $0x220] sm:$0xf]  ;;  %v20543_v42 = vld [vmem:[#allocation12 + $0x22c] sm:$0xf0]  ;;  %v18308_v21 = vor.u32 %v20511_v33, %v18307_v12  ;;  %11985 = vmatpush.bf16.msra.mxu3 %v18580_v24 }
 0x860   : > { %v18563_v16 = vld [vmem:[#allocation12 + $0x320] sm:$0xf]  ;;  %v20575_v59 = vld [vmem:[#allocation12 + $0x32c] sm:$0xf0]  ;;  %v18436_v39 = vor.u32 %v20543_v42, %v18435_v43  ;;  %11947 = vmatpush.bf16.msra.mxu0 %v18180_v36 }
 0x861   : > { %v18163_v37 = vld [vmem:[#allocation12] sm:$0xf]  ;;  %v20475_v2 = vld [vmem:[#allocation12 + $0xc] sm:$0xf0]  ;;  %v18564_v41 = vor.u32 %v20575_v59, %v18563_v16  ;;  %11960 = vmatpush.bf16.msra.mxu1 %v18308_v21 }
 0x862   : > { %v18291_v13 = vld [vmem:[#allocation12 + $0x100] sm:$0xf]  ;;  %v20507_v3 = vld [vmem:[#allocation12 + $0x10c] sm:$0xf0]  ;;  %v18164_v22 = vor.u32 %v20475_v2, %v18163_v37  ;;  %11973 = vmatpush.bf16.msra.mxu2 %v18436_v39 }
 0x863   : > { %v18419_v62 = vld [vmem:[#allocation12 + $0x200] sm:$0xf]  ;;  %v20539_v46 = vld [vmem:[#allocation12 + $0x20c] sm:$0xf0]  ;;  %v18292_v53 = vor.u32 %v20507_v3, %v18291_v13  ;;  %11986 = vmatpush.bf16.msra.mxu3 %v18564_v41 }
 0x864   : > { %v18547_v5 = vld [vmem:[#allocation12 + $0x300] sm:$0xf]  ;;  %v20571_v23 = vld [vmem:[#allocation12 + $0x30c] sm:$0xf0]  ;;  %v18420_v14 = vor.u32 %v20539_v46, %v18419_v62  ;;  %11948 = vmatpush.bf16.msra.mxu0 %v18164_v22 }
 0x865   : > { %v18787_v7 = vld [vmem:[#allocation12 + $0x4e0] sm:$0xf]  ;;  %v20631_v48 = vld [vmem:[#allocation12 + $0x4ec] sm:$0xf0]  ;;  %v18548_v34 = vor.u32 %v20571_v23, %v18547_v5  ;;  %11961 = vmatpush.bf16.msra.mxu1 %v18292_v53 }
 0x866   : > { %v18915_v49 = vld [vmem:[#allocation12 + $0x5e0] sm:$0xf]  ;;  %v20663_v4 = vld [vmem:[#allocation12 + $0x5ec] sm:$0xf0]  ;;  %v18788_v45 = vor.u32 %v20631_v48, %v18787_v7  ;;  %11974 = vmatpush.bf16.msra.mxu2 %v18420_v14 }
 0x867   : > { %v19043_v20 = vld [vmem:[#allocation12 + $0x6e0] sm:$0xf]  ;;  %v20695_v32 = vld [vmem:[#allocation12 + $0x6ec] sm:$0xf0]  ;;  %v18916_v58 = vor.u32 %v20663_v4, %v18915_v49  ;;  %11987 = vmatpush.bf16.msra.mxu3 %v18548_v34  ;;  %11949 = vmatmul.bf16.vlgmr.msra.gmra.mxu0 %v23885_v0 }
 0x868   : > { %v19171_v38 = vld [vmem:[#allocation12 + $0x7e0] sm:$0xf]  ;;  %v20727_v50 = vld [vmem:[#allocation12 + $0x7ec] sm:$0xf0]  ;;  %v19044_v6 = vor.u32 %v20695_v32, %v19043_v20  ;;  %11993 = vmatpush.bf16.msrb.mxu0 %v18788_v45  ;;  %11962 = vmatmul.bf16.vlgmr.msra.gmra.mxu1 %v23893_v56 }
 0x869   : > { %v18771_v28 = vld [vmem:[#allocation12 + $0x4c0] sm:$0xf]  ;;  %v20627_v15 = vld [vmem:[#allocation12 + $0x4cc] sm:$0xf0]  ;;  %v19172_v18 = vor.u32 %v20727_v50, %v19171_v38  ;;  %12006 = vmatpush.bf16.msrb.mxu1 %v18916_v58  ;;  %11975 = vmatmul.bf16.vlgmr.msra.gmra.mxu2 %v23881_v25 }
 0x86a   : > { %v18899_v63 = vld [vmem:[#allocation12 + $0x5c0] sm:$0xf]  ;;  %v20659_v60 = vld [vmem:[#allocation12 + $0x5cc] sm:$0xf0]  ;;  %v18772_v61 = vor.u32 %v20627_v15, %v18771_v28  ;;  %12019 = vmatpush.bf16.msrb.mxu2 %v19044_v6  ;;  %11988 = vmatmul.bf16.vlgmr.msra.gmra.mxu3 %v23889_v11 }
 0x86b   : > { %v19027_v17 = vld [vmem:[#allocation12 + $0x6c0] sm:$0xf]  ;;  %v20691_v8 = vld [vmem:[#allocation12 + $0x6cc] sm:$0xf0]  ;;  %v18900_v19 = vor.u32 %v20659_v60, %v18899_v63  ;;  %12032 = vmatpush.bf16.msrb.mxu3 %v19172_v18 }
 0x86c   : > { %v19155_v27 = vld [vmem:[#allocation12 + $0x7c0] sm:$0xf]  ;;  %v20723_v9 = vld [vmem:[#allocation12 + $0x7cc] sm:$0xf0]  ;;  %v19028_v52 = vor.u32 %v20691_v8, %v19027_v17  ;;  %11994 = vmatpush.bf16.msrb.mxu0 %v18772_v61 }
 0x86d   : > { %v18755_v29 = vld [vmem:[#allocation12 + $0x4a0] sm:$0xf]  ;;  %v20623_v31 = vld [vmem:[#allocation12 + $0x4ac] sm:$0xf0]  ;;  %v19156_v51 = vor.u32 %v20723_v9, %v19155_v27  ;;  %12007 = vmatpush.bf16.msrb.mxu1 %v18900_v19 }
 0x86e   : > { %v18883_v10 = vld [vmem:[#allocation12 + $0x5a0] sm:$0xf]  ;;  %v20655_v57 = vld [vmem:[#allocation12 + $0x5ac] sm:$0xf0]  ;;  %v18756_v54 = vor.u32 %v20623_v31, %v18755_v29  ;;  %12020 = vmatpush.bf16.msrb.mxu2 %v19028_v52 }
 0x86f   : > { %v19011_v55 = vld [vmem:[#allocation12 + $0x6a0] sm:$0xf]  ;;  %v20687_v30 = vld [vmem:[#allocation12 + $0x6ac] sm:$0xf0]  ;;  %v18884_v12 = vor.u32 %v20655_v57, %v18883_v10  ;;  %12033 = vmatpush.bf16.msrb.mxu3 %v19156_v51 }
 0x870   : > { %v19139_v40 = vld [vmem:[#allocation12 + $0x7a0] sm:$0xf]  ;;  %v20719_v1 = vld [vmem:[#allocation12 + $0x7ac] sm:$0xf0]  ;;  %v19012_v24 = vor.u32 %v20687_v30, %v19011_v55  ;;  %11995 = vmatpush.bf16.msrb.mxu0 %v18756_v54 }
 0x871   : > { %v18739_v33 = vld [vmem:[#allocation12 + $0x480] sm:$0xf]  ;;  %v20619_v43 = vld [vmem:[#allocation12 + $0x48c] sm:$0xf0]  ;;  %v19140_v16 = vor.u32 %v20719_v1, %v19139_v40  ;;  %12008 = vmatpush.bf16.msrb.mxu1 %v18884_v12 }
 0x872   : > { %v18867_v42 = vld [vmem:[#allocation12 + $0x580] sm:$0xf]  ;;  %v20651_v59 = vld [vmem:[#allocation12 + $0x58c] sm:$0xf0]  ;;  %v18740_v39 = vor.u32 %v20619_v43, %v18739_v33  ;;  %12021 = vmatpush.bf16.msrb.mxu2 %v19012_v24  ;;  %v20501_v43 = vld [vmem:[#allocation12 + $0xe4] sm:$0xf] }
 0x873   : > { %v18995_v36 = vld [vmem:[#allocation12 + $0x680] sm:$0xf]  ;;  %v20683_v37 = vld [vmem:[#allocation12 + $0x68c] sm:$0xf0]  ;;  %v18868_v13 = vor.u32 %v20651_v59, %v18867_v42  ;;  %12034 = vmatpush.bf16.msrb.mxu3 %v19140_v16  ;;  %v18277_v42 = vld [vmem:[#allocation12 + $0xf0] sm:$0xf0] }
 0x874   : > { %v19123_v2 = vld [vmem:[#allocation12 + $0x780] sm:$0xf]  ;;  %v20715_v21 = vld [vmem:[#allocation12 + $0x78c] sm:$0xf0]  ;;  %v18996_v3 = vor.u32 %v20683_v37, %v18995_v36  ;;  %11996 = vmatpush.bf16.msrb.mxu0 %v18740_v39  ;;  %v20533_v16 = vld [vmem:[#allocation12 + $0x1e4] sm:$0xf] }
 0x875   : > { %v18723_v62 = vld [vmem:[#allocation12 + $0x460] sm:$0xf]  ;;  %v20615_v41 = vld [vmem:[#allocation12 + $0x46c] sm:$0xf0]  ;;  %v19124_v5 = vor.u32 %v20715_v21, %v19123_v2  ;;  %12009 = vmatpush.bf16.msrb.mxu1 %v18868_v13  ;;  %v18405_v36 = vld [vmem:[#allocation12 + $0x1f0] sm:$0xf0] }
 0x876   : > { %v18851_v46 = vld [vmem:[#allocation12 + $0x560] sm:$0xf]  ;;  %v20647_v23 = vld [vmem:[#allocation12 + $0x56c] sm:$0xf0]  ;;  %v18724_v4 = vor.u32 %v20615_v41, %v18723_v62  ;;  %12022 = vmatpush.bf16.msrb.mxu2 %v18996_v3  ;;  %v20565_v37 = vld [vmem:[#allocation12 + $0x2e4] sm:$0xf]  ;;  %v18280_v41 = vor.u32 %v20501_v43, %v18277_v42 }
 0x877   : > { %v18979_v7 = vld [vmem:[#allocation12 + $0x660] sm:$0xf]  ;;  %v20679_v48 = vld [vmem:[#allocation12 + $0x66c] sm:$0xf0]  ;;  %v18852_v20 = vor.u32 %v20647_v23, %v18851_v46  ;;  %12035 = vmatpush.bf16.msrb.mxu3 %v19124_v5  ;;  %v18533_v2 = vld [vmem:[#allocation12 + $0x2f0] sm:$0xf0]  ;;  %v18408_v46 = vor.u32 %v20533_v16, %v18405_v36 }
 0x878   : > { %v19107_v49 = vld [vmem:[#allocation12 + $0x760] sm:$0xf]  ;;  %v20711_v22 = vld [vmem:[#allocation12 + $0x76c] sm:$0xf0]  ;;  %v18980_v32 = vor.u32 %v20679_v48, %v18979_v7  ;;  %11997 = vmatpush.bf16.msrb.mxu0 %v18724_v4  ;;  %v20597_v13 = vld [vmem:[#allocation12 + $0x3e4] sm:$0xf]  ;;  %v18536_v5 = vor.u32 %v20565_v37, %v18533_v2 }
 0x879   : > { %v18707_v53 = vld [vmem:[#allocation12 + $0x440] sm:$0xf]  ;;  %v20611_v14 = vld [vmem:[#allocation12 + $0x44c] sm:$0xf0]  ;;  %v19108_v50 = vor.u32 %v20711_v22, %v19107_v49  ;;  %12010 = vmatpush.bf16.msrb.mxu1 %v18852_v20  ;;  %v18661_v3 = vld [vmem:[#allocation12 + $0x3f0] sm:$0xf0] }
 0x87a   : > { %v18835_v38 = vld [vmem:[#allocation12 + $0x540] sm:$0xf]  ;;  %v20643_v34 = vld [vmem:[#allocation12 + $0x54c] sm:$0xf0]  ;;  %v18708_v15 = vor.u32 %v20611_v14, %v18707_v53  ;;  %12023 = vmatpush.bf16.msrb.mxu2 %v18980_v32  ;;  %v20497_v23 = vld [vmem:[#allocation12 + $0xc4] sm:$0xf]  ;;  %v18664_v49 = vor.u32 %v20597_v13, %v18661_v3  ;;  %v23901_v32 = vpack.c.bf16 %v23872_v47, %v23872_v47 }
 0x87b   : > { %v18963_v45 = vld [vmem:[#allocation12 + $0x640] sm:$0xf]  ;;  %v20675_v58 = vld [vmem:[#allocation12 + $0x64c] sm:$0xf0]  ;;  %v18836_v63 = vor.u32 %v20643_v34, %v18835_v38  ;;  %12036 = vmatpush.bf16.msrb.mxu3 %v19108_v50  ;;  %v18261_v7 = vld [vmem:[#allocation12 + $0xd0] sm:$0xf0]  ;;  %v23905_v38 = vpack.c.bf16 %v23840_v44, %v23840_v44  ;;  %v23909_v50 = vpack.c.bf16 %v23875_v35, %v23875_v35 }
 0x87c   : > { %v19091_v6 = vld [vmem:[#allocation12 + $0x740] sm:$0xf]  ;;  %v20707_v28 = vld [vmem:[#allocation12 + $0x74c] sm:$0xf0]  ;;  %v18964_v18 = vor.u32 %v20675_v58, %v18963_v45  ;;  %11998 = vmatpush.bf16.msrb.mxu0 %v18708_v15  ;;  %v20529_v48 = vld [vmem:[#allocation12 + $0x1c4] sm:$0xf]  ;;  %v18264_v34 = vor.u32 %v20497_v23, %v18261_v7  ;;  %v23913_v45 = vpack.c.bf16 %v23868_v26, %v23868_v26 }
 0x87d   : > { %v18691_v60 = vld [vmem:[#allocation12 + $0x420] sm:$0xf]  ;;  %v20607_v17 = vld [vmem:[#allocation12 + $0x42c] sm:$0xf0]  ;;  %v19092_v27 = vor.u32 %v20707_v28, %v19091_v6  ;;  %12011 = vmatpush.bf16.msrb.mxu1 %v18836_v63  ;;  %v18389_v22 = vld [vmem:[#allocation12 + $0x1d0] sm:$0xf0] }
 0x87e   : > { %v18819_v8 = vld [vmem:[#allocation12 + $0x520] sm:$0xf]  ;;  %v20639_v9 = vld [vmem:[#allocation12 + $0x52c] sm:$0xf0]  ;;  %v18692_v31 = vor.u32 %v20607_v17, %v18691_v60  ;;  %12024 = vmatpush.bf16.msrb.mxu2 %v18964_v18  ;;  %v20561_v4 = vld [vmem:[#allocation12 + $0x2c4] sm:$0xf]  ;;  %v18392_v47 = vor.u32 %v20529_v48, %v18389_v22 }
 0x87f   : > { %v18947_v61 = vld [vmem:[#allocation12 + $0x620] sm:$0xf]  ;;  %v20671_v19 = vld [vmem:[#allocation12 + $0x62c] sm:$0xf0]  ;;  %v18820_v57 = vor.u32 %v20639_v9, %v18819_v8  ;;  %12037 = vmatpush.bf16.msrb.mxu3 %v19092_v27  ;;  %v18517_v20 = vld [vmem:[#allocation12 + $0x2d0] sm:$0xf0] }
 0x880   : > { %v19075_v52 = vld [vmem:[#allocation12 + $0x720] sm:$0xf]  ;;  %v20703_v29 = vld [vmem:[#allocation12 + $0x72c] sm:$0xf0]  ;;  %v18948_v55 = vor.u32 %v20671_v19, %v18947_v61  ;;  %11999 = vmatpush.bf16.msrb.mxu0 %v18692_v31  ;;  %v20593_v53 = vld [vmem:[#allocation12 + $0x3c4] sm:$0xf]  ;;  %v18520_v58 = vor.u32 %v20561_v4, %v18517_v20 }
 0x881   : > { %v18675_v10 = vld [vmem:[#allocation12 + $0x400] sm:$0xf]  ;;  %v20603_v51 = vld [vmem:[#allocation12 + $0x40c] sm:$0xf0]  ;;  %v19076_v54 = vor.u32 %v20703_v29, %v19075_v52  ;;  %12012 = vmatpush.bf16.msrb.mxu1 %v18820_v57  ;;  %v18645_v14 = vld [vmem:[#allocation12 + $0x3d0] sm:$0xf0] }
 0x882   : > { %v18803_v30 = vld [vmem:[#allocation12 + $0x500] sm:$0xf]  ;;  %v20635_v40 = vld [vmem:[#allocation12 + $0x50c] sm:$0xf0]  ;;  %v18676_v59 = vor.u32 %v20603_v51, %v18675_v10  ;;  %12025 = vmatpush.bf16.msrb.mxu2 %v18948_v55  ;;  %v20493_v6 = vld [vmem:[#allocation12 + $0xa4] sm:$0xf]  ;;  %v18648_v44 = vor.u32 %v20593_v53, %v18645_v14 }
 0x883   : > { %v18931_v1 = vld [vmem:[#allocation12 + $0x600] sm:$0xf]  ;;  %v20667_v12 = vld [vmem:[#allocation12 + $0x60c] sm:$0xf0]  ;;  %v18804_v21 = vor.u32 %v20635_v40, %v18803_v30  ;;  %12038 = vmatpush.bf16.msrb.mxu3 %v19076_v54  ;;  %v18245_v28 = vld [vmem:[#allocation12 + $0xb0] sm:$0xf0] }
 0x884   : > { %v19059_v24 = vld [vmem:[#allocation12 + $0x700] sm:$0xf]  ;;  %v20699_v33 = vld [vmem:[#allocation12 + $0x70c] sm:$0xf0]  ;;  %v18932_v39 = vor.u32 %v20667_v12, %v18931_v1  ;;  %12000 = vmatpush.bf16.msrb.mxu0 %v18676_v59  ;;  %v20525_v15 = vld [vmem:[#allocation12 + $0x1a4] sm:$0xf]  ;;  %v18248_v17 = vor.u32 %v20493_v6, %v18245_v28 }
 0x885   : > { %v19060_v62 = vor.u32 %v20699_v33, %v19059_v24  ;;  %12013 = vmatpush.bf16.msrb.mxu1 %v18804_v21  ;;  %v18373_v35 = vld [vmem:[#allocation12 + $0x1b0] sm:$0xf0]  ;;  %v20557_v63 = vld [vmem:[#allocation12 + $0x2a4] sm:$0xf] }
 0x886   : > { %12026 = vmatpush.bf16.msrb.mxu2 %v18932_v39  ;;  %v18501_v18 = vld [vmem:[#allocation12 + $0x2b0] sm:$0xf0]  ;;  %v20589_v26 = vld [vmem:[#allocation12 + $0x3a4] sm:$0xf]  ;;  %v18376_v8 = vor.u32 %v20525_v15, %v18373_v35 }
 0x887   : > { %12039 = vmatpush.bf16.msrb.mxu3 %v19060_v62  ;;  %12001 = vmatmul.bf16.vlgmr.msrb.gmra.mxu0 %v23905_v38  ;;  %v18629_v60 = vld [vmem:[#allocation12 + $0x3b0] sm:$0xf0]  ;;  %v18504_v27 = vor.u32 %v20557_v63, %v18501_v18  ;;  %v20489_v9 = vld [vmem:[#allocation12 + $0x84] sm:$0xf] }
 0x888   : > { %12045 = vmatpush.bf16.msra.mxu0 %v18280_v41  ;;  %12014 = vmatmul.bf16.vlgmr.msrb.gmra.mxu1 %v23913_v45  ;;  %v18229_v61 = vld [vmem:[#allocation12 + $0x90] sm:$0xf0]  ;;  %v20521_v19 = vld [vmem:[#allocation12 + $0x184] sm:$0xf]  ;;  %v18632_v52 = vor.u32 %v20589_v26, %v18629_v60 }
 0x889   : > { %12058 = vmatpush.bf16.msra.mxu1 %v18408_v46  ;;  %12027 = vmatmul.bf16.vlgmr.msrb.gmra.mxu2 %v23901_v32  ;;  %v18357_v29 = vld [vmem:[#allocation12 + $0x190] sm:$0xf0]  ;;  %v20553_v31 = vld [vmem:[#allocation12 + $0x284] sm:$0xf]  ;;  %v18232_v55 = vor.u32 %v20489_v9, %v18229_v61 }
 0x88a   : > { %12071 = vmatpush.bf16.msra.mxu2 %v18536_v5  ;;  %12040 = vmatmul.bf16.vlgmr.msrb.gmra.mxu3 %v23909_v50  ;;  %v18485_v10 = vld [vmem:[#allocation12 + $0x290] sm:$0xf0]  ;;  %v20585_v51 = vld [vmem:[#allocation12 + $0x384] sm:$0xf]  ;;  %v18360_v30 = vor.u32 %v20521_v19, %v18357_v29 }
 0x88b   : > { %12084 = vmatpush.bf16.msra.mxu3 %v18664_v49  ;;  %v18613_v57 = vld [vmem:[#allocation12 + $0x390] sm:$0xf0]  ;;  %v18488_v40 = vor.u32 %v20553_v31, %v18485_v10  ;;  %v20485_v1 = vld [vmem:[#allocation12 + $0x64] sm:$0xf] }
 0x88c   : > { %12046 = vmatpush.bf16.msra.mxu0 %v18264_v34  ;;  %v18213_v54 = vld [vmem:[#allocation12 + $0x70] sm:$0xf0]  ;;  %v20517_v12 = vld [vmem:[#allocation12 + $0x164] sm:$0xf]  ;;  %v18616_v24 = vor.u32 %v20585_v51, %v18613_v57 }
 0x88d   : > { %12059 = vmatpush.bf16.msra.mxu1 %v18392_v47  ;;  %v18341_v33 = vld [vmem:[#allocation12 + $0x170] sm:$0xf0]  ;;  %v20549_v43 = vld [vmem:[#allocation12 + $0x264] sm:$0xf]  ;;  %v18216_v36 = vor.u32 %v20485_v1, %v18213_v54 }
 0x88e   : > { %12072 = vmatpush.bf16.msra.mxu2 %v18520_v58  ;;  %v18469_v42 = vld [vmem:[#allocation12 + $0x270] sm:$0xf0]  ;;  %v20581_v16 = vld [vmem:[#allocation12 + $0x364] sm:$0xf]  ;;  %v18344_v37 = vor.u32 %v20517_v12, %v18341_v33 }
 0x88f   : > { %12085 = vmatpush.bf16.msra.mxu3 %v18648_v44  ;;  %v18597_v59 = vld [vmem:[#allocation12 + $0x370] sm:$0xf0]  ;;  %v18472_v2 = vor.u32 %v20549_v43, %v18469_v42  ;;  %v20481_v21 = vld [vmem:[#allocation12 + $0x44] sm:$0xf] }
 0x890   : > { %12047 = vmatpush.bf16.msra.mxu0 %v18248_v17  ;;  %v18197_v39 = vld [vmem:[#allocation12 + $0x50] sm:$0xf0]  ;;  %v20513_v13 = vld [vmem:[#allocation12 + $0x144] sm:$0xf]  ;;  %v18600_v3 = vor.u32 %v20581_v16, %v18597_v59 }
 0x891   : > { %12060 = vmatpush.bf16.msra.mxu1 %v18376_v8  ;;  %v18325_v62 = vld [vmem:[#allocation12 + $0x150] sm:$0xf0]  ;;  %v20545_v41 = vld [vmem:[#allocation12 + $0x244] sm:$0xf]  ;;  %v18200_v7 = vor.u32 %v20481_v21, %v18197_v39 }
 0x892   : > { %12073 = vmatpush.bf16.msra.mxu2 %v18504_v27  ;;  %v18453_v46 = vld [vmem:[#allocation12 + $0x250] sm:$0xf0]  ;;  %v20577_v5 = vld [vmem:[#allocation12 + $0x344] sm:$0xf]  ;;  %v18328_v48 = vor.u32 %v20513_v13, %v18325_v62 }
 0x893   : > { %12086 = vmatpush.bf16.msra.mxu3 %v18632_v52  ;;  %v18581_v23 = vld [vmem:[#allocation12 + $0x350] sm:$0xf0]  ;;  %v18456_v49 = vor.u32 %v20545_v41, %v18453_v46  ;;  %v20477_v22 = vld [vmem:[#allocation12 + $0x24] sm:$0xf] }
 0x894   : > { %12048 = vmatpush.bf16.msra.mxu0 %v18232_v55  ;;  %v18181_v4 = vld [vmem:[#allocation12 + $0x30] sm:$0xf0]  ;;  %v20509_v20 = vld [vmem:[#allocation12 + $0x124] sm:$0xf]  ;;  %v18584_v53 = vor.u32 %v20577_v5, %v18581_v23 }
 0x895   : > { %12061 = vmatpush.bf16.msra.mxu1 %v18360_v30  ;;  %v18309_v14 = vld [vmem:[#allocation12 + $0x130] sm:$0xf0]  ;;  %v20541_v34 = vld [vmem:[#allocation12 + $0x224] sm:$0xf]  ;;  %v18184_v28 = vor.u32 %v20477_v22, %v18181_v4 }
 0x896   : > { %12074 = vmatpush.bf16.msra.mxu2 %v18488_v40  ;;  %v18437_v47 = vld [vmem:[#allocation12 + $0x230] sm:$0xf0]  ;;  %v20573_v58 = vld [vmem:[#allocation12 + $0x324] sm:$0xf]  ;;  %v18312_v35 = vor.u32 %v20509_v20, %v18309_v14 }
 0x897   : > { %12087 = vmatpush.bf16.msra.mxu3 %v18616_v24  ;;  %v18565_v6 = vld [vmem:[#allocation12 + $0x330] sm:$0xf0]  ;;  %v20473_v15 = vld [vmem:[#allocation12 + $0x4] sm:$0xf]  ;;  %v18440_v63 = vor.u32 %v20541_v34, %v18437_v47 }
 0x898   : > { %12049 = vmatpush.bf16.msra.mxu0 %v18216_v36  ;;  %v18165_v44 = vld [vmem:[#allocation12 + $0x10] sm:$0xf0]  ;;  %v20505_v18 = vld [vmem:[#allocation12 + $0x104] sm:$0xf]  ;;  %v18568_v17 = vor.u32 %v20573_v58, %v18565_v6 }
 0x899   : > { %12062 = vmatpush.bf16.msra.mxu1 %v18344_v37  ;;  %v18293_v26 = vld [vmem:[#allocation12 + $0x110] sm:$0xf0]  ;;  %v20537_v60 = vld [vmem:[#allocation12 + $0x204] sm:$0xf]  ;;  %v18168_v29 = vor.u32 %v20473_v15, %v18165_v44 }
 0x89a   : > { %12075 = vmatpush.bf16.msra.mxu2 %v18472_v2  ;;  %v18421_v8 = vld [vmem:[#allocation12 + $0x210] sm:$0xf0]  ;;  %v20569_v27 = vld [vmem:[#allocation12 + $0x304] sm:$0xf]  ;;  %v18296_v57 = vor.u32 %v20505_v18, %v18293_v26 }
 0x89b   : > { %12088 = vmatpush.bf16.msra.mxu3 %v18600_v3  ;;  %v18549_v9 = vld [vmem:[#allocation12 + $0x310] sm:$0xf0]  ;;  %v20629_v61 = vld [vmem:[#allocation12 + $0x4e4] sm:$0xf]  ;;  %v18424_v55 = vor.u32 %v20537_v60, %v18421_v8 }
 0x89c   : > { %12050 = vmatpush.bf16.msra.mxu0 %v18200_v7  ;;  %v18789_v19 = vld [vmem:[#allocation12 + $0x4f0] sm:$0xf0]  ;;  %v20661_v52 = vld [vmem:[#allocation12 + $0x5e4] sm:$0xf]  ;;  %v18552_v1 = vor.u32 %v20569_v27, %v18549_v9 }
 0x89d   : > { %12063 = vmatpush.bf16.msra.mxu1 %v18328_v48  ;;  %v18917_v31 = vld [vmem:[#allocation12 + $0x5f0] sm:$0xf0]  ;;  %v20693_v10 = vld [vmem:[#allocation12 + $0x6e4] sm:$0xf]  ;;  %v18792_v54 = vor.u32 %v20629_v61, %v18789_v19 }
 0x89e   : > { %12076 = vmatpush.bf16.msra.mxu2 %v18456_v49  ;;  %v19045_v51 = vld [vmem:[#allocation12 + $0x6f0] sm:$0xf0]  ;;  %v20725_v30 = vld [vmem:[#allocation12 + $0x7e4] sm:$0xf]  ;;  %v18920_v12 = vor.u32 %v20661_v52, %v18917_v31 }
 0x89f   : > { %12089 = vmatpush.bf16.msra.mxu3 %v18584_v53  ;;  %v19173_v40 = vld [vmem:[#allocation12 + $0x7f0] sm:$0xf0]  ;;  %v19048_v24 = vor.u32 %v20693_v10, %v19045_v51  ;;  %v20625_v33 = vld [vmem:[#allocation12 + $0x4c4] sm:$0xf] }
 0x8a0   : > { %12051 = vmatpush.bf16.msra.mxu0 %v18184_v28  ;;  %v18773_v43 = vld [vmem:[#allocation12 + $0x4d0] sm:$0xf0]  ;;  %v20657_v42 = vld [vmem:[#allocation12 + $0x5c4] sm:$0xf]  ;;  %v19176_v16 = vor.u32 %v20725_v30, %v19173_v40 }
 0x8a1   : > { %12064 = vmatpush.bf16.msra.mxu1 %v18312_v35  ;;  %v18901_v59 = vld [vmem:[#allocation12 + $0x5d0] sm:$0xf0]  ;;  %v20689_v36 = vld [vmem:[#allocation12 + $0x6c4] sm:$0xf]  ;;  %v18776_v39 = vor.u32 %v20625_v33, %v18773_v43 }
 0x8a2   : > { %12077 = vmatpush.bf16.msra.mxu2 %v18440_v63  ;;  %v19029_v37 = vld [vmem:[#allocation12 + $0x6d0] sm:$0xf0]  ;;  %v20721_v2 = vld [vmem:[#allocation12 + $0x7c4] sm:$0xf]  ;;  %v18904_v13 = vor.u32 %v20657_v42, %v18901_v59 }
 0x8a3   : > { %12090 = vmatpush.bf16.msra.mxu3 %v18568_v17  ;;  %v19157_v21 = vld [vmem:[#allocation12 + $0x7d0] sm:$0xf0]  ;;  %v19032_v3 = vor.u32 %v20689_v36, %v19029_v37  ;;  %v20621_v62 = vld [vmem:[#allocation12 + $0x4a4] sm:$0xf] }
 0x8a4   : > { %12052 = vmatpush.bf16.msra.mxu0 %v18168_v29  ;;  %v18757_v41 = vld [vmem:[#allocation12 + $0x4b0] sm:$0xf0]  ;;  %v20653_v46 = vld [vmem:[#allocation12 + $0x5a4] sm:$0xf]  ;;  %v19160_v5 = vor.u32 %v20721_v2, %v19157_v21 }
 0x8a5   : > { %12065 = vmatpush.bf16.msra.mxu1 %v18296_v57  ;;  %v18885_v23 = vld [vmem:[#allocation12 + $0x5b0] sm:$0xf0]  ;;  %v20685_v7 = vld [vmem:[#allocation12 + $0x6a4] sm:$0xf]  ;;  %v18760_v4 = vor.u32 %v20621_v62, %v18757_v41 }
 0x8a6   : > { %12078 = vmatpush.bf16.msra.mxu2 %v18424_v55  ;;  %v19013_v48 = vld [vmem:[#allocation12 + $0x6b0] sm:$0xf0]  ;;  %v20717_v49 = vld [vmem:[#allocation12 + $0x7a4] sm:$0xf]  ;;  %v18888_v20 = vor.u32 %v20653_v46, %v18885_v23 }
 0x8a7   : > { %12091 = vmatpush.bf16.msra.mxu3 %v18552_v1  ;;  %v19141_v22 = vld [vmem:[#allocation12 + $0x7b0] sm:$0xf0]  ;;  %12053 = vmatmul.bf16.vlgmr.msra.gmra.mxu0 %v23885_v0  ;;  %v19016_v53 = vor.u32 %v20685_v7, %v19013_v48  ;;  %v20617_v14 = vld [vmem:[#allocation12 + $0x484] sm:$0xf] }
 0x8a8   : > { %12097 = vmatpush.bf16.msrb.mxu0 %v18792_v54  ;;  %12066 = vmatmul.bf16.vlgmr.msra.gmra.mxu1 %v23893_v56  ;;  %v18741_v34 = vld [vmem:[#allocation12 + $0x490] sm:$0xf0]  ;;  %v20649_v47 = vld [vmem:[#allocation12 + $0x584] sm:$0xf]  ;;  %v19144_v58 = vor.u32 %v20717_v49, %v19141_v22 }
 0x8a9   : > { %12110 = vmatpush.bf16.msrb.mxu1 %v18920_v12  ;;  %12079 = vmatmul.bf16.vlgmr.msra.gmra.mxu2 %v23881_v25  ;;  %v18869_v6 = vld [vmem:[#allocation12 + $0x590] sm:$0xf0]  ;;  %v20681_v28 = vld [vmem:[#allocation12 + $0x684] sm:$0xf]  ;;  %v18744_v63 = vor.u32 %v20617_v14, %v18741_v34  ;;  %v18283_v34 = vld [vmem:[#allocation12 + $0xe8] sm:$0xf] }
 0x8aa   : > { %12123 = vmatpush.bf16.msrb.mxu2 %v19048_v24  ;;  %12092 = vmatmul.bf16.vlgmr.msra.gmra.mxu3 %v23889_v11  ;;  %v18997_v15 = vld [vmem:[#allocation12 + $0x690] sm:$0xf0]  ;;  %v20713_v44 = vld [vmem:[#allocation12 + $0x784] sm:$0xf]  ;;  %v18872_v18 = vor.u32 %v20649_v47, %v18869_v6  ;;  %v20504_v47 = vld [vmem:[#allocation12 + $0xf4] sm:$0xf0] }
 0x8ab   : > { %12136 = vmatpush.bf16.msrb.mxu3 %v19176_v16  ;;  %v19125_v35 = vld [vmem:[#allocation12 + $0x790] sm:$0xf0]  ;;  %v19000_v26 = vor.u32 %v20681_v28, %v18997_v15  ;;  %v20613_v60 = vld [vmem:[#allocation12 + $0x464] sm:$0xf]  ;;  %v20536_v28 = vld [vmem:[#allocation12 + $0x1f4] sm:$0xf0] }
 0x8ac   : > { %12098 = vmatpush.bf16.msrb.mxu0 %v18776_v39  ;;  %v18725_v17 = vld [vmem:[#allocation12 + $0x470] sm:$0xf0]  ;;  %v20645_v8 = vld [vmem:[#allocation12 + $0x564] sm:$0xf]  ;;  %v19128_v27 = vor.u32 %v20713_v44, %v19125_v35  ;;  %v18539_v15 = vld [vmem:[#allocation12 + $0x2e8] sm:$0xf] }
 0x8ad   : > { %12111 = vmatpush.bf16.msrb.mxu1 %v18904_v13  ;;  %v18853_v9 = vld [vmem:[#allocation12 + $0x570] sm:$0xf0]  ;;  %v20677_v61 = vld [vmem:[#allocation12 + $0x664] sm:$0xf]  ;;  %v18728_v31 = vor.u32 %v20613_v60, %v18725_v17  ;;  %v20568_v44 = vld [vmem:[#allocation12 + $0x2f4] sm:$0xf0]  ;;  %v18284_v17 = vor.u32 %v20504_v47, %v18283_v34 }
 0x8ae   : > { %12124 = vmatpush.bf16.msrb.mxu2 %v19032_v3  ;;  %v18981_v19 = vld [vmem:[#allocation12 + $0x670] sm:$0xf0]  ;;  %v20709_v52 = vld [vmem:[#allocation12 + $0x764] sm:$0xf]  ;;  %v18856_v10 = vor.u32 %v20645_v8, %v18853_v9  ;;  %v18267_v9 = vld [vmem:[#allocation12 + $0xc8] sm:$0xf] }
 0x8af   : > { %12137 = vmatpush.bf16.msrb.mxu3 %v19160_v5  ;;  %v19109_v29 = vld [vmem:[#allocation12 + $0x770] sm:$0xf0]  ;;  %v18984_v51 = vor.u32 %v20677_v61, %v18981_v19  ;;  %v20609_v57 = vld [vmem:[#allocation12 + $0x444] sm:$0xf]  ;;  %v20500_v61 = vld [vmem:[#allocation12 + $0xd4] sm:$0xf0] }
 0x8b0   : > { %12099 = vmatpush.bf16.msrb.mxu0 %v18760_v4  ;;  %v18709_v55 = vld [vmem:[#allocation12 + $0x450] sm:$0xf0]  ;;  %v20641_v30 = vld [vmem:[#allocation12 + $0x544] sm:$0xf]  ;;  %v19112_v40 = vor.u32 %v20709_v52, %v19109_v29  ;;  %v18395_v19 = vld [vmem:[#allocation12 + $0x1c8] sm:$0xf] }
 0x8b1   : > { %12112 = vmatpush.bf16.msrb.mxu1 %v18888_v20  ;;  %v18837_v1 = vld [vmem:[#allocation12 + $0x550] sm:$0xf0]  ;;  %v20673_v54 = vld [vmem:[#allocation12 + $0x644] sm:$0xf]  ;;  %v18712_v43 = vor.u32 %v20609_v57, %v18709_v55  ;;  %v20532_v29 = vld [vmem:[#allocation12 + $0x1d4] sm:$0xf0]  ;;  %v18268_v55 = vor.u32 %v20500_v61, %v18267_v9 }
 0x8b2   : > { %12125 = vmatpush.bf16.msrb.mxu2 %v19016_v53  ;;  %v18965_v12 = vld [vmem:[#allocation12 + $0x650] sm:$0xf0]  ;;  %v20705_v24 = vld [vmem:[#allocation12 + $0x744] sm:$0xf]  ;;  %v18840_v42 = vor.u32 %v20641_v30, %v18837_v1  ;;  %v20596_v57 = vld [vmem:[#allocation12 + $0x3d4] sm:$0xf0]  ;;  %v18396_v30 = vor.u32 %v20532_v29, %v18395_v19 }
 0x8b3   : > { %12138 = vmatpush.bf16.msrb.mxu3 %v19144_v58  ;;  %v19093_v33 = vld [vmem:[#allocation12 + $0x750] sm:$0xf0]  ;;  %v18968_v16 = vor.u32 %v20673_v54, %v18965_v12  ;;  %v20605_v59 = vld [vmem:[#allocation12 + $0x424] sm:$0xf]  ;;  %v18411_v58 = vld [vmem:[#allocation12 + $0x1e8] sm:$0xf] }
 0x8b4   : > { %12100 = vmatpush.bf16.msrb.mxu0 %v18744_v63  ;;  %v18693_v36 = vld [vmem:[#allocation12 + $0x430] sm:$0xf0]  ;;  %v20637_v37 = vld [vmem:[#allocation12 + $0x524] sm:$0xf]  ;;  %v19096_v2 = vor.u32 %v20705_v24, %v19093_v33  ;;  %v18412_v8 = vor.u32 %v20536_v28, %v18411_v58  ;;  %v18251_v1 = vld [vmem:[#allocation12 + $0xa8] sm:$0xf] }
 0x8b5   : > { %12113 = vmatpush.bf16.msrb.mxu1 %v18872_v18  ;;  %v18821_v21 = vld [vmem:[#allocation12 + $0x530] sm:$0xf0]  ;;  %v20669_v39 = vld [vmem:[#allocation12 + $0x624] sm:$0xf]  ;;  %v18696_v41 = vor.u32 %v20605_v59, %v18693_v36  ;;  %v18667_v18 = vld [vmem:[#allocation12 + $0x3e8] sm:$0xf] }
 0x8b6   : > { %12126 = vmatpush.bf16.msrb.mxu2 %v19000_v26  ;;  %v18949_v13 = vld [vmem:[#allocation12 + $0x630] sm:$0xf0]  ;;  %v20701_v3 = vld [vmem:[#allocation12 + $0x724] sm:$0xf]  ;;  %v18824_v23 = vor.u32 %v20637_v37, %v18821_v21  ;;  %v20600_v26 = vld [vmem:[#allocation12 + $0x3f4] sm:$0xf0] }
 0x8b7   : > { %12139 = vmatpush.bf16.msrb.mxu3 %v19128_v27  ;;  %v19077_v62 = vld [vmem:[#allocation12 + $0x730] sm:$0xf0]  ;;  %v20601_v46 = vld [vmem:[#allocation12 + $0x404] sm:$0xf]  ;;  %v18952_v7 = vor.u32 %v20669_v39, %v18949_v13  ;;  %v18540_v27 = vor.u32 %v20568_v44, %v18539_v15  ;;  %v18668_v52 = vor.u32 %v20600_v26, %v18667_v18  ;;  %v20496_v54 = vld [vmem:[#allocation12 + $0xb4] sm:$0xf0] }
 0x8b8   : > { %12101 = vmatpush.bf16.msrb.mxu0 %v18728_v31  ;;  %v18677_v5 = vld [vmem:[#allocation12 + $0x410] sm:$0xf0]  ;;  %v20633_v48 = vld [vmem:[#allocation12 + $0x504] sm:$0xf]  ;;  %v19080_v4 = vor.u32 %v20701_v3, %v19077_v62  ;;  %v18523_v31 = vld [vmem:[#allocation12 + $0x2c8] sm:$0xf]  ;;  %v18252_v36 = vor.u32 %v20496_v54, %v18251_v1 }
 0x8b9   : > { %12114 = vmatpush.bf16.msrb.mxu1 %v18856_v10  ;;  %v18805_v49 = vld [vmem:[#allocation12 + $0x510] sm:$0xf0]  ;;  %v20665_v22 = vld [vmem:[#allocation12 + $0x604] sm:$0xf]  ;;  %v18680_v6 = vor.u32 %v20601_v46, %v18677_v5  ;;  %v20564_v10 = vld [vmem:[#allocation12 + $0x2d4] sm:$0xf0] }
 0x8ba   : > { %12127 = vmatpush.bf16.msrb.mxu2 %v18984_v51  ;;  %v18933_v20 = vld [vmem:[#allocation12 + $0x610] sm:$0xf0]  ;;  %v20697_v53 = vld [vmem:[#allocation12 + $0x704] sm:$0xf]  ;;  %v18808_v35 = vor.u32 %v20633_v48, %v18805_v49  ;;  %v18651_v51 = vld [vmem:[#allocation12 + $0x3c8] sm:$0xf] }
 0x8bb   : > { %12140 = vmatpush.bf16.msrb.mxu3 %v19112_v40  ;;  %v19061_v14 = vld [vmem:[#allocation12 + $0x710] sm:$0xf0]  ;;  %v18936_v63 = vor.u32 %v20665_v22, %v18933_v20  ;;  %v18524_v40 = vor.u32 %v20564_v10, %v18523_v31  ;;  %v18379_v12 = vld [vmem:[#allocation12 + $0x1a8] sm:$0xf]  ;;  %v18652_v24 = vor.u32 %v20596_v57, %v18651_v51  ;;  %v20528_v33 = vld [vmem:[#allocation12 + $0x1b4] sm:$0xf0] }
 0x8bc   : > { %12102 = vmatpush.bf16.msrb.mxu0 %v18712_v43  ;;  %v19064_v60 = vor.u32 %v20697_v53, %v19061_v14  ;;  %v18507_v43 = vld [vmem:[#allocation12 + $0x2a8] sm:$0xf]  ;;  %v20592_v59 = vld [vmem:[#allocation12 + $0x3b4] sm:$0xf0]  ;;  %v18380_v37 = vor.u32 %v20528_v33, %v18379_v12 }
 0x8bd   : > { %12115 = vmatpush.bf16.msrb.mxu1 %v18840_v42  ;;  %v20560_v42 = vld [vmem:[#allocation12 + $0x2b4] sm:$0xf0]  ;;  %v18235_v21 = vld [vmem:[#allocation12 + $0x88] sm:$0xf] }
 0x8be   : > { %12128 = vmatpush.bf16.msrb.mxu2 %v18968_v16  ;;  %v18635_v16 = vld [vmem:[#allocation12 + $0x3a8] sm:$0xf]  ;;  %v20492_v39 = vld [vmem:[#allocation12 + $0x94] sm:$0xf0] }
 0x8bf   : > { %12141 = vmatpush.bf16.msrb.mxu3 %v19096_v2  ;;  %v18508_v2 = vor.u32 %v20560_v42, %v18507_v43  ;;  %v18363_v13 = vld [vmem:[#allocation12 + $0x188] sm:$0xf]  ;;  %v18636_v3 = vor.u32 %v20592_v59, %v18635_v16  ;;  %v20524_v62 = vld [vmem:[#allocation12 + $0x194] sm:$0xf0] }
 0x8c0   : > { %12103 = vmatpush.bf16.msrb.mxu0 %v18696_v41  ;;  %v18491_v41 = vld [vmem:[#allocation12 + $0x288] sm:$0xf]  ;;  %v20556_v46 = vld [vmem:[#allocation12 + $0x294] sm:$0xf0]  ;;  %v18364_v48 = vor.u32 %v20524_v62, %v18363_v13 }
 0x8c1   : > { %12116 = vmatpush.bf16.msrb.mxu1 %v18824_v23  ;;  %v18619_v5 = vld [vmem:[#allocation12 + $0x388] sm:$0xf]  ;;  %v20588_v23 = vld [vmem:[#allocation12 + $0x394] sm:$0xf0]  ;;  %v18492_v49 = vor.u32 %v20556_v46, %v18491_v41 }
 0x8c2   : > { %12129 = vmatpush.bf16.msrb.mxu2 %v18952_v7  ;;  %v18236_v7 = vor.u32 %v20492_v39, %v18235_v21  ;;  %v18219_v22 = vld [vmem:[#allocation12 + $0x68] sm:$0xf]  ;;  %v18620_v53 = vor.u32 %v20588_v23, %v18619_v5  ;;  %v20520_v14 = vld [vmem:[#allocation12 + $0x174] sm:$0xf0] }
 0x8c3   : > { %12142 = vmatpush.bf16.msrb.mxu3 %v19080_v4  ;;  %v20488_v4 = vld [vmem:[#allocation12 + $0x74] sm:$0xf0]  ;;  %v18347_v20 = vld [vmem:[#allocation12 + $0x168] sm:$0xf] }
 0x8c4   : > { %12104 = vmatpush.bf16.msrb.mxu0 %v18680_v6  ;;  %v18475_v34 = vld [vmem:[#allocation12 + $0x268] sm:$0xf]  ;;  %v20552_v47 = vld [vmem:[#allocation12 + $0x274] sm:$0xf0]  ;;  %v18220_v28 = vor.u32 %v20488_v4, %v18219_v22  ;;  %v18348_v15 = vor.u32 %v20520_v14, %v18347_v20 }
 0x8c5   : > { %12117 = vmatpush.bf16.msrb.mxu1 %v18808_v35  ;;  %v18603_v58 = vld [vmem:[#allocation12 + $0x368] sm:$0xf]  ;;  %v20584_v6 = vld [vmem:[#allocation12 + $0x374] sm:$0xf0]  ;;  %v18476_v44 = vor.u32 %v20552_v47, %v18475_v34 }
 0x8c6   : > { %12130 = vmatpush.bf16.msrb.mxu2 %v18936_v63  ;;  %v18203_v35 = vld [vmem:[#allocation12 + $0x48] sm:$0xf]  ;;  %v20484_v63 = vld [vmem:[#allocation12 + $0x54] sm:$0xf0]  ;;  %v18604_v26 = vor.u32 %v20584_v6, %v18603_v58 }
 0x8c7   : > { %12143 = vmatpush.bf16.msrb.mxu3 %v19064_v60  ;;  %12105 = vmatmul.bf16.vlgmr.msrb.gmra.mxu0 %v23905_v38  ;;  %v18331_v18 = vld [vmem:[#allocation12 + $0x148] sm:$0xf]  ;;  %v20516_v60 = vld [vmem:[#allocation12 + $0x154] sm:$0xf0]  ;;  %v18204_v61 = vor.u32 %v20484_v63, %v18203_v35 }
 0x8c8   : > { %12149 = vmatpush.bf16.msra.mxu0 %v18284_v17  ;;  %12118 = vmatmul.bf16.vlgmr.msrb.gmra.mxu1 %v23913_v45  ;;  %v18459_v17 = vld [vmem:[#allocation12 + $0x248] sm:$0xf]  ;;  %v20580_v9 = vld [vmem:[#allocation12 + $0x354] sm:$0xf0]  ;;  %v18332_v19 = vor.u32 %v20516_v60, %v18331_v18 }
 0x8c9   : > { %12162 = vmatpush.bf16.msra.mxu1 %v18412_v8  ;;  %12131 = vmatmul.bf16.vlgmr.msrb.gmra.mxu2 %v23901_v32  ;;  %v20548_v8 = vld [vmem:[#allocation12 + $0x254] sm:$0xf0]  ;;  %v18187_v29 = vld [vmem:[#allocation12 + $0x28] sm:$0xf] }
 0x8ca   : > { %12175 = vmatpush.bf16.msra.mxu2 %v18540_v27  ;;  %12144 = vmatmul.bf16.vlgmr.msrb.gmra.mxu3 %v23909_v50  ;;  %v18587_v27 = vld [vmem:[#allocation12 + $0x348] sm:$0xf]  ;;  %v20480_v31 = vld [vmem:[#allocation12 + $0x34] sm:$0xf0] }
 0x8cb   : > { %12188 = vmatpush.bf16.msra.mxu3 %v18668_v52  ;;  %v18460_v52 = vor.u32 %v20548_v8, %v18459_v17  ;;  %v18315_v10 = vld [vmem:[#allocation12 + $0x128] sm:$0xf]  ;;  %v18588_v51 = vor.u32 %v20580_v9, %v18587_v27  ;;  %v20512_v57 = vld [vmem:[#allocation12 + $0x134] sm:$0xf0]  ;;  %v18188_v54 = vor.u32 %v20480_v31, %v18187_v29 }
 0x8cc   : > { %12150 = vmatpush.bf16.msra.mxu0 %v18268_v55  ;;  %v18443_v55 = vld [vmem:[#allocation12 + $0x228] sm:$0xf]  ;;  %v20576_v1 = vld [vmem:[#allocation12 + $0x334] sm:$0xf0]  ;;  %v18316_v33 = vor.u32 %v20512_v57, %v18315_v10 }
 0x8cd   : > { %12163 = vmatpush.bf16.msra.mxu1 %v18396_v30  ;;  %v20544_v30 = vld [vmem:[#allocation12 + $0x234] sm:$0xf0]  ;;  %v18171_v12 = vld [vmem:[#allocation12 + $0x8] sm:$0xf] }
 0x8ce   : > { %12176 = vmatpush.bf16.msra.mxu2 %v18524_v40  ;;  %v18571_v40 = vld [vmem:[#allocation12 + $0x328] sm:$0xf]  ;;  %v18444_v43 = vor.u32 %v20544_v30, %v18443_v55  ;;  %v20508_v16 = vld [vmem:[#allocation12 + $0x114] sm:$0xf0] }
 0x8cf   : > { %12189 = vmatpush.bf16.msra.mxu3 %v18652_v24  ;;  %v20476_v24 = vld [vmem:[#allocation12 + $0x14] sm:$0xf0]  ;;  %v18299_v42 = vld [vmem:[#allocation12 + $0x108] sm:$0xf] }
 0x8d0   : > { %12151 = vmatpush.bf16.msra.mxu0 %v18252_v36  ;;  %v18427_v59 = vld [vmem:[#allocation12 + $0x208] sm:$0xf]  ;;  %v18572_v36 = vor.u32 %v20576_v1, %v18571_v40  ;;  %v20572_v21 = vld [vmem:[#allocation12 + $0x314] sm:$0xf0]  ;;  %v18172_v62 = vor.u32 %v20476_v24, %v18171_v12  ;;  %v18300_v23 = vor.u32 %v20508_v16, %v18299_v42 }
 0x8d1   : > { %12164 = vmatpush.bf16.msra.mxu1 %v18380_v37  ;;  %v20540_v37 = vld [vmem:[#allocation12 + $0x214] sm:$0xf0]  ;;  %v18795_v39 = vld [vmem:[#allocation12 + $0x4e8] sm:$0xf] }
 0x8d2   : > { %12177 = vmatpush.bf16.msra.mxu2 %v18508_v2  ;;  %v18555_v2 = vld [vmem:[#allocation12 + $0x308] sm:$0xf]  ;;  %v20632_v13 = vld [vmem:[#allocation12 + $0x4f4] sm:$0xf0] }
 0x8d3   : > { %12190 = vmatpush.bf16.msra.mxu3 %v18636_v3  ;;  %v18923_v3 = vld [vmem:[#allocation12 + $0x5e8] sm:$0xf]  ;;  %v20664_v41 = vld [vmem:[#allocation12 + $0x5f4] sm:$0xf0]  ;;  %v18556_v22 = vor.u32 %v20572_v21, %v18555_v2  ;;  %v18796_v4 = vor.u32 %v20632_v13, %v18795_v39 }
 0x8d4   : > { %12152 = vmatpush.bf16.msra.mxu0 %v18236_v7  ;;  %v19051_v46 = vld [vmem:[#allocation12 + $0x6e8] sm:$0xf]  ;;  %v20696_v5 = vld [vmem:[#allocation12 + $0x6f4] sm:$0xf0]  ;;  %v18428_v7 = vor.u32 %v20540_v37, %v18427_v59  ;;  %v18924_v20 = vor.u32 %v20664_v41, %v18923_v3 }
 0x8d5   : > { %12165 = vmatpush.bf16.msra.mxu1 %v18364_v48  ;;  %v19179_v48 = vld [vmem:[#allocation12 + $0x7e8] sm:$0xf]  ;;  %v20628_v34 = vld [vmem:[#allocation12 + $0x4d4] sm:$0xf0] }
 0x8d6   : > { %12178 = vmatpush.bf16.msra.mxu2 %v18492_v49  ;;  %v20728_v49 = vld [vmem:[#allocation12 + $0x7f4] sm:$0xf0]  ;;  %v18779_v14 = vld [vmem:[#allocation12 + $0x4c8] sm:$0xf] }
 0x8d7   : > { %12191 = vmatpush.bf16.msra.mxu3 %v18620_v53  ;;  %v19052_v53 = vor.u32 %v20696_v5, %v19051_v46  ;;  %v18907_v47 = vld [vmem:[#allocation12 + $0x5c8] sm:$0xf]  ;;  %v19180_v58 = vor.u32 %v20728_v49, %v19179_v48  ;;  %v20660_v6 = vld [vmem:[#allocation12 + $0x5d4] sm:$0xf0]  ;;  %v18780_v63 = vor.u32 %v20628_v34, %v18779_v14 }
 0x8d8   : > { %12153 = vmatpush.bf16.msra.mxu0 %v18220_v28  ;;  %v19035_v28 = vld [vmem:[#allocation12 + $0x6c8] sm:$0xf]  ;;  %v20724_v35 = vld [vmem:[#allocation12 + $0x7d4] sm:$0xf0]  ;;  %v18908_v18 = vor.u32 %v20660_v6, %v18907_v47 }
 0x8d9   : > { %12166 = vmatpush.bf16.msra.mxu1 %v18348_v15  ;;  %v20692_v15 = vld [vmem:[#allocation12 + $0x6d4] sm:$0xf0]  ;;  %v18763_v60 = vld [vmem:[#allocation12 + $0x4a8] sm:$0xf] }
 0x8da   : > { %12179 = vmatpush.bf16.msra.mxu2 %v18476_v44  ;;  %v19163_v44 = vld [vmem:[#allocation12 + $0x7c8] sm:$0xf]  ;;  %v20624_v17 = vld [vmem:[#allocation12 + $0x4b4] sm:$0xf0] }
 0x8db   : > { %12192 = vmatpush.bf16.msra.mxu3 %v18604_v26  ;;  %v19036_v26 = vor.u32 %v20692_v15, %v19035_v28  ;;  %v18891_v8 = vld [vmem:[#allocation12 + $0x5a8] sm:$0xf]  ;;  %v19164_v27 = vor.u32 %v20724_v35, %v19163_v44  ;;  %v20656_v9 = vld [vmem:[#allocation12 + $0x5b4] sm:$0xf0]  ;;  %v18764_v31 = vor.u32 %v20624_v17, %v18763_v60  ;;  %v23939_v15 = vld [vmem:[#allocation14] sm:$0xf] }
 0x8dc   : > { %12154 = vmatpush.bf16.msra.mxu0 %v18204_v61  ;;  %v19019_v61 = vld [vmem:[#allocation12 + $0x6a8] sm:$0xf]  ;;  %v20720_v29 = vld [vmem:[#allocation12 + $0x7b4] sm:$0xf0]  ;;  %v18892_v10 = vor.u32 %v20656_v9, %v18891_v8 }
 0x8dd   : > { %12167 = vmatpush.bf16.msra.mxu1 %v18332_v19  ;;  %v20688_v19 = vld [vmem:[#allocation12 + $0x6b4] sm:$0xf0]  ;;  %v18747_v57 = vld [vmem:[#allocation12 + $0x488] sm:$0xf] }
 0x8de   : > { %12180 = vmatpush.bf16.msra.mxu2 %v18460_v52  ;;  %v19147_v52 = vld [vmem:[#allocation12 + $0x7a8] sm:$0xf]  ;;  %v20620_v55 = vld [vmem:[#allocation12 + $0x494] sm:$0xf0] }
 0x8df   : > { %12193 = vmatpush.bf16.msra.mxu3 %v18588_v51  ;;  %v19020_v51 = vor.u32 %v20688_v19, %v19019_v61  ;;  %v18875_v30 = vld [vmem:[#allocation12 + $0x588] sm:$0xf]  ;;  %v19148_v40 = vor.u32 %v20720_v29, %v19147_v52  ;;  %v20652_v1 = vld [vmem:[#allocation12 + $0x594] sm:$0xf0]  ;;  %v10653_v29 = vperm.slane %v23939_v15, 0 }
 0x8e0   : > { %12155 = vmatpush.bf16.msra.mxu0 %v18188_v54  ;;  %v19003_v54 = vld [vmem:[#allocation12 + $0x688] sm:$0xf]  ;;  %v20684_v12 = vld [vmem:[#allocation12 + $0x694] sm:$0xf0]  ;;  %v18876_v16 = vor.u32 %v20652_v1, %v18875_v30 }
 0x8e1   : > { %12168 = vmatpush.bf16.msra.mxu1 %v18316_v33  ;;  %v19131_v24 = vld [vmem:[#allocation12 + $0x788] sm:$0xf]  ;;  %v20716_v33 = vld [vmem:[#allocation12 + $0x794] sm:$0xf0]  ;;  %v19004_v59 = vor.u32 %v20684_v12, %v19003_v54 }
 0x8e2   : > { %12181 = vmatpush.bf16.msra.mxu2 %v18444_v43  ;;  %v18748_v43 = vor.u32 %v20620_v55, %v18747_v57  ;;  %v20616_v37 = vld [vmem:[#allocation12 + $0x474] sm:$0xf0]  ;;  %v18859_v2 = vld [vmem:[#allocation12 + $0x568] sm:$0xf]  ;;  %v19132_v39 = vor.u32 %v20716_v33, %v19131_v24 }
 0x8e3   : > { %12194 = vmatpush.bf16.msra.mxu3 %v18572_v36  ;;  %v18731_v36 = vld [vmem:[#allocation12 + $0x468] sm:$0xf]  ;;  %v20648_v13 = vld [vmem:[#allocation12 + $0x574] sm:$0xf0] }
 0x8e4   : > { %12156 = vmatpush.bf16.msra.mxu0 %v18172_v62  ;;  %v23931_v42 = vpop.f32.mrf.mxu0  ;;  %v18987_v3 = vld [vmem:[#allocation12 + $0x668] sm:$0xf]  ;;  %v20680_v62 = vld [vmem:[#allocation12 + $0x674] sm:$0xf0]  ;;  %v18732_v5 = vor.u32 %v20616_v37, %v18731_v36  ;;  %v18285_v36 = vld [vmem:[#allocation12 + $0xf8] sm:$0xf0] }
 0x8e5   : > { %12169 = vmatpush.bf16.msra.mxu1 %v18300_v23  ;;  %v23933_v21 = vpop.f32.mrf.mxu1  ;;  %v19115_v41 = vld [vmem:[#allocation12 + $0x768] sm:$0xf]  ;;  %v20712_v46 = vld [vmem:[#allocation12 + $0x774] sm:$0xf0]  ;;  %v18860_v23 = vor.u32 %v20648_v13, %v18859_v2  ;;  %v20534_v37 = vld [vmem:[#allocation12 + $0x1ec] sm:$0xf]  ;;  %v11951_v2 = vadd.f32 %v23931_v42, %v10653_v29 }
 0x8e6   : > { %12182 = vmatpush.bf16.msra.mxu2 %v18428_v7  ;;  %v18988_v7 = vor.u32 %v20680_v62, %v18987_v3  ;;  %v18715_v48 = vld [vmem:[#allocation12 + $0x448] sm:$0xf]  ;;  %v20612_v49 = vld [vmem:[#allocation12 + $0x454] sm:$0xf0]  ;;  %v18413_v13 = vld [vmem:[#allocation12 + $0x1f8] sm:$0xf0] }
 0x8e7   : > { %12195 = vmatpush.bf16.msra.mxu3 %v18556_v22  ;;  %12157 = vmatmul.bf16.vlgmr.msra.gmra.mxu0 %v23885_v0  ;;  %v18843_v22 = vld [vmem:[#allocation12 + $0x548] sm:$0xf]  ;;  %v20676_v34 = vld [vmem:[#allocation12 + $0x654] sm:$0xf0]  ;;  %v18716_v28 = vor.u32 %v20612_v49, %v18715_v48  ;;  %v20566_v3 = vld [vmem:[#allocation12 + $0x2ec] sm:$0xf]  ;;  %v18416_v49 = vor.u32 %v20534_v37, %v18413_v13 }
 0x8e8   : > { %12201 = vmatpush.bf16.msrb.mxu0 %v18796_v4  ;;  %12170 = vmatmul.bf16.vlgmr.msra.gmra.mxu1 %v23893_v56  ;;  %v18971_v14 = vld [vmem:[#allocation12 + $0x648] sm:$0xf]  ;;  %v20708_v6 = vld [vmem:[#allocation12 + $0x754] sm:$0xf0]  ;;  %v18541_v62 = vld [vmem:[#allocation12 + $0x2f8] sm:$0xf0] }
 0x8e9   : > { %12214 = vmatpush.bf16.msrb.mxu1 %v18924_v20  ;;  %12183 = vmatmul.bf16.vlgmr.msra.gmra.mxu2 %v23881_v25  ;;  %v19116_v20 = vor.u32 %v20712_v46, %v19115_v41  ;;  %v18827_v60 = vld [vmem:[#allocation12 + $0x528] sm:$0xf]  ;;  %v20672_v61 = vld [vmem:[#allocation12 + $0x634] sm:$0xf0]  ;;  %v18269_v42 = vld [vmem:[#allocation12 + $0xd8] sm:$0xf0] }
 0x8ea   : > { %12227 = vmatpush.bf16.msrb.mxu2 %v19052_v53  ;;  %12196 = vmatmul.bf16.vlgmr.msra.gmra.mxu3 %v23889_v11  ;;  %v20644_v53 = vld [vmem:[#allocation12 + $0x554] sm:$0xf0]  ;;  %v18955_v9 = vld [vmem:[#allocation12 + $0x628] sm:$0xf]  ;;  %v18637_v29 = vld [vmem:[#allocation12 + $0x3b8] sm:$0xf0] }
 0x8eb   : > { %12240 = vmatpush.bf16.msrb.mxu3 %v19180_v58  ;;  %v19099_v58 = vld [vmem:[#allocation12 + $0x748] sm:$0xf]  ;;  %v18844_v35 = vor.u32 %v20644_v53, %v18843_v22  ;;  %v20704_v52 = vld [vmem:[#allocation12 + $0x734] sm:$0xf0]  ;;  %v18956_v55 = vor.u32 %v20672_v61, %v18955_v9  ;;  %v18544_v22 = vor.u32 %v20566_v3, %v18541_v62  ;;  %v20498_v53 = vld [vmem:[#allocation12 + $0xcc] sm:$0xf] }
 0x8ec   : > { %12202 = vmatpush.bf16.msrb.mxu0 %v18780_v63  ;;  %v23935_v4 = vpop.f32.mrf.mxu2  ;;  %v11952_v44 = vpop.f32.mrf.mxu0  ;;  %v18972_v63 = vor.u32 %v20676_v34, %v18971_v14  ;;  %v19100_v8 = vor.u32 %v20708_v6, %v19099_v58  ;;  %v19083_v19 = vld [vmem:[#allocation12 + $0x728] sm:$0xf]  ;;  %v20668_v24 = vld [vmem:[#allocation12 + $0x614] sm:$0xf0]  ;;  %v20530_v14 = vld [vmem:[#allocation12 + $0x1cc] sm:$0xf] }
 0x8ed   : > { %12215 = vmatpush.bf16.msrb.mxu1 %v18908_v18  ;;  %v23937_v47 = vpop.f32.mrf.mxu3  ;;  %v18699_v18 = vld [vmem:[#allocation12 + $0x428] sm:$0xf]  ;;  %v11965_v17 = vpop.f32.mrf.mxu1  ;;  %v19084_v12 = vor.u32 %v20704_v52, %v19083_v19  ;;  %v18397_v58 = vld [vmem:[#allocation12 + $0x1d8] sm:$0xf0]  ;;  %v20562_v6 = vld [vmem:[#allocation12 + $0x2cc] sm:$0xf] }
 0x8ee   : > { %12228 = vmatpush.bf16.msrb.mxu2 %v19036_v26  ;;  %v20608_v26 = vld [vmem:[#allocation12 + $0x434] sm:$0xf0]  ;;  %v18811_v30 = vld [vmem:[#allocation12 + $0x508] sm:$0xf]  ;;  %v20594_v44 = vld [vmem:[#allocation12 + $0x3cc] sm:$0xf] }
 0x8ef   : > { %12241 = vmatpush.bf16.msrb.mxu3 %v19164_v27  ;;  %v20640_v27 = vld [vmem:[#allocation12 + $0x534] sm:$0xf0]  ;;  %v18939_v1 = vld [vmem:[#allocation12 + $0x608] sm:$0xf]  ;;  %v18253_v17 = vld [vmem:[#allocation12 + $0xb8] sm:$0xf0] }
 0x8f0   : > { %12203 = vmatpush.bf16.msrb.mxu0 %v18764_v31  ;;  %v18700_v31 = vor.u32 %v20608_v26, %v18699_v18  ;;  %v18828_v57 = vor.u32 %v20640_v27, %v18827_v60  ;;  %v19067_v33 = vld [vmem:[#allocation12 + $0x708] sm:$0xf]  ;;  %v18940_v46 = vor.u32 %v20668_v24, %v18939_v1  ;;  %v18400_v18 = vor.u32 %v20530_v14, %v18397_v58  ;;  %v20494_v60 = vld [vmem:[#allocation12 + $0xac] sm:$0xf]  ;;  %v18381_v9 = vld [vmem:[#allocation12 + $0x1b8] sm:$0xf0] }
 0x8f1   : > { %12216 = vmatpush.bf16.msrb.mxu1 %v18892_v10  ;;  %v18683_v10 = vld [vmem:[#allocation12 + $0x408] sm:$0xf]  ;;  %v20558_v61 = vld [vmem:[#allocation12 + $0x2ac] sm:$0xf]  ;;  %v18509_v19 = vld [vmem:[#allocation12 + $0x2b8] sm:$0xf0] }
 0x8f2   : > { %12229 = vmatpush.bf16.msrb.mxu2 %v19020_v51  ;;  %v20604_v51 = vld [vmem:[#allocation12 + $0x414] sm:$0xf0]  ;;  %v20590_v52 = vld [vmem:[#allocation12 + $0x3ac] sm:$0xf]  ;;  %v18365_v1 = vld [vmem:[#allocation12 + $0x198] sm:$0xf0] }
 0x8f3   : > { %12242 = vmatpush.bf16.msrb.mxu3 %v19148_v40  ;;  %v20636_v40 = vld [vmem:[#allocation12 + $0x514] sm:$0xf0]  ;;  %v20586_v24 = vld [vmem:[#allocation12 + $0x38c] sm:$0xf]  ;;  %v18221_v37 = vld [vmem:[#allocation12 + $0x78] sm:$0xf0] }
 0x8f4   : > { %12204 = vmatpush.bf16.msrb.mxu0 %v18748_v43  ;;  %v11978_v54 = vpop.f32.mrf.mxu2  ;;  %v20700_v43 = vld [vmem:[#allocation12 + $0x714] sm:$0xf0]  ;;  %v18812_v41 = vor.u32 %v20636_v40, %v18811_v30  ;;  %v20522_v30 = vld [vmem:[#allocation12 + $0x18c] sm:$0xf]  ;;  %v18640_v40 = vor.u32 %v20590_v52, %v18637_v29  ;;  %v18349_v62 = vld [vmem:[#allocation12 + $0x178] sm:$0xf0] }
 0x8f5   : > { %12217 = vmatpush.bf16.msrb.mxu1 %v18876_v16  ;;  %v11991_v16 = vpop.f32.mrf.mxu3  ;;  %v20554_v54 = vld [vmem:[#allocation12 + $0x28c] sm:$0xf]  ;;  %v18333_v58 = vld [vmem:[#allocation12 + $0x158] sm:$0xf0] }
 0x8f6   : > { %12230 = vmatpush.bf16.msrb.mxu2 %v19004_v59  ;;  %v20502_v59 = vld [vmem:[#allocation12 + $0xec] sm:$0xf] }
 0x8f7   : > { %12243 = vmatpush.bf16.msrb.mxu3 %v19132_v39  ;;  %v18684_v39 = vor.u32 %v20604_v51, %v18683_v10  ;;  %v18288_v48 = vor.u32 %v20502_v59, %v18285_v36  ;;  %v18512_v51 = vor.u32 %v20558_v61, %v18509_v19  ;;  %v18368_v59 = vor.u32 %v20522_v30, %v18365_v1  ;;  %v20510_v61 = vld [vmem:[#allocation12 + $0x12c] sm:$0xf]  ;;  %v18317_v19 = vld [vmem:[#allocation12 + $0x138] sm:$0xf0] }
 0x8f8   : > { %12205 = vmatpush.bf16.msrb.mxu0 %v18732_v5  ;;  %v20598_v5 = vld [vmem:[#allocation12 + $0x3ec] sm:$0xf]  ;;  %v18173_v1 = vld [vmem:[#allocation12 + $0x18] sm:$0xf0] }
 0x8f9   : > { %12218 = vmatpush.bf16.msrb.mxu1 %v18860_v23  ;;  %v18669_v23 = vld [vmem:[#allocation12 + $0x3f8] sm:$0xf0]  ;;  %v20542_v52 = vld [vmem:[#allocation12 + $0x22c] sm:$0xf] }
 0x8fa   : > { %12231 = vmatpush.bf16.msrb.mxu2 %v18988_v7  ;;  %v19068_v7 = vor.u32 %v20700_v43, %v19067_v33  ;;  %v18672_v34 = vor.u32 %v20598_v5, %v18669_v23  ;;  %v18621_v33 = vld [vmem:[#allocation12 + $0x398] sm:$0xf0]  ;;  %v20582_v5 = vld [vmem:[#allocation12 + $0x36c] sm:$0xf] }
 0x8fb   : > { %12244 = vmatpush.bf16.msrb.mxu3 %v19116_v20  ;;  %v11964_v20 = vadd.f32 %v23933_v21, %v11951_v2  ;;  %v20518_v2 = vld [vmem:[#allocation12 + $0x16c] sm:$0xf]  ;;  %v18624_v3 = vor.u32 %v20586_v24, %v18621_v33  ;;  %v18605_v23 = vld [vmem:[#allocation12 + $0x378] sm:$0xf0]  ;;  %v18320_v33 = vor.u32 %v20510_v61, %v18317_v19 }
 0x8fc   : > { %12206 = vmatpush.bf16.msrb.mxu0 %v18716_v28  ;;  %v18525_v28 = vld [vmem:[#allocation12 + $0x2d8] sm:$0xf0] }
 0x8fd   : > { %12219 = vmatpush.bf16.msrb.mxu1 %v18844_v35  ;;  %v18653_v35 = vld [vmem:[#allocation12 + $0x3d8] sm:$0xf0]  ;;  %v18528_v26 = vor.u32 %v20562_v6, %v18525_v28  ;;  %v11977_v21 = vadd.f32 %v23935_v4, %v11964_v20  ;;  %v20482_v20 = vld [vmem:[#allocation12 + $0x4c] sm:$0xf] }
 0x8fe   : > { %12232 = vmatpush.bf16.msrb.mxu2 %v18972_v63  ;;  %v18272_v63 = vor.u32 %v20498_v53, %v18269_v42  ;;  %v18656_v27 = vor.u32 %v20594_v44, %v18653_v35  ;;  %v18205_v53 = vld [vmem:[#allocation12 + $0x58] sm:$0xf0]  ;;  %v20514_v42 = vld [vmem:[#allocation12 + $0x14c] sm:$0xf] }
 0x8ff   : > { %12245 = vmatpush.bf16.msrb.mxu3 %v19100_v8  ;;  %v20526_v8 = vld [vmem:[#allocation12 + $0x1ac] sm:$0xf]  ;;  %v11990_v4 = vadd.f32 %v23937_v47, %v11977_v21  ;;  %v18461_v28 = vld [vmem:[#allocation12 + $0x258] sm:$0xf0] }
 0x900   : > { %12207 = vmatpush.bf16.msrb.mxu0 %v18700_v31  ;;  %v18256_v31 = vor.u32 %v20494_v60, %v18253_v17  ;;  %v18384_v10 = vor.u32 %v20526_v8, %v18381_v9  ;;  %v20486_v47 = vld [vmem:[#allocation12 + $0x6c] sm:$0xf]  ;;  %v18189_v17 = vld [vmem:[#allocation12 + $0x38] sm:$0xf0] }
 0x901   : > { %12220 = vmatpush.bf16.msrb.mxu1 %v18828_v57  ;;  %v20490_v57 = vld [vmem:[#allocation12 + $0x8c] sm:$0xf]  ;;  %v18893_v19 = vld [vmem:[#allocation12 + $0x5b8] sm:$0xf0] }
 0x902   : > { %12233 = vmatpush.bf16.msrb.mxu2 %v18956_v55  ;;  %v18237_v55 = vld [vmem:[#allocation12 + $0x98] sm:$0xf0]  ;;  %v20546_v6 = vld [vmem:[#allocation12 + $0x24c] sm:$0xf] }
 0x903   : > { %12246 = vmatpush.bf16.msrb.mxu3 %v19084_v12  ;;  %v18493_v12 = vld [vmem:[#allocation12 + $0x298] sm:$0xf0]  ;;  %v18240_v43 = vor.u32 %v20490_v57, %v18237_v55  ;;  %v20478_v60 = vld [vmem:[#allocation12 + $0x2c] sm:$0xf]  ;;  %v18464_v9 = vor.u32 %v20546_v6, %v18461_v28 }
 0x904   : > { %12208 = vmatpush.bf16.msrb.mxu0 %v18684_v39  ;;  %v12002_v16 = vpop.f32.mrf.mxu0  ;;  %v18496_v36 = vor.u32 %v20554_v54, %v18493_v12  ;;  %v18573_v57 = vld [vmem:[#allocation12 + $0x338] sm:$0xf0]  ;;  %v20474_v55 = vld [vmem:[#allocation12 + $0xc] sm:$0xf] }
 0x905   : > { %12221 = vmatpush.bf16.msrb.mxu1 %v18812_v41  ;;  %v12003_v39 = vadd.f32 %v12002_v16, %v11990_v4  ;;  %v12015_v13 = vpop.f32.mrf.mxu1  ;;  %v20550_v41 = vld [vmem:[#allocation12 + $0x26c] sm:$0xf]  ;;  %v18301_v12 = vld [vmem:[#allocation12 + $0x118] sm:$0xf0] }
 0x906   : > { %12234 = vmatpush.bf16.msrb.mxu2 %v18940_v46  ;;  %v18477_v46 = vld [vmem:[#allocation12 + $0x278] sm:$0xf0]  ;;  %v20506_v54 = vld [vmem:[#allocation12 + $0x10c] sm:$0xf] }
 0x907   : > { %12247 = vmatpush.bf16.msrb.mxu3 %v19068_v7  ;;  %12209 = vmatmul.bf16.vlgmr.msrb.gmra.mxu0 %v23905_v38  ;;  %v12016_v7 = vadd.f32 %v12015_v13, %v12003_v39  ;;  %v20538_v16 = vld [vmem:[#allocation12 + $0x20c] sm:$0xf] }
 0x908   : > { %12253 = vmatpush.bf16.msra.mxu0 %v18288_v48  ;;  %12222 = vmatmul.bf16.vlgmr.msrb.gmra.mxu1 %v23913_v45  ;;  %v18224_v48 = vor.u32 %v20486_v47, %v18221_v37  ;;  %v20570_v37 = vld [vmem:[#allocation12 + $0x30c] sm:$0xf] }
 0x909   : > { %12266 = vmatpush.bf16.msra.mxu1 %v18416_v49  ;;  %12235 = vmatmul.bf16.vlgmr.msrb.gmra.mxu2 %v23901_v32  ;;  %v18352_v49 = vor.u32 %v20518_v2, %v18349_v62  ;;  %v18557_v2 = vld [vmem:[#allocation12 + $0x318] sm:$0xf0]  ;;  %v20630_v39 = vld [vmem:[#allocation12 + $0x4ec] sm:$0xf] }
 0x90a   : > { %12279 = vmatpush.bf16.msra.mxu2 %v18544_v22  ;;  %12248 = vmatmul.bf16.vlgmr.msrb.gmra.mxu3 %v23909_v50  ;;  %v18480_v22 = vor.u32 %v20550_v41, %v18477_v46  ;;  %v20662_v62 = vld [vmem:[#allocation12 + $0x5ec] sm:$0xf]  ;;  %v18176_v41 = vor.u32 %v20474_v55, %v18173_v1  ;;  %v18925_v46 = vld [vmem:[#allocation12 + $0x5f8] sm:$0xf0] }
 0x90b   : > { %12292 = vmatpush.bf16.msra.mxu3 %v18672_v34  ;;  %v18608_v34 = vor.u32 %v20582_v5, %v18605_v23  ;;  %v20694_v5 = vld [vmem:[#allocation12 + $0x6ec] sm:$0xf]  ;;  %v19053_v23 = vld [vmem:[#allocation12 + $0x6f8] sm:$0xf0] }
 0x90c   : > { %12254 = vmatpush.bf16.msra.mxu0 %v18272_v63  ;;  %v12028_v14 = vpop.f32.mrf.mxu2  ;;  %v20578_v63 = vld [vmem:[#allocation12 + $0x34c] sm:$0xf]  ;;  %v12004_v8 = vpop.f32.mrf.mxu0  ;;  %v18877_v1 = vld [vmem:[#allocation12 + $0x598] sm:$0xf0] }
 0x90d   : > { %12267 = vmatpush.bf16.msra.mxu1 %v18400_v18  ;;  %v12029_v44 = vadd.f32 %v12028_v14, %v12016_v7  ;;  %v12041_v35 = vpop.f32.mrf.mxu3  ;;  %v18589_v18 = vld [vmem:[#allocation12 + $0x358] sm:$0xf0]  ;;  %v12017_v29 = vpop.f32.mrf.mxu1  ;;  %v18304_v7 = vor.u32 %v20506_v54, %v18301_v12  ;;  %v19056_v14 = vor.u32 %v20694_v5, %v19053_v23  ;;  %v20658_v6 = vld [vmem:[#allocation12 + $0x5cc] sm:$0xf] }
 0x90e   : > { %12280 = vmatpush.bf16.msra.mxu2 %v18528_v26  ;;  %v18208_v26 = vor.u32 %v20482_v20, %v18205_v53  ;;  %v18560_v20 = vor.u32 %v20570_v37, %v18557_v2  ;;  %v20622_v8 = vld [vmem:[#allocation12 + $0x4ac] sm:$0xf]  ;;  %v19021_v29 = vld [vmem:[#allocation12 + $0x6b8] sm:$0xf0] }
 0x90f   : > { %12293 = vmatpush.bf16.msra.mxu3 %v18656_v27  ;;  %v12042_v21 = vadd.f32 %v12041_v35, %v12029_v44  ;;  %v18336_v27 = vor.u32 %v20514_v42, %v18333_v58  ;;  %v18928_v42 = vor.u32 %v20662_v62, %v18925_v46  ;;  %v18781_v58 = vld [vmem:[#allocation12 + $0x4d8] sm:$0xf0]  ;;  %v20690_v35 = vld [vmem:[#allocation12 + $0x6cc] sm:$0xf] }
 0x910   : > { %12255 = vmatpush.bf16.msra.mxu0 %v18256_v31  ;;  %v18592_v31 = vor.u32 %v20578_v63, %v18589_v18  ;;  %v18909_v44 = vld [vmem:[#allocation12 + $0x5d8] sm:$0xf0]  ;;  %v20722_v18 = vld [vmem:[#allocation12 + $0x7cc] sm:$0xf] }
 0x911   : > { %12268 = vmatpush.bf16.msra.mxu1 %v18384_v10  ;;  %vm12357_vm12 = vcmp.ge.f32.partialorder %v12042_v21, 0.0  ;;  %v12361_v4 = vmul.f32 0.2, %v12042_v21  ;;  %v18445_v10 = vld [vmem:[#allocation12 + $0x238] sm:$0xf0] }
 0x912   : > { %12281 = vmatpush.bf16.msra.mxu2 %v18512_v51  ;;  %v20574_v51 = vld [vmem:[#allocation12 + $0x32c] sm:$0xf]  ;;  %v19037_v63 = vld [vmem:[#allocation12 + $0x6d8] sm:$0xf0] }
 0x913   : > { %12294 = vmatpush.bf16.msra.mxu3 %v18640_v40  ;;  %v12365_v30 = vsel %vm12357_vm12, %v12042_v21, %v12361_v4  ;;  %v18192_v40 = vor.u32 %v20478_v60, %v18189_v17  ;;  %v18576_v47 = vor.u32 %v20574_v51, %v18573_v57  ;;  %v18912_v60 = vor.u32 %v20658_v6, %v18909_v44  ;;  %v19149_v4 = vld [vmem:[#allocation12 + $0x7b8] sm:$0xf0]  ;;  %v20618_v55 = vld [vmem:[#allocation12 + $0x48c] sm:$0xf] }
 0x914   : > { %12256 = vmatpush.bf16.msra.mxu0 %v18240_v43  ;;  %v12369_v24 = vmul.f32 1.4142135, %v12365_v30  ;;  %v18448_v43 = vor.u32 %v20542_v52, %v18445_v10  ;;  %v19040_v17 = vor.u32 %v20690_v35, %v19037_v63  ;;  %v20686_v52 = vld [vmem:[#allocation12 + $0x6ac] sm:$0xf]  ;;  %v18749_v30 = vld [vmem:[#allocation12 + $0x498] sm:$0xf0] }
 0x915   : > { %12269 = vmatpush.bf16.msra.mxu1 %v18368_v59  ;;  %v18429_v59 = vld [vmem:[#allocation12 + $0x218] sm:$0xf0]  ;;  %v12043_v13 = vpop.f32.mrf.mxu3  ;;  %v19024_v57 = vor.u32 %v20686_v52, %v19021_v29  ;;  %v20682_v54 = vld [vmem:[#allocation12 + $0x68c] sm:$0xf] }
 0x916   : > { %12282 = vmatpush.bf16.msra.mxu2 %v18496_v36  ;;  %v12030_v36 = vpop.f32.mrf.mxu2  ;;  %12373 = vst [vmem:[#allocation15] sm:$0xff] %v12369_v24  ;;  %v19005_v12 = vld [vmem:[#allocation12 + $0x698] sm:$0xf0]  ;;  %v20714_v24 = vld [vmem:[#allocation12 + $0x78c] sm:$0xf] }
 0x917   : > { %12295 = vmatpush.bf16.msra.mxu3 %v18624_v3  ;;  %v18797_v3 = vld [vmem:[#allocation12 + $0x4f8] sm:$0xf0]  ;;  %v20646_v36 = vld [vmem:[#allocation12 + $0x56c] sm:$0xf] }
 0x918   : > { %12257 = vmatpush.bf16.msra.mxu0 %v18224_v48  ;;  %v18432_v48 = vor.u32 %v20538_v16, %v18429_v59  ;;  %v18800_v53 = vor.u32 %v20630_v39, %v18797_v3  ;;  %v20614_v16 = vld [vmem:[#allocation12 + $0x46c] sm:$0xf]  ;;  %v18733_v59 = vld [vmem:[#allocation12 + $0x478] sm:$0xf0] }
 0x919   : > { %12270 = vmatpush.bf16.msra.mxu1 %v18352_v49  ;;  %v20726_v49 = vld [vmem:[#allocation12 + $0x7ec] sm:$0xf]  ;;  %v18861_v2 = vld [vmem:[#allocation12 + $0x578] sm:$0xf0] }
 0x91a   : > { %12283 = vmatpush.bf16.msra.mxu2 %v18480_v22  ;;  %v19181_v22 = vld [vmem:[#allocation12 + $0x7f8] sm:$0xf0]  ;;  %v20678_v39 = vld [vmem:[#allocation12 + $0x66c] sm:$0xf]  ;;  %v18864_v46 = vor.u32 %v20646_v36, %v18861_v2 }
 0x91b   : > { %12296 = vmatpush.bf16.msra.mxu3 %v18608_v34  ;;  %v20626_v34 = vld [vmem:[#allocation12 + $0x4cc] sm:$0xf]  ;;  %v19184_v28 = vor.u32 %v20726_v49, %v19181_v22  ;;  %v18989_v13 = vld [vmem:[#allocation12 + $0x678] sm:$0xf0] }
 0x91c   : > { %12258 = vmatpush.bf16.msra.mxu0 %v18208_v26  ;;  %v19165_v26 = vld [vmem:[#allocation12 + $0x7d8] sm:$0xf0]  ;;  %v18784_v21 = vor.u32 %v20626_v34, %v18781_v58  ;;  %v20710_v3 = vld [vmem:[#allocation12 + $0x76c] sm:$0xf]  ;;  %v18992_v5 = vor.u32 %v20678_v39, %v18989_v13 }
 0x91d   : > { %12271 = vmatpush.bf16.msra.mxu1 %v18336_v27  ;;  %v18765_v27 = vld [vmem:[#allocation12 + $0x4b8] sm:$0xf0]  ;;  %v19168_v61 = vor.u32 %v20722_v18, %v19165_v26  ;;  %v20610_v23 = vld [vmem:[#allocation12 + $0x44c] sm:$0xf] }
 0x91e   : > { %12284 = vmatpush.bf16.msra.mxu2 %v18464_v9  ;;  %v20654_v9 = vld [vmem:[#allocation12 + $0x5ac] sm:$0xf]  ;;  %v18768_v10 = vor.u32 %v20622_v8, %v18765_v27  ;;  %v19117_v62 = vld [vmem:[#allocation12 + $0x778] sm:$0xf0] }
 0x91f   : > { %12297 = vmatpush.bf16.msra.mxu3 %v18592_v31  ;;  %v20718_v31 = vld [vmem:[#allocation12 + $0x7ac] sm:$0xf]  ;;  %v18896_v51 = vor.u32 %v20654_v9, %v18893_v19  ;;  %v19120_v22 = vor.u32 %v20710_v3, %v19117_v62  ;;  %v19101_v58 = vld [vmem:[#allocation12 + $0x758] sm:$0xf0]  ;;  %v10654_v19 = vperm.slane %v23939_v15, 1 }
 0x920   : > { %12259 = vmatpush.bf16.msra.mxu0 %v18192_v40  ;;  %v19152_v40 = vor.u32 %v20718_v31, %v19149_v4  ;;  %v20706_v34 = vld [vmem:[#allocation12 + $0x74c] sm:$0xf]  ;;  %v18701_v18 = vld [vmem:[#allocation12 + $0x438] sm:$0xf0] }
 0x921   : > { %12272 = vmatpush.bf16.msra.mxu1 %v18320_v33  ;;  %v20606_v63 = vld [vmem:[#allocation12 + $0x42c] sm:$0xf]  ;;  %v18957_v27 = vld [vmem:[#allocation12 + $0x638] sm:$0xf0] }
 0x922   : > { %12285 = vmatpush.bf16.msra.mxu2 %v18448_v43  ;;  %v19008_v43 = vor.u32 %v20682_v54, %v19005_v12  ;;  %v20638_v26 = vld [vmem:[#allocation12 + $0x52c] sm:$0xf]  ;;  %v18704_v52 = vor.u32 %v20606_v63, %v18701_v18  ;;  %v19069_v12 = vld [vmem:[#allocation12 + $0x718] sm:$0xf0] }
 0x923   : > { %12298 = vmatpush.bf16.msra.mxu3 %v18576_v47  ;;  %v20670_v8 = vld [vmem:[#allocation12 + $0x62c] sm:$0xf] }
 0x924   : > { %12260 = vmatpush.bf16.msra.mxu0 %v18176_v41  ;;  %v23954_v33 = vpop.f32.mrf.mxu0  ;;  %v18736_v41 = vor.u32 %v20614_v16, %v18733_v59  ;;  %v20702_v9 = vld [vmem:[#allocation12 + $0x72c] sm:$0xf]  ;;  %v18960_v31 = vor.u32 %v20670_v8, %v18957_v27 }
 0x925   : > { %12273 = vmatpush.bf16.msra.mxu1 %v18304_v7  ;;  %v23956_v47 = vpop.f32.mrf.mxu1  ;;  %v18717_v7 = vld [vmem:[#allocation12 + $0x458] sm:$0xf0]  ;;  %v20602_v4 = vld [vmem:[#allocation12 + $0x40c] sm:$0xf] }
 0x926   : > { %12286 = vmatpush.bf16.msra.mxu2 %v18432_v48  ;;  %v20642_v48 = vld [vmem:[#allocation12 + $0x54c] sm:$0xf]  ;;  %v18720_v6 = vor.u32 %v20610_v23, %v18717_v7 }
 0x927   : > { %12299 = vmatpush.bf16.msra.mxu3 %v18560_v20  ;;  %12261 = vmatmul.bf16.vlgmr.msra.gmra.mxu0 %v23885_v0  ;;  %v19133_v0 = vld [vmem:[#allocation12 + $0x798] sm:$0xf0]  ;;  %v20698_v54 = vld [vmem:[#allocation12 + $0x70c] sm:$0xf] }
 0x928   : > { %12305 = vmatpush.bf16.msrb.mxu0 %v18800_v53  ;;  %12274 = vmatmul.bf16.vlgmr.msra.gmra.mxu1 %v23893_v56  ;;  %v19136_v37 = vor.u32 %v20714_v24, %v19133_v0  ;;  %v18845_v20 = vld [vmem:[#allocation12 + $0x558] sm:$0xf0]  ;;  %v20674_v53 = vld [vmem:[#allocation12 + $0x64c] sm:$0xf]  ;;  %v12055_v24 = vadd.f32 %v23954_v33, %v10654_v19 }
 0x929   : > { %12318 = vmatpush.bf16.msrb.mxu1 %v18928_v42  ;;  %12287 = vmatmul.bf16.vlgmr.msra.gmra.mxu2 %v23881_v25  ;;  %v20650_v25 = vld [vmem:[#allocation12 + $0x58c] sm:$0xf]  ;;  %v18973_v42 = vld [vmem:[#allocation12 + $0x658] sm:$0xf0]  ;;  %v18848_v44 = vor.u32 %v20642_v48, %v18845_v20 }
 0x92a   : > { %12331 = vmatpush.bf16.msrb.mxu2 %v19056_v14  ;;  %12300 = vmatmul.bf16.vlgmr.msra.gmra.mxu3 %v23889_v11  ;;  %v18752_v11 = vor.u32 %v20618_v55, %v18749_v30  ;;  %v18880_v56 = vor.u32 %v20650_v25, %v18877_v1  ;;  %v18976_v35 = vor.u32 %v20674_v53, %v18973_v42  ;;  %v18813_v30 = vld [vmem:[#allocation12 + $0x518] sm:$0xf0]  ;;  %v20666_v25 = vld [vmem:[#allocation12 + $0x60c] sm:$0xf]  ;;  %v10655_v53 = vperm.slane %v23939_v15, 2 }
 0x92b   : > { %12344 = vmatpush.bf16.msrb.mxu3 %v19184_v28  ;;  %v12068_v16 = vadd.f32 %v23956_v47, %v12055_v24 }
 0x92c   : > { %12306 = vmatpush.bf16.msrb.mxu0 %v18784_v21  ;;  %v12080_v49 = vpop.f32.mrf.mxu2  ;;  %v12056_v28 = vpop.f32.mrf.mxu0 }
 0x92d   : > { %12319 = vmatpush.bf16.msrb.mxu1 %v18912_v60  ;;  %v12093_v14 = vpop.f32.mrf.mxu3  ;;  %v12069_v21 = vpop.f32.mrf.mxu1  ;;  %v19104_v60 = vor.u32 %v20706_v34, %v19101_v58  ;;  %v12081_v59 = vadd.f32 %v12080_v49, %v12068_v16 }
 0x92e   : > { %12332 = vmatpush.bf16.msrb.mxu2 %v19040_v17  ;;  %v18829_v17 = vld [vmem:[#allocation12 + $0x538] sm:$0xf0] }
 0x92f   : > { %12345 = vmatpush.bf16.msrb.mxu3 %v19168_v61  ;;  %v19085_v61 = vld [vmem:[#allocation12 + $0x738] sm:$0xf0]  ;;  %v18832_v29 = vor.u32 %v20638_v26, %v18829_v17  ;;  %v12094_v33 = vadd.f32 %v12093_v14, %v12081_v59 }
 0x930   : > { %12307 = vmatpush.bf16.msrb.mxu0 %v18768_v10  ;;  %v18685_v10 = vld [vmem:[#allocation12 + $0x418] sm:$0xf0]  ;;  %v19088_v55 = vor.u32 %v20702_v9, %v19085_v61 }
 0x931   : > { %12320 = vmatpush.bf16.msrb.mxu1 %v18896_v51  ;;  %v20634_v51 = vld [vmem:[#allocation12 + $0x50c] sm:$0xf]  ;;  %v18688_v0 = vor.u32 %v20602_v4, %v18685_v10 }
 0x932   : > { %12333 = vmatpush.bf16.msrb.mxu2 %v19024_v57 }
 0x933   : > { %12346 = vmatpush.bf16.msrb.mxu3 %v19152_v40  ;;  %v18941_v40 = vld [vmem:[#allocation12 + $0x618] sm:$0xf0] }
 0x934   : > { %12308 = vmatpush.bf16.msrb.mxu0 %v18752_v11  ;;  %v12082_v57 = vpop.f32.mrf.mxu2  ;;  %v18816_v11 = vor.u32 %v20634_v51, %v18813_v30  ;;  %v10656_v30 = vperm.slane %v23939_v15, 3 }
 0x935   : > { %12321 = vmatpush.bf16.msrb.mxu1 %v18880_v56  ;;  %v12095_v1 = vpop.f32.mrf.mxu3  ;;  %v18944_v56 = vor.u32 %v20666_v25, %v18941_v40 }
 0x936   : > { %12334 = vmatpush.bf16.msrb.mxu2 %v19008_v43  ;;  %v19072_v43 = vor.u32 %v20698_v54, %v19069_v12 }
 0x937   : > { %12347 = vmatpush.bf16.msrb.mxu3 %v19136_v37 }
 0x938   : > { %12309 = vmatpush.bf16.msrb.mxu0 %v18736_v41 }
 0x939   : > { %12322 = vmatpush.bf16.msrb.mxu1 %v18864_v46 }
 0x93a   : > { %12335 = vmatpush.bf16.msrb.mxu2 %v18992_v5 }
 0x93b   : > { %12348 = vmatpush.bf16.msrb.mxu3 %v19120_v22 }
 0x93c   : > { %12310 = vmatpush.bf16.msrb.mxu0 %v18720_v6 }
 0x93d   : > { %12323 = vmatpush.bf16.msrb.mxu1 %v18848_v44 }
 0x93e   : > { %12336 = vmatpush.bf16.msrb.mxu2 %v18976_v35 }
 0x93f   : > { %12349 = vmatpush.bf16.msrb.mxu3 %v19104_v60 }
 0x940   : > { %12311 = vmatpush.bf16.msrb.mxu0 %v18704_v52 }
 0x941   : > { %12324 = vmatpush.bf16.msrb.mxu1 %v18832_v29 }
 0x942   : > { %12337 = vmatpush.bf16.msrb.mxu2 %v18960_v31 }
 0x943   : > { %12350 = vmatpush.bf16.msrb.mxu3 %v19088_v55 }
 0x944   : > { %12312 = vmatpush.bf16.msrb.mxu0 %v18688_v0  ;;  %v12106_v36 = vpop.f32.mrf.mxu0 }
 0x945   : > { %12325 = vmatpush.bf16.msrb.mxu1 %v18816_v11  ;;  %v12107_v37 = vadd.f32 %v12106_v36, %v12094_v33  ;;  %v12119_v2 = vpop.f32.mrf.mxu1 }
 0x946   : > { %12338 = vmatpush.bf16.msrb.mxu2 %v18944_v56 }
 0x947   : > { %12351 = vmatpush.bf16.msrb.mxu3 %v19072_v43  ;;  %12313 = vmatmul.bf16.vlgmr.msrb.gmra.mxu0 %v23905_v38  ;;  %v12120_v39 = vadd.f32 %v12119_v2, %v12107_v37 }
 0x948   : > { %12326 = vmatmul.bf16.vlgmr.msrb.gmra.mxu1 %v23913_v45 }
 0x949   : > { %12339 = vmatmul.bf16.vlgmr.msrb.gmra.mxu2 %v23901_v32 }
 0x94a   : > { %12352 = vmatmul.bf16.vlgmr.msrb.gmra.mxu3 %v23909_v50 }
 0x94c   : > { %v12132_v13 = vpop.f32.mrf.mxu2  ;;  %v12108_v41 = vpop.f32.mrf.mxu0 }
 0x94d   : > { %v12133_v47 = vadd.f32 %v12132_v13, %v12120_v39  ;;  %v12145_v3 = vpop.f32.mrf.mxu3  ;;  %v12121_v46 = vpop.f32.mrf.mxu1 }
 0x94f   : > { %v12146_v62 = vadd.f32 %v12145_v3, %v12133_v47 }
 0x951   : > { %vm12358_vm13 = vcmp.ge.f32.partialorder %v12146_v62, 0.0  ;;  %v12362_v38 = vmul.f32 0.2, %v12146_v62 }
 0x953   : > { %v12366_v5 = vsel %vm12358_vm13, %v12146_v62, %v12362_v38 }
 0x954   : > { %v12370_v23 = vmul.f32 1.4142135, %v12366_v5  ;;  %v12134_v45 = vpop.f32.mrf.mxu2 }
 0x955   : > { %v12147_v7 = vpop.f32.mrf.mxu3 }
 0x956   : > { %12374 = vst [vmem:[#allocation15 + $0x8] sm:$0xff] %v12370_v23 }
 0x964   : > { %v12158_v32 = vpop.f32.mrf.mxu0 }
 0x965   : > { %v12171_v50 = vpop.f32.mrf.mxu1  ;;  %v12159_v34 = vadd.f32 %v12158_v32, %v10655_v53 }
 0x967   : > { %v12172_v58 = vadd.f32 %v12171_v50, %v12159_v34 }
 0x96c   : > { %v12184_v48 = vpop.f32.mrf.mxu2  ;;  %v12160_v22 = vpop.f32.mrf.mxu0 }
 0x96d   : > { %v12197_v49 = vpop.f32.mrf.mxu3  ;;  %v12173_v20 = vpop.f32.mrf.mxu1  ;;  %v12185_v6 = vadd.f32 %v12184_v48, %v12172_v58 }
 0x96f   : > { %v12198_v28 = vadd.f32 %v12197_v49, %v12185_v6 }
 0x974   : > { %v12186_v42 = vpop.f32.mrf.mxu2 }
 0x975   : > { %v12199_v14 = vpop.f32.mrf.mxu3 }
 0x984   : > { %v12210_v44 = vpop.f32.mrf.mxu0 }
 0x985   : > { %v12211_v35 = vadd.f32 %v12210_v44, %v12198_v28  ;;  %v12223_v63 = vpop.f32.mrf.mxu1 }
 0x987   : > { %v12224_v18 = vadd.f32 %v12223_v63, %v12211_v35 }
 0x98c   : > { %v12236_v26 = vpop.f32.mrf.mxu2  ;;  %v12212_v8 = vpop.f32.mrf.mxu0 }
 0x98d   : > { %v12237_v21 = vadd.f32 %v12236_v26, %v12224_v18  ;;  %v12249_v60 = vpop.f32.mrf.mxu3  ;;  %v12225_v27 = vpop.f32.mrf.mxu1 }
 0x98f   : > { %v12250_v17 = vadd.f32 %v12249_v60, %v12237_v21 }
 0x991   : > { %vm12359_vm14 = vcmp.ge.f32.partialorder %v12250_v17, 0.0  ;;  %v12363_v9 = vmul.f32 0.2, %v12250_v17 }
 0x993   : > { %v12367_v61 = vsel %vm12359_vm14, %v12250_v17, %v12363_v9 }
 0x994   : > { %v12371_v19 = vmul.f32 1.4142135, %v12367_v61  ;;  %v12238_v52 = vpop.f32.mrf.mxu2 }
 0x995   : > { %v12251_v29 = vpop.f32.mrf.mxu3 }
 0x996   : > { %12375 = vst [vmem:[#allocation15 + $0x10] sm:$0xff] %v12371_v19 }
 0x9a4   : > { %v12262_v31 = vpop.f32.mrf.mxu0 }
 0x9a5   : > { %v12275_v4 = vpop.f32.mrf.mxu1  ;;  %v12263_v1 = vadd.f32 %v12262_v31, %v10656_v30 }
 0x9a7   : > { %v12276_v54 = vadd.f32 %v12275_v4, %v12263_v1 }
 0x9ac   : > { %v12288_v10 = vpop.f32.mrf.mxu2  ;;  %v12264_v57 = vpop.f32.mrf.mxu0 }
 0x9ad   : > { %v12301_v51 = vpop.f32.mrf.mxu3  ;;  %v12277_v55 = vpop.f32.mrf.mxu1  ;;  %v12289_v12 = vadd.f32 %v12288_v10, %v12276_v54 }
 0x9af   : > { %v12302_v24 = vadd.f32 %v12301_v51, %v12289_v12 }
 0x9b4   : > { %v12290_v25 = vpop.f32.mrf.mxu2 }
 0x9b5   : > { %v12303_v40 = vpop.f32.mrf.mxu3 }
 0x9c4   : > { %v12314_v0 = vpop.f32.mrf.mxu0 }
 0x9c5   : > { %v12327_v11 = vpop.f32.mrf.mxu1  ;;  %v12315_v56 = vadd.f32 %v12314_v0, %v12302_v24 }
 0x9c7   : > { %v12328_v43 = vadd.f32 %v12327_v11, %v12315_v56 }
 0x9cc   : > { %v12340_v16 = vpop.f32.mrf.mxu2  ;;  %v12316_v36 = vpop.f32.mrf.mxu0 }
 0x9cd   : > { %v12341_v59 = vadd.f32 %v12340_v16, %v12328_v43  ;;  %v12353_v33 = vpop.f32.mrf.mxu3  ;;  %v12329_v37 = vpop.f32.mrf.mxu1 }
 0x9cf   : > { %v12354_v2 = vadd.f32 %v12353_v33, %v12341_v59 }
 0x9d1   : > { %vm12360_vm15 = vcmp.ge.f32.partialorder %v12354_v2, 0.0  ;;  %v12364_v39 = vmul.f32 0.2, %v12354_v2 }
 0x9d3   : > { %v12368_v13 = vsel %vm12360_vm15, %v12354_v2, %v12364_v39 }
 0x9d4   : > { %v12372_v15 = vmul.f32 1.4142135, %v12368_v13  ;;  %v12342_v47 = vpop.f32.mrf.mxu2 }
 0x9d5   : > { %v12355_v3 = vpop.f32.mrf.mxu3 }
 0x9d6   : > { %12376 = vst [vmem:[#allocation15 + $0x18] sm:$0xff] %v12372_v15 }
 0x9d7 PF: > { %p20795_p3 = scmp.eq.s32.totalorder %s21225_s8, 3  ;;  %s21160_s13 = smov [#allocation15]  }
 0x9d8   : > { %s12383_s24 = sshll.u32 %s21160_s13, 4  ;;  %s12385_s14 = sshll.u32 %s23991_s7, 4  ;;  %s12384_s24 = int_to_ptr.vmem [resolvable:$true] %s12383_s24  ;;  %s12386_s14 = int_to_ptr.hbm [resolvable:$true] %s12385_s14 }
 0x9d9   : > { %20756 = dma.vmem_to_hbm [thread:$0]  (%p20795_p3), %s12384_s24, 512, %s12386_s14, [#allocation5]  }
 0x9da   : > { %21128 = dma.done.wait (%p20795_p3), [#allocation5], 512  }
 0x9db   : > { %21130 = vsyncadd (%p20795_p3), [#allocation5], 4294966784 }
 0x9dc PF: > { %p21_p4 = scmp.ge.s32.totalorder %s21274_s30, 6   ;;  %s23996_s24 = smov %s21137_s25 }
 0x9dd   : > { %s23997_s25 = smov %s21141_s26  ;;  %s23998_s26 = smov %s21286_s17 }
 0x9de   : > { %s23999_s27 = smov %s21274_s30  ;;  %23 = sbr.rel (!%p21_p4) target bundleno = 7 (0x7), region = 121 }
 0x9e3   :  { %12399 = vsyncpa [#allocation4], 1 }
 0x9e4   :  { %12401 = vsyncpa [#allocation4 + $0x1], 1 }
 0x9e5   :  { %12402 = vsyncpa [#allocation7], 1 }
 0x9e6   :  { %12403 = vsyncpa [#allocation10], 1 }
 0x9e7   :  { %12405 = vsyncpa [#allocation10 + $0x1], 1 }
 0x9e8   :  { %12406 = vsyncpa [#allocation13], 1 }
 0x9e9   :  { %12407 = vsyncpa [#allocation5], 1 }
 0x9ea   :  { %12409 = vsyncpa [#allocation5 + $0x1], 1 }

</bundles_post_ra>
